<compile_context>
chip_gen: v5e
topology: v5e:2x2
jax: 0.10.0
libtpu: 0.0.40
codegen_flags: <defaults>
</compile_context>

<pallas_src>
from functools import partial

import jax
import jax.numpy as jnp
from jax.experimental import pallas as pl
from jax.experimental.pallas import tpu as pltpu


def _downsample_kernel(w_ref, p_ref, sel_ref, x_ref, o_ref, xp_ref,
                       *, H, W, Cin, CB, HB):
    """One grid step = (one image) x (one block of CB output channels).

    w_ref  : SMEM (Cout*Cin*9,)    conv weights, flattened [cout][cin][kh][kw]
    p_ref  : SMEM (4, Cout)        rows = conv bias, FRN scale, FRN bias, FRN tau
    sel_ref: VMEM (W, W2)          0/1 even-column selector (resident, constant block)
    x_ref  : VMEM (Cin, H, W)      one input image (batch dim squeezed)
    o_ref  : VMEM (CB, H2, W2)     output channels [cb*CB, (cb+1)*CB) of this image
    xp_ref : VMEM (Cin, H+2, W+2)  zero-halo input planes (built once per image)
    """
    H2, W2 = H // 2, W // 2
    HB2 = HB // 2
    nrb = H // HB
    cb = pl.program_id(1)

    # ---- zero-halo input planes: built once per image.  The cb axis is "arbitrary",
    #      so cb == 0 runs first for every image and the scratch stays resident. ----
    @pl.when(cb == 0)
    def _build_halo():
        xp_ref[:, pl.ds(0, 1), :] = jnp.zeros((Cin, 1, W + 2), jnp.float32)
        xp_ref[:, pl.ds(H + 1, 1), :] = jnp.zeros((Cin, 1, W + 2), jnp.float32)
        xp_ref[:, :, pl.ds(0, 1)] = jnp.zeros((Cin, H + 2, 1), jnp.float32)
        xp_ref[:, :, pl.ds(W + 1, 1)] = jnp.zeros((Cin, H + 2, 1), jnp.float32)
        xp_ref[:, pl.ds(1, H), pl.ds(1, W)] = x_ref[...].astype(jnp.float32)

    sel = sel_ref[...]                      # (W, W2) 0/1 even-column selector
    w_base = cb * (CB * Cin * 9)            # weight offset of this cout block
    cout0 = cb * CB
    inv_n = 1.0 / float(H2 * W2)

    # ---- conv(3x3, pad 1) + bias + LeakyReLU + 2x2/2 max-pool, one row block at a
    #      time so the CB accumulators (HB x W each) stay in vregs. ----
    def row_block(rb, carry):
        row0 = rb * HB
        accs = [jnp.zeros((HB, W), jnp.float32) for _ in range(CB)]
        for cin in range(Cin):
            for kh in range(3):
                for kw in range(3):
                    # TODO(synk): replace the lane-offset (kw=1,2) slices with one
                    #             aligned load + pltpu.roll + edge masks (XLU slot).
                    patch = xp_ref[cin, pl.ds(row0 + kh, HB), pl.ds(kw, W)]
                    for c in range(CB):
                        wv = w_ref[w_base + ((c * Cin + cin) * 3 + kh) * 3 + kw]
                        accs[c] = accs[c] + wv * patch

        # bias + LeakyReLU(0.01) + max-pool over H (sublane pairs), per channel
        rows = []
        for c in range(CB):
            y = accs[c] + p_ref[0, cout0 + c]
            y = jnp.where(y > 0, y, 0.01 * y)
            yr = y.reshape(HB2, 2, W)
            rows.append(jnp.maximum(yr[:, 0, :], yr[:, 1, :]))
        yh = jnp.concatenate(rows, axis=0)                            # (CB*HB2, W)

        # max-pool over W: neighbour max on the XLU, then a single even-column
        # selection matmul on the otherwise-idle MXU (lane compaction, no strided
        # lane ops).  roll by W-1 == roll by -1, so col 2t holds max(col 2t, 2t+1);
        # the odd wrap-around column is never selected.
        pair = jnp.maximum(yh, pltpu.roll(yh, W - 1, axis=1))
        pooled = jnp.dot(pair, sel, preferred_element_type=jnp.float32)  # (CB*HB2, W2)

        prow0 = pl.multiple_of(rb * HB2, HB2)
        for c in range(CB):
            o_ref[c, pl.ds(prow0, HB2), :] = pooled[c * HB2:(c + 1) * HB2, :]
        return carry

    jax.lax.fori_loop(0, nrb, row_block, 0)

    # ---- FilterResponseNorm2d finalize: per-channel mean of squares over the pooled
    #      plane already sitting in the output VMEM block.  dropout(p=0.0) = identity.
    # TODO(synk): nonzero training-mode dropout would need pltpu.prng_seed /
    #             pltpu.prng_random_bits masking in-kernel.
    for c in range(CB):
        pch = o_ref[c]                                                # (H2, W2)
        nu2 = jnp.sum(pch * pch) * inv_n
        yn = pch * jax.lax.rsqrt(nu2 + 1e-5)
        yn = yn * p_ref[1, cout0 + c] + p_ref[2, cout0 + c]
        yn = jnp.maximum(yn, p_ref[3, cout0 + c])
        o_ref[c] = yn.astype(o_ref.dtype)


def downsample_block_forward(x_nchw, conv_w, conv_b, frn_scale, frn_bias, frn_tau,
                             *, cout_block=8):
    """DownSampleBlock.forward.  Input/output are NCHW (PyTorch convention)."""
    B, Cin, H, W = x_nchw.shape
    Cout = conv_w.shape[0]
    assert H % 2 == 0 and W % 2 == 0, "MaxPool2d((2,2),2) fast path requires even H, W"

    # Largest divisor of Cout that is <= cout_block (avoid the CB=1 perf cliff).
    CB = max(d for d in range(1, min(cout_block, Cout) + 1) if Cout % d == 0)
    H2, W2 = H // 2, W // 2
    # Row-block height: 8 sublanes when possible so conv accumulators stay in vregs.
    HB = 8 if H % 8 == 0 else H

    # No transpose / pad of the activations: the kernel is NCHW-native and builds its
    # own zero halo.  Only the tiny parameter tensors are repacked for SMEM.
    x = x_nchw.astype(jnp.float32)
    w_flat = conv_w.astype(jnp.float32).reshape(-1)                                  # (Cout*Cin*9,)
    params = jnp.stack([conv_b, frn_scale, frn_bias, frn_tau]).astype(jnp.float32)   # (4, Cout)

    # Even-column 0/1 selector for the W-direction pool, built once in the wrapper
    # and kept resident in VMEM (constant index_map).
    cols = jax.lax.broadcasted_iota(jnp.int32, (W, W2), 0)
    tgts = jax.lax.broadcasted_iota(jnp.int32, (W, W2), 1)
    sel_even = (cols == 2 * tgts).astype(jnp.float32)

    kernel = partial(_downsample_kernel, H=H, W=W, Cin=Cin, CB=CB, HB=HB)

    # TODO(synk): for very wide OCR line images add a W-block grid axis (two-phase FRN
    #             sum-of-squares) and a bf16 activation path on v6e/v7x.
    out = pl.pallas_call(
        kernel,
        out_shape=jax.ShapeDtypeStruct((B, Cout, H2, W2), jnp.float32),
        grid_spec=pltpu.PrefetchScalarGridSpec(
            num_scalar_prefetch=0,
            grid=(B, Cout // CB),
            in_specs=[
                pl.BlockSpec(memory_space=pltpu.MemorySpace.SMEM),              # w_flat
                pl.BlockSpec(memory_space=pltpu.MemorySpace.SMEM),              # params
                pl.BlockSpec((W, W2), lambda b, cb: (0, 0)),                    # selector
                pl.BlockSpec((None, Cin, H, W), lambda b, cb: (b, 0, 0, 0)),    # x (NCHW)
            ],
            out_specs=pl.BlockSpec((None, CB, H2, W2), lambda b, cb: (b, cb, 0, 0)),
            scratch_shapes=[
                pltpu.VMEM((Cin, H + 2, W + 2), jnp.float32),   # zero-halo input planes
            ],
        ),
        compiler_params=pltpu.CompilerParams(
            # batch parallel (feeds both v7x TCs); cb "arbitrary" so the cb==0 halo
            # build is guaranteed to run before the other cout blocks of an image.
            dimension_semantics=("parallel", "arbitrary"),
            vmem_limit_bytes=32 * 1024 * 1024),
    )(w_flat, params, sel_even, x)
    return out


def _reference(x_nchw, conv_w, conv_b, frn_scale, frn_bias, frn_tau):
    """Plain-JAX reference of the same forward pass (NCHW, mirrors PyTorch ops)."""
    y = jax.lax.conv_general_dilated(
        x_nchw, conv_w, window_strides=(1, 1), padding=((1, 1), (1, 1)),
        dimension_numbers=('NCHW', 'OIHW', 'NCHW'),
        precision=jax.lax.Precision.HIGHEST)
    y = y + conv_b[None, :, None, None]
    y = jnp.where(y > 0, y, 0.01 * y)
    y = jax.lax.reduce_window(y, -jnp.inf, jax.lax.max,
                              (1, 1, 2, 2), (1, 1, 2, 2), 'VALID')
    nu2 = jnp.mean(y * y, axis=(2, 3), keepdims=True)
    y = y * jax.lax.rsqrt(nu2 + 1e-5)
    y = y * frn_scale[None, :, None, None] + frn_bias[None, :, None, None]
    return jnp.maximum(y, frn_tau[None, :, None, None])


if __name__ == "__main__":
    B, Cin, H, W, Cout = 2, 4, 16, 16, 8

    key = jax.random.PRNGKey(0)
    k_x, k_w, k_b = jax.random.split(key, 3)
    x = jax.random.normal(k_x, (B, Cin, H, W), jnp.float32)

    # Deterministic parameter init (shapes from the module's __init__).
    conv_w = jax.random.normal(k_w, (Cout, Cin, 3, 3), jnp.float32) * 0.1
    conv_b = jax.random.normal(k_b, (Cout,), jnp.float32) * 0.1
    frn_scale = jnp.ones((Cout,), jnp.float32)   # nn.init.ones_
    frn_bias = jnp.zeros((Cout,), jnp.float32)   # nn.init.zeros_
    frn_tau = jnp.zeros((Cout,), jnp.float32)    # nn.init.zeros_

    out = downsample_block_forward(x, conv_w, conv_b, frn_scale, frn_bias, frn_tau)
    out = jax.block_until_ready(out)

    ref = _reference(x, conv_w, conv_b, frn_scale, frn_bias, frn_tau)
    assert out.shape == (B, Cout, H // 2, W // 2), out.shape
    # Tolerance leaves headroom for the MXU f32 path used by the (exact 0/1 selection)
    # pooling matmul; conv / LeakyReLU / FRN are computed in full f32 on the VPU.
    assert jnp.allclose(out, ref, atol=2e-3, rtol=2e-3), float(jnp.max(jnp.abs(out - ref)))

    print("KERNEL_OK")
</pallas_src>

<mosaic_0001>
module attributes {stable_mosaic.version = 11 : i64} {
  func.func @_downsample_kernel(%arg0: i32, %arg1: i32, %arg2: memref<288xf32, #tpu.memory_space<smem>>, %arg3: memref<4x8xf32, #tpu.memory_space<smem>>, %arg4: memref<16x8xf32, #tpu.memory_space<vmem>>, %arg5: memref<1x4x16x16xf32, #tpu.memory_space<vmem>>, %arg6: memref<1x8x8x8xf32, #tpu.memory_space<vmem>>, %arg7: memref<4x18x18xf32, #tpu.memory_space<vmem>>) attributes {dimension_semantics = [#tpu.dimension_semantics<parallel>, #tpu.dimension_semantics<arbitrary>], iteration_bounds = array<i64: 2, 1>, scalar_prefetch = 0 : i64, scratch_operands = 1 : i64, tpu.core_type = #tpu.core_type<tc>, window_params = [{transform_indices = @transform_0, window_bounds = array<i64: 288>}, {transform_indices = @transform_1, window_bounds = array<i64: 4, 8>}, {pipeline_mode = #tpu.pipeline_mode<synchronous>, transform_indices = @transform_2, window_bounds = array<i64: 16, 8>}, {transform_indices = @transform_3, window_bounds = array<i64: 1, 4, 16, 16>}, {transform_indices = @transform_4, window_bounds = array<i64: 1, 8, 8, 8>}]} {
    %c0_i32 = arith.constant 0 : i32
    %0 = arith.cmpi eq, %arg1, %c0_i32 : i32
    %1 = arith.extui %0 : i1 to i32
    %c0_i32_0 = arith.constant 0 : i32
    %2 = arith.cmpi ne, %1, %c0_i32_0 : i32
    scf.if %2 {
      %cst_127 = arith.constant 0.000000e+00 : f32
      %247 = vector.broadcast %cst_127 : f32 to vector<4x1x18xf32>
      %c0_128 = arith.constant 0 : index
      %c0_129 = arith.constant 0 : index
      %c0_130 = arith.constant 0 : index
      %248 = vector.load %arg7[%c0_128, %c0_129, %c0_130] : memref<4x18x18xf32, #tpu.memory_space<vmem>>, vector<4x1x18xf32>
      tpu.vector_store %arg7[%c0_128, %c0_129, %c0_130], %247 {strides = array<i32>} : memref<4x18x18xf32, #tpu.memory_space<vmem>>, vector<4x1x18xf32>,
      %cst_131 = arith.constant 0.000000e+00 : f32
      %249 = vector.broadcast %cst_131 : f32 to vector<4x1x18xf32>
      %c0_132 = arith.constant 0 : index
      %c17 = arith.constant 17 : index
      %c0_133 = arith.constant 0 : index
      %250 = vector.load %arg7[%c0_132, %c17, %c0_133] : memref<4x18x18xf32, #tpu.memory_space<vmem>>, vector<4x1x18xf32>
      tpu.vector_store %arg7[%c0_132, %c17, %c0_133], %249 {strides = array<i32>} : memref<4x18x18xf32, #tpu.memory_space<vmem>>, vector<4x1x18xf32>,
      %cst_134 = arith.constant 0.000000e+00 : f32
      %251 = vector.broadcast %cst_134 : f32 to vector<4x18x1xf32>
      %c0_135 = arith.constant 0 : index
      %c0_136 = arith.constant 0 : index
      %c0_137 = arith.constant 0 : index
      %252 = vector.load %arg7[%c0_135, %c0_136, %c0_137] : memref<4x18x18xf32, #tpu.memory_space<vmem>>, vector<4x18x1xf32>
      tpu.vector_store %arg7[%c0_135, %c0_136, %c0_137], %251 {strides = array<i32>} : memref<4x18x18xf32, #tpu.memory_space<vmem>>, vector<4x18x1xf32>,
      %cst_138 = arith.constant 0.000000e+00 : f32
      %253 = vector.broadcast %cst_138 : f32 to vector<4x18x1xf32>
      %c0_139 = arith.constant 0 : index
      %c0_140 = arith.constant 0 : index
      %c17_141 = arith.constant 17 : index
      %254 = vector.load %arg7[%c0_139, %c0_140, %c17_141] : memref<4x18x18xf32, #tpu.memory_space<vmem>>, vector<4x18x1xf32>
      tpu.vector_store %arg7[%c0_139, %c0_140, %c17_141], %253 {strides = array<i32>} : memref<4x18x18xf32, #tpu.memory_space<vmem>>, vector<4x18x1xf32>,
      %c0_142 = arith.constant 0 : index
      %c0_143 = arith.constant 0 : index
      %c0_144 = arith.constant 0 : index
      %c0_145 = arith.constant 0 : index
      %255 = vector.load %arg5[%c0_142, %c0_143, %c0_144, %c0_145] : memref<1x4x16x16xf32, #tpu.memory_space<vmem>>, vector<1x4x16x16xf32>
      %256 = vector.shape_cast %255 : vector<1x4x16x16xf32> to vector<4x16x16xf32>
      %c0_146 = arith.constant 0 : index
      %c1_147 = arith.constant 1 : index
      %c1_148 = arith.constant 1 : index
      %257 = vector.load %arg7[%c0_146, %c1_147, %c1_148] : memref<4x18x18xf32, #tpu.memory_space<vmem>>, vector<4x16x16xf32>
      tpu.vector_store %arg7[%c0_146, %c1_147, %c1_148], %256 {strides = array<i32>} : memref<4x18x18xf32, #tpu.memory_space<vmem>>, vector<4x16x16xf32>,
    } else {
    }
    %c0 = arith.constant 0 : index
    %c0_1 = arith.constant 0 : index
    %3 = vector.load %arg4[%c0, %c0_1] : memref<16x8xf32, #tpu.memory_space<vmem>>, vector<16x8xf32>
    %c288_i32 = arith.constant 288 : i32
    %4 = arith.muli %arg1, %c288_i32 : i32
    %c8_i32 = arith.constant 8 : i32
    %5 = arith.muli %arg1, %c8_i32 : i32
    %c0_i32_2 = arith.constant 0 : i32
    %c2_i32 = arith.constant 2 : i32
    %6 = arith.addi %c0_i32_2, %c2_i32 : i32
    %c1_i32 = arith.constant 1 : i32
    scf.for %arg8 = %c0_i32_2 to %6 step %c1_i32  : i32 {
      %c8_i32_127 = arith.constant 8 : i32
      %247 = arith.muli %arg8, %c8_i32_127 : i32
      %cst_128 = arith.constant 0.000000e+00 : f32
      %248 = vector.broadcast %cst_128 : f32 to vector<8x16xf32>
      %cst_129 = arith.constant 0.000000e+00 : f32
      %249 = vector.broadcast %cst_129 : f32 to vector<8x16xf32>
      %cst_130 = arith.constant 0.000000e+00 : f32
      %250 = vector.broadcast %cst_130 : f32 to vector<8x16xf32>
      %cst_131 = arith.constant 0.000000e+00 : f32
      %251 = vector.broadcast %cst_131 : f32 to vector<8x16xf32>
      %cst_132 = arith.constant 0.000000e+00 : f32
      %252 = vector.broadcast %cst_132 : f32 to vector<8x16xf32>
      %cst_133 = arith.constant 0.000000e+00 : f32
      %253 = vector.broadcast %cst_133 : f32 to vector<8x16xf32>
      %cst_134 = arith.constant 0.000000e+00 : f32
      %254 = vector.broadcast %cst_134 : f32 to vector<8x16xf32>
      %cst_135 = arith.constant 0.000000e+00 : f32
      %255 = vector.broadcast %cst_135 : f32 to vector<8x16xf32>
      %c0_i32_136 = arith.constant 0 : i32
      %256 = arith.addi %247, %c0_i32_136 : i32
      %c0_137 = arith.constant 0 : index
      %257 = arith.index_cast %256 : i32 to index
      %c0_138 = arith.constant 0 : index
      %258 = vector.load %arg7[%c0_137, %257, %c0_138] : memref<4x18x18xf32, #tpu.memory_space<vmem>>, vector<1x8x16xf32>
      %259 = vector.shape_cast %258 : vector<1x8x16xf32> to vector<8x16xf32>
      %c0_i32_139 = arith.constant 0 : i32
      %260 = arith.addi %4, %c0_i32_139 : i32
      %c0_i32_140 = arith.constant 0 : i32
      %261 = arith.addi %260, %c0_i32_140 : i32
      %262 = arith.index_cast %261 : i32 to index
      %263 = memref.load %arg2[%262] : memref<288xf32, #tpu.memory_space<smem>>
      %264 = vector.broadcast %263 : f32 to vector<8x16xf32>
      %265 = arith.mulf %264, %259 : vector<8x16xf32>
      %266 = arith.addf %248, %265 : vector<8x16xf32>
      %c36_i32 = arith.constant 36 : i32
      %267 = arith.addi %4, %c36_i32 : i32
      %c0_i32_141 = arith.constant 0 : i32
      %268 = arith.addi %267, %c0_i32_141 : i32
      %269 = arith.index_cast %268 : i32 to index
      %270 = memref.load %arg2[%269] : memref<288xf32, #tpu.memory_space<smem>>
      %271 = vector.broadcast %270 : f32 to vector<8x16xf32>
      %272 = arith.mulf %271, %259 : vector<8x16xf32>
      %273 = arith.addf %249, %272 : vector<8x16xf32>
      %c72_i32 = arith.constant 72 : i32
      %274 = arith.addi %4, %c72_i32 : i32
      %c0_i32_142 = arith.constant 0 : i32
      %275 = arith.addi %274, %c0_i32_142 : i32
      %276 = arith.index_cast %275 : i32 to index
      %277 = memref.load %arg2[%276] : memref<288xf32, #tpu.memory_space<smem>>
      %278 = vector.broadcast %277 : f32 to vector<8x16xf32>
      %279 = arith.mulf %278, %259 : vector<8x16xf32>
      %280 = arith.addf %250, %279 : vector<8x16xf32>
      %c108_i32 = arith.constant 108 : i32
      %281 = arith.addi %4, %c108_i32 : i32
      %c0_i32_143 = arith.constant 0 : i32
      %282 = arith.addi %281, %c0_i32_143 : i32
      %283 = arith.index_cast %282 : i32 to index
      %284 = memref.load %arg2[%283] : memref<288xf32, #tpu.memory_space<smem>>
      %285 = vector.broadcast %284 : f32 to vector<8x16xf32>
      %286 = arith.mulf %285, %259 : vector<8x16xf32>
      %287 = arith.addf %251, %286 : vector<8x16xf32>
      %c144_i32 = arith.constant 144 : i32
      %288 = arith.addi %4, %c144_i32 : i32
      %c0_i32_144 = arith.constant 0 : i32
      %289 = arith.addi %288, %c0_i32_144 : i32
      %290 = arith.index_cast %289 : i32 to index
      %291 = memref.load %arg2[%290] : memref<288xf32, #tpu.memory_space<smem>>
      %292 = vector.broadcast %291 : f32 to vector<8x16xf32>
      %293 = arith.mulf %292, %259 : vector<8x16xf32>
      %294 = arith.addf %252, %293 : vector<8x16xf32>
      %c180_i32 = arith.constant 180 : i32
      %295 = arith.addi %4, %c180_i32 : i32
      %c0_i32_145 = arith.constant 0 : i32
      %296 = arith.addi %295, %c0_i32_145 : i32
      %297 = arith.index_cast %296 : i32 to index
      %298 = memref.load %arg2[%297] : memref<288xf32, #tpu.memory_space<smem>>
      %299 = vector.broadcast %298 : f32 to vector<8x16xf32>
      %300 = arith.mulf %299, %259 : vector<8x16xf32>
      %301 = arith.addf %253, %300 : vector<8x16xf32>
      %c216_i32 = arith.constant 216 : i32
      %302 = arith.addi %4, %c216_i32 : i32
      %c0_i32_146 = arith.constant 0 : i32
      %303 = arith.addi %302, %c0_i32_146 : i32
      %304 = arith.index_cast %303 : i32 to index
      %305 = memref.load %arg2[%304] : memref<288xf32, #tpu.memory_space<smem>>
      %306 = vector.broadcast %305 : f32 to vector<8x16xf32>
      %307 = arith.mulf %306, %259 : vector<8x16xf32>
      %308 = arith.addf %254, %307 : vector<8x16xf32>
      %c252_i32 = arith.constant 252 : i32
      %309 = arith.addi %4, %c252_i32 : i32
      %c0_i32_147 = arith.constant 0 : i32
      %310 = arith.addi %309, %c0_i32_147 : i32
      %311 = arith.index_cast %310 : i32 to index
      %312 = memref.load %arg2[%311] : memref<288xf32, #tpu.memory_space<smem>>
      %313 = vector.broadcast %312 : f32 to vector<8x16xf32>
      %314 = arith.mulf %313, %259 : vector<8x16xf32>
      %315 = arith.addf %255, %314 : vector<8x16xf32>
      %c0_i32_148 = arith.constant 0 : i32
      %316 = arith.addi %247, %c0_i32_148 : i32
      %c0_149 = arith.constant 0 : index
      %317 = arith.index_cast %316 : i32 to index
      %c1_150 = arith.constant 1 : index
      %318 = vector.load %arg7[%c0_149, %317, %c1_150] : memref<4x18x18xf32, #tpu.memory_space<vmem>>, vector<1x8x16xf32>
      %319 = vector.shape_cast %318 : vector<1x8x16xf32> to vector<8x16xf32>
      %c0_i32_151 = arith.constant 0 : i32
      %320 = arith.addi %4, %c0_i32_151 : i32
      %c1_i32_152 = arith.constant 1 : i32
      %321 = arith.addi %320, %c1_i32_152 : i32
      %322 = arith.index_cast %321 : i32 to index
      %323 = memref.load %arg2[%322] : memref<288xf32, #tpu.memory_space<smem>>
      %324 = vector.broadcast %323 : f32 to vector<8x16xf32>
      %325 = arith.mulf %324, %319 : vector<8x16xf32>
      %326 = arith.addf %266, %325 : vector<8x16xf32>
      %c36_i32_153 = arith.constant 36 : i32
      %327 = arith.addi %4, %c36_i32_153 : i32
      %c1_i32_154 = arith.constant 1 : i32
      %328 = arith.addi %327, %c1_i32_154 : i32
      %329 = arith.index_cast %328 : i32 to index
      %330 = memref.load %arg2[%329] : memref<288xf32, #tpu.memory_space<smem>>
      %331 = vector.broadcast %330 : f32 to vector<8x16xf32>
      %332 = arith.mulf %331, %319 : vector<8x16xf32>
      %333 = arith.addf %273, %332 : vector<8x16xf32>
      %c72_i32_155 = arith.constant 72 : i32
      %334 = arith.addi %4, %c72_i32_155 : i32
      %c1_i32_156 = arith.constant 1 : i32
      %335 = arith.addi %334, %c1_i32_156 : i32
      %336 = arith.index_cast %335 : i32 to index
      %337 = memref.load %arg2[%336] : memref<288xf32, #tpu.memory_space<smem>>
      %338 = vector.broadcast %337 : f32 to vector<8x16xf32>
      %339 = arith.mulf %338, %319 : vector<8x16xf32>
      %340 = arith.addf %280, %339 : vector<8x16xf32>
      %c108_i32_157 = arith.constant 108 : i32
      %341 = arith.addi %4, %c108_i32_157 : i32
      %c1_i32_158 = arith.constant 1 : i32
      %342 = arith.addi %341, %c1_i32_158 : i32
      %343 = arith.index_cast %342 : i32 to index
      %344 = memref.load %arg2[%343] : memref<288xf32, #tpu.memory_space<smem>>
      %345 = vector.broadcast %344 : f32 to vector<8x16xf32>
      %346 = arith.mulf %345, %319 : vector<8x16xf32>
      %347 = arith.addf %287, %346 : vector<8x16xf32>
      %c144_i32_159 = arith.constant 144 : i32
      %348 = arith.addi %4, %c144_i32_159 : i32
      %c1_i32_160 = arith.constant 1 : i32
      %349 = arith.addi %348, %c1_i32_160 : i32
      %350 = arith.index_cast %349 : i32 to index
      %351 = memref.load %arg2[%350] : memref<288xf32, #tpu.memory_space<smem>>
      %352 = vector.broadcast %351 : f32 to vector<8x16xf32>
      %353 = arith.mulf %352, %319 : vector<8x16xf32>
      %354 = arith.addf %294, %353 : vector<8x16xf32>
      %c180_i32_161 = arith.constant 180 : i32
      %355 = arith.addi %4, %c180_i32_161 : i32
      %c1_i32_162 = arith.constant 1 : i32
      %356 = arith.addi %355, %c1_i32_162 : i32
      %357 = arith.index_cast %356 : i32 to index
      %358 = memref.load %arg2[%357] : memref<288xf32, #tpu.memory_space<smem>>
      %359 = vector.broadcast %358 : f32 to vector<8x16xf32>
      %360 = arith.mulf %359, %319 : vector<8x16xf32>
      %361 = arith.addf %301, %360 : vector<8x16xf32>
      %c216_i32_163 = arith.constant 216 : i32
      %362 = arith.addi %4, %c216_i32_163 : i32
      %c1_i32_164 = arith.constant 1 : i32
      %363 = arith.addi %362, %c1_i32_164 : i32
      %364 = arith.index_cast %363 : i32 to index
      %365 = memref.load %arg2[%364] : memref<288xf32, #tpu.memory_space<smem>>
      %366 = vector.broadcast %365 : f32 to vector<8x16xf32>
      %367 = arith.mulf %366, %319 : vector<8x16xf32>
      %368 = arith.addf %308, %367 : vector<8x16xf32>
      %c252_i32_165 = arith.constant 252 : i32
      %369 = arith.addi %4, %c252_i32_165 : i32
      %c1_i32_166 = arith.constant 1 : i32
      %370 = arith.addi %369, %c1_i32_166 : i32
      %371 = arith.index_cast %370 : i32 to index
      %372 = memref.load %arg2[%371] : memref<288xf32, #tpu.memory_space<smem>>
      %373 = vector.broadcast %372 : f32 to vector<8x16xf32>
      %374 = arith.mulf %373, %319 : vector<8x16xf32>
      %375 = arith.addf %315, %374 : vector<8x16xf32>
      %c0_i32_167 = arith.constant 0 : i32
      %376 = arith.addi %247, %c0_i32_167 : i32
      %c0_168 = arith.constant 0 : index
      %377 = arith.index_cast %376 : i32 to index
      %c2_169 = arith.constant 2 : index
      %378 = vector.load %arg7[%c0_168, %377, %c2_169] : memref<4x18x18xf32, #tpu.memory_space<vmem>>, vector<1x8x16xf32>
      %379 = vector.shape_cast %378 : vector<1x8x16xf32> to vector<8x16xf32>
      %c0_i32_170 = arith.constant 0 : i32
      %380 = arith.addi %4, %c0_i32_170 : i32
      %c2_i32_171 = arith.constant 2 : i32
      %381 = arith.addi %380, %c2_i32_171 : i32
      %382 = arith.index_cast %381 : i32 to index
      %383 = memref.load %arg2[%382] : memref<288xf32, #tpu.memory_space<smem>>
      %384 = vector.broadcast %383 : f32 to vector<8x16xf32>
      %385 = arith.mulf %384, %379 : vector<8x16xf32>
      %386 = arith.addf %326, %385 : vector<8x16xf32>
      %c36_i32_172 = arith.constant 36 : i32
      %387 = arith.addi %4, %c36_i32_172 : i32
      %c2_i32_173 = arith.constant 2 : i32
      %388 = arith.addi %387, %c2_i32_173 : i32
      %389 = arith.index_cast %388 : i32 to index
      %390 = memref.load %arg2[%389] : memref<288xf32, #tpu.memory_space<smem>>
      %391 = vector.broadcast %390 : f32 to vector<8x16xf32>
      %392 = arith.mulf %391, %379 : vector<8x16xf32>
      %393 = arith.addf %333, %392 : vector<8x16xf32>
      %c72_i32_174 = arith.constant 72 : i32
      %394 = arith.addi %4, %c72_i32_174 : i32
      %c2_i32_175 = arith.constant 2 : i32
      %395 = arith.addi %394, %c2_i32_175 : i32
      %396 = arith.index_cast %395 : i32 to index
      %397 = memref.load %arg2[%396] : memref<288xf32, #tpu.memory_space<smem>>
      %398 = vector.broadcast %397 : f32 to vector<8x16xf32>
      %399 = arith.mulf %398, %379 : vector<8x16xf32>
      %400 = arith.addf %340, %399 : vector<8x16xf32>
      %c108_i32_176 = arith.constant 108 : i32
      %401 = arith.addi %4, %c108_i32_176 : i32
      %c2_i32_177 = arith.constant 2 : i32
      %402 = arith.addi %401, %c2_i32_177 : i32
      %403 = arith.index_cast %402 : i32 to index
      %404 = memref.load %arg2[%403] : memref<288xf32, #tpu.memory_space<smem>>
      %405 = vector.broadcast %404 : f32 to vector<8x16xf32>
      %406 = arith.mulf %405, %379 : vector<8x16xf32>
      %407 = arith.addf %347, %406 : vector<8x16xf32>
      %c144_i32_178 = arith.constant 144 : i32
      %408 = arith.addi %4, %c144_i32_178 : i32
      %c2_i32_179 = arith.constant 2 : i32
      %409 = arith.addi %408, %c2_i32_179 : i32
      %410 = arith.index_cast %409 : i32 to index
      %411 = memref.load %arg2[%410] : memref<288xf32, #tpu.memory_space<smem>>
      %412 = vector.broadcast %411 : f32 to vector<8x16xf32>
      %413 = arith.mulf %412, %379 : vector<8x16xf32>
      %414 = arith.addf %354, %413 : vector<8x16xf32>
      %c180_i32_180 = arith.constant 180 : i32
      %415 = arith.addi %4, %c180_i32_180 : i32
      %c2_i32_181 = arith.constant 2 : i32
      %416 = arith.addi %415, %c2_i32_181 : i32
      %417 = arith.index_cast %416 : i32 to index
      %418 = memref.load %arg2[%417] : memref<288xf32, #tpu.memory_space<smem>>
      %419 = vector.broadcast %418 : f32 to vector<8x16xf32>
      %420 = arith.mulf %419, %379 : vector<8x16xf32>
      %421 = arith.addf %361, %420 : vector<8x16xf32>
      %c216_i32_182 = arith.constant 216 : i32
      %422 = arith.addi %4, %c216_i32_182 : i32
      %c2_i32_183 = arith.constant 2 : i32
      %423 = arith.addi %422, %c2_i32_183 : i32
      %424 = arith.index_cast %423 : i32 to index
      %425 = memref.load %arg2[%424] : memref<288xf32, #tpu.memory_space<smem>>
      %426 = vector.broadcast %425 : f32 to vector<8x16xf32>
      %427 = arith.mulf %426, %379 : vector<8x16xf32>
      %428 = arith.addf %368, %427 : vector<8x16xf32>
      %c252_i32_184 = arith.constant 252 : i32
      %429 = arith.addi %4, %c252_i32_184 : i32
      %c2_i32_185 = arith.constant 2 : i32
      %430 = arith.addi %429, %c2_i32_185 : i32
      %431 = arith.index_cast %430 : i32 to index
      %432 = memref.load %arg2[%431] : memref<288xf32, #tpu.memory_space<smem>>
      %433 = vector.broadcast %432 : f32 to vector<8x16xf32>
      %434 = arith.mulf %433, %379 : vector<8x16xf32>
      %435 = arith.addf %375, %434 : vector<8x16xf32>
      %c1_i32_186 = arith.constant 1 : i32
      %436 = arith.addi %247, %c1_i32_186 : i32
      %c0_187 = arith.constant 0 : index
      %437 = arith.index_cast %436 : i32 to index
      %c0_188 = arith.constant 0 : index
      %438 = vector.load %arg7[%c0_187, %437, %c0_188] : memref<4x18x18xf32, #tpu.memory_space<vmem>>, vector<1x8x16xf32>
      %439 = vector.shape_cast %438 : vector<1x8x16xf32> to vector<8x16xf32>
      %c3_i32_189 = arith.constant 3 : i32
      %440 = arith.addi %4, %c3_i32_189 : i32
      %c0_i32_190 = arith.constant 0 : i32
      %441 = arith.addi %440, %c0_i32_190 : i32
      %442 = arith.index_cast %441 : i32 to index
      %443 = memref.load %arg2[%442] : memref<288xf32, #tpu.memory_space<smem>>
      %444 = vector.broadcast %443 : f32 to vector<8x16xf32>
      %445 = arith.mulf %444, %439 : vector<8x16xf32>
      %446 = arith.addf %386, %445 : vector<8x16xf32>
      %c39_i32 = arith.constant 39 : i32
      %447 = arith.addi %4, %c39_i32 : i32
      %c0_i32_191 = arith.constant 0 : i32
      %448 = arith.addi %447, %c0_i32_191 : i32
      %449 = arith.index_cast %448 : i32 to index
      %450 = memref.load %arg2[%449] : memref<288xf32, #tpu.memory_space<smem>>
      %451 = vector.broadcast %450 : f32 to vector<8x16xf32>
      %452 = arith.mulf %451, %439 : vector<8x16xf32>
      %453 = arith.addf %393, %452 : vector<8x16xf32>
      %c75_i32 = arith.constant 75 : i32
      %454 = arith.addi %4, %c75_i32 : i32
      %c0_i32_192 = arith.constant 0 : i32
      %455 = arith.addi %454, %c0_i32_192 : i32
      %456 = arith.index_cast %455 : i32 to index
      %457 = memref.load %arg2[%456] : memref<288xf32, #tpu.memory_space<smem>>
      %458 = vector.broadcast %457 : f32 to vector<8x16xf32>
      %459 = arith.mulf %458, %439 : vector<8x16xf32>
      %460 = arith.addf %400, %459 : vector<8x16xf32>
      %c111_i32 = arith.constant 111 : i32
      %461 = arith.addi %4, %c111_i32 : i32
      %c0_i32_193 = arith.constant 0 : i32
      %462 = arith.addi %461, %c0_i32_193 : i32
      %463 = arith.index_cast %462 : i32 to index
      %464 = memref.load %arg2[%463] : memref<288xf32, #tpu.memory_space<smem>>
      %465 = vector.broadcast %464 : f32 to vector<8x16xf32>
      %466 = arith.mulf %465, %439 : vector<8x16xf32>
      %467 = arith.addf %407, %466 : vector<8x16xf32>
      %c147_i32 = arith.constant 147 : i32
      %468 = arith.addi %4, %c147_i32 : i32
      %c0_i32_194 = arith.constant 0 : i32
      %469 = arith.addi %468, %c0_i32_194 : i32
      %470 = arith.index_cast %469 : i32 to index
      %471 = memref.load %arg2[%470] : memref<288xf32, #tpu.memory_space<smem>>
      %472 = vector.broadcast %471 : f32 to vector<8x16xf32>
      %473 = arith.mulf %472, %439 : vector<8x16xf32>
      %474 = arith.addf %414, %473 : vector<8x16xf32>
      %c183_i32 = arith.constant 183 : i32
      %475 = arith.addi %4, %c183_i32 : i32
      %c0_i32_195 = arith.constant 0 : i32
      %476 = arith.addi %475, %c0_i32_195 : i32
      %477 = arith.index_cast %476 : i32 to index
      %478 = memref.load %arg2[%477] : memref<288xf32, #tpu.memory_space<smem>>
      %479 = vector.broadcast %478 : f32 to vector<8x16xf32>
      %480 = arith.mulf %479, %439 : vector<8x16xf32>
      %481 = arith.addf %421, %480 : vector<8x16xf32>
      %c219_i32 = arith.constant 219 : i32
      %482 = arith.addi %4, %c219_i32 : i32
      %c0_i32_196 = arith.constant 0 : i32
      %483 = arith.addi %482, %c0_i32_196 : i32
      %484 = arith.index_cast %483 : i32 to index
      %485 = memref.load %arg2[%484] : memref<288xf32, #tpu.memory_space<smem>>
      %486 = vector.broadcast %485 : f32 to vector<8x16xf32>
      %487 = arith.mulf %486, %439 : vector<8x16xf32>
      %488 = arith.addf %428, %487 : vector<8x16xf32>
      %c255_i32 = arith.constant 255 : i32
      %489 = arith.addi %4, %c255_i32 : i32
      %c0_i32_197 = arith.constant 0 : i32
      %490 = arith.addi %489, %c0_i32_197 : i32
      %491 = arith.index_cast %490 : i32 to index
      %492 = memref.load %arg2[%491] : memref<288xf32, #tpu.memory_space<smem>>
      %493 = vector.broadcast %492 : f32 to vector<8x16xf32>
      %494 = arith.mulf %493, %439 : vector<8x16xf32>
      %495 = arith.addf %435, %494 : vector<8x16xf32>
      %c1_i32_198 = arith.constant 1 : i32
      %496 = arith.addi %247, %c1_i32_198 : i32
      %c0_199 = arith.constant 0 : index
      %497 = arith.index_cast %496 : i32 to index
      %c1_200 = arith.constant 1 : index
      %498 = vector.load %arg7[%c0_199, %497, %c1_200] : memref<4x18x18xf32, #tpu.memory_space<vmem>>, vector<1x8x16xf32>
      %499 = vector.shape_cast %498 : vector<1x8x16xf32> to vector<8x16xf32>
      %c3_i32_201 = arith.constant 3 : i32
      %500 = arith.addi %4, %c3_i32_201 : i32
      %c1_i32_202 = arith.constant 1 : i32
      %501 = arith.addi %500, %c1_i32_202 : i32
      %502 = arith.index_cast %501 : i32 to index
      %503 = memref.load %arg2[%502] : memref<288xf32, #tpu.memory_space<smem>>
      %504 = vector.broadcast %503 : f32 to vector<8x16xf32>
      %505 = arith.mulf %504, %499 : vector<8x16xf32>
      %506 = arith.addf %446, %505 : vector<8x16xf32>
      %c39_i32_203 = arith.constant 39 : i32
      %507 = arith.addi %4, %c39_i32_203 : i32
      %c1_i32_204 = arith.constant 1 : i32
      %508 = arith.addi %507, %c1_i32_204 : i32
      %509 = arith.index_cast %508 : i32 to index
      %510 = memref.load %arg2[%509] : memref<288xf32, #tpu.memory_space<smem>>
      %511 = vector.broadcast %510 : f32 to vector<8x16xf32>
      %512 = arith.mulf %511, %499 : vector<8x16xf32>
      %513 = arith.addf %453, %512 : vector<8x16xf32>
      %c75_i32_205 = arith.constant 75 : i32
      %514 = arith.addi %4, %c75_i32_205 : i32
      %c1_i32_206 = arith.constant 1 : i32
      %515 = arith.addi %514, %c1_i32_206 : i32
      %516 = arith.index_cast %515 : i32 to index
      %517 = memref.load %arg2[%516] : memref<288xf32, #tpu.memory_space<smem>>
      %518 = vector.broadcast %517 : f32 to vector<8x16xf32>
      %519 = arith.mulf %518, %499 : vector<8x16xf32>
      %520 = arith.addf %460, %519 : vector<8x16xf32>
      %c111_i32_207 = arith.constant 111 : i32
      %521 = arith.addi %4, %c111_i32_207 : i32
      %c1_i32_208 = arith.constant 1 : i32
      %522 = arith.addi %521, %c1_i32_208 : i32
      %523 = arith.index_cast %522 : i32 to index
      %524 = memref.load %arg2[%523] : memref<288xf32, #tpu.memory_space<smem>>
      %525 = vector.broadcast %524 : f32 to vector<8x16xf32>
      %526 = arith.mulf %525, %499 : vector<8x16xf32>
      %527 = arith.addf %467, %526 : vector<8x16xf32>
      %c147_i32_209 = arith.constant 147 : i32
      %528 = arith.addi %4, %c147_i32_209 : i32
      %c1_i32_210 = arith.constant 1 : i32
      %529 = arith.addi %528, %c1_i32_210 : i32
      %530 = arith.index_cast %529 : i32 to index
      %531 = memref.load %arg2[%530] : memref<288xf32, #tpu.memory_space<smem>>
      %532 = vector.broadcast %531 : f32 to vector<8x16xf32>
      %533 = arith.mulf %532, %499 : vector<8x16xf32>
      %534 = arith.addf %474, %533 : vector<8x16xf32>
      %c183_i32_211 = arith.constant 183 : i32
      %535 = arith.addi %4, %c183_i32_211 : i32
      %c1_i32_212 = arith.constant 1 : i32
      %536 = arith.addi %535, %c1_i32_212 : i32
      %537 = arith.index_cast %536 : i32 to index
      %538 = memref.load %arg2[%537] : memref<288xf32, #tpu.memory_space<smem>>
      %539 = vector.broadcast %538 : f32 to vector<8x16xf32>
      %540 = arith.mulf %539, %499 : vector<8x16xf32>
      %541 = arith.addf %481, %540 : vector<8x16xf32>
      %c219_i32_213 = arith.constant 219 : i32
      %542 = arith.addi %4, %c219_i32_213 : i32
      %c1_i32_214 = arith.constant 1 : i32
      %543 = arith.addi %542, %c1_i32_214 : i32
      %544 = arith.index_cast %543 : i32 to index
      %545 = memref.load %arg2[%544] : memref<288xf32, #tpu.memory_space<smem>>
      %546 = vector.broadcast %545 : f32 to vector<8x16xf32>
      %547 = arith.mulf %546, %499 : vector<8x16xf32>
      %548 = arith.addf %488, %547 : vector<8x16xf32>
      %c255_i32_215 = arith.constant 255 : i32
      %549 = arith.addi %4, %c255_i32_215 : i32
      %c1_i32_216 = arith.constant 1 : i32
      %550 = arith.addi %549, %c1_i32_216 : i32
      %551 = arith.index_cast %550 : i32 to index
      %552 = memref.load %arg2[%551] : memref<288xf32, #tpu.memory_space<smem>>
      %553 = vector.broadcast %552 : f32 to vector<8x16xf32>
      %554 = arith.mulf %553, %499 : vector<8x16xf32>
      %555 = arith.addf %495, %554 : vector<8x16xf32>
      %c1_i32_217 = arith.constant 1 : i32
      %556 = arith.addi %247, %c1_i32_217 : i32
      %c0_218 = arith.constant 0 : index
      %557 = arith.index_cast %556 : i32 to index
      %c2_219 = arith.constant 2 : index
      %558 = vector.load %arg7[%c0_218, %557, %c2_219] : memref<4x18x18xf32, #tpu.memory_space<vmem>>, vector<1x8x16xf32>
      %559 = vector.shape_cast %558 : vector<1x8x16xf32> to vector<8x16xf32>
      %c3_i32_220 = arith.constant 3 : i32
      %560 = arith.addi %4, %c3_i32_220 : i32
      %c2_i32_221 = arith.constant 2 : i32
      %561 = arith.addi %560, %c2_i32_221 : i32
      %562 = arith.index_cast %561 : i32 to index
      %563 = memref.load %arg2[%562] : memref<288xf32, #tpu.memory_space<smem>>
      %564 = vector.broadcast %563 : f32 to vector<8x16xf32>
      %565 = arith.mulf %564, %559 : vector<8x16xf32>
      %566 = arith.addf %506, %565 : vector<8x16xf32>
      %c39_i32_222 = arith.constant 39 : i32
      %567 = arith.addi %4, %c39_i32_222 : i32
      %c2_i32_223 = arith.constant 2 : i32
      %568 = arith.addi %567, %c2_i32_223 : i32
      %569 = arith.index_cast %568 : i32 to index
      %570 = memref.load %arg2[%569] : memref<288xf32, #tpu.memory_space<smem>>
      %571 = vector.broadcast %570 : f32 to vector<8x16xf32>
      %572 = arith.mulf %571, %559 : vector<8x16xf32>
      %573 = arith.addf %513, %572 : vector<8x16xf32>
      %c75_i32_224 = arith.constant 75 : i32
      %574 = arith.addi %4, %c75_i32_224 : i32
      %c2_i32_225 = arith.constant 2 : i32
      %575 = arith.addi %574, %c2_i32_225 : i32
      %576 = arith.index_cast %575 : i32 to index
      %577 = memref.load %arg2[%576] : memref<288xf32, #tpu.memory_space<smem>>
      %578 = vector.broadcast %577 : f32 to vector<8x16xf32>
      %579 = arith.mulf %578, %559 : vector<8x16xf32>
      %580 = arith.addf %520, %579 : vector<8x16xf32>
      %c111_i32_226 = arith.constant 111 : i32
      %581 = arith.addi %4, %c111_i32_226 : i32
      %c2_i32_227 = arith.constant 2 : i32
      %582 = arith.addi %581, %c2_i32_227 : i32
      %583 = arith.index_cast %582 : i32 to index
      %584 = memref.load %arg2[%583] : memref<288xf32, #tpu.memory_space<smem>>
      %585 = vector.broadcast %584 : f32 to vector<8x16xf32>
      %586 = arith.mulf %585, %559 : vector<8x16xf32>
      %587 = arith.addf %527, %586 : vector<8x16xf32>
      %c147_i32_228 = arith.constant 147 : i32
      %588 = arith.addi %4, %c147_i32_228 : i32
      %c2_i32_229 = arith.constant 2 : i32
      %589 = arith.addi %588, %c2_i32_229 : i32
      %590 = arith.index_cast %589 : i32 to index
      %591 = memref.load %arg2[%590] : memref<288xf32, #tpu.memory_space<smem>>
      %592 = vector.broadcast %591 : f32 to vector<8x16xf32>
      %593 = arith.mulf %592, %559 : vector<8x16xf32>
      %594 = arith.addf %534, %593 : vector<8x16xf32>
      %c183_i32_230 = arith.constant 183 : i32
      %595 = arith.addi %4, %c183_i32_230 : i32
      %c2_i32_231 = arith.constant 2 : i32
      %596 = arith.addi %595, %c2_i32_231 : i32
      %597 = arith.index_cast %596 : i32 to index
      %598 = memref.load %arg2[%597] : memref<288xf32, #tpu.memory_space<smem>>
      %599 = vector.broadcast %598 : f32 to vector<8x16xf32>
      %600 = arith.mulf %599, %559 : vector<8x16xf32>
      %601 = arith.addf %541, %600 : vector<8x16xf32>
      %c219_i32_232 = arith.constant 219 : i32
      %602 = arith.addi %4, %c219_i32_232 : i32
      %c2_i32_233 = arith.constant 2 : i32
      %603 = arith.addi %602, %c2_i32_233 : i32
      %604 = arith.index_cast %603 : i32 to index
      %605 = memref.load %arg2[%604] : memref<288xf32, #tpu.memory_space<smem>>
      %606 = vector.broadcast %605 : f32 to vector<8x16xf32>
      %607 = arith.mulf %606, %559 : vector<8x16xf32>
      %608 = arith.addf %548, %607 : vector<8x16xf32>
      %c255_i32_234 = arith.constant 255 : i32
      %609 = arith.addi %4, %c255_i32_234 : i32
      %c2_i32_235 = arith.constant 2 : i32
      %610 = arith.addi %609, %c2_i32_235 : i32
      %611 = arith.index_cast %610 : i32 to index
      %612 = memref.load %arg2[%611] : memref<288xf32, #tpu.memory_space<smem>>
      %613 = vector.broadcast %612 : f32 to vector<8x16xf32>
      %614 = arith.mulf %613, %559 : vector<8x16xf32>
      %615 = arith.addf %555, %614 : vector<8x16xf32>
      %c2_i32_236 = arith.constant 2 : i32
      %616 = arith.addi %247, %c2_i32_236 : i32
      %c0_237 = arith.constant 0 : index
      %617 = arith.index_cast %616 : i32 to index
      %c0_238 = arith.constant 0 : index
      %618 = vector.load %arg7[%c0_237, %617, %c0_238] : memref<4x18x18xf32, #tpu.memory_space<vmem>>, vector<1x8x16xf32>
      %619 = vector.shape_cast %618 : vector<1x8x16xf32> to vector<8x16xf32>
      %c6_i32_239 = arith.constant 6 : i32
      %620 = arith.addi %4, %c6_i32_239 : i32
      %c0_i32_240 = arith.constant 0 : i32
      %621 = arith.addi %620, %c0_i32_240 : i32
      %622 = arith.index_cast %621 : i32 to index
      %623 = memref.load %arg2[%622] : memref<288xf32, #tpu.memory_space<smem>>
      %624 = vector.broadcast %623 : f32 to vector<8x16xf32>
      %625 = arith.mulf %624, %619 : vector<8x16xf32>
      %626 = arith.addf %566, %625 : vector<8x16xf32>
      %c42_i32 = arith.constant 42 : i32
      %627 = arith.addi %4, %c42_i32 : i32
      %c0_i32_241 = arith.constant 0 : i32
      %628 = arith.addi %627, %c0_i32_241 : i32
      %629 = arith.index_cast %628 : i32 to index
      %630 = memref.load %arg2[%629] : memref<288xf32, #tpu.memory_space<smem>>
      %631 = vector.broadcast %630 : f32 to vector<8x16xf32>
      %632 = arith.mulf %631, %619 : vector<8x16xf32>
      %633 = arith.addf %573, %632 : vector<8x16xf32>
      %c78_i32 = arith.constant 78 : i32
      %634 = arith.addi %4, %c78_i32 : i32
      %c0_i32_242 = arith.constant 0 : i32
      %635 = arith.addi %634, %c0_i32_242 : i32
      %636 = arith.index_cast %635 : i32 to index
      %637 = memref.load %arg2[%636] : memref<288xf32, #tpu.memory_space<smem>>
      %638 = vector.broadcast %637 : f32 to vector<8x16xf32>
      %639 = arith.mulf %638, %619 : vector<8x16xf32>
      %640 = arith.addf %580, %639 : vector<8x16xf32>
      %c114_i32 = arith.constant 114 : i32
      %641 = arith.addi %4, %c114_i32 : i32
      %c0_i32_243 = arith.constant 0 : i32
      %642 = arith.addi %641, %c0_i32_243 : i32
      %643 = arith.index_cast %642 : i32 to index
      %644 = memref.load %arg2[%643] : memref<288xf32, #tpu.memory_space<smem>>
      %645 = vector.broadcast %644 : f32 to vector<8x16xf32>
      %646 = arith.mulf %645, %619 : vector<8x16xf32>
      %647 = arith.addf %587, %646 : vector<8x16xf32>
      %c150_i32 = arith.constant 150 : i32
      %648 = arith.addi %4, %c150_i32 : i32
      %c0_i32_244 = arith.constant 0 : i32
      %649 = arith.addi %648, %c0_i32_244 : i32
      %650 = arith.index_cast %649 : i32 to index
      %651 = memref.load %arg2[%650] : memref<288xf32, #tpu.memory_space<smem>>
      %652 = vector.broadcast %651 : f32 to vector<8x16xf32>
      %653 = arith.mulf %652, %619 : vector<8x16xf32>
      %654 = arith.addf %594, %653 : vector<8x16xf32>
      %c186_i32 = arith.constant 186 : i32
      %655 = arith.addi %4, %c186_i32 : i32
      %c0_i32_245 = arith.constant 0 : i32
      %656 = arith.addi %655, %c0_i32_245 : i32
      %657 = arith.index_cast %656 : i32 to index
      %658 = memref.load %arg2[%657] : memref<288xf32, #tpu.memory_space<smem>>
      %659 = vector.broadcast %658 : f32 to vector<8x16xf32>
      %660 = arith.mulf %659, %619 : vector<8x16xf32>
      %661 = arith.addf %601, %660 : vector<8x16xf32>
      %c222_i32 = arith.constant 222 : i32
      %662 = arith.addi %4, %c222_i32 : i32
      %c0_i32_246 = arith.constant 0 : i32
      %663 = arith.addi %662, %c0_i32_246 : i32
      %664 = arith.index_cast %663 : i32 to index
      %665 = memref.load %arg2[%664] : memref<288xf32, #tpu.memory_space<smem>>
      %666 = vector.broadcast %665 : f32 to vector<8x16xf32>
      %667 = arith.mulf %666, %619 : vector<8x16xf32>
      %668 = arith.addf %608, %667 : vector<8x16xf32>
      %c258_i32 = arith.constant 258 : i32
      %669 = arith.addi %4, %c258_i32 : i32
      %c0_i32_247 = arith.constant 0 : i32
      %670 = arith.addi %669, %c0_i32_247 : i32
      %671 = arith.index_cast %670 : i32 to index
      %672 = memref.load %arg2[%671] : memref<288xf32, #tpu.memory_space<smem>>
      %673 = vector.broadcast %672 : f32 to vector<8x16xf32>
      %674 = arith.mulf %673, %619 : vector<8x16xf32>
      %675 = arith.addf %615, %674 : vector<8x16xf32>
      %c2_i32_248 = arith.constant 2 : i32
      %676 = arith.addi %247, %c2_i32_248 : i32
      %c0_249 = arith.constant 0 : index
      %677 = arith.index_cast %676 : i32 to index
      %c1_250 = arith.constant 1 : index
      %678 = vector.load %arg7[%c0_249, %677, %c1_250] : memref<4x18x18xf32, #tpu.memory_space<vmem>>, vector<1x8x16xf32>
      %679 = vector.shape_cast %678 : vector<1x8x16xf32> to vector<8x16xf32>
      %c6_i32_251 = arith.constant 6 : i32
      %680 = arith.addi %4, %c6_i32_251 : i32
      %c1_i32_252 = arith.constant 1 : i32
      %681 = arith.addi %680, %c1_i32_252 : i32
      %682 = arith.index_cast %681 : i32 to index
      %683 = memref.load %arg2[%682] : memref<288xf32, #tpu.memory_space<smem>>
      %684 = vector.broadcast %683 : f32 to vector<8x16xf32>
      %685 = arith.mulf %684, %679 : vector<8x16xf32>
      %686 = arith.addf %626, %685 : vector<8x16xf32>
      %c42_i32_253 = arith.constant 42 : i32
      %687 = arith.addi %4, %c42_i32_253 : i32
      %c1_i32_254 = arith.constant 1 : i32
      %688 = arith.addi %687, %c1_i32_254 : i32
      %689 = arith.index_cast %688 : i32 to index
      %690 = memref.load %arg2[%689] : memref<288xf32, #tpu.memory_space<smem>>
      %691 = vector.broadcast %690 : f32 to vector<8x16xf32>
      %692 = arith.mulf %691, %679 : vector<8x16xf32>
      %693 = arith.addf %633, %692 : vector<8x16xf32>
      %c78_i32_255 = arith.constant 78 : i32
      %694 = arith.addi %4, %c78_i32_255 : i32
      %c1_i32_256 = arith.constant 1 : i32
      %695 = arith.addi %694, %c1_i32_256 : i32
      %696 = arith.index_cast %695 : i32 to index
      %697 = memref.load %arg2[%696] : memref<288xf32, #tpu.memory_space<smem>>
      %698 = vector.broadcast %697 : f32 to vector<8x16xf32>
      %699 = arith.mulf %698, %679 : vector<8x16xf32>
      %700 = arith.addf %640, %699 : vector<8x16xf32>
      %c114_i32_257 = arith.constant 114 : i32
      %701 = arith.addi %4, %c114_i32_257 : i32
      %c1_i32_258 = arith.constant 1 : i32
      %702 = arith.addi %701, %c1_i32_258 : i32
      %703 = arith.index_cast %702 : i32 to index
      %704 = memref.load %arg2[%703] : memref<288xf32, #tpu.memory_space<smem>>
      %705 = vector.broadcast %704 : f32 to vector<8x16xf32>
      %706 = arith.mulf %705, %679 : vector<8x16xf32>
      %707 = arith.addf %647, %706 : vector<8x16xf32>
      %c150_i32_259 = arith.constant 150 : i32
      %708 = arith.addi %4, %c150_i32_259 : i32
      %c1_i32_260 = arith.constant 1 : i32
      %709 = arith.addi %708, %c1_i32_260 : i32
      %710 = arith.index_cast %709 : i32 to index
      %711 = memref.load %arg2[%710] : memref<288xf32, #tpu.memory_space<smem>>
      %712 = vector.broadcast %711 : f32 to vector<8x16xf32>
      %713 = arith.mulf %712, %679 : vector<8x16xf32>
      %714 = arith.addf %654, %713 : vector<8x16xf32>
      %c186_i32_261 = arith.constant 186 : i32
      %715 = arith.addi %4, %c186_i32_261 : i32
      %c1_i32_262 = arith.constant 1 : i32
      %716 = arith.addi %715, %c1_i32_262 : i32
      %717 = arith.index_cast %716 : i32 to index
      %718 = memref.load %arg2[%717] : memref<288xf32, #tpu.memory_space<smem>>
      %719 = vector.broadcast %718 : f32 to vector<8x16xf32>
      %720 = arith.mulf %719, %679 : vector<8x16xf32>
      %721 = arith.addf %661, %720 : vector<8x16xf32>
      %c222_i32_263 = arith.constant 222 : i32
      %722 = arith.addi %4, %c222_i32_263 : i32
      %c1_i32_264 = arith.constant 1 : i32
      %723 = arith.addi %722, %c1_i32_264 : i32
      %724 = arith.index_cast %723 : i32 to index
      %725 = memref.load %arg2[%724] : memref<288xf32, #tpu.memory_space<smem>>
      %726 = vector.broadcast %725 : f32 to vector<8x16xf32>
      %727 = arith.mulf %726, %679 : vector<8x16xf32>
      %728 = arith.addf %668, %727 : vector<8x16xf32>
      %c258_i32_265 = arith.constant 258 : i32
      %729 = arith.addi %4, %c258_i32_265 : i32
      %c1_i32_266 = arith.constant 1 : i32
      %730 = arith.addi %729, %c1_i32_266 : i32
      %731 = arith.index_cast %730 : i32 to index
      %732 = memref.load %arg2[%731] : memref<288xf32, #tpu.memory_space<smem>>
      %733 = vector.broadcast %732 : f32 to vector<8x16xf32>
      %734 = arith.mulf %733, %679 : vector<8x16xf32>
      %735 = arith.addf %675, %734 : vector<8x16xf32>
      %c2_i32_267 = arith.constant 2 : i32
      %736 = arith.addi %247, %c2_i32_267 : i32
      %c0_268 = arith.constant 0 : index
      %737 = arith.index_cast %736 : i32 to index
      %c2_269 = arith.constant 2 : index
      %738 = vector.load %arg7[%c0_268, %737, %c2_269] : memref<4x18x18xf32, #tpu.memory_space<vmem>>, vector<1x8x16xf32>
      %739 = vector.shape_cast %738 : vector<1x8x16xf32> to vector<8x16xf32>
      %c6_i32_270 = arith.constant 6 : i32
      %740 = arith.addi %4, %c6_i32_270 : i32
      %c2_i32_271 = arith.constant 2 : i32
      %741 = arith.addi %740, %c2_i32_271 : i32
      %742 = arith.index_cast %741 : i32 to index
      %743 = memref.load %arg2[%742] : memref<288xf32, #tpu.memory_space<smem>>
      %744 = vector.broadcast %743 : f32 to vector<8x16xf32>
      %745 = arith.mulf %744, %739 : vector<8x16xf32>
      %746 = arith.addf %686, %745 : vector<8x16xf32>
      %c42_i32_272 = arith.constant 42 : i32
      %747 = arith.addi %4, %c42_i32_272 : i32
      %c2_i32_273 = arith.constant 2 : i32
      %748 = arith.addi %747, %c2_i32_273 : i32
      %749 = arith.index_cast %748 : i32 to index
      %750 = memref.load %arg2[%749] : memref<288xf32, #tpu.memory_space<smem>>
      %751 = vector.broadcast %750 : f32 to vector<8x16xf32>
      %752 = arith.mulf %751, %739 : vector<8x16xf32>
      %753 = arith.addf %693, %752 : vector<8x16xf32>
      %c78_i32_274 = arith.constant 78 : i32
      %754 = arith.addi %4, %c78_i32_274 : i32
      %c2_i32_275 = arith.constant 2 : i32
      %755 = arith.addi %754, %c2_i32_275 : i32
      %756 = arith.index_cast %755 : i32 to index
      %757 = memref.load %arg2[%756] : memref<288xf32, #tpu.memory_space<smem>>
      %758 = vector.broadcast %757 : f32 to vector<8x16xf32>
      %759 = arith.mulf %758, %739 : vector<8x16xf32>
      %760 = arith.addf %700, %759 : vector<8x16xf32>
      %c114_i32_276 = arith.constant 114 : i32
      %761 = arith.addi %4, %c114_i32_276 : i32
      %c2_i32_277 = arith.constant 2 : i32
      %762 = arith.addi %761, %c2_i32_277 : i32
      %763 = arith.index_cast %762 : i32 to index
      %764 = memref.load %arg2[%763] : memref<288xf32, #tpu.memory_space<smem>>
      %765 = vector.broadcast %764 : f32 to vector<8x16xf32>
      %766 = arith.mulf %765, %739 : vector<8x16xf32>
      %767 = arith.addf %707, %766 : vector<8x16xf32>
      %c150_i32_278 = arith.constant 150 : i32
      %768 = arith.addi %4, %c150_i32_278 : i32
      %c2_i32_279 = arith.constant 2 : i32
      %769 = arith.addi %768, %c2_i32_279 : i32
      %770 = arith.index_cast %769 : i32 to index
      %771 = memref.load %arg2[%770] : memref<288xf32, #tpu.memory_space<smem>>
      %772 = vector.broadcast %771 : f32 to vector<8x16xf32>
      %773 = arith.mulf %772, %739 : vector<8x16xf32>
      %774 = arith.addf %714, %773 : vector<8x16xf32>
      %c186_i32_280 = arith.constant 186 : i32
      %775 = arith.addi %4, %c186_i32_280 : i32
      %c2_i32_281 = arith.constant 2 : i32
      %776 = arith.addi %775, %c2_i32_281 : i32
      %777 = arith.index_cast %776 : i32 to index
      %778 = memref.load %arg2[%777] : memref<288xf32, #tpu.memory_space<smem>>
      %779 = vector.broadcast %778 : f32 to vector<8x16xf32>
      %780 = arith.mulf %779, %739 : vector<8x16xf32>
      %781 = arith.addf %721, %780 : vector<8x16xf32>
      %c222_i32_282 = arith.constant 222 : i32
      %782 = arith.addi %4, %c222_i32_282 : i32
      %c2_i32_283 = arith.constant 2 : i32
      %783 = arith.addi %782, %c2_i32_283 : i32
      %784 = arith.index_cast %783 : i32 to index
      %785 = memref.load %arg2[%784] : memref<288xf32, #tpu.memory_space<smem>>
      %786 = vector.broadcast %785 : f32 to vector<8x16xf32>
      %787 = arith.mulf %786, %739 : vector<8x16xf32>
      %788 = arith.addf %728, %787 : vector<8x16xf32>
      %c258_i32_284 = arith.constant 258 : i32
      %789 = arith.addi %4, %c258_i32_284 : i32
      %c2_i32_285 = arith.constant 2 : i32
      %790 = arith.addi %789, %c2_i32_285 : i32
      %791 = arith.index_cast %790 : i32 to index
      %792 = memref.load %arg2[%791] : memref<288xf32, #tpu.memory_space<smem>>
      %793 = vector.broadcast %792 : f32 to vector<8x16xf32>
      %794 = arith.mulf %793, %739 : vector<8x16xf32>
      %795 = arith.addf %735, %794 : vector<8x16xf32>
      %c0_i32_286 = arith.constant 0 : i32
      %796 = arith.addi %247, %c0_i32_286 : i32
      %c1_287 = arith.constant 1 : index
      %797 = arith.index_cast %796 : i32 to index
      %c0_288 = arith.constant 0 : index
      %798 = vector.load %arg7[%c1_287, %797, %c0_288] : memref<4x18x18xf32, #tpu.memory_space<vmem>>, vector<1x8x16xf32>
      %799 = vector.shape_cast %798 : vector<1x8x16xf32> to vector<8x16xf32>
      %c9_i32 = arith.constant 9 : i32
      %800 = arith.addi %4, %c9_i32 : i32
      %c0_i32_289 = arith.constant 0 : i32
      %801 = arith.addi %800, %c0_i32_289 : i32
      %802 = arith.index_cast %801 : i32 to index
      %803 = memref.load %arg2[%802] : memref<288xf32, #tpu.memory_space<smem>>
      %804 = vector.broadcast %803 : f32 to vector<8x16xf32>
      %805 = arith.mulf %804, %799 : vector<8x16xf32>
      %806 = arith.addf %746, %805 : vector<8x16xf32>
      %c45_i32 = arith.constant 45 : i32
      %807 = arith.addi %4, %c45_i32 : i32
      %c0_i32_290 = arith.constant 0 : i32
      %808 = arith.addi %807, %c0_i32_290 : i32
      %809 = arith.index_cast %808 : i32 to index
      %810 = memref.load %arg2[%809] : memref<288xf32, #tpu.memory_space<smem>>
      %811 = vector.broadcast %810 : f32 to vector<8x16xf32>
      %812 = arith.mulf %811, %799 : vector<8x16xf32>
      %813 = arith.addf %753, %812 : vector<8x16xf32>
      %c81_i32 = arith.constant 81 : i32
      %814 = arith.addi %4, %c81_i32 : i32
      %c0_i32_291 = arith.constant 0 : i32
      %815 = arith.addi %814, %c0_i32_291 : i32
      %816 = arith.index_cast %815 : i32 to index
      %817 = memref.load %arg2[%816] : memref<288xf32, #tpu.memory_space<smem>>
      %818 = vector.broadcast %817 : f32 to vector<8x16xf32>
      %819 = arith.mulf %818, %799 : vector<8x16xf32>
      %820 = arith.addf %760, %819 : vector<8x16xf32>
      %c117_i32 = arith.constant 117 : i32
      %821 = arith.addi %4, %c117_i32 : i32
      %c0_i32_292 = arith.constant 0 : i32
      %822 = arith.addi %821, %c0_i32_292 : i32
      %823 = arith.index_cast %822 : i32 to index
      %824 = memref.load %arg2[%823] : memref<288xf32, #tpu.memory_space<smem>>
      %825 = vector.broadcast %824 : f32 to vector<8x16xf32>
      %826 = arith.mulf %825, %799 : vector<8x16xf32>
      %827 = arith.addf %767, %826 : vector<8x16xf32>
      %c153_i32 = arith.constant 153 : i32
      %828 = arith.addi %4, %c153_i32 : i32
      %c0_i32_293 = arith.constant 0 : i32
      %829 = arith.addi %828, %c0_i32_293 : i32
      %830 = arith.index_cast %829 : i32 to index
      %831 = memref.load %arg2[%830] : memref<288xf32, #tpu.memory_space<smem>>
      %832 = vector.broadcast %831 : f32 to vector<8x16xf32>
      %833 = arith.mulf %832, %799 : vector<8x16xf32>
      %834 = arith.addf %774, %833 : vector<8x16xf32>
      %c189_i32 = arith.constant 189 : i32
      %835 = arith.addi %4, %c189_i32 : i32
      %c0_i32_294 = arith.constant 0 : i32
      %836 = arith.addi %835, %c0_i32_294 : i32
      %837 = arith.index_cast %836 : i32 to index
      %838 = memref.load %arg2[%837] : memref<288xf32, #tpu.memory_space<smem>>
      %839 = vector.broadcast %838 : f32 to vector<8x16xf32>
      %840 = arith.mulf %839, %799 : vector<8x16xf32>
      %841 = arith.addf %781, %840 : vector<8x16xf32>
      %c225_i32 = arith.constant 225 : i32
      %842 = arith.addi %4, %c225_i32 : i32
      %c0_i32_295 = arith.constant 0 : i32
      %843 = arith.addi %842, %c0_i32_295 : i32
      %844 = arith.index_cast %843 : i32 to index
      %845 = memref.load %arg2[%844] : memref<288xf32, #tpu.memory_space<smem>>
      %846 = vector.broadcast %845 : f32 to vector<8x16xf32>
      %847 = arith.mulf %846, %799 : vector<8x16xf32>
      %848 = arith.addf %788, %847 : vector<8x16xf32>
      %c261_i32 = arith.constant 261 : i32
      %849 = arith.addi %4, %c261_i32 : i32
      %c0_i32_296 = arith.constant 0 : i32
      %850 = arith.addi %849, %c0_i32_296 : i32
      %851 = arith.index_cast %850 : i32 to index
      %852 = memref.load %arg2[%851] : memref<288xf32, #tpu.memory_space<smem>>
      %853 = vector.broadcast %852 : f32 to vector<8x16xf32>
      %854 = arith.mulf %853, %799 : vector<8x16xf32>
      %855 = arith.addf %795, %854 : vector<8x16xf32>
      %c0_i32_297 = arith.constant 0 : i32
      %856 = arith.addi %247, %c0_i32_297 : i32
      %c1_298 = arith.constant 1 : index
      %857 = arith.index_cast %856 : i32 to index
      %c1_299 = arith.constant 1 : index
      %858 = vector.load %arg7[%c1_298, %857, %c1_299] : memref<4x18x18xf32, #tpu.memory_space<vmem>>, vector<1x8x16xf32>
      %859 = vector.shape_cast %858 : vector<1x8x16xf32> to vector<8x16xf32>
      %c9_i32_300 = arith.constant 9 : i32
      %860 = arith.addi %4, %c9_i32_300 : i32
      %c1_i32_301 = arith.constant 1 : i32
      %861 = arith.addi %860, %c1_i32_301 : i32
      %862 = arith.index_cast %861 : i32 to index
      %863 = memref.load %arg2[%862] : memref<288xf32, #tpu.memory_space<smem>>
      %864 = vector.broadcast %863 : f32 to vector<8x16xf32>
      %865 = arith.mulf %864, %859 : vector<8x16xf32>
      %866 = arith.addf %806, %865 : vector<8x16xf32>
      %c45_i32_302 = arith.constant 45 : i32
      %867 = arith.addi %4, %c45_i32_302 : i32
      %c1_i32_303 = arith.constant 1 : i32
      %868 = arith.addi %867, %c1_i32_303 : i32
      %869 = arith.index_cast %868 : i32 to index
      %870 = memref.load %arg2[%869] : memref<288xf32, #tpu.memory_space<smem>>
      %871 = vector.broadcast %870 : f32 to vector<8x16xf32>
      %872 = arith.mulf %871, %859 : vector<8x16xf32>
      %873 = arith.addf %813, %872 : vector<8x16xf32>
      %c81_i32_304 = arith.constant 81 : i32
      %874 = arith.addi %4, %c81_i32_304 : i32
      %c1_i32_305 = arith.constant 1 : i32
      %875 = arith.addi %874, %c1_i32_305 : i32
      %876 = arith.index_cast %875 : i32 to index
      %877 = memref.load %arg2[%876] : memref<288xf32, #tpu.memory_space<smem>>
      %878 = vector.broadcast %877 : f32 to vector<8x16xf32>
      %879 = arith.mulf %878, %859 : vector<8x16xf32>
      %880 = arith.addf %820, %879 : vector<8x16xf32>
      %c117_i32_306 = arith.constant 117 : i32
      %881 = arith.addi %4, %c117_i32_306 : i32
      %c1_i32_307 = arith.constant 1 : i32
      %882 = arith.addi %881, %c1_i32_307 : i32
      %883 = arith.index_cast %882 : i32 to index
      %884 = memref.load %arg2[%883] : memref<288xf32, #tpu.memory_space<smem>>
      %885 = vector.broadcast %884 : f32 to vector<8x16xf32>
      %886 = arith.mulf %885, %859 : vector<8x16xf32>
      %887 = arith.addf %827, %886 : vector<8x16xf32>
      %c153_i32_308 = arith.constant 153 : i32
      %888 = arith.addi %4, %c153_i32_308 : i32
      %c1_i32_309 = arith.constant 1 : i32
      %889 = arith.addi %888, %c1_i32_309 : i32
      %890 = arith.index_cast %889 : i32 to index
      %891 = memref.load %arg2[%890] : memref<288xf32, #tpu.memory_space<smem>>
      %892 = vector.broadcast %891 : f32 to vector<8x16xf32>
      %893 = arith.mulf %892, %859 : vector<8x16xf32>
      %894 = arith.addf %834, %893 : vector<8x16xf32>
      %c189_i32_310 = arith.constant 189 : i32
      %895 = arith.addi %4, %c189_i32_310 : i32
      %c1_i32_311 = arith.constant 1 : i32
      %896 = arith.addi %895, %c1_i32_311 : i32
      %897 = arith.index_cast %896 : i32 to index
      %898 = memref.load %arg2[%897] : memref<288xf32, #tpu.memory_space<smem>>
      %899 = vector.broadcast %898 : f32 to vector<8x16xf32>
      %900 = arith.mulf %899, %859 : vector<8x16xf32>
      %901 = arith.addf %841, %900 : vector<8x16xf32>
      %c225_i32_312 = arith.constant 225 : i32
      %902 = arith.addi %4, %c225_i32_312 : i32
      %c1_i32_313 = arith.constant 1 : i32
      %903 = arith.addi %902, %c1_i32_313 : i32
      %904 = arith.index_cast %903 : i32 to index
      %905 = memref.load %arg2[%904] : memref<288xf32, #tpu.memory_space<smem>>
      %906 = vector.broadcast %905 : f32 to vector<8x16xf32>
      %907 = arith.mulf %906, %859 : vector<8x16xf32>
      %908 = arith.addf %848, %907 : vector<8x16xf32>
      %c261_i32_314 = arith.constant 261 : i32
      %909 = arith.addi %4, %c261_i32_314 : i32
      %c1_i32_315 = arith.constant 1 : i32
      %910 = arith.addi %909, %c1_i32_315 : i32
      %911 = arith.index_cast %910 : i32 to index
      %912 = memref.load %arg2[%911] : memref<288xf32, #tpu.memory_space<smem>>
      %913 = vector.broadcast %912 : f32 to vector<8x16xf32>
      %914 = arith.mulf %913, %859 : vector<8x16xf32>
      %915 = arith.addf %855, %914 : vector<8x16xf32>
      %c0_i32_316 = arith.constant 0 : i32
      %916 = arith.addi %247, %c0_i32_316 : i32
      %c1_317 = arith.constant 1 : index
      %917 = arith.index_cast %916 : i32 to index
      %c2_318 = arith.constant 2 : index
      %918 = vector.load %arg7[%c1_317, %917, %c2_318] : memref<4x18x18xf32, #tpu.memory_space<vmem>>, vector<1x8x16xf32>
      %919 = vector.shape_cast %918 : vector<1x8x16xf32> to vector<8x16xf32>
      %c9_i32_319 = arith.constant 9 : i32
      %920 = arith.addi %4, %c9_i32_319 : i32
      %c2_i32_320 = arith.constant 2 : i32
      %921 = arith.addi %920, %c2_i32_320 : i32
      %922 = arith.index_cast %921 : i32 to index
      %923 = memref.load %arg2[%922] : memref<288xf32, #tpu.memory_space<smem>>
      %924 = vector.broadcast %923 : f32 to vector<8x16xf32>
      %925 = arith.mulf %924, %919 : vector<8x16xf32>
      %926 = arith.addf %866, %925 : vector<8x16xf32>
      %c45_i32_321 = arith.constant 45 : i32
      %927 = arith.addi %4, %c45_i32_321 : i32
      %c2_i32_322 = arith.constant 2 : i32
      %928 = arith.addi %927, %c2_i32_322 : i32
      %929 = arith.index_cast %928 : i32 to index
      %930 = memref.load %arg2[%929] : memref<288xf32, #tpu.memory_space<smem>>
      %931 = vector.broadcast %930 : f32 to vector<8x16xf32>
      %932 = arith.mulf %931, %919 : vector<8x16xf32>
      %933 = arith.addf %873, %932 : vector<8x16xf32>
      %c81_i32_323 = arith.constant 81 : i32
      %934 = arith.addi %4, %c81_i32_323 : i32
      %c2_i32_324 = arith.constant 2 : i32
      %935 = arith.addi %934, %c2_i32_324 : i32
      %936 = arith.index_cast %935 : i32 to index
      %937 = memref.load %arg2[%936] : memref<288xf32, #tpu.memory_space<smem>>
      %938 = vector.broadcast %937 : f32 to vector<8x16xf32>
      %939 = arith.mulf %938, %919 : vector<8x16xf32>
      %940 = arith.addf %880, %939 : vector<8x16xf32>
      %c117_i32_325 = arith.constant 117 : i32
      %941 = arith.addi %4, %c117_i32_325 : i32
      %c2_i32_326 = arith.constant 2 : i32
      %942 = arith.addi %941, %c2_i32_326 : i32
      %943 = arith.index_cast %942 : i32 to index
      %944 = memref.load %arg2[%943] : memref<288xf32, #tpu.memory_space<smem>>
      %945 = vector.broadcast %944 : f32 to vector<8x16xf32>
      %946 = arith.mulf %945, %919 : vector<8x16xf32>
      %947 = arith.addf %887, %946 : vector<8x16xf32>
      %c153_i32_327 = arith.constant 153 : i32
      %948 = arith.addi %4, %c153_i32_327 : i32
      %c2_i32_328 = arith.constant 2 : i32
      %949 = arith.addi %948, %c2_i32_328 : i32
      %950 = arith.index_cast %949 : i32 to index
      %951 = memref.load %arg2[%950] : memref<288xf32, #tpu.memory_space<smem>>
      %952 = vector.broadcast %951 : f32 to vector<8x16xf32>
      %953 = arith.mulf %952, %919 : vector<8x16xf32>
      %954 = arith.addf %894, %953 : vector<8x16xf32>
      %c189_i32_329 = arith.constant 189 : i32
      %955 = arith.addi %4, %c189_i32_329 : i32
      %c2_i32_330 = arith.constant 2 : i32
      %956 = arith.addi %955, %c2_i32_330 : i32
      %957 = arith.index_cast %956 : i32 to index
      %958 = memref.load %arg2[%957] : memref<288xf32, #tpu.memory_space<smem>>
      %959 = vector.broadcast %958 : f32 to vector<8x16xf32>
      %960 = arith.mulf %959, %919 : vector<8x16xf32>
      %961 = arith.addf %901, %960 : vector<8x16xf32>
      %c225_i32_331 = arith.constant 225 : i32
      %962 = arith.addi %4, %c225_i32_331 : i32
      %c2_i32_332 = arith.constant 2 : i32
      %963 = arith.addi %962, %c2_i32_332 : i32
      %964 = arith.index_cast %963 : i32 to index
      %965 = memref.load %arg2[%964] : memref<288xf32, #tpu.memory_space<smem>>
      %966 = vector.broadcast %965 : f32 to vector<8x16xf32>
      %967 = arith.mulf %966, %919 : vector<8x16xf32>
      %968 = arith.addf %908, %967 : vector<8x16xf32>
      %c261_i32_333 = arith.constant 261 : i32
      %969 = arith.addi %4, %c261_i32_333 : i32
      %c2_i32_334 = arith.constant 2 : i32
      %970 = arith.addi %969, %c2_i32_334 : i32
      %971 = arith.index_cast %970 : i32 to index
      %972 = memref.load %arg2[%971] : memref<288xf32, #tpu.memory_space<smem>>
      %973 = vector.broadcast %972 : f32 to vector<8x16xf32>
      %974 = arith.mulf %973, %919 : vector<8x16xf32>
      %975 = arith.addf %915, %974 : vector<8x16xf32>
      %c1_i32_335 = arith.constant 1 : i32
      %976 = arith.addi %247, %c1_i32_335 : i32
      %c1_336 = arith.constant 1 : index
      %977 = arith.index_cast %976 : i32 to index
      %c0_337 = arith.constant 0 : index
      %978 = vector.load %arg7[%c1_336, %977, %c0_337] : memref<4x18x18xf32, #tpu.memory_space<vmem>>, vector<1x8x16xf32>
      %979 = vector.shape_cast %978 : vector<1x8x16xf32> to vector<8x16xf32>
      %c12_i32 = arith.constant 12 : i32
      %980 = arith.addi %4, %c12_i32 : i32
      %c0_i32_338 = arith.constant 0 : i32
      %981 = arith.addi %980, %c0_i32_338 : i32
      %982 = arith.index_cast %981 : i32 to index
      %983 = memref.load %arg2[%982] : memref<288xf32, #tpu.memory_space<smem>>
      %984 = vector.broadcast %983 : f32 to vector<8x16xf32>
      %985 = arith.mulf %984, %979 : vector<8x16xf32>
      %986 = arith.addf %926, %985 : vector<8x16xf32>
      %c48_i32 = arith.constant 48 : i32
      %987 = arith.addi %4, %c48_i32 : i32
      %c0_i32_339 = arith.constant 0 : i32
      %988 = arith.addi %987, %c0_i32_339 : i32
      %989 = arith.index_cast %988 : i32 to index
      %990 = memref.load %arg2[%989] : memref<288xf32, #tpu.memory_space<smem>>
      %991 = vector.broadcast %990 : f32 to vector<8x16xf32>
      %992 = arith.mulf %991, %979 : vector<8x16xf32>
      %993 = arith.addf %933, %992 : vector<8x16xf32>
      %c84_i32 = arith.constant 84 : i32
      %994 = arith.addi %4, %c84_i32 : i32
      %c0_i32_340 = arith.constant 0 : i32
      %995 = arith.addi %994, %c0_i32_340 : i32
      %996 = arith.index_cast %995 : i32 to index
      %997 = memref.load %arg2[%996] : memref<288xf32, #tpu.memory_space<smem>>
      %998 = vector.broadcast %997 : f32 to vector<8x16xf32>
      %999 = arith.mulf %998, %979 : vector<8x16xf32>
      %1000 = arith.addf %940, %999 : vector<8x16xf32>
      %c120_i32 = arith.constant 120 : i32
      %1001 = arith.addi %4, %c120_i32 : i32
      %c0_i32_341 = arith.constant 0 : i32
      %1002 = arith.addi %1001, %c0_i32_341 : i32
      %1003 = arith.index_cast %1002 : i32 to index
      %1004 = memref.load %arg2[%1003] : memref<288xf32, #tpu.memory_space<smem>>
      %1005 = vector.broadcast %1004 : f32 to vector<8x16xf32>
      %1006 = arith.mulf %1005, %979 : vector<8x16xf32>
      %1007 = arith.addf %947, %1006 : vector<8x16xf32>
      %c156_i32 = arith.constant 156 : i32
      %1008 = arith.addi %4, %c156_i32 : i32
      %c0_i32_342 = arith.constant 0 : i32
      %1009 = arith.addi %1008, %c0_i32_342 : i32
      %1010 = arith.index_cast %1009 : i32 to index
      %1011 = memref.load %arg2[%1010] : memref<288xf32, #tpu.memory_space<smem>>
      %1012 = vector.broadcast %1011 : f32 to vector<8x16xf32>
      %1013 = arith.mulf %1012, %979 : vector<8x16xf32>
      %1014 = arith.addf %954, %1013 : vector<8x16xf32>
      %c192_i32 = arith.constant 192 : i32
      %1015 = arith.addi %4, %c192_i32 : i32
      %c0_i32_343 = arith.constant 0 : i32
      %1016 = arith.addi %1015, %c0_i32_343 : i32
      %1017 = arith.index_cast %1016 : i32 to index
      %1018 = memref.load %arg2[%1017] : memref<288xf32, #tpu.memory_space<smem>>
      %1019 = vector.broadcast %1018 : f32 to vector<8x16xf32>
      %1020 = arith.mulf %1019, %979 : vector<8x16xf32>
      %1021 = arith.addf %961, %1020 : vector<8x16xf32>
      %c228_i32 = arith.constant 228 : i32
      %1022 = arith.addi %4, %c228_i32 : i32
      %c0_i32_344 = arith.constant 0 : i32
      %1023 = arith.addi %1022, %c0_i32_344 : i32
      %1024 = arith.index_cast %1023 : i32 to index
      %1025 = memref.load %arg2[%1024] : memref<288xf32, #tpu.memory_space<smem>>
      %1026 = vector.broadcast %1025 : f32 to vector<8x16xf32>
      %1027 = arith.mulf %1026, %979 : vector<8x16xf32>
      %1028 = arith.addf %968, %1027 : vector<8x16xf32>
      %c264_i32 = arith.constant 264 : i32
      %1029 = arith.addi %4, %c264_i32 : i32
      %c0_i32_345 = arith.constant 0 : i32
      %1030 = arith.addi %1029, %c0_i32_345 : i32
      %1031 = arith.index_cast %1030 : i32 to index
      %1032 = memref.load %arg2[%1031] : memref<288xf32, #tpu.memory_space<smem>>
      %1033 = vector.broadcast %1032 : f32 to vector<8x16xf32>
      %1034 = arith.mulf %1033, %979 : vector<8x16xf32>
      %1035 = arith.addf %975, %1034 : vector<8x16xf32>
      %c1_i32_346 = arith.constant 1 : i32
      %1036 = arith.addi %247, %c1_i32_346 : i32
      %c1_347 = arith.constant 1 : index
      %1037 = arith.index_cast %1036 : i32 to index
      %c1_348 = arith.constant 1 : index
      %1038 = vector.load %arg7[%c1_347, %1037, %c1_348] : memref<4x18x18xf32, #tpu.memory_space<vmem>>, vector<1x8x16xf32>
      %1039 = vector.shape_cast %1038 : vector<1x8x16xf32> to vector<8x16xf32>
      %c12_i32_349 = arith.constant 12 : i32
      %1040 = arith.addi %4, %c12_i32_349 : i32
      %c1_i32_350 = arith.constant 1 : i32
      %1041 = arith.addi %1040, %c1_i32_350 : i32
      %1042 = arith.index_cast %1041 : i32 to index
      %1043 = memref.load %arg2[%1042] : memref<288xf32, #tpu.memory_space<smem>>
      %1044 = vector.broadcast %1043 : f32 to vector<8x16xf32>
      %1045 = arith.mulf %1044, %1039 : vector<8x16xf32>
      %1046 = arith.addf %986, %1045 : vector<8x16xf32>
      %c48_i32_351 = arith.constant 48 : i32
      %1047 = arith.addi %4, %c48_i32_351 : i32
      %c1_i32_352 = arith.constant 1 : i32
      %1048 = arith.addi %1047, %c1_i32_352 : i32
      %1049 = arith.index_cast %1048 : i32 to index
      %1050 = memref.load %arg2[%1049] : memref<288xf32, #tpu.memory_space<smem>>
      %1051 = vector.broadcast %1050 : f32 to vector<8x16xf32>
      %1052 = arith.mulf %1051, %1039 : vector<8x16xf32>
      %1053 = arith.addf %993, %1052 : vector<8x16xf32>
      %c84_i32_353 = arith.constant 84 : i32
      %1054 = arith.addi %4, %c84_i32_353 : i32
      %c1_i32_354 = arith.constant 1 : i32
      %1055 = arith.addi %1054, %c1_i32_354 : i32
      %1056 = arith.index_cast %1055 : i32 to index
      %1057 = memref.load %arg2[%1056] : memref<288xf32, #tpu.memory_space<smem>>
      %1058 = vector.broadcast %1057 : f32 to vector<8x16xf32>
      %1059 = arith.mulf %1058, %1039 : vector<8x16xf32>
      %1060 = arith.addf %1000, %1059 : vector<8x16xf32>
      %c120_i32_355 = arith.constant 120 : i32
      %1061 = arith.addi %4, %c120_i32_355 : i32
      %c1_i32_356 = arith.constant 1 : i32
      %1062 = arith.addi %1061, %c1_i32_356 : i32
      %1063 = arith.index_cast %1062 : i32 to index
      %1064 = memref.load %arg2[%1063] : memref<288xf32, #tpu.memory_space<smem>>
      %1065 = vector.broadcast %1064 : f32 to vector<8x16xf32>
      %1066 = arith.mulf %1065, %1039 : vector<8x16xf32>
      %1067 = arith.addf %1007, %1066 : vector<8x16xf32>
      %c156_i32_357 = arith.constant 156 : i32
      %1068 = arith.addi %4, %c156_i32_357 : i32
      %c1_i32_358 = arith.constant 1 : i32
      %1069 = arith.addi %1068, %c1_i32_358 : i32
      %1070 = arith.index_cast %1069 : i32 to index
      %1071 = memref.load %arg2[%1070] : memref<288xf32, #tpu.memory_space<smem>>
      %1072 = vector.broadcast %1071 : f32 to vector<8x16xf32>
      %1073 = arith.mulf %1072, %1039 : vector<8x16xf32>
      %1074 = arith.addf %1014, %1073 : vector<8x16xf32>
      %c192_i32_359 = arith.constant 192 : i32
      %1075 = arith.addi %4, %c192_i32_359 : i32
      %c1_i32_360 = arith.constant 1 : i32
      %1076 = arith.addi %1075, %c1_i32_360 : i32
      %1077 = arith.index_cast %1076 : i32 to index
      %1078 = memref.load %arg2[%1077] : memref<288xf32, #tpu.memory_space<smem>>
      %1079 = vector.broadcast %1078 : f32 to vector<8x16xf32>
      %1080 = arith.mulf %1079, %1039 : vector<8x16xf32>
      %1081 = arith.addf %1021, %1080 : vector<8x16xf32>
      %c228_i32_361 = arith.constant 228 : i32
      %1082 = arith.addi %4, %c228_i32_361 : i32
      %c1_i32_362 = arith.constant 1 : i32
      %1083 = arith.addi %1082, %c1_i32_362 : i32
      %1084 = arith.index_cast %1083 : i32 to index
      %1085 = memref.load %arg2[%1084] : memref<288xf32, #tpu.memory_space<smem>>
      %1086 = vector.broadcast %1085 : f32 to vector<8x16xf32>
      %1087 = arith.mulf %1086, %1039 : vector<8x16xf32>
      %1088 = arith.addf %1028, %1087 : vector<8x16xf32>
      %c264_i32_363 = arith.constant 264 : i32
      %1089 = arith.addi %4, %c264_i32_363 : i32
      %c1_i32_364 = arith.constant 1 : i32
      %1090 = arith.addi %1089, %c1_i32_364 : i32
      %1091 = arith.index_cast %1090 : i32 to index
      %1092 = memref.load %arg2[%1091] : memref<288xf32, #tpu.memory_space<smem>>
      %1093 = vector.broadcast %1092 : f32 to vector<8x16xf32>
      %1094 = arith.mulf %1093, %1039 : vector<8x16xf32>
      %1095 = arith.addf %1035, %1094 : vector<8x16xf32>
      %c1_i32_365 = arith.constant 1 : i32
      %1096 = arith.addi %247, %c1_i32_365 : i32
      %c1_366 = arith.constant 1 : index
      %1097 = arith.index_cast %1096 : i32 to index
      %c2_367 = arith.constant 2 : index
      %1098 = vector.load %arg7[%c1_366, %1097, %c2_367] : memref<4x18x18xf32, #tpu.memory_space<vmem>>, vector<1x8x16xf32>
      %1099 = vector.shape_cast %1098 : vector<1x8x16xf32> to vector<8x16xf32>
      %c12_i32_368 = arith.constant 12 : i32
      %1100 = arith.addi %4, %c12_i32_368 : i32
      %c2_i32_369 = arith.constant 2 : i32
      %1101 = arith.addi %1100, %c2_i32_369 : i32
      %1102 = arith.index_cast %1101 : i32 to index
      %1103 = memref.load %arg2[%1102] : memref<288xf32, #tpu.memory_space<smem>>
      %1104 = vector.broadcast %1103 : f32 to vector<8x16xf32>
      %1105 = arith.mulf %1104, %1099 : vector<8x16xf32>
      %1106 = arith.addf %1046, %1105 : vector<8x16xf32>
      %c48_i32_370 = arith.constant 48 : i32
      %1107 = arith.addi %4, %c48_i32_370 : i32
      %c2_i32_371 = arith.constant 2 : i32
      %1108 = arith.addi %1107, %c2_i32_371 : i32
      %1109 = arith.index_cast %1108 : i32 to index
      %1110 = memref.load %arg2[%1109] : memref<288xf32, #tpu.memory_space<smem>>
      %1111 = vector.broadcast %1110 : f32 to vector<8x16xf32>
      %1112 = arith.mulf %1111, %1099 : vector<8x16xf32>
      %1113 = arith.addf %1053, %1112 : vector<8x16xf32>
      %c84_i32_372 = arith.constant 84 : i32
      %1114 = arith.addi %4, %c84_i32_372 : i32
      %c2_i32_373 = arith.constant 2 : i32
      %1115 = arith.addi %1114, %c2_i32_373 : i32
      %1116 = arith.index_cast %1115 : i32 to index
      %1117 = memref.load %arg2[%1116] : memref<288xf32, #tpu.memory_space<smem>>
      %1118 = vector.broadcast %1117 : f32 to vector<8x16xf32>
      %1119 = arith.mulf %1118, %1099 : vector<8x16xf32>
      %1120 = arith.addf %1060, %1119 : vector<8x16xf32>
      %c120_i32_374 = arith.constant 120 : i32
      %1121 = arith.addi %4, %c120_i32_374 : i32
      %c2_i32_375 = arith.constant 2 : i32
      %1122 = arith.addi %1121, %c2_i32_375 : i32
      %1123 = arith.index_cast %1122 : i32 to index
      %1124 = memref.load %arg2[%1123] : memref<288xf32, #tpu.memory_space<smem>>
      %1125 = vector.broadcast %1124 : f32 to vector<8x16xf32>
      %1126 = arith.mulf %1125, %1099 : vector<8x16xf32>
      %1127 = arith.addf %1067, %1126 : vector<8x16xf32>
      %c156_i32_376 = arith.constant 156 : i32
      %1128 = arith.addi %4, %c156_i32_376 : i32
      %c2_i32_377 = arith.constant 2 : i32
      %1129 = arith.addi %1128, %c2_i32_377 : i32
      %1130 = arith.index_cast %1129 : i32 to index
      %1131 = memref.load %arg2[%1130] : memref<288xf32, #tpu.memory_space<smem>>
      %1132 = vector.broadcast %1131 : f32 to vector<8x16xf32>
      %1133 = arith.mulf %1132, %1099 : vector<8x16xf32>
      %1134 = arith.addf %1074, %1133 : vector<8x16xf32>
      %c192_i32_378 = arith.constant 192 : i32
      %1135 = arith.addi %4, %c192_i32_378 : i32
      %c2_i32_379 = arith.constant 2 : i32
      %1136 = arith.addi %1135, %c2_i32_379 : i32
      %1137 = arith.index_cast %1136 : i32 to index
      %1138 = memref.load %arg2[%1137] : memref<288xf32, #tpu.memory_space<smem>>
      %1139 = vector.broadcast %1138 : f32 to vector<8x16xf32>
      %1140 = arith.mulf %1139, %1099 : vector<8x16xf32>
      %1141 = arith.addf %1081, %1140 : vector<8x16xf32>
      %c228_i32_380 = arith.constant 228 : i32
      %1142 = arith.addi %4, %c228_i32_380 : i32
      %c2_i32_381 = arith.constant 2 : i32
      %1143 = arith.addi %1142, %c2_i32_381 : i32
      %1144 = arith.index_cast %1143 : i32 to index
      %1145 = memref.load %arg2[%1144] : memref<288xf32, #tpu.memory_space<smem>>
      %1146 = vector.broadcast %1145 : f32 to vector<8x16xf32>
      %1147 = arith.mulf %1146, %1099 : vector<8x16xf32>
      %1148 = arith.addf %1088, %1147 : vector<8x16xf32>
      %c264_i32_382 = arith.constant 264 : i32
      %1149 = arith.addi %4, %c264_i32_382 : i32
      %c2_i32_383 = arith.constant 2 : i32
      %1150 = arith.addi %1149, %c2_i32_383 : i32
      %1151 = arith.index_cast %1150 : i32 to index
      %1152 = memref.load %arg2[%1151] : memref<288xf32, #tpu.memory_space<smem>>
      %1153 = vector.broadcast %1152 : f32 to vector<8x16xf32>
      %1154 = arith.mulf %1153, %1099 : vector<8x16xf32>
      %1155 = arith.addf %1095, %1154 : vector<8x16xf32>
      %c2_i32_384 = arith.constant 2 : i32
      %1156 = arith.addi %247, %c2_i32_384 : i32
      %c1_385 = arith.constant 1 : index
      %1157 = arith.index_cast %1156 : i32 to index
      %c0_386 = arith.constant 0 : index
      %1158 = vector.load %arg7[%c1_385, %1157, %c0_386] : memref<4x18x18xf32, #tpu.memory_space<vmem>>, vector<1x8x16xf32>
      %1159 = vector.shape_cast %1158 : vector<1x8x16xf32> to vector<8x16xf32>
      %c15_i32 = arith.constant 15 : i32
      %1160 = arith.addi %4, %c15_i32 : i32
      %c0_i32_387 = arith.constant 0 : i32
      %1161 = arith.addi %1160, %c0_i32_387 : i32
      %1162 = arith.index_cast %1161 : i32 to index
      %1163 = memref.load %arg2[%1162] : memref<288xf32, #tpu.memory_space<smem>>
      %1164 = vector.broadcast %1163 : f32 to vector<8x16xf32>
      %1165 = arith.mulf %1164, %1159 : vector<8x16xf32>
      %1166 = arith.addf %1106, %1165 : vector<8x16xf32>
      %c51_i32 = arith.constant 51 : i32
      %1167 = arith.addi %4, %c51_i32 : i32
      %c0_i32_388 = arith.constant 0 : i32
      %1168 = arith.addi %1167, %c0_i32_388 : i32
      %1169 = arith.index_cast %1168 : i32 to index
      %1170 = memref.load %arg2[%1169] : memref<288xf32, #tpu.memory_space<smem>>
      %1171 = vector.broadcast %1170 : f32 to vector<8x16xf32>
      %1172 = arith.mulf %1171, %1159 : vector<8x16xf32>
      %1173 = arith.addf %1113, %1172 : vector<8x16xf32>
      %c87_i32 = arith.constant 87 : i32
      %1174 = arith.addi %4, %c87_i32 : i32
      %c0_i32_389 = arith.constant 0 : i32
      %1175 = arith.addi %1174, %c0_i32_389 : i32
      %1176 = arith.index_cast %1175 : i32 to index
      %1177 = memref.load %arg2[%1176] : memref<288xf32, #tpu.memory_space<smem>>
      %1178 = vector.broadcast %1177 : f32 to vector<8x16xf32>
      %1179 = arith.mulf %1178, %1159 : vector<8x16xf32>
      %1180 = arith.addf %1120, %1179 : vector<8x16xf32>
      %c123_i32 = arith.constant 123 : i32
      %1181 = arith.addi %4, %c123_i32 : i32
      %c0_i32_390 = arith.constant 0 : i32
      %1182 = arith.addi %1181, %c0_i32_390 : i32
      %1183 = arith.index_cast %1182 : i32 to index
      %1184 = memref.load %arg2[%1183] : memref<288xf32, #tpu.memory_space<smem>>
      %1185 = vector.broadcast %1184 : f32 to vector<8x16xf32>
      %1186 = arith.mulf %1185, %1159 : vector<8x16xf32>
      %1187 = arith.addf %1127, %1186 : vector<8x16xf32>
      %c159_i32 = arith.constant 159 : i32
      %1188 = arith.addi %4, %c159_i32 : i32
      %c0_i32_391 = arith.constant 0 : i32
      %1189 = arith.addi %1188, %c0_i32_391 : i32
      %1190 = arith.index_cast %1189 : i32 to index
      %1191 = memref.load %arg2[%1190] : memref<288xf32, #tpu.memory_space<smem>>
      %1192 = vector.broadcast %1191 : f32 to vector<8x16xf32>
      %1193 = arith.mulf %1192, %1159 : vector<8x16xf32>
      %1194 = arith.addf %1134, %1193 : vector<8x16xf32>
      %c195_i32 = arith.constant 195 : i32
      %1195 = arith.addi %4, %c195_i32 : i32
      %c0_i32_392 = arith.constant 0 : i32
      %1196 = arith.addi %1195, %c0_i32_392 : i32
      %1197 = arith.index_cast %1196 : i32 to index
      %1198 = memref.load %arg2[%1197] : memref<288xf32, #tpu.memory_space<smem>>
      %1199 = vector.broadcast %1198 : f32 to vector<8x16xf32>
      %1200 = arith.mulf %1199, %1159 : vector<8x16xf32>
      %1201 = arith.addf %1141, %1200 : vector<8x16xf32>
      %c231_i32 = arith.constant 231 : i32
      %1202 = arith.addi %4, %c231_i32 : i32
      %c0_i32_393 = arith.constant 0 : i32
      %1203 = arith.addi %1202, %c0_i32_393 : i32
      %1204 = arith.index_cast %1203 : i32 to index
      %1205 = memref.load %arg2[%1204] : memref<288xf32, #tpu.memory_space<smem>>
      %1206 = vector.broadcast %1205 : f32 to vector<8x16xf32>
      %1207 = arith.mulf %1206, %1159 : vector<8x16xf32>
      %1208 = arith.addf %1148, %1207 : vector<8x16xf32>
      %c267_i32 = arith.constant 267 : i32
      %1209 = arith.addi %4, %c267_i32 : i32
      %c0_i32_394 = arith.constant 0 : i32
      %1210 = arith.addi %1209, %c0_i32_394 : i32
      %1211 = arith.index_cast %1210 : i32 to index
      %1212 = memref.load %arg2[%1211] : memref<288xf32, #tpu.memory_space<smem>>
      %1213 = vector.broadcast %1212 : f32 to vector<8x16xf32>
      %1214 = arith.mulf %1213, %1159 : vector<8x16xf32>
      %1215 = arith.addf %1155, %1214 : vector<8x16xf32>
      %c2_i32_395 = arith.constant 2 : i32
      %1216 = arith.addi %247, %c2_i32_395 : i32
      %c1_396 = arith.constant 1 : index
      %1217 = arith.index_cast %1216 : i32 to index
      %c1_397 = arith.constant 1 : index
      %1218 = vector.load %arg7[%c1_396, %1217, %c1_397] : memref<4x18x18xf32, #tpu.memory_space<vmem>>, vector<1x8x16xf32>
      %1219 = vector.shape_cast %1218 : vector<1x8x16xf32> to vector<8x16xf32>
      %c15_i32_398 = arith.constant 15 : i32
      %1220 = arith.addi %4, %c15_i32_398 : i32
      %c1_i32_399 = arith.constant 1 : i32
      %1221 = arith.addi %1220, %c1_i32_399 : i32
      %1222 = arith.index_cast %1221 : i32 to index
      %1223 = memref.load %arg2[%1222] : memref<288xf32, #tpu.memory_space<smem>>
      %1224 = vector.broadcast %1223 : f32 to vector<8x16xf32>
      %1225 = arith.mulf %1224, %1219 : vector<8x16xf32>
      %1226 = arith.addf %1166, %1225 : vector<8x16xf32>
      %c51_i32_400 = arith.constant 51 : i32
      %1227 = arith.addi %4, %c51_i32_400 : i32
      %c1_i32_401 = arith.constant 1 : i32
      %1228 = arith.addi %1227, %c1_i32_401 : i32
      %1229 = arith.index_cast %1228 : i32 to index
      %1230 = memref.load %arg2[%1229] : memref<288xf32, #tpu.memory_space<smem>>
      %1231 = vector.broadcast %1230 : f32 to vector<8x16xf32>
      %1232 = arith.mulf %1231, %1219 : vector<8x16xf32>
      %1233 = arith.addf %1173, %1232 : vector<8x16xf32>
      %c87_i32_402 = arith.constant 87 : i32
      %1234 = arith.addi %4, %c87_i32_402 : i32
      %c1_i32_403 = arith.constant 1 : i32
      %1235 = arith.addi %1234, %c1_i32_403 : i32
      %1236 = arith.index_cast %1235 : i32 to index
      %1237 = memref.load %arg2[%1236] : memref<288xf32, #tpu.memory_space<smem>>
      %1238 = vector.broadcast %1237 : f32 to vector<8x16xf32>
      %1239 = arith.mulf %1238, %1219 : vector<8x16xf32>
      %1240 = arith.addf %1180, %1239 : vector<8x16xf32>
      %c123_i32_404 = arith.constant 123 : i32
      %1241 = arith.addi %4, %c123_i32_404 : i32
      %c1_i32_405 = arith.constant 1 : i32
      %1242 = arith.addi %1241, %c1_i32_405 : i32
      %1243 = arith.index_cast %1242 : i32 to index
      %1244 = memref.load %arg2[%1243] : memref<288xf32, #tpu.memory_space<smem>>
      %1245 = vector.broadcast %1244 : f32 to vector<8x16xf32>
      %1246 = arith.mulf %1245, %1219 : vector<8x16xf32>
      %1247 = arith.addf %1187, %1246 : vector<8x16xf32>
      %c159_i32_406 = arith.constant 159 : i32
      %1248 = arith.addi %4, %c159_i32_406 : i32
      %c1_i32_407 = arith.constant 1 : i32
      %1249 = arith.addi %1248, %c1_i32_407 : i32
      %1250 = arith.index_cast %1249 : i32 to index
      %1251 = memref.load %arg2[%1250] : memref<288xf32, #tpu.memory_space<smem>>
      %1252 = vector.broadcast %1251 : f32 to vector<8x16xf32>
      %1253 = arith.mulf %1252, %1219 : vector<8x16xf32>
      %1254 = arith.addf %1194, %1253 : vector<8x16xf32>
      %c195_i32_408 = arith.constant 195 : i32
      %1255 = arith.addi %4, %c195_i32_408 : i32
      %c1_i32_409 = arith.constant 1 : i32
      %1256 = arith.addi %1255, %c1_i32_409 : i32
      %1257 = arith.index_cast %1256 : i32 to index
      %1258 = memref.load %arg2[%1257] : memref<288xf32, #tpu.memory_space<smem>>
      %1259 = vector.broadcast %1258 : f32 to vector<8x16xf32>
      %1260 = arith.mulf %1259, %1219 : vector<8x16xf32>
      %1261 = arith.addf %1201, %1260 : vector<8x16xf32>
      %c231_i32_410 = arith.constant 231 : i32
      %1262 = arith.addi %4, %c231_i32_410 : i32
      %c1_i32_411 = arith.constant 1 : i32
      %1263 = arith.addi %1262, %c1_i32_411 : i32
      %1264 = arith.index_cast %1263 : i32 to index
      %1265 = memref.load %arg2[%1264] : memref<288xf32, #tpu.memory_space<smem>>
      %1266 = vector.broadcast %1265 : f32 to vector<8x16xf32>
      %1267 = arith.mulf %1266, %1219 : vector<8x16xf32>
      %1268 = arith.addf %1208, %1267 : vector<8x16xf32>
      %c267_i32_412 = arith.constant 267 : i32
      %1269 = arith.addi %4, %c267_i32_412 : i32
      %c1_i32_413 = arith.constant 1 : i32
      %1270 = arith.addi %1269, %c1_i32_413 : i32
      %1271 = arith.index_cast %1270 : i32 to index
      %1272 = memref.load %arg2[%1271] : memref<288xf32, #tpu.memory_space<smem>>
      %1273 = vector.broadcast %1272 : f32 to vector<8x16xf32>
      %1274 = arith.mulf %1273, %1219 : vector<8x16xf32>
      %1275 = arith.addf %1215, %1274 : vector<8x16xf32>
      %c2_i32_414 = arith.constant 2 : i32
      %1276 = arith.addi %247, %c2_i32_414 : i32
      %c1_415 = arith.constant 1 : index
      %1277 = arith.index_cast %1276 : i32 to index
      %c2_416 = arith.constant 2 : index
      %1278 = vector.load %arg7[%c1_415, %1277, %c2_416] : memref<4x18x18xf32, #tpu.memory_space<vmem>>, vector<1x8x16xf32>
      %1279 = vector.shape_cast %1278 : vector<1x8x16xf32> to vector<8x16xf32>
      %c15_i32_417 = arith.constant 15 : i32
      %1280 = arith.addi %4, %c15_i32_417 : i32
      %c2_i32_418 = arith.constant 2 : i32
      %1281 = arith.addi %1280, %c2_i32_418 : i32
      %1282 = arith.index_cast %1281 : i32 to index
      %1283 = memref.load %arg2[%1282] : memref<288xf32, #tpu.memory_space<smem>>
      %1284 = vector.broadcast %1283 : f32 to vector<8x16xf32>
      %1285 = arith.mulf %1284, %1279 : vector<8x16xf32>
      %1286 = arith.addf %1226, %1285 : vector<8x16xf32>
      %c51_i32_419 = arith.constant 51 : i32
      %1287 = arith.addi %4, %c51_i32_419 : i32
      %c2_i32_420 = arith.constant 2 : i32
      %1288 = arith.addi %1287, %c2_i32_420 : i32
      %1289 = arith.index_cast %1288 : i32 to index
      %1290 = memref.load %arg2[%1289] : memref<288xf32, #tpu.memory_space<smem>>
      %1291 = vector.broadcast %1290 : f32 to vector<8x16xf32>
      %1292 = arith.mulf %1291, %1279 : vector<8x16xf32>
      %1293 = arith.addf %1233, %1292 : vector<8x16xf32>
      %c87_i32_421 = arith.constant 87 : i32
      %1294 = arith.addi %4, %c87_i32_421 : i32
      %c2_i32_422 = arith.constant 2 : i32
      %1295 = arith.addi %1294, %c2_i32_422 : i32
      %1296 = arith.index_cast %1295 : i32 to index
      %1297 = memref.load %arg2[%1296] : memref<288xf32, #tpu.memory_space<smem>>
      %1298 = vector.broadcast %1297 : f32 to vector<8x16xf32>
      %1299 = arith.mulf %1298, %1279 : vector<8x16xf32>
      %1300 = arith.addf %1240, %1299 : vector<8x16xf32>
      %c123_i32_423 = arith.constant 123 : i32
      %1301 = arith.addi %4, %c123_i32_423 : i32
      %c2_i32_424 = arith.constant 2 : i32
      %1302 = arith.addi %1301, %c2_i32_424 : i32
      %1303 = arith.index_cast %1302 : i32 to index
      %1304 = memref.load %arg2[%1303] : memref<288xf32, #tpu.memory_space<smem>>
      %1305 = vector.broadcast %1304 : f32 to vector<8x16xf32>
      %1306 = arith.mulf %1305, %1279 : vector<8x16xf32>
      %1307 = arith.addf %1247, %1306 : vector<8x16xf32>
      %c159_i32_425 = arith.constant 159 : i32
      %1308 = arith.addi %4, %c159_i32_425 : i32
      %c2_i32_426 = arith.constant 2 : i32
      %1309 = arith.addi %1308, %c2_i32_426 : i32
      %1310 = arith.index_cast %1309 : i32 to index
      %1311 = memref.load %arg2[%1310] : memref<288xf32, #tpu.memory_space<smem>>
      %1312 = vector.broadcast %1311 : f32 to vector<8x16xf32>
      %1313 = arith.mulf %1312, %1279 : vector<8x16xf32>
      %1314 = arith.addf %1254, %1313 : vector<8x16xf32>
      %c195_i32_427 = arith.constant 195 : i32
      %1315 = arith.addi %4, %c195_i32_427 : i32
      %c2_i32_428 = arith.constant 2 : i32
      %1316 = arith.addi %1315, %c2_i32_428 : i32
      %1317 = arith.index_cast %1316 : i32 to index
      %1318 = memref.load %arg2[%1317] : memref<288xf32, #tpu.memory_space<smem>>
      %1319 = vector.broadcast %1318 : f32 to vector<8x16xf32>
      %1320 = arith.mulf %1319, %1279 : vector<8x16xf32>
      %1321 = arith.addf %1261, %1320 : vector<8x16xf32>
      %c231_i32_429 = arith.constant 231 : i32
      %1322 = arith.addi %4, %c231_i32_429 : i32
      %c2_i32_430 = arith.constant 2 : i32
      %1323 = arith.addi %1322, %c2_i32_430 : i32
      %1324 = arith.index_cast %1323 : i32 to index
      %1325 = memref.load %arg2[%1324] : memref<288xf32, #tpu.memory_space<smem>>
      %1326 = vector.broadcast %1325 : f32 to vector<8x16xf32>
      %1327 = arith.mulf %1326, %1279 : vector<8x16xf32>
      %1328 = arith.addf %1268, %1327 : vector<8x16xf32>
      %c267_i32_431 = arith.constant 267 : i32
      %1329 = arith.addi %4, %c267_i32_431 : i32
      %c2_i32_432 = arith.constant 2 : i32
      %1330 = arith.addi %1329, %c2_i32_432 : i32
      %1331 = arith.index_cast %1330 : i32 to index
      %1332 = memref.load %arg2[%1331] : memref<288xf32, #tpu.memory_space<smem>>
      %1333 = vector.broadcast %1332 : f32 to vector<8x16xf32>
      %1334 = arith.mulf %1333, %1279 : vector<8x16xf32>
      %1335 = arith.addf %1275, %1334 : vector<8x16xf32>
      %c0_i32_433 = arith.constant 0 : i32
      %1336 = arith.addi %247, %c0_i32_433 : i32
      %c2_434 = arith.constant 2 : index
      %1337 = arith.index_cast %1336 : i32 to index
      %c0_435 = arith.constant 0 : index
      %1338 = vector.load %arg7[%c2_434, %1337, %c0_435] : memref<4x18x18xf32, #tpu.memory_space<vmem>>, vector<1x8x16xf32>
      %1339 = vector.shape_cast %1338 : vector<1x8x16xf32> to vector<8x16xf32>
      %c18_i32 = arith.constant 18 : i32
      %1340 = arith.addi %4, %c18_i32 : i32
      %c0_i32_436 = arith.constant 0 : i32
      %1341 = arith.addi %1340, %c0_i32_436 : i32
      %1342 = arith.index_cast %1341 : i32 to index
      %1343 = memref.load %arg2[%1342] : memref<288xf32, #tpu.memory_space<smem>>
      %1344 = vector.broadcast %1343 : f32 to vector<8x16xf32>
      %1345 = arith.mulf %1344, %1339 : vector<8x16xf32>
      %1346 = arith.addf %1286, %1345 : vector<8x16xf32>
      %c54_i32 = arith.constant 54 : i32
      %1347 = arith.addi %4, %c54_i32 : i32
      %c0_i32_437 = arith.constant 0 : i32
      %1348 = arith.addi %1347, %c0_i32_437 : i32
      %1349 = arith.index_cast %1348 : i32 to index
      %1350 = memref.load %arg2[%1349] : memref<288xf32, #tpu.memory_space<smem>>
      %1351 = vector.broadcast %1350 : f32 to vector<8x16xf32>
      %1352 = arith.mulf %1351, %1339 : vector<8x16xf32>
      %1353 = arith.addf %1293, %1352 : vector<8x16xf32>
      %c90_i32 = arith.constant 90 : i32
      %1354 = arith.addi %4, %c90_i32 : i32
      %c0_i32_438 = arith.constant 0 : i32
      %1355 = arith.addi %1354, %c0_i32_438 : i32
      %1356 = arith.index_cast %1355 : i32 to index
      %1357 = memref.load %arg2[%1356] : memref<288xf32, #tpu.memory_space<smem>>
      %1358 = vector.broadcast %1357 : f32 to vector<8x16xf32>
      %1359 = arith.mulf %1358, %1339 : vector<8x16xf32>
      %1360 = arith.addf %1300, %1359 : vector<8x16xf32>
      %c126_i32 = arith.constant 126 : i32
      %1361 = arith.addi %4, %c126_i32 : i32
      %c0_i32_439 = arith.constant 0 : i32
      %1362 = arith.addi %1361, %c0_i32_439 : i32
      %1363 = arith.index_cast %1362 : i32 to index
      %1364 = memref.load %arg2[%1363] : memref<288xf32, #tpu.memory_space<smem>>
      %1365 = vector.broadcast %1364 : f32 to vector<8x16xf32>
      %1366 = arith.mulf %1365, %1339 : vector<8x16xf32>
      %1367 = arith.addf %1307, %1366 : vector<8x16xf32>
      %c162_i32 = arith.constant 162 : i32
      %1368 = arith.addi %4, %c162_i32 : i32
      %c0_i32_440 = arith.constant 0 : i32
      %1369 = arith.addi %1368, %c0_i32_440 : i32
      %1370 = arith.index_cast %1369 : i32 to index
      %1371 = memref.load %arg2[%1370] : memref<288xf32, #tpu.memory_space<smem>>
      %1372 = vector.broadcast %1371 : f32 to vector<8x16xf32>
      %1373 = arith.mulf %1372, %1339 : vector<8x16xf32>
      %1374 = arith.addf %1314, %1373 : vector<8x16xf32>
      %c198_i32 = arith.constant 198 : i32
      %1375 = arith.addi %4, %c198_i32 : i32
      %c0_i32_441 = arith.constant 0 : i32
      %1376 = arith.addi %1375, %c0_i32_441 : i32
      %1377 = arith.index_cast %1376 : i32 to index
      %1378 = memref.load %arg2[%1377] : memref<288xf32, #tpu.memory_space<smem>>
      %1379 = vector.broadcast %1378 : f32 to vector<8x16xf32>
      %1380 = arith.mulf %1379, %1339 : vector<8x16xf32>
      %1381 = arith.addf %1321, %1380 : vector<8x16xf32>
      %c234_i32 = arith.constant 234 : i32
      %1382 = arith.addi %4, %c234_i32 : i32
      %c0_i32_442 = arith.constant 0 : i32
      %1383 = arith.addi %1382, %c0_i32_442 : i32
      %1384 = arith.index_cast %1383 : i32 to index
      %1385 = memref.load %arg2[%1384] : memref<288xf32, #tpu.memory_space<smem>>
      %1386 = vector.broadcast %1385 : f32 to vector<8x16xf32>
      %1387 = arith.mulf %1386, %1339 : vector<8x16xf32>
      %1388 = arith.addf %1328, %1387 : vector<8x16xf32>
      %c270_i32 = arith.constant 270 : i32
      %1389 = arith.addi %4, %c270_i32 : i32
      %c0_i32_443 = arith.constant 0 : i32
      %1390 = arith.addi %1389, %c0_i32_443 : i32
      %1391 = arith.index_cast %1390 : i32 to index
      %1392 = memref.load %arg2[%1391] : memref<288xf32, #tpu.memory_space<smem>>
      %1393 = vector.broadcast %1392 : f32 to vector<8x16xf32>
      %1394 = arith.mulf %1393, %1339 : vector<8x16xf32>
      %1395 = arith.addf %1335, %1394 : vector<8x16xf32>
      %c0_i32_444 = arith.constant 0 : i32
      %1396 = arith.addi %247, %c0_i32_444 : i32
      %c2_445 = arith.constant 2 : index
      %1397 = arith.index_cast %1396 : i32 to index
      %c1_446 = arith.constant 1 : index
      %1398 = vector.load %arg7[%c2_445, %1397, %c1_446] : memref<4x18x18xf32, #tpu.memory_space<vmem>>, vector<1x8x16xf32>
      %1399 = vector.shape_cast %1398 : vector<1x8x16xf32> to vector<8x16xf32>
      %c18_i32_447 = arith.constant 18 : i32
      %1400 = arith.addi %4, %c18_i32_447 : i32
      %c1_i32_448 = arith.constant 1 : i32
      %1401 = arith.addi %1400, %c1_i32_448 : i32
      %1402 = arith.index_cast %1401 : i32 to index
      %1403 = memref.load %arg2[%1402] : memref<288xf32, #tpu.memory_space<smem>>
      %1404 = vector.broadcast %1403 : f32 to vector<8x16xf32>
      %1405 = arith.mulf %1404, %1399 : vector<8x16xf32>
      %1406 = arith.addf %1346, %1405 : vector<8x16xf32>
      %c54_i32_449 = arith.constant 54 : i32
      %1407 = arith.addi %4, %c54_i32_449 : i32
      %c1_i32_450 = arith.constant 1 : i32
      %1408 = arith.addi %1407, %c1_i32_450 : i32
      %1409 = arith.index_cast %1408 : i32 to index
      %1410 = memref.load %arg2[%1409] : memref<288xf32, #tpu.memory_space<smem>>
      %1411 = vector.broadcast %1410 : f32 to vector<8x16xf32>
      %1412 = arith.mulf %1411, %1399 : vector<8x16xf32>
      %1413 = arith.addf %1353, %1412 : vector<8x16xf32>
      %c90_i32_451 = arith.constant 90 : i32
      %1414 = arith.addi %4, %c90_i32_451 : i32
      %c1_i32_452 = arith.constant 1 : i32
      %1415 = arith.addi %1414, %c1_i32_452 : i32
      %1416 = arith.index_cast %1415 : i32 to index
      %1417 = memref.load %arg2[%1416] : memref<288xf32, #tpu.memory_space<smem>>
      %1418 = vector.broadcast %1417 : f32 to vector<8x16xf32>
      %1419 = arith.mulf %1418, %1399 : vector<8x16xf32>
      %1420 = arith.addf %1360, %1419 : vector<8x16xf32>
      %c126_i32_453 = arith.constant 126 : i32
      %1421 = arith.addi %4, %c126_i32_453 : i32
      %c1_i32_454 = arith.constant 1 : i32
      %1422 = arith.addi %1421, %c1_i32_454 : i32
      %1423 = arith.index_cast %1422 : i32 to index
      %1424 = memref.load %arg2[%1423] : memref<288xf32, #tpu.memory_space<smem>>
      %1425 = vector.broadcast %1424 : f32 to vector<8x16xf32>
      %1426 = arith.mulf %1425, %1399 : vector<8x16xf32>
      %1427 = arith.addf %1367, %1426 : vector<8x16xf32>
      %c162_i32_455 = arith.constant 162 : i32
      %1428 = arith.addi %4, %c162_i32_455 : i32
      %c1_i32_456 = arith.constant 1 : i32
      %1429 = arith.addi %1428, %c1_i32_456 : i32
      %1430 = arith.index_cast %1429 : i32 to index
      %1431 = memref.load %arg2[%1430] : memref<288xf32, #tpu.memory_space<smem>>
      %1432 = vector.broadcast %1431 : f32 to vector<8x16xf32>
      %1433 = arith.mulf %1432, %1399 : vector<8x16xf32>
      %1434 = arith.addf %1374, %1433 : vector<8x16xf32>
      %c198_i32_457 = arith.constant 198 : i32
      %1435 = arith.addi %4, %c198_i32_457 : i32
      %c1_i32_458 = arith.constant 1 : i32
      %1436 = arith.addi %1435, %c1_i32_458 : i32
      %1437 = arith.index_cast %1436 : i32 to index
      %1438 = memref.load %arg2[%1437] : memref<288xf32, #tpu.memory_space<smem>>
      %1439 = vector.broadcast %1438 : f32 to vector<8x16xf32>
      %1440 = arith.mulf %1439, %1399 : vector<8x16xf32>
      %1441 = arith.addf %1381, %1440 : vector<8x16xf32>
      %c234_i32_459 = arith.constant 234 : i32
      %1442 = arith.addi %4, %c234_i32_459 : i32
      %c1_i32_460 = arith.constant 1 : i32
      %1443 = arith.addi %1442, %c1_i32_460 : i32
      %1444 = arith.index_cast %1443 : i32 to index
      %1445 = memref.load %arg2[%1444] : memref<288xf32, #tpu.memory_space<smem>>
      %1446 = vector.broadcast %1445 : f32 to vector<8x16xf32>
      %1447 = arith.mulf %1446, %1399 : vector<8x16xf32>
      %1448 = arith.addf %1388, %1447 : vector<8x16xf32>
      %c270_i32_461 = arith.constant 270 : i32
      %1449 = arith.addi %4, %c270_i32_461 : i32
      %c1_i32_462 = arith.constant 1 : i32
      %1450 = arith.addi %1449, %c1_i32_462 : i32
      %1451 = arith.index_cast %1450 : i32 to index
      %1452 = memref.load %arg2[%1451] : memref<288xf32, #tpu.memory_space<smem>>
      %1453 = vector.broadcast %1452 : f32 to vector<8x16xf32>
      %1454 = arith.mulf %1453, %1399 : vector<8x16xf32>
      %1455 = arith.addf %1395, %1454 : vector<8x16xf32>
      %c0_i32_463 = arith.constant 0 : i32
      %1456 = arith.addi %247, %c0_i32_463 : i32
      %c2_464 = arith.constant 2 : index
      %1457 = arith.index_cast %1456 : i32 to index
      %c2_465 = arith.constant 2 : index
      %1458 = vector.load %arg7[%c2_464, %1457, %c2_465] : memref<4x18x18xf32, #tpu.memory_space<vmem>>, vector<1x8x16xf32>
      %1459 = vector.shape_cast %1458 : vector<1x8x16xf32> to vector<8x16xf32>
      %c18_i32_466 = arith.constant 18 : i32
      %1460 = arith.addi %4, %c18_i32_466 : i32
      %c2_i32_467 = arith.constant 2 : i32
      %1461 = arith.addi %1460, %c2_i32_467 : i32
      %1462 = arith.index_cast %1461 : i32 to index
      %1463 = memref.load %arg2[%1462] : memref<288xf32, #tpu.memory_space<smem>>
      %1464 = vector.broadcast %1463 : f32 to vector<8x16xf32>
      %1465 = arith.mulf %1464, %1459 : vector<8x16xf32>
      %1466 = arith.addf %1406, %1465 : vector<8x16xf32>
      %c54_i32_468 = arith.constant 54 : i32
      %1467 = arith.addi %4, %c54_i32_468 : i32
      %c2_i32_469 = arith.constant 2 : i32
      %1468 = arith.addi %1467, %c2_i32_469 : i32
      %1469 = arith.index_cast %1468 : i32 to index
      %1470 = memref.load %arg2[%1469] : memref<288xf32, #tpu.memory_space<smem>>
      %1471 = vector.broadcast %1470 : f32 to vector<8x16xf32>
      %1472 = arith.mulf %1471, %1459 : vector<8x16xf32>
      %1473 = arith.addf %1413, %1472 : vector<8x16xf32>
      %c90_i32_470 = arith.constant 90 : i32
      %1474 = arith.addi %4, %c90_i32_470 : i32
      %c2_i32_471 = arith.constant 2 : i32
      %1475 = arith.addi %1474, %c2_i32_471 : i32
      %1476 = arith.index_cast %1475 : i32 to index
      %1477 = memref.load %arg2[%1476] : memref<288xf32, #tpu.memory_space<smem>>
      %1478 = vector.broadcast %1477 : f32 to vector<8x16xf32>
      %1479 = arith.mulf %1478, %1459 : vector<8x16xf32>
      %1480 = arith.addf %1420, %1479 : vector<8x16xf32>
      %c126_i32_472 = arith.constant 126 : i32
      %1481 = arith.addi %4, %c126_i32_472 : i32
      %c2_i32_473 = arith.constant 2 : i32
      %1482 = arith.addi %1481, %c2_i32_473 : i32
      %1483 = arith.index_cast %1482 : i32 to index
      %1484 = memref.load %arg2[%1483] : memref<288xf32, #tpu.memory_space<smem>>
      %1485 = vector.broadcast %1484 : f32 to vector<8x16xf32>
      %1486 = arith.mulf %1485, %1459 : vector<8x16xf32>
      %1487 = arith.addf %1427, %1486 : vector<8x16xf32>
      %c162_i32_474 = arith.constant 162 : i32
      %1488 = arith.addi %4, %c162_i32_474 : i32
      %c2_i32_475 = arith.constant 2 : i32
      %1489 = arith.addi %1488, %c2_i32_475 : i32
      %1490 = arith.index_cast %1489 : i32 to index
      %1491 = memref.load %arg2[%1490] : memref<288xf32, #tpu.memory_space<smem>>
      %1492 = vector.broadcast %1491 : f32 to vector<8x16xf32>
      %1493 = arith.mulf %1492, %1459 : vector<8x16xf32>
      %1494 = arith.addf %1434, %1493 : vector<8x16xf32>
      %c198_i32_476 = arith.constant 198 : i32
      %1495 = arith.addi %4, %c198_i32_476 : i32
      %c2_i32_477 = arith.constant 2 : i32
      %1496 = arith.addi %1495, %c2_i32_477 : i32
      %1497 = arith.index_cast %1496 : i32 to index
      %1498 = memref.load %arg2[%1497] : memref<288xf32, #tpu.memory_space<smem>>
      %1499 = vector.broadcast %1498 : f32 to vector<8x16xf32>
      %1500 = arith.mulf %1499, %1459 : vector<8x16xf32>
      %1501 = arith.addf %1441, %1500 : vector<8x16xf32>
      %c234_i32_478 = arith.constant 234 : i32
      %1502 = arith.addi %4, %c234_i32_478 : i32
      %c2_i32_479 = arith.constant 2 : i32
      %1503 = arith.addi %1502, %c2_i32_479 : i32
      %1504 = arith.index_cast %1503 : i32 to index
      %1505 = memref.load %arg2[%1504] : memref<288xf32, #tpu.memory_space<smem>>
      %1506 = vector.broadcast %1505 : f32 to vector<8x16xf32>
      %1507 = arith.mulf %1506, %1459 : vector<8x16xf32>
      %1508 = arith.addf %1448, %1507 : vector<8x16xf32>
      %c270_i32_480 = arith.constant 270 : i32
      %1509 = arith.addi %4, %c270_i32_480 : i32
      %c2_i32_481 = arith.constant 2 : i32
      %1510 = arith.addi %1509, %c2_i32_481 : i32
      %1511 = arith.index_cast %1510 : i32 to index
      %1512 = memref.load %arg2[%1511] : memref<288xf32, #tpu.memory_space<smem>>
      %1513 = vector.broadcast %1512 : f32 to vector<8x16xf32>
      %1514 = arith.mulf %1513, %1459 : vector<8x16xf32>
      %1515 = arith.addf %1455, %1514 : vector<8x16xf32>
      %c1_i32_482 = arith.constant 1 : i32
      %1516 = arith.addi %247, %c1_i32_482 : i32
      %c2_483 = arith.constant 2 : index
      %1517 = arith.index_cast %1516 : i32 to index
      %c0_484 = arith.constant 0 : index
      %1518 = vector.load %arg7[%c2_483, %1517, %c0_484] : memref<4x18x18xf32, #tpu.memory_space<vmem>>, vector<1x8x16xf32>
      %1519 = vector.shape_cast %1518 : vector<1x8x16xf32> to vector<8x16xf32>
      %c21_i32 = arith.constant 21 : i32
      %1520 = arith.addi %4, %c21_i32 : i32
      %c0_i32_485 = arith.constant 0 : i32
      %1521 = arith.addi %1520, %c0_i32_485 : i32
      %1522 = arith.index_cast %1521 : i32 to index
      %1523 = memref.load %arg2[%1522] : memref<288xf32, #tpu.memory_space<smem>>
      %1524 = vector.broadcast %1523 : f32 to vector<8x16xf32>
      %1525 = arith.mulf %1524, %1519 : vector<8x16xf32>
      %1526 = arith.addf %1466, %1525 : vector<8x16xf32>
      %c57_i32 = arith.constant 57 : i32
      %1527 = arith.addi %4, %c57_i32 : i32
      %c0_i32_486 = arith.constant 0 : i32
      %1528 = arith.addi %1527, %c0_i32_486 : i32
      %1529 = arith.index_cast %1528 : i32 to index
      %1530 = memref.load %arg2[%1529] : memref<288xf32, #tpu.memory_space<smem>>
      %1531 = vector.broadcast %1530 : f32 to vector<8x16xf32>
      %1532 = arith.mulf %1531, %1519 : vector<8x16xf32>
      %1533 = arith.addf %1473, %1532 : vector<8x16xf32>
      %c93_i32 = arith.constant 93 : i32
      %1534 = arith.addi %4, %c93_i32 : i32
      %c0_i32_487 = arith.constant 0 : i32
      %1535 = arith.addi %1534, %c0_i32_487 : i32
      %1536 = arith.index_cast %1535 : i32 to index
      %1537 = memref.load %arg2[%1536] : memref<288xf32, #tpu.memory_space<smem>>
      %1538 = vector.broadcast %1537 : f32 to vector<8x16xf32>
      %1539 = arith.mulf %1538, %1519 : vector<8x16xf32>
      %1540 = arith.addf %1480, %1539 : vector<8x16xf32>
      %c129_i32 = arith.constant 129 : i32
      %1541 = arith.addi %4, %c129_i32 : i32
      %c0_i32_488 = arith.constant 0 : i32
      %1542 = arith.addi %1541, %c0_i32_488 : i32
      %1543 = arith.index_cast %1542 : i32 to index
      %1544 = memref.load %arg2[%1543] : memref<288xf32, #tpu.memory_space<smem>>
      %1545 = vector.broadcast %1544 : f32 to vector<8x16xf32>
      %1546 = arith.mulf %1545, %1519 : vector<8x16xf32>
      %1547 = arith.addf %1487, %1546 : vector<8x16xf32>
      %c165_i32 = arith.constant 165 : i32
      %1548 = arith.addi %4, %c165_i32 : i32
      %c0_i32_489 = arith.constant 0 : i32
      %1549 = arith.addi %1548, %c0_i32_489 : i32
      %1550 = arith.index_cast %1549 : i32 to index
      %1551 = memref.load %arg2[%1550] : memref<288xf32, #tpu.memory_space<smem>>
      %1552 = vector.broadcast %1551 : f32 to vector<8x16xf32>
      %1553 = arith.mulf %1552, %1519 : vector<8x16xf32>
      %1554 = arith.addf %1494, %1553 : vector<8x16xf32>
      %c201_i32 = arith.constant 201 : i32
      %1555 = arith.addi %4, %c201_i32 : i32
      %c0_i32_490 = arith.constant 0 : i32
      %1556 = arith.addi %1555, %c0_i32_490 : i32
      %1557 = arith.index_cast %1556 : i32 to index
      %1558 = memref.load %arg2[%1557] : memref<288xf32, #tpu.memory_space<smem>>
      %1559 = vector.broadcast %1558 : f32 to vector<8x16xf32>
      %1560 = arith.mulf %1559, %1519 : vector<8x16xf32>
      %1561 = arith.addf %1501, %1560 : vector<8x16xf32>
      %c237_i32 = arith.constant 237 : i32
      %1562 = arith.addi %4, %c237_i32 : i32
      %c0_i32_491 = arith.constant 0 : i32
      %1563 = arith.addi %1562, %c0_i32_491 : i32
      %1564 = arith.index_cast %1563 : i32 to index
      %1565 = memref.load %arg2[%1564] : memref<288xf32, #tpu.memory_space<smem>>
      %1566 = vector.broadcast %1565 : f32 to vector<8x16xf32>
      %1567 = arith.mulf %1566, %1519 : vector<8x16xf32>
      %1568 = arith.addf %1508, %1567 : vector<8x16xf32>
      %c273_i32 = arith.constant 273 : i32
      %1569 = arith.addi %4, %c273_i32 : i32
      %c0_i32_492 = arith.constant 0 : i32
      %1570 = arith.addi %1569, %c0_i32_492 : i32
      %1571 = arith.index_cast %1570 : i32 to index
      %1572 = memref.load %arg2[%1571] : memref<288xf32, #tpu.memory_space<smem>>
      %1573 = vector.broadcast %1572 : f32 to vector<8x16xf32>
      %1574 = arith.mulf %1573, %1519 : vector<8x16xf32>
      %1575 = arith.addf %1515, %1574 : vector<8x16xf32>
      %c1_i32_493 = arith.constant 1 : i32
      %1576 = arith.addi %247, %c1_i32_493 : i32
      %c2_494 = arith.constant 2 : index
      %1577 = arith.index_cast %1576 : i32 to index
      %c1_495 = arith.constant 1 : index
      %1578 = vector.load %arg7[%c2_494, %1577, %c1_495] : memref<4x18x18xf32, #tpu.memory_space<vmem>>, vector<1x8x16xf32>
      %1579 = vector.shape_cast %1578 : vector<1x8x16xf32> to vector<8x16xf32>
      %c21_i32_496 = arith.constant 21 : i32
      %1580 = arith.addi %4, %c21_i32_496 : i32
      %c1_i32_497 = arith.constant 1 : i32
      %1581 = arith.addi %1580, %c1_i32_497 : i32
      %1582 = arith.index_cast %1581 : i32 to index
      %1583 = memref.load %arg2[%1582] : memref<288xf32, #tpu.memory_space<smem>>
      %1584 = vector.broadcast %1583 : f32 to vector<8x16xf32>
      %1585 = arith.mulf %1584, %1579 : vector<8x16xf32>
      %1586 = arith.addf %1526, %1585 : vector<8x16xf32>
      %c57_i32_498 = arith.constant 57 : i32
      %1587 = arith.addi %4, %c57_i32_498 : i32
      %c1_i32_499 = arith.constant 1 : i32
      %1588 = arith.addi %1587, %c1_i32_499 : i32
      %1589 = arith.index_cast %1588 : i32 to index
      %1590 = memref.load %arg2[%1589] : memref<288xf32, #tpu.memory_space<smem>>
      %1591 = vector.broadcast %1590 : f32 to vector<8x16xf32>
      %1592 = arith.mulf %1591, %1579 : vector<8x16xf32>
      %1593 = arith.addf %1533, %1592 : vector<8x16xf32>
      %c93_i32_500 = arith.constant 93 : i32
      %1594 = arith.addi %4, %c93_i32_500 : i32
      %c1_i32_501 = arith.constant 1 : i32
      %1595 = arith.addi %1594, %c1_i32_501 : i32
      %1596 = arith.index_cast %1595 : i32 to index
      %1597 = memref.load %arg2[%1596] : memref<288xf32, #tpu.memory_space<smem>>
      %1598 = vector.broadcast %1597 : f32 to vector<8x16xf32>
      %1599 = arith.mulf %1598, %1579 : vector<8x16xf32>
      %1600 = arith.addf %1540, %1599 : vector<8x16xf32>
      %c129_i32_502 = arith.constant 129 : i32
      %1601 = arith.addi %4, %c129_i32_502 : i32
      %c1_i32_503 = arith.constant 1 : i32
      %1602 = arith.addi %1601, %c1_i32_503 : i32
      %1603 = arith.index_cast %1602 : i32 to index
      %1604 = memref.load %arg2[%1603] : memref<288xf32, #tpu.memory_space<smem>>
      %1605 = vector.broadcast %1604 : f32 to vector<8x16xf32>
      %1606 = arith.mulf %1605, %1579 : vector<8x16xf32>
      %1607 = arith.addf %1547, %1606 : vector<8x16xf32>
      %c165_i32_504 = arith.constant 165 : i32
      %1608 = arith.addi %4, %c165_i32_504 : i32
      %c1_i32_505 = arith.constant 1 : i32
      %1609 = arith.addi %1608, %c1_i32_505 : i32
      %1610 = arith.index_cast %1609 : i32 to index
      %1611 = memref.load %arg2[%1610] : memref<288xf32, #tpu.memory_space<smem>>
      %1612 = vector.broadcast %1611 : f32 to vector<8x16xf32>
      %1613 = arith.mulf %1612, %1579 : vector<8x16xf32>
      %1614 = arith.addf %1554, %1613 : vector<8x16xf32>
      %c201_i32_506 = arith.constant 201 : i32
      %1615 = arith.addi %4, %c201_i32_506 : i32
      %c1_i32_507 = arith.constant 1 : i32
      %1616 = arith.addi %1615, %c1_i32_507 : i32
      %1617 = arith.index_cast %1616 : i32 to index
      %1618 = memref.load %arg2[%1617] : memref<288xf32, #tpu.memory_space<smem>>
      %1619 = vector.broadcast %1618 : f32 to vector<8x16xf32>
      %1620 = arith.mulf %1619, %1579 : vector<8x16xf32>
      %1621 = arith.addf %1561, %1620 : vector<8x16xf32>
      %c237_i32_508 = arith.constant 237 : i32
      %1622 = arith.addi %4, %c237_i32_508 : i32
      %c1_i32_509 = arith.constant 1 : i32
      %1623 = arith.addi %1622, %c1_i32_509 : i32
      %1624 = arith.index_cast %1623 : i32 to index
      %1625 = memref.load %arg2[%1624] : memref<288xf32, #tpu.memory_space<smem>>
      %1626 = vector.broadcast %1625 : f32 to vector<8x16xf32>
      %1627 = arith.mulf %1626, %1579 : vector<8x16xf32>
      %1628 = arith.addf %1568, %1627 : vector<8x16xf32>
      %c273_i32_510 = arith.constant 273 : i32
      %1629 = arith.addi %4, %c273_i32_510 : i32
      %c1_i32_511 = arith.constant 1 : i32
      %1630 = arith.addi %1629, %c1_i32_511 : i32
      %1631 = arith.index_cast %1630 : i32 to index
      %1632 = memref.load %arg2[%1631] : memref<288xf32, #tpu.memory_space<smem>>
      %1633 = vector.broadcast %1632 : f32 to vector<8x16xf32>
      %1634 = arith.mulf %1633, %1579 : vector<8x16xf32>
      %1635 = arith.addf %1575, %1634 : vector<8x16xf32>
      %c1_i32_512 = arith.constant 1 : i32
      %1636 = arith.addi %247, %c1_i32_512 : i32
      %c2_513 = arith.constant 2 : index
      %1637 = arith.index_cast %1636 : i32 to index
      %c2_514 = arith.constant 2 : index
      %1638 = vector.load %arg7[%c2_513, %1637, %c2_514] : memref<4x18x18xf32, #tpu.memory_space<vmem>>, vector<1x8x16xf32>
      %1639 = vector.shape_cast %1638 : vector<1x8x16xf32> to vector<8x16xf32>
      %c21_i32_515 = arith.constant 21 : i32
      %1640 = arith.addi %4, %c21_i32_515 : i32
      %c2_i32_516 = arith.constant 2 : i32
      %1641 = arith.addi %1640, %c2_i32_516 : i32
      %1642 = arith.index_cast %1641 : i32 to index
      %1643 = memref.load %arg2[%1642] : memref<288xf32, #tpu.memory_space<smem>>
      %1644 = vector.broadcast %1643 : f32 to vector<8x16xf32>
      %1645 = arith.mulf %1644, %1639 : vector<8x16xf32>
      %1646 = arith.addf %1586, %1645 : vector<8x16xf32>
      %c57_i32_517 = arith.constant 57 : i32
      %1647 = arith.addi %4, %c57_i32_517 : i32
      %c2_i32_518 = arith.constant 2 : i32
      %1648 = arith.addi %1647, %c2_i32_518 : i32
      %1649 = arith.index_cast %1648 : i32 to index
      %1650 = memref.load %arg2[%1649] : memref<288xf32, #tpu.memory_space<smem>>
      %1651 = vector.broadcast %1650 : f32 to vector<8x16xf32>
      %1652 = arith.mulf %1651, %1639 : vector<8x16xf32>
      %1653 = arith.addf %1593, %1652 : vector<8x16xf32>
      %c93_i32_519 = arith.constant 93 : i32
      %1654 = arith.addi %4, %c93_i32_519 : i32
      %c2_i32_520 = arith.constant 2 : i32
      %1655 = arith.addi %1654, %c2_i32_520 : i32
      %1656 = arith.index_cast %1655 : i32 to index
      %1657 = memref.load %arg2[%1656] : memref<288xf32, #tpu.memory_space<smem>>
      %1658 = vector.broadcast %1657 : f32 to vector<8x16xf32>
      %1659 = arith.mulf %1658, %1639 : vector<8x16xf32>
      %1660 = arith.addf %1600, %1659 : vector<8x16xf32>
      %c129_i32_521 = arith.constant 129 : i32
      %1661 = arith.addi %4, %c129_i32_521 : i32
      %c2_i32_522 = arith.constant 2 : i32
      %1662 = arith.addi %1661, %c2_i32_522 : i32
      %1663 = arith.index_cast %1662 : i32 to index
      %1664 = memref.load %arg2[%1663] : memref<288xf32, #tpu.memory_space<smem>>
      %1665 = vector.broadcast %1664 : f32 to vector<8x16xf32>
      %1666 = arith.mulf %1665, %1639 : vector<8x16xf32>
      %1667 = arith.addf %1607, %1666 : vector<8x16xf32>
      %c165_i32_523 = arith.constant 165 : i32
      %1668 = arith.addi %4, %c165_i32_523 : i32
      %c2_i32_524 = arith.constant 2 : i32
      %1669 = arith.addi %1668, %c2_i32_524 : i32
      %1670 = arith.index_cast %1669 : i32 to index
      %1671 = memref.load %arg2[%1670] : memref<288xf32, #tpu.memory_space<smem>>
      %1672 = vector.broadcast %1671 : f32 to vector<8x16xf32>
      %1673 = arith.mulf %1672, %1639 : vector<8x16xf32>
      %1674 = arith.addf %1614, %1673 : vector<8x16xf32>
      %c201_i32_525 = arith.constant 201 : i32
      %1675 = arith.addi %4, %c201_i32_525 : i32
      %c2_i32_526 = arith.constant 2 : i32
      %1676 = arith.addi %1675, %c2_i32_526 : i32
      %1677 = arith.index_cast %1676 : i32 to index
      %1678 = memref.load %arg2[%1677] : memref<288xf32, #tpu.memory_space<smem>>
      %1679 = vector.broadcast %1678 : f32 to vector<8x16xf32>
      %1680 = arith.mulf %1679, %1639 : vector<8x16xf32>
      %1681 = arith.addf %1621, %1680 : vector<8x16xf32>
      %c237_i32_527 = arith.constant 237 : i32
      %1682 = arith.addi %4, %c237_i32_527 : i32
      %c2_i32_528 = arith.constant 2 : i32
      %1683 = arith.addi %1682, %c2_i32_528 : i32
      %1684 = arith.index_cast %1683 : i32 to index
      %1685 = memref.load %arg2[%1684] : memref<288xf32, #tpu.memory_space<smem>>
      %1686 = vector.broadcast %1685 : f32 to vector<8x16xf32>
      %1687 = arith.mulf %1686, %1639 : vector<8x16xf32>
      %1688 = arith.addf %1628, %1687 : vector<8x16xf32>
      %c273_i32_529 = arith.constant 273 : i32
      %1689 = arith.addi %4, %c273_i32_529 : i32
      %c2_i32_530 = arith.constant 2 : i32
      %1690 = arith.addi %1689, %c2_i32_530 : i32
      %1691 = arith.index_cast %1690 : i32 to index
      %1692 = memref.load %arg2[%1691] : memref<288xf32, #tpu.memory_space<smem>>
      %1693 = vector.broadcast %1692 : f32 to vector<8x16xf32>
      %1694 = arith.mulf %1693, %1639 : vector<8x16xf32>
      %1695 = arith.addf %1635, %1694 : vector<8x16xf32>
      %c2_i32_531 = arith.constant 2 : i32
      %1696 = arith.addi %247, %c2_i32_531 : i32
      %c2_532 = arith.constant 2 : index
      %1697 = arith.index_cast %1696 : i32 to index
      %c0_533 = arith.constant 0 : index
      %1698 = vector.load %arg7[%c2_532, %1697, %c0_533] : memref<4x18x18xf32, #tpu.memory_space<vmem>>, vector<1x8x16xf32>
      %1699 = vector.shape_cast %1698 : vector<1x8x16xf32> to vector<8x16xf32>
      %c24_i32 = arith.constant 24 : i32
      %1700 = arith.addi %4, %c24_i32 : i32
      %c0_i32_534 = arith.constant 0 : i32
      %1701 = arith.addi %1700, %c0_i32_534 : i32
      %1702 = arith.index_cast %1701 : i32 to index
      %1703 = memref.load %arg2[%1702] : memref<288xf32, #tpu.memory_space<smem>>
      %1704 = vector.broadcast %1703 : f32 to vector<8x16xf32>
      %1705 = arith.mulf %1704, %1699 : vector<8x16xf32>
      %1706 = arith.addf %1646, %1705 : vector<8x16xf32>
      %c60_i32 = arith.constant 60 : i32
      %1707 = arith.addi %4, %c60_i32 : i32
      %c0_i32_535 = arith.constant 0 : i32
      %1708 = arith.addi %1707, %c0_i32_535 : i32
      %1709 = arith.index_cast %1708 : i32 to index
      %1710 = memref.load %arg2[%1709] : memref<288xf32, #tpu.memory_space<smem>>
      %1711 = vector.broadcast %1710 : f32 to vector<8x16xf32>
      %1712 = arith.mulf %1711, %1699 : vector<8x16xf32>
      %1713 = arith.addf %1653, %1712 : vector<8x16xf32>
      %c96_i32 = arith.constant 96 : i32
      %1714 = arith.addi %4, %c96_i32 : i32
      %c0_i32_536 = arith.constant 0 : i32
      %1715 = arith.addi %1714, %c0_i32_536 : i32
      %1716 = arith.index_cast %1715 : i32 to index
      %1717 = memref.load %arg2[%1716] : memref<288xf32, #tpu.memory_space<smem>>
      %1718 = vector.broadcast %1717 : f32 to vector<8x16xf32>
      %1719 = arith.mulf %1718, %1699 : vector<8x16xf32>
      %1720 = arith.addf %1660, %1719 : vector<8x16xf32>
      %c132_i32 = arith.constant 132 : i32
      %1721 = arith.addi %4, %c132_i32 : i32
      %c0_i32_537 = arith.constant 0 : i32
      %1722 = arith.addi %1721, %c0_i32_537 : i32
      %1723 = arith.index_cast %1722 : i32 to index
      %1724 = memref.load %arg2[%1723] : memref<288xf32, #tpu.memory_space<smem>>
      %1725 = vector.broadcast %1724 : f32 to vector<8x16xf32>
      %1726 = arith.mulf %1725, %1699 : vector<8x16xf32>
      %1727 = arith.addf %1667, %1726 : vector<8x16xf32>
      %c168_i32 = arith.constant 168 : i32
      %1728 = arith.addi %4, %c168_i32 : i32
      %c0_i32_538 = arith.constant 0 : i32
      %1729 = arith.addi %1728, %c0_i32_538 : i32
      %1730 = arith.index_cast %1729 : i32 to index
      %1731 = memref.load %arg2[%1730] : memref<288xf32, #tpu.memory_space<smem>>
      %1732 = vector.broadcast %1731 : f32 to vector<8x16xf32>
      %1733 = arith.mulf %1732, %1699 : vector<8x16xf32>
      %1734 = arith.addf %1674, %1733 : vector<8x16xf32>
      %c204_i32 = arith.constant 204 : i32
      %1735 = arith.addi %4, %c204_i32 : i32
      %c0_i32_539 = arith.constant 0 : i32
      %1736 = arith.addi %1735, %c0_i32_539 : i32
      %1737 = arith.index_cast %1736 : i32 to index
      %1738 = memref.load %arg2[%1737] : memref<288xf32, #tpu.memory_space<smem>>
      %1739 = vector.broadcast %1738 : f32 to vector<8x16xf32>
      %1740 = arith.mulf %1739, %1699 : vector<8x16xf32>
      %1741 = arith.addf %1681, %1740 : vector<8x16xf32>
      %c240_i32 = arith.constant 240 : i32
      %1742 = arith.addi %4, %c240_i32 : i32
      %c0_i32_540 = arith.constant 0 : i32
      %1743 = arith.addi %1742, %c0_i32_540 : i32
      %1744 = arith.index_cast %1743 : i32 to index
      %1745 = memref.load %arg2[%1744] : memref<288xf32, #tpu.memory_space<smem>>
      %1746 = vector.broadcast %1745 : f32 to vector<8x16xf32>
      %1747 = arith.mulf %1746, %1699 : vector<8x16xf32>
      %1748 = arith.addf %1688, %1747 : vector<8x16xf32>
      %c276_i32 = arith.constant 276 : i32
      %1749 = arith.addi %4, %c276_i32 : i32
      %c0_i32_541 = arith.constant 0 : i32
      %1750 = arith.addi %1749, %c0_i32_541 : i32
      %1751 = arith.index_cast %1750 : i32 to index
      %1752 = memref.load %arg2[%1751] : memref<288xf32, #tpu.memory_space<smem>>
      %1753 = vector.broadcast %1752 : f32 to vector<8x16xf32>
      %1754 = arith.mulf %1753, %1699 : vector<8x16xf32>
      %1755 = arith.addf %1695, %1754 : vector<8x16xf32>
      %c2_i32_542 = arith.constant 2 : i32
      %1756 = arith.addi %247, %c2_i32_542 : i32
      %c2_543 = arith.constant 2 : index
      %1757 = arith.index_cast %1756 : i32 to index
      %c1_544 = arith.constant 1 : index
      %1758 = vector.load %arg7[%c2_543, %1757, %c1_544] : memref<4x18x18xf32, #tpu.memory_space<vmem>>, vector<1x8x16xf32>
      %1759 = vector.shape_cast %1758 : vector<1x8x16xf32> to vector<8x16xf32>
      %c24_i32_545 = arith.constant 24 : i32
      %1760 = arith.addi %4, %c24_i32_545 : i32
      %c1_i32_546 = arith.constant 1 : i32
      %1761 = arith.addi %1760, %c1_i32_546 : i32
      %1762 = arith.index_cast %1761 : i32 to index
      %1763 = memref.load %arg2[%1762] : memref<288xf32, #tpu.memory_space<smem>>
      %1764 = vector.broadcast %1763 : f32 to vector<8x16xf32>
      %1765 = arith.mulf %1764, %1759 : vector<8x16xf32>
      %1766 = arith.addf %1706, %1765 : vector<8x16xf32>
      %c60_i32_547 = arith.constant 60 : i32
      %1767 = arith.addi %4, %c60_i32_547 : i32
      %c1_i32_548 = arith.constant 1 : i32
      %1768 = arith.addi %1767, %c1_i32_548 : i32
      %1769 = arith.index_cast %1768 : i32 to index
      %1770 = memref.load %arg2[%1769] : memref<288xf32, #tpu.memory_space<smem>>
      %1771 = vector.broadcast %1770 : f32 to vector<8x16xf32>
      %1772 = arith.mulf %1771, %1759 : vector<8x16xf32>
      %1773 = arith.addf %1713, %1772 : vector<8x16xf32>
      %c96_i32_549 = arith.constant 96 : i32
      %1774 = arith.addi %4, %c96_i32_549 : i32
      %c1_i32_550 = arith.constant 1 : i32
      %1775 = arith.addi %1774, %c1_i32_550 : i32
      %1776 = arith.index_cast %1775 : i32 to index
      %1777 = memref.load %arg2[%1776] : memref<288xf32, #tpu.memory_space<smem>>
      %1778 = vector.broadcast %1777 : f32 to vector<8x16xf32>
      %1779 = arith.mulf %1778, %1759 : vector<8x16xf32>
      %1780 = arith.addf %1720, %1779 : vector<8x16xf32>
      %c132_i32_551 = arith.constant 132 : i32
      %1781 = arith.addi %4, %c132_i32_551 : i32
      %c1_i32_552 = arith.constant 1 : i32
      %1782 = arith.addi %1781, %c1_i32_552 : i32
      %1783 = arith.index_cast %1782 : i32 to index
      %1784 = memref.load %arg2[%1783] : memref<288xf32, #tpu.memory_space<smem>>
      %1785 = vector.broadcast %1784 : f32 to vector<8x16xf32>
      %1786 = arith.mulf %1785, %1759 : vector<8x16xf32>
      %1787 = arith.addf %1727, %1786 : vector<8x16xf32>
      %c168_i32_553 = arith.constant 168 : i32
      %1788 = arith.addi %4, %c168_i32_553 : i32
      %c1_i32_554 = arith.constant 1 : i32
      %1789 = arith.addi %1788, %c1_i32_554 : i32
      %1790 = arith.index_cast %1789 : i32 to index
      %1791 = memref.load %arg2[%1790] : memref<288xf32, #tpu.memory_space<smem>>
      %1792 = vector.broadcast %1791 : f32 to vector<8x16xf32>
      %1793 = arith.mulf %1792, %1759 : vector<8x16xf32>
      %1794 = arith.addf %1734, %1793 : vector<8x16xf32>
      %c204_i32_555 = arith.constant 204 : i32
      %1795 = arith.addi %4, %c204_i32_555 : i32
      %c1_i32_556 = arith.constant 1 : i32
      %1796 = arith.addi %1795, %c1_i32_556 : i32
      %1797 = arith.index_cast %1796 : i32 to index
      %1798 = memref.load %arg2[%1797] : memref<288xf32, #tpu.memory_space<smem>>
      %1799 = vector.broadcast %1798 : f32 to vector<8x16xf32>
      %1800 = arith.mulf %1799, %1759 : vector<8x16xf32>
      %1801 = arith.addf %1741, %1800 : vector<8x16xf32>
      %c240_i32_557 = arith.constant 240 : i32
      %1802 = arith.addi %4, %c240_i32_557 : i32
      %c1_i32_558 = arith.constant 1 : i32
      %1803 = arith.addi %1802, %c1_i32_558 : i32
      %1804 = arith.index_cast %1803 : i32 to index
      %1805 = memref.load %arg2[%1804] : memref<288xf32, #tpu.memory_space<smem>>
      %1806 = vector.broadcast %1805 : f32 to vector<8x16xf32>
      %1807 = arith.mulf %1806, %1759 : vector<8x16xf32>
      %1808 = arith.addf %1748, %1807 : vector<8x16xf32>
      %c276_i32_559 = arith.constant 276 : i32
      %1809 = arith.addi %4, %c276_i32_559 : i32
      %c1_i32_560 = arith.constant 1 : i32
      %1810 = arith.addi %1809, %c1_i32_560 : i32
      %1811 = arith.index_cast %1810 : i32 to index
      %1812 = memref.load %arg2[%1811] : memref<288xf32, #tpu.memory_space<smem>>
      %1813 = vector.broadcast %1812 : f32 to vector<8x16xf32>
      %1814 = arith.mulf %1813, %1759 : vector<8x16xf32>
      %1815 = arith.addf %1755, %1814 : vector<8x16xf32>
      %c2_i32_561 = arith.constant 2 : i32
      %1816 = arith.addi %247, %c2_i32_561 : i32
      %c2_562 = arith.constant 2 : index
      %1817 = arith.index_cast %1816 : i32 to index
      %c2_563 = arith.constant 2 : index
      %1818 = vector.load %arg7[%c2_562, %1817, %c2_563] : memref<4x18x18xf32, #tpu.memory_space<vmem>>, vector<1x8x16xf32>
      %1819 = vector.shape_cast %1818 : vector<1x8x16xf32> to vector<8x16xf32>
      %c24_i32_564 = arith.constant 24 : i32
      %1820 = arith.addi %4, %c24_i32_564 : i32
      %c2_i32_565 = arith.constant 2 : i32
      %1821 = arith.addi %1820, %c2_i32_565 : i32
      %1822 = arith.index_cast %1821 : i32 to index
      %1823 = memref.load %arg2[%1822] : memref<288xf32, #tpu.memory_space<smem>>
      %1824 = vector.broadcast %1823 : f32 to vector<8x16xf32>
      %1825 = arith.mulf %1824, %1819 : vector<8x16xf32>
      %1826 = arith.addf %1766, %1825 : vector<8x16xf32>
      %c60_i32_566 = arith.constant 60 : i32
      %1827 = arith.addi %4, %c60_i32_566 : i32
      %c2_i32_567 = arith.constant 2 : i32
      %1828 = arith.addi %1827, %c2_i32_567 : i32
      %1829 = arith.index_cast %1828 : i32 to index
      %1830 = memref.load %arg2[%1829] : memref<288xf32, #tpu.memory_space<smem>>
      %1831 = vector.broadcast %1830 : f32 to vector<8x16xf32>
      %1832 = arith.mulf %1831, %1819 : vector<8x16xf32>
      %1833 = arith.addf %1773, %1832 : vector<8x16xf32>
      %c96_i32_568 = arith.constant 96 : i32
      %1834 = arith.addi %4, %c96_i32_568 : i32
      %c2_i32_569 = arith.constant 2 : i32
      %1835 = arith.addi %1834, %c2_i32_569 : i32
      %1836 = arith.index_cast %1835 : i32 to index
      %1837 = memref.load %arg2[%1836] : memref<288xf32, #tpu.memory_space<smem>>
      %1838 = vector.broadcast %1837 : f32 to vector<8x16xf32>
      %1839 = arith.mulf %1838, %1819 : vector<8x16xf32>
      %1840 = arith.addf %1780, %1839 : vector<8x16xf32>
      %c132_i32_570 = arith.constant 132 : i32
      %1841 = arith.addi %4, %c132_i32_570 : i32
      %c2_i32_571 = arith.constant 2 : i32
      %1842 = arith.addi %1841, %c2_i32_571 : i32
      %1843 = arith.index_cast %1842 : i32 to index
      %1844 = memref.load %arg2[%1843] : memref<288xf32, #tpu.memory_space<smem>>
      %1845 = vector.broadcast %1844 : f32 to vector<8x16xf32>
      %1846 = arith.mulf %1845, %1819 : vector<8x16xf32>
      %1847 = arith.addf %1787, %1846 : vector<8x16xf32>
      %c168_i32_572 = arith.constant 168 : i32
      %1848 = arith.addi %4, %c168_i32_572 : i32
      %c2_i32_573 = arith.constant 2 : i32
      %1849 = arith.addi %1848, %c2_i32_573 : i32
      %1850 = arith.index_cast %1849 : i32 to index
      %1851 = memref.load %arg2[%1850] : memref<288xf32, #tpu.memory_space<smem>>
      %1852 = vector.broadcast %1851 : f32 to vector<8x16xf32>
      %1853 = arith.mulf %1852, %1819 : vector<8x16xf32>
      %1854 = arith.addf %1794, %1853 : vector<8x16xf32>
      %c204_i32_574 = arith.constant 204 : i32
      %1855 = arith.addi %4, %c204_i32_574 : i32
      %c2_i32_575 = arith.constant 2 : i32
      %1856 = arith.addi %1855, %c2_i32_575 : i32
      %1857 = arith.index_cast %1856 : i32 to index
      %1858 = memref.load %arg2[%1857] : memref<288xf32, #tpu.memory_space<smem>>
      %1859 = vector.broadcast %1858 : f32 to vector<8x16xf32>
      %1860 = arith.mulf %1859, %1819 : vector<8x16xf32>
      %1861 = arith.addf %1801, %1860 : vector<8x16xf32>
      %c240_i32_576 = arith.constant 240 : i32
      %1862 = arith.addi %4, %c240_i32_576 : i32
      %c2_i32_577 = arith.constant 2 : i32
      %1863 = arith.addi %1862, %c2_i32_577 : i32
      %1864 = arith.index_cast %1863 : i32 to index
      %1865 = memref.load %arg2[%1864] : memref<288xf32, #tpu.memory_space<smem>>
      %1866 = vector.broadcast %1865 : f32 to vector<8x16xf32>
      %1867 = arith.mulf %1866, %1819 : vector<8x16xf32>
      %1868 = arith.addf %1808, %1867 : vector<8x16xf32>
      %c276_i32_578 = arith.constant 276 : i32
      %1869 = arith.addi %4, %c276_i32_578 : i32
      %c2_i32_579 = arith.constant 2 : i32
      %1870 = arith.addi %1869, %c2_i32_579 : i32
      %1871 = arith.index_cast %1870 : i32 to index
      %1872 = memref.load %arg2[%1871] : memref<288xf32, #tpu.memory_space<smem>>
      %1873 = vector.broadcast %1872 : f32 to vector<8x16xf32>
      %1874 = arith.mulf %1873, %1819 : vector<8x16xf32>
      %1875 = arith.addf %1815, %1874 : vector<8x16xf32>
      %c0_i32_580 = arith.constant 0 : i32
      %1876 = arith.addi %247, %c0_i32_580 : i32
      %c3_581 = arith.constant 3 : index
      %1877 = arith.index_cast %1876 : i32 to index
      %c0_582 = arith.constant 0 : index
      %1878 = vector.load %arg7[%c3_581, %1877, %c0_582] : memref<4x18x18xf32, #tpu.memory_space<vmem>>, vector<1x8x16xf32>
      %1879 = vector.shape_cast %1878 : vector<1x8x16xf32> to vector<8x16xf32>
      %c27_i32 = arith.constant 27 : i32
      %1880 = arith.addi %4, %c27_i32 : i32
      %c0_i32_583 = arith.constant 0 : i32
      %1881 = arith.addi %1880, %c0_i32_583 : i32
      %1882 = arith.index_cast %1881 : i32 to index
      %1883 = memref.load %arg2[%1882] : memref<288xf32, #tpu.memory_space<smem>>
      %1884 = vector.broadcast %1883 : f32 to vector<8x16xf32>
      %1885 = arith.mulf %1884, %1879 : vector<8x16xf32>
      %1886 = arith.addf %1826, %1885 : vector<8x16xf32>
      %c63_i32 = arith.constant 63 : i32
      %1887 = arith.addi %4, %c63_i32 : i32
      %c0_i32_584 = arith.constant 0 : i32
      %1888 = arith.addi %1887, %c0_i32_584 : i32
      %1889 = arith.index_cast %1888 : i32 to index
      %1890 = memref.load %arg2[%1889] : memref<288xf32, #tpu.memory_space<smem>>
      %1891 = vector.broadcast %1890 : f32 to vector<8x16xf32>
      %1892 = arith.mulf %1891, %1879 : vector<8x16xf32>
      %1893 = arith.addf %1833, %1892 : vector<8x16xf32>
      %c99_i32 = arith.constant 99 : i32
      %1894 = arith.addi %4, %c99_i32 : i32
      %c0_i32_585 = arith.constant 0 : i32
      %1895 = arith.addi %1894, %c0_i32_585 : i32
      %1896 = arith.index_cast %1895 : i32 to index
      %1897 = memref.load %arg2[%1896] : memref<288xf32, #tpu.memory_space<smem>>
      %1898 = vector.broadcast %1897 : f32 to vector<8x16xf32>
      %1899 = arith.mulf %1898, %1879 : vector<8x16xf32>
      %1900 = arith.addf %1840, %1899 : vector<8x16xf32>
      %c135_i32 = arith.constant 135 : i32
      %1901 = arith.addi %4, %c135_i32 : i32
      %c0_i32_586 = arith.constant 0 : i32
      %1902 = arith.addi %1901, %c0_i32_586 : i32
      %1903 = arith.index_cast %1902 : i32 to index
      %1904 = memref.load %arg2[%1903] : memref<288xf32, #tpu.memory_space<smem>>
      %1905 = vector.broadcast %1904 : f32 to vector<8x16xf32>
      %1906 = arith.mulf %1905, %1879 : vector<8x16xf32>
      %1907 = arith.addf %1847, %1906 : vector<8x16xf32>
      %c171_i32 = arith.constant 171 : i32
      %1908 = arith.addi %4, %c171_i32 : i32
      %c0_i32_587 = arith.constant 0 : i32
      %1909 = arith.addi %1908, %c0_i32_587 : i32
      %1910 = arith.index_cast %1909 : i32 to index
      %1911 = memref.load %arg2[%1910] : memref<288xf32, #tpu.memory_space<smem>>
      %1912 = vector.broadcast %1911 : f32 to vector<8x16xf32>
      %1913 = arith.mulf %1912, %1879 : vector<8x16xf32>
      %1914 = arith.addf %1854, %1913 : vector<8x16xf32>
      %c207_i32 = arith.constant 207 : i32
      %1915 = arith.addi %4, %c207_i32 : i32
      %c0_i32_588 = arith.constant 0 : i32
      %1916 = arith.addi %1915, %c0_i32_588 : i32
      %1917 = arith.index_cast %1916 : i32 to index
      %1918 = memref.load %arg2[%1917] : memref<288xf32, #tpu.memory_space<smem>>
      %1919 = vector.broadcast %1918 : f32 to vector<8x16xf32>
      %1920 = arith.mulf %1919, %1879 : vector<8x16xf32>
      %1921 = arith.addf %1861, %1920 : vector<8x16xf32>
      %c243_i32 = arith.constant 243 : i32
      %1922 = arith.addi %4, %c243_i32 : i32
      %c0_i32_589 = arith.constant 0 : i32
      %1923 = arith.addi %1922, %c0_i32_589 : i32
      %1924 = arith.index_cast %1923 : i32 to index
      %1925 = memref.load %arg2[%1924] : memref<288xf32, #tpu.memory_space<smem>>
      %1926 = vector.broadcast %1925 : f32 to vector<8x16xf32>
      %1927 = arith.mulf %1926, %1879 : vector<8x16xf32>
      %1928 = arith.addf %1868, %1927 : vector<8x16xf32>
      %c279_i32 = arith.constant 279 : i32
      %1929 = arith.addi %4, %c279_i32 : i32
      %c0_i32_590 = arith.constant 0 : i32
      %1930 = arith.addi %1929, %c0_i32_590 : i32
      %1931 = arith.index_cast %1930 : i32 to index
      %1932 = memref.load %arg2[%1931] : memref<288xf32, #tpu.memory_space<smem>>
      %1933 = vector.broadcast %1932 : f32 to vector<8x16xf32>
      %1934 = arith.mulf %1933, %1879 : vector<8x16xf32>
      %1935 = arith.addf %1875, %1934 : vector<8x16xf32>
      %c0_i32_591 = arith.constant 0 : i32
      %1936 = arith.addi %247, %c0_i32_591 : i32
      %c3_592 = arith.constant 3 : index
      %1937 = arith.index_cast %1936 : i32 to index
      %c1_593 = arith.constant 1 : index
      %1938 = vector.load %arg7[%c3_592, %1937, %c1_593] : memref<4x18x18xf32, #tpu.memory_space<vmem>>, vector<1x8x16xf32>
      %1939 = vector.shape_cast %1938 : vector<1x8x16xf32> to vector<8x16xf32>
      %c27_i32_594 = arith.constant 27 : i32
      %1940 = arith.addi %4, %c27_i32_594 : i32
      %c1_i32_595 = arith.constant 1 : i32
      %1941 = arith.addi %1940, %c1_i32_595 : i32
      %1942 = arith.index_cast %1941 : i32 to index
      %1943 = memref.load %arg2[%1942] : memref<288xf32, #tpu.memory_space<smem>>
      %1944 = vector.broadcast %1943 : f32 to vector<8x16xf32>
      %1945 = arith.mulf %1944, %1939 : vector<8x16xf32>
      %1946 = arith.addf %1886, %1945 : vector<8x16xf32>
      %c63_i32_596 = arith.constant 63 : i32
      %1947 = arith.addi %4, %c63_i32_596 : i32
      %c1_i32_597 = arith.constant 1 : i32
      %1948 = arith.addi %1947, %c1_i32_597 : i32
      %1949 = arith.index_cast %1948 : i32 to index
      %1950 = memref.load %arg2[%1949] : memref<288xf32, #tpu.memory_space<smem>>
      %1951 = vector.broadcast %1950 : f32 to vector<8x16xf32>
      %1952 = arith.mulf %1951, %1939 : vector<8x16xf32>
      %1953 = arith.addf %1893, %1952 : vector<8x16xf32>
      %c99_i32_598 = arith.constant 99 : i32
      %1954 = arith.addi %4, %c99_i32_598 : i32
      %c1_i32_599 = arith.constant 1 : i32
      %1955 = arith.addi %1954, %c1_i32_599 : i32
      %1956 = arith.index_cast %1955 : i32 to index
      %1957 = memref.load %arg2[%1956] : memref<288xf32, #tpu.memory_space<smem>>
      %1958 = vector.broadcast %1957 : f32 to vector<8x16xf32>
      %1959 = arith.mulf %1958, %1939 : vector<8x16xf32>
      %1960 = arith.addf %1900, %1959 : vector<8x16xf32>
      %c135_i32_600 = arith.constant 135 : i32
      %1961 = arith.addi %4, %c135_i32_600 : i32
      %c1_i32_601 = arith.constant 1 : i32
      %1962 = arith.addi %1961, %c1_i32_601 : i32
      %1963 = arith.index_cast %1962 : i32 to index
      %1964 = memref.load %arg2[%1963] : memref<288xf32, #tpu.memory_space<smem>>
      %1965 = vector.broadcast %1964 : f32 to vector<8x16xf32>
      %1966 = arith.mulf %1965, %1939 : vector<8x16xf32>
      %1967 = arith.addf %1907, %1966 : vector<8x16xf32>
      %c171_i32_602 = arith.constant 171 : i32
      %1968 = arith.addi %4, %c171_i32_602 : i32
      %c1_i32_603 = arith.constant 1 : i32
      %1969 = arith.addi %1968, %c1_i32_603 : i32
      %1970 = arith.index_cast %1969 : i32 to index
      %1971 = memref.load %arg2[%1970] : memref<288xf32, #tpu.memory_space<smem>>
      %1972 = vector.broadcast %1971 : f32 to vector<8x16xf32>
      %1973 = arith.mulf %1972, %1939 : vector<8x16xf32>
      %1974 = arith.addf %1914, %1973 : vector<8x16xf32>
      %c207_i32_604 = arith.constant 207 : i32
      %1975 = arith.addi %4, %c207_i32_604 : i32
      %c1_i32_605 = arith.constant 1 : i32
      %1976 = arith.addi %1975, %c1_i32_605 : i32
      %1977 = arith.index_cast %1976 : i32 to index
      %1978 = memref.load %arg2[%1977] : memref<288xf32, #tpu.memory_space<smem>>
      %1979 = vector.broadcast %1978 : f32 to vector<8x16xf32>
      %1980 = arith.mulf %1979, %1939 : vector<8x16xf32>
      %1981 = arith.addf %1921, %1980 : vector<8x16xf32>
      %c243_i32_606 = arith.constant 243 : i32
      %1982 = arith.addi %4, %c243_i32_606 : i32
      %c1_i32_607 = arith.constant 1 : i32
      %1983 = arith.addi %1982, %c1_i32_607 : i32
      %1984 = arith.index_cast %1983 : i32 to index
      %1985 = memref.load %arg2[%1984] : memref<288xf32, #tpu.memory_space<smem>>
      %1986 = vector.broadcast %1985 : f32 to vector<8x16xf32>
      %1987 = arith.mulf %1986, %1939 : vector<8x16xf32>
      %1988 = arith.addf %1928, %1987 : vector<8x16xf32>
      %c279_i32_608 = arith.constant 279 : i32
      %1989 = arith.addi %4, %c279_i32_608 : i32
      %c1_i32_609 = arith.constant 1 : i32
      %1990 = arith.addi %1989, %c1_i32_609 : i32
      %1991 = arith.index_cast %1990 : i32 to index
      %1992 = memref.load %arg2[%1991] : memref<288xf32, #tpu.memory_space<smem>>
      %1993 = vector.broadcast %1992 : f32 to vector<8x16xf32>
      %1994 = arith.mulf %1993, %1939 : vector<8x16xf32>
      %1995 = arith.addf %1935, %1994 : vector<8x16xf32>
      %c0_i32_610 = arith.constant 0 : i32
      %1996 = arith.addi %247, %c0_i32_610 : i32
      %c3_611 = arith.constant 3 : index
      %1997 = arith.index_cast %1996 : i32 to index
      %c2_612 = arith.constant 2 : index
      %1998 = vector.load %arg7[%c3_611, %1997, %c2_612] : memref<4x18x18xf32, #tpu.memory_space<vmem>>, vector<1x8x16xf32>
      %1999 = vector.shape_cast %1998 : vector<1x8x16xf32> to vector<8x16xf32>
      %c27_i32_613 = arith.constant 27 : i32
      %2000 = arith.addi %4, %c27_i32_613 : i32
      %c2_i32_614 = arith.constant 2 : i32
      %2001 = arith.addi %2000, %c2_i32_614 : i32
      %2002 = arith.index_cast %2001 : i32 to index
      %2003 = memref.load %arg2[%2002] : memref<288xf32, #tpu.memory_space<smem>>
      %2004 = vector.broadcast %2003 : f32 to vector<8x16xf32>
      %2005 = arith.mulf %2004, %1999 : vector<8x16xf32>
      %2006 = arith.addf %1946, %2005 : vector<8x16xf32>
      %c63_i32_615 = arith.constant 63 : i32
      %2007 = arith.addi %4, %c63_i32_615 : i32
      %c2_i32_616 = arith.constant 2 : i32
      %2008 = arith.addi %2007, %c2_i32_616 : i32
      %2009 = arith.index_cast %2008 : i32 to index
      %2010 = memref.load %arg2[%2009] : memref<288xf32, #tpu.memory_space<smem>>
      %2011 = vector.broadcast %2010 : f32 to vector<8x16xf32>
      %2012 = arith.mulf %2011, %1999 : vector<8x16xf32>
      %2013 = arith.addf %1953, %2012 : vector<8x16xf32>
      %c99_i32_617 = arith.constant 99 : i32
      %2014 = arith.addi %4, %c99_i32_617 : i32
      %c2_i32_618 = arith.constant 2 : i32
      %2015 = arith.addi %2014, %c2_i32_618 : i32
      %2016 = arith.index_cast %2015 : i32 to index
      %2017 = memref.load %arg2[%2016] : memref<288xf32, #tpu.memory_space<smem>>
      %2018 = vector.broadcast %2017 : f32 to vector<8x16xf32>
      %2019 = arith.mulf %2018, %1999 : vector<8x16xf32>
      %2020 = arith.addf %1960, %2019 : vector<8x16xf32>
      %c135_i32_619 = arith.constant 135 : i32
      %2021 = arith.addi %4, %c135_i32_619 : i32
      %c2_i32_620 = arith.constant 2 : i32
      %2022 = arith.addi %2021, %c2_i32_620 : i32
      %2023 = arith.index_cast %2022 : i32 to index
      %2024 = memref.load %arg2[%2023] : memref<288xf32, #tpu.memory_space<smem>>
      %2025 = vector.broadcast %2024 : f32 to vector<8x16xf32>
      %2026 = arith.mulf %2025, %1999 : vector<8x16xf32>
      %2027 = arith.addf %1967, %2026 : vector<8x16xf32>
      %c171_i32_621 = arith.constant 171 : i32
      %2028 = arith.addi %4, %c171_i32_621 : i32
      %c2_i32_622 = arith.constant 2 : i32
      %2029 = arith.addi %2028, %c2_i32_622 : i32
      %2030 = arith.index_cast %2029 : i32 to index
      %2031 = memref.load %arg2[%2030] : memref<288xf32, #tpu.memory_space<smem>>
      %2032 = vector.broadcast %2031 : f32 to vector<8x16xf32>
      %2033 = arith.mulf %2032, %1999 : vector<8x16xf32>
      %2034 = arith.addf %1974, %2033 : vector<8x16xf32>
      %c207_i32_623 = arith.constant 207 : i32
      %2035 = arith.addi %4, %c207_i32_623 : i32
      %c2_i32_624 = arith.constant 2 : i32
      %2036 = arith.addi %2035, %c2_i32_624 : i32
      %2037 = arith.index_cast %2036 : i32 to index
      %2038 = memref.load %arg2[%2037] : memref<288xf32, #tpu.memory_space<smem>>
      %2039 = vector.broadcast %2038 : f32 to vector<8x16xf32>
      %2040 = arith.mulf %2039, %1999 : vector<8x16xf32>
      %2041 = arith.addf %1981, %2040 : vector<8x16xf32>
      %c243_i32_625 = arith.constant 243 : i32
      %2042 = arith.addi %4, %c243_i32_625 : i32
      %c2_i32_626 = arith.constant 2 : i32
      %2043 = arith.addi %2042, %c2_i32_626 : i32
      %2044 = arith.index_cast %2043 : i32 to index
      %2045 = memref.load %arg2[%2044] : memref<288xf32, #tpu.memory_space<smem>>
      %2046 = vector.broadcast %2045 : f32 to vector<8x16xf32>
      %2047 = arith.mulf %2046, %1999 : vector<8x16xf32>
      %2048 = arith.addf %1988, %2047 : vector<8x16xf32>
      %c279_i32_627 = arith.constant 279 : i32
      %2049 = arith.addi %4, %c279_i32_627 : i32
      %c2_i32_628 = arith.constant 2 : i32
      %2050 = arith.addi %2049, %c2_i32_628 : i32
      %2051 = arith.index_cast %2050 : i32 to index
      %2052 = memref.load %arg2[%2051] : memref<288xf32, #tpu.memory_space<smem>>
      %2053 = vector.broadcast %2052 : f32 to vector<8x16xf32>
      %2054 = arith.mulf %2053, %1999 : vector<8x16xf32>
      %2055 = arith.addf %1995, %2054 : vector<8x16xf32>
      %c1_i32_629 = arith.constant 1 : i32
      %2056 = arith.addi %247, %c1_i32_629 : i32
      %c3_630 = arith.constant 3 : index
      %2057 = arith.index_cast %2056 : i32 to index
      %c0_631 = arith.constant 0 : index
      %2058 = vector.load %arg7[%c3_630, %2057, %c0_631] : memref<4x18x18xf32, #tpu.memory_space<vmem>>, vector<1x8x16xf32>
      %2059 = vector.shape_cast %2058 : vector<1x8x16xf32> to vector<8x16xf32>
      %c30_i32 = arith.constant 30 : i32
      %2060 = arith.addi %4, %c30_i32 : i32
      %c0_i32_632 = arith.constant 0 : i32
      %2061 = arith.addi %2060, %c0_i32_632 : i32
      %2062 = arith.index_cast %2061 : i32 to index
      %2063 = memref.load %arg2[%2062] : memref<288xf32, #tpu.memory_space<smem>>
      %2064 = vector.broadcast %2063 : f32 to vector<8x16xf32>
      %2065 = arith.mulf %2064, %2059 : vector<8x16xf32>
      %2066 = arith.addf %2006, %2065 : vector<8x16xf32>
      %c66_i32 = arith.constant 66 : i32
      %2067 = arith.addi %4, %c66_i32 : i32
      %c0_i32_633 = arith.constant 0 : i32
      %2068 = arith.addi %2067, %c0_i32_633 : i32
      %2069 = arith.index_cast %2068 : i32 to index
      %2070 = memref.load %arg2[%2069] : memref<288xf32, #tpu.memory_space<smem>>
      %2071 = vector.broadcast %2070 : f32 to vector<8x16xf32>
      %2072 = arith.mulf %2071, %2059 : vector<8x16xf32>
      %2073 = arith.addf %2013, %2072 : vector<8x16xf32>
      %c102_i32 = arith.constant 102 : i32
      %2074 = arith.addi %4, %c102_i32 : i32
      %c0_i32_634 = arith.constant 0 : i32
      %2075 = arith.addi %2074, %c0_i32_634 : i32
      %2076 = arith.index_cast %2075 : i32 to index
      %2077 = memref.load %arg2[%2076] : memref<288xf32, #tpu.memory_space<smem>>
      %2078 = vector.broadcast %2077 : f32 to vector<8x16xf32>
      %2079 = arith.mulf %2078, %2059 : vector<8x16xf32>
      %2080 = arith.addf %2020, %2079 : vector<8x16xf32>
      %c138_i32 = arith.constant 138 : i32
      %2081 = arith.addi %4, %c138_i32 : i32
      %c0_i32_635 = arith.constant 0 : i32
      %2082 = arith.addi %2081, %c0_i32_635 : i32
      %2083 = arith.index_cast %2082 : i32 to index
      %2084 = memref.load %arg2[%2083] : memref<288xf32, #tpu.memory_space<smem>>
      %2085 = vector.broadcast %2084 : f32 to vector<8x16xf32>
      %2086 = arith.mulf %2085, %2059 : vector<8x16xf32>
      %2087 = arith.addf %2027, %2086 : vector<8x16xf32>
      %c174_i32 = arith.constant 174 : i32
      %2088 = arith.addi %4, %c174_i32 : i32
      %c0_i32_636 = arith.constant 0 : i32
      %2089 = arith.addi %2088, %c0_i32_636 : i32
      %2090 = arith.index_cast %2089 : i32 to index
      %2091 = memref.load %arg2[%2090] : memref<288xf32, #tpu.memory_space<smem>>
      %2092 = vector.broadcast %2091 : f32 to vector<8x16xf32>
      %2093 = arith.mulf %2092, %2059 : vector<8x16xf32>
      %2094 = arith.addf %2034, %2093 : vector<8x16xf32>
      %c210_i32 = arith.constant 210 : i32
      %2095 = arith.addi %4, %c210_i32 : i32
      %c0_i32_637 = arith.constant 0 : i32
      %2096 = arith.addi %2095, %c0_i32_637 : i32
      %2097 = arith.index_cast %2096 : i32 to index
      %2098 = memref.load %arg2[%2097] : memref<288xf32, #tpu.memory_space<smem>>
      %2099 = vector.broadcast %2098 : f32 to vector<8x16xf32>
      %2100 = arith.mulf %2099, %2059 : vector<8x16xf32>
      %2101 = arith.addf %2041, %2100 : vector<8x16xf32>
      %c246_i32 = arith.constant 246 : i32
      %2102 = arith.addi %4, %c246_i32 : i32
      %c0_i32_638 = arith.constant 0 : i32
      %2103 = arith.addi %2102, %c0_i32_638 : i32
      %2104 = arith.index_cast %2103 : i32 to index
      %2105 = memref.load %arg2[%2104] : memref<288xf32, #tpu.memory_space<smem>>
      %2106 = vector.broadcast %2105 : f32 to vector<8x16xf32>
      %2107 = arith.mulf %2106, %2059 : vector<8x16xf32>
      %2108 = arith.addf %2048, %2107 : vector<8x16xf32>
      %c282_i32 = arith.constant 282 : i32
      %2109 = arith.addi %4, %c282_i32 : i32
      %c0_i32_639 = arith.constant 0 : i32
      %2110 = arith.addi %2109, %c0_i32_639 : i32
      %2111 = arith.index_cast %2110 : i32 to index
      %2112 = memref.load %arg2[%2111] : memref<288xf32, #tpu.memory_space<smem>>
      %2113 = vector.broadcast %2112 : f32 to vector<8x16xf32>
      %2114 = arith.mulf %2113, %2059 : vector<8x16xf32>
      %2115 = arith.addf %2055, %2114 : vector<8x16xf32>
      %c1_i32_640 = arith.constant 1 : i32
      %2116 = arith.addi %247, %c1_i32_640 : i32
      %c3_641 = arith.constant 3 : index
      %2117 = arith.index_cast %2116 : i32 to index
      %c1_642 = arith.constant 1 : index
      %2118 = vector.load %arg7[%c3_641, %2117, %c1_642] : memref<4x18x18xf32, #tpu.memory_space<vmem>>, vector<1x8x16xf32>
      %2119 = vector.shape_cast %2118 : vector<1x8x16xf32> to vector<8x16xf32>
      %c30_i32_643 = arith.constant 30 : i32
      %2120 = arith.addi %4, %c30_i32_643 : i32
      %c1_i32_644 = arith.constant 1 : i32
      %2121 = arith.addi %2120, %c1_i32_644 : i32
      %2122 = arith.index_cast %2121 : i32 to index
      %2123 = memref.load %arg2[%2122] : memref<288xf32, #tpu.memory_space<smem>>
      %2124 = vector.broadcast %2123 : f32 to vector<8x16xf32>
      %2125 = arith.mulf %2124, %2119 : vector<8x16xf32>
      %2126 = arith.addf %2066, %2125 : vector<8x16xf32>
      %c66_i32_645 = arith.constant 66 : i32
      %2127 = arith.addi %4, %c66_i32_645 : i32
      %c1_i32_646 = arith.constant 1 : i32
      %2128 = arith.addi %2127, %c1_i32_646 : i32
      %2129 = arith.index_cast %2128 : i32 to index
      %2130 = memref.load %arg2[%2129] : memref<288xf32, #tpu.memory_space<smem>>
      %2131 = vector.broadcast %2130 : f32 to vector<8x16xf32>
      %2132 = arith.mulf %2131, %2119 : vector<8x16xf32>
      %2133 = arith.addf %2073, %2132 : vector<8x16xf32>
      %c102_i32_647 = arith.constant 102 : i32
      %2134 = arith.addi %4, %c102_i32_647 : i32
      %c1_i32_648 = arith.constant 1 : i32
      %2135 = arith.addi %2134, %c1_i32_648 : i32
      %2136 = arith.index_cast %2135 : i32 to index
      %2137 = memref.load %arg2[%2136] : memref<288xf32, #tpu.memory_space<smem>>
      %2138 = vector.broadcast %2137 : f32 to vector<8x16xf32>
      %2139 = arith.mulf %2138, %2119 : vector<8x16xf32>
      %2140 = arith.addf %2080, %2139 : vector<8x16xf32>
      %c138_i32_649 = arith.constant 138 : i32
      %2141 = arith.addi %4, %c138_i32_649 : i32
      %c1_i32_650 = arith.constant 1 : i32
      %2142 = arith.addi %2141, %c1_i32_650 : i32
      %2143 = arith.index_cast %2142 : i32 to index
      %2144 = memref.load %arg2[%2143] : memref<288xf32, #tpu.memory_space<smem>>
      %2145 = vector.broadcast %2144 : f32 to vector<8x16xf32>
      %2146 = arith.mulf %2145, %2119 : vector<8x16xf32>
      %2147 = arith.addf %2087, %2146 : vector<8x16xf32>
      %c174_i32_651 = arith.constant 174 : i32
      %2148 = arith.addi %4, %c174_i32_651 : i32
      %c1_i32_652 = arith.constant 1 : i32
      %2149 = arith.addi %2148, %c1_i32_652 : i32
      %2150 = arith.index_cast %2149 : i32 to index
      %2151 = memref.load %arg2[%2150] : memref<288xf32, #tpu.memory_space<smem>>
      %2152 = vector.broadcast %2151 : f32 to vector<8x16xf32>
      %2153 = arith.mulf %2152, %2119 : vector<8x16xf32>
      %2154 = arith.addf %2094, %2153 : vector<8x16xf32>
      %c210_i32_653 = arith.constant 210 : i32
      %2155 = arith.addi %4, %c210_i32_653 : i32
      %c1_i32_654 = arith.constant 1 : i32
      %2156 = arith.addi %2155, %c1_i32_654 : i32
      %2157 = arith.index_cast %2156 : i32 to index
      %2158 = memref.load %arg2[%2157] : memref<288xf32, #tpu.memory_space<smem>>
      %2159 = vector.broadcast %2158 : f32 to vector<8x16xf32>
      %2160 = arith.mulf %2159, %2119 : vector<8x16xf32>
      %2161 = arith.addf %2101, %2160 : vector<8x16xf32>
      %c246_i32_655 = arith.constant 246 : i32
      %2162 = arith.addi %4, %c246_i32_655 : i32
      %c1_i32_656 = arith.constant 1 : i32
      %2163 = arith.addi %2162, %c1_i32_656 : i32
      %2164 = arith.index_cast %2163 : i32 to index
      %2165 = memref.load %arg2[%2164] : memref<288xf32, #tpu.memory_space<smem>>
      %2166 = vector.broadcast %2165 : f32 to vector<8x16xf32>
      %2167 = arith.mulf %2166, %2119 : vector<8x16xf32>
      %2168 = arith.addf %2108, %2167 : vector<8x16xf32>
      %c282_i32_657 = arith.constant 282 : i32
      %2169 = arith.addi %4, %c282_i32_657 : i32
      %c1_i32_658 = arith.constant 1 : i32
      %2170 = arith.addi %2169, %c1_i32_658 : i32
      %2171 = arith.index_cast %2170 : i32 to index
      %2172 = memref.load %arg2[%2171] : memref<288xf32, #tpu.memory_space<smem>>
      %2173 = vector.broadcast %2172 : f32 to vector<8x16xf32>
      %2174 = arith.mulf %2173, %2119 : vector<8x16xf32>
      %2175 = arith.addf %2115, %2174 : vector<8x16xf32>
      %c1_i32_659 = arith.constant 1 : i32
      %2176 = arith.addi %247, %c1_i32_659 : i32
      %c3_660 = arith.constant 3 : index
      %2177 = arith.index_cast %2176 : i32 to index
      %c2_661 = arith.constant 2 : index
      %2178 = vector.load %arg7[%c3_660, %2177, %c2_661] : memref<4x18x18xf32, #tpu.memory_space<vmem>>, vector<1x8x16xf32>
      %2179 = vector.shape_cast %2178 : vector<1x8x16xf32> to vector<8x16xf32>
      %c30_i32_662 = arith.constant 30 : i32
      %2180 = arith.addi %4, %c30_i32_662 : i32
      %c2_i32_663 = arith.constant 2 : i32
      %2181 = arith.addi %2180, %c2_i32_663 : i32
      %2182 = arith.index_cast %2181 : i32 to index
      %2183 = memref.load %arg2[%2182] : memref<288xf32, #tpu.memory_space<smem>>
      %2184 = vector.broadcast %2183 : f32 to vector<8x16xf32>
      %2185 = arith.mulf %2184, %2179 : vector<8x16xf32>
      %2186 = arith.addf %2126, %2185 : vector<8x16xf32>
      %c66_i32_664 = arith.constant 66 : i32
      %2187 = arith.addi %4, %c66_i32_664 : i32
      %c2_i32_665 = arith.constant 2 : i32
      %2188 = arith.addi %2187, %c2_i32_665 : i32
      %2189 = arith.index_cast %2188 : i32 to index
      %2190 = memref.load %arg2[%2189] : memref<288xf32, #tpu.memory_space<smem>>
      %2191 = vector.broadcast %2190 : f32 to vector<8x16xf32>
      %2192 = arith.mulf %2191, %2179 : vector<8x16xf32>
      %2193 = arith.addf %2133, %2192 : vector<8x16xf32>
      %c102_i32_666 = arith.constant 102 : i32
      %2194 = arith.addi %4, %c102_i32_666 : i32
      %c2_i32_667 = arith.constant 2 : i32
      %2195 = arith.addi %2194, %c2_i32_667 : i32
      %2196 = arith.index_cast %2195 : i32 to index
      %2197 = memref.load %arg2[%2196] : memref<288xf32, #tpu.memory_space<smem>>
      %2198 = vector.broadcast %2197 : f32 to vector<8x16xf32>
      %2199 = arith.mulf %2198, %2179 : vector<8x16xf32>
      %2200 = arith.addf %2140, %2199 : vector<8x16xf32>
      %c138_i32_668 = arith.constant 138 : i32
      %2201 = arith.addi %4, %c138_i32_668 : i32
      %c2_i32_669 = arith.constant 2 : i32
      %2202 = arith.addi %2201, %c2_i32_669 : i32
      %2203 = arith.index_cast %2202 : i32 to index
      %2204 = memref.load %arg2[%2203] : memref<288xf32, #tpu.memory_space<smem>>
      %2205 = vector.broadcast %2204 : f32 to vector<8x16xf32>
      %2206 = arith.mulf %2205, %2179 : vector<8x16xf32>
      %2207 = arith.addf %2147, %2206 : vector<8x16xf32>
      %c174_i32_670 = arith.constant 174 : i32
      %2208 = arith.addi %4, %c174_i32_670 : i32
      %c2_i32_671 = arith.constant 2 : i32
      %2209 = arith.addi %2208, %c2_i32_671 : i32
      %2210 = arith.index_cast %2209 : i32 to index
      %2211 = memref.load %arg2[%2210] : memref<288xf32, #tpu.memory_space<smem>>
      %2212 = vector.broadcast %2211 : f32 to vector<8x16xf32>
      %2213 = arith.mulf %2212, %2179 : vector<8x16xf32>
      %2214 = arith.addf %2154, %2213 : vector<8x16xf32>
      %c210_i32_672 = arith.constant 210 : i32
      %2215 = arith.addi %4, %c210_i32_672 : i32
      %c2_i32_673 = arith.constant 2 : i32
      %2216 = arith.addi %2215, %c2_i32_673 : i32
      %2217 = arith.index_cast %2216 : i32 to index
      %2218 = memref.load %arg2[%2217] : memref<288xf32, #tpu.memory_space<smem>>
      %2219 = vector.broadcast %2218 : f32 to vector<8x16xf32>
      %2220 = arith.mulf %2219, %2179 : vector<8x16xf32>
      %2221 = arith.addf %2161, %2220 : vector<8x16xf32>
      %c246_i32_674 = arith.constant 246 : i32
      %2222 = arith.addi %4, %c246_i32_674 : i32
      %c2_i32_675 = arith.constant 2 : i32
      %2223 = arith.addi %2222, %c2_i32_675 : i32
      %2224 = arith.index_cast %2223 : i32 to index
      %2225 = memref.load %arg2[%2224] : memref<288xf32, #tpu.memory_space<smem>>
      %2226 = vector.broadcast %2225 : f32 to vector<8x16xf32>
      %2227 = arith.mulf %2226, %2179 : vector<8x16xf32>
      %2228 = arith.addf %2168, %2227 : vector<8x16xf32>
      %c282_i32_676 = arith.constant 282 : i32
      %2229 = arith.addi %4, %c282_i32_676 : i32
      %c2_i32_677 = arith.constant 2 : i32
      %2230 = arith.addi %2229, %c2_i32_677 : i32
      %2231 = arith.index_cast %2230 : i32 to index
      %2232 = memref.load %arg2[%2231] : memref<288xf32, #tpu.memory_space<smem>>
      %2233 = vector.broadcast %2232 : f32 to vector<8x16xf32>
      %2234 = arith.mulf %2233, %2179 : vector<8x16xf32>
      %2235 = arith.addf %2175, %2234 : vector<8x16xf32>
      %c2_i32_678 = arith.constant 2 : i32
      %2236 = arith.addi %247, %c2_i32_678 : i32
      %c3_679 = arith.constant 3 : index
      %2237 = arith.index_cast %2236 : i32 to index
      %c0_680 = arith.constant 0 : index
      %2238 = vector.load %arg7[%c3_679, %2237, %c0_680] : memref<4x18x18xf32, #tpu.memory_space<vmem>>, vector<1x8x16xf32>
      %2239 = vector.shape_cast %2238 : vector<1x8x16xf32> to vector<8x16xf32>
      %c33_i32 = arith.constant 33 : i32
      %2240 = arith.addi %4, %c33_i32 : i32
      %c0_i32_681 = arith.constant 0 : i32
      %2241 = arith.addi %2240, %c0_i32_681 : i32
      %2242 = arith.index_cast %2241 : i32 to index
      %2243 = memref.load %arg2[%2242] : memref<288xf32, #tpu.memory_space<smem>>
      %2244 = vector.broadcast %2243 : f32 to vector<8x16xf32>
      %2245 = arith.mulf %2244, %2239 : vector<8x16xf32>
      %2246 = arith.addf %2186, %2245 : vector<8x16xf32>
      %c69_i32 = arith.constant 69 : i32
      %2247 = arith.addi %4, %c69_i32 : i32
      %c0_i32_682 = arith.constant 0 : i32
      %2248 = arith.addi %2247, %c0_i32_682 : i32
      %2249 = arith.index_cast %2248 : i32 to index
      %2250 = memref.load %arg2[%2249] : memref<288xf32, #tpu.memory_space<smem>>
      %2251 = vector.broadcast %2250 : f32 to vector<8x16xf32>
      %2252 = arith.mulf %2251, %2239 : vector<8x16xf32>
      %2253 = arith.addf %2193, %2252 : vector<8x16xf32>
      %c105_i32 = arith.constant 105 : i32
      %2254 = arith.addi %4, %c105_i32 : i32
      %c0_i32_683 = arith.constant 0 : i32
      %2255 = arith.addi %2254, %c0_i32_683 : i32
      %2256 = arith.index_cast %2255 : i32 to index
      %2257 = memref.load %arg2[%2256] : memref<288xf32, #tpu.memory_space<smem>>
      %2258 = vector.broadcast %2257 : f32 to vector<8x16xf32>
      %2259 = arith.mulf %2258, %2239 : vector<8x16xf32>
      %2260 = arith.addf %2200, %2259 : vector<8x16xf32>
      %c141_i32 = arith.constant 141 : i32
      %2261 = arith.addi %4, %c141_i32 : i32
      %c0_i32_684 = arith.constant 0 : i32
      %2262 = arith.addi %2261, %c0_i32_684 : i32
      %2263 = arith.index_cast %2262 : i32 to index
      %2264 = memref.load %arg2[%2263] : memref<288xf32, #tpu.memory_space<smem>>
      %2265 = vector.broadcast %2264 : f32 to vector<8x16xf32>
      %2266 = arith.mulf %2265, %2239 : vector<8x16xf32>
      %2267 = arith.addf %2207, %2266 : vector<8x16xf32>
      %c177_i32 = arith.constant 177 : i32
      %2268 = arith.addi %4, %c177_i32 : i32
      %c0_i32_685 = arith.constant 0 : i32
      %2269 = arith.addi %2268, %c0_i32_685 : i32
      %2270 = arith.index_cast %2269 : i32 to index
      %2271 = memref.load %arg2[%2270] : memref<288xf32, #tpu.memory_space<smem>>
      %2272 = vector.broadcast %2271 : f32 to vector<8x16xf32>
      %2273 = arith.mulf %2272, %2239 : vector<8x16xf32>
      %2274 = arith.addf %2214, %2273 : vector<8x16xf32>
      %c213_i32 = arith.constant 213 : i32
      %2275 = arith.addi %4, %c213_i32 : i32
      %c0_i32_686 = arith.constant 0 : i32
      %2276 = arith.addi %2275, %c0_i32_686 : i32
      %2277 = arith.index_cast %2276 : i32 to index
      %2278 = memref.load %arg2[%2277] : memref<288xf32, #tpu.memory_space<smem>>
      %2279 = vector.broadcast %2278 : f32 to vector<8x16xf32>
      %2280 = arith.mulf %2279, %2239 : vector<8x16xf32>
      %2281 = arith.addf %2221, %2280 : vector<8x16xf32>
      %c249_i32 = arith.constant 249 : i32
      %2282 = arith.addi %4, %c249_i32 : i32
      %c0_i32_687 = arith.constant 0 : i32
      %2283 = arith.addi %2282, %c0_i32_687 : i32
      %2284 = arith.index_cast %2283 : i32 to index
      %2285 = memref.load %arg2[%2284] : memref<288xf32, #tpu.memory_space<smem>>
      %2286 = vector.broadcast %2285 : f32 to vector<8x16xf32>
      %2287 = arith.mulf %2286, %2239 : vector<8x16xf32>
      %2288 = arith.addf %2228, %2287 : vector<8x16xf32>
      %c285_i32 = arith.constant 285 : i32
      %2289 = arith.addi %4, %c285_i32 : i32
      %c0_i32_688 = arith.constant 0 : i32
      %2290 = arith.addi %2289, %c0_i32_688 : i32
      %2291 = arith.index_cast %2290 : i32 to index
      %2292 = memref.load %arg2[%2291] : memref<288xf32, #tpu.memory_space<smem>>
      %2293 = vector.broadcast %2292 : f32 to vector<8x16xf32>
      %2294 = arith.mulf %2293, %2239 : vector<8x16xf32>
      %2295 = arith.addf %2235, %2294 : vector<8x16xf32>
      %c2_i32_689 = arith.constant 2 : i32
      %2296 = arith.addi %247, %c2_i32_689 : i32
      %c3_690 = arith.constant 3 : index
      %2297 = arith.index_cast %2296 : i32 to index
      %c1_691 = arith.constant 1 : index
      %2298 = vector.load %arg7[%c3_690, %2297, %c1_691] : memref<4x18x18xf32, #tpu.memory_space<vmem>>, vector<1x8x16xf32>
      %2299 = vector.shape_cast %2298 : vector<1x8x16xf32> to vector<8x16xf32>
      %c33_i32_692 = arith.constant 33 : i32
      %2300 = arith.addi %4, %c33_i32_692 : i32
      %c1_i32_693 = arith.constant 1 : i32
      %2301 = arith.addi %2300, %c1_i32_693 : i32
      %2302 = arith.index_cast %2301 : i32 to index
      %2303 = memref.load %arg2[%2302] : memref<288xf32, #tpu.memory_space<smem>>
      %2304 = vector.broadcast %2303 : f32 to vector<8x16xf32>
      %2305 = arith.mulf %2304, %2299 : vector<8x16xf32>
      %2306 = arith.addf %2246, %2305 : vector<8x16xf32>
      %c69_i32_694 = arith.constant 69 : i32
      %2307 = arith.addi %4, %c69_i32_694 : i32
      %c1_i32_695 = arith.constant 1 : i32
      %2308 = arith.addi %2307, %c1_i32_695 : i32
      %2309 = arith.index_cast %2308 : i32 to index
      %2310 = memref.load %arg2[%2309] : memref<288xf32, #tpu.memory_space<smem>>
      %2311 = vector.broadcast %2310 : f32 to vector<8x16xf32>
      %2312 = arith.mulf %2311, %2299 : vector<8x16xf32>
      %2313 = arith.addf %2253, %2312 : vector<8x16xf32>
      %c105_i32_696 = arith.constant 105 : i32
      %2314 = arith.addi %4, %c105_i32_696 : i32
      %c1_i32_697 = arith.constant 1 : i32
      %2315 = arith.addi %2314, %c1_i32_697 : i32
      %2316 = arith.index_cast %2315 : i32 to index
      %2317 = memref.load %arg2[%2316] : memref<288xf32, #tpu.memory_space<smem>>
      %2318 = vector.broadcast %2317 : f32 to vector<8x16xf32>
      %2319 = arith.mulf %2318, %2299 : vector<8x16xf32>
      %2320 = arith.addf %2260, %2319 : vector<8x16xf32>
      %c141_i32_698 = arith.constant 141 : i32
      %2321 = arith.addi %4, %c141_i32_698 : i32
      %c1_i32_699 = arith.constant 1 : i32
      %2322 = arith.addi %2321, %c1_i32_699 : i32
      %2323 = arith.index_cast %2322 : i32 to index
      %2324 = memref.load %arg2[%2323] : memref<288xf32, #tpu.memory_space<smem>>
      %2325 = vector.broadcast %2324 : f32 to vector<8x16xf32>
      %2326 = arith.mulf %2325, %2299 : vector<8x16xf32>
      %2327 = arith.addf %2267, %2326 : vector<8x16xf32>
      %c177_i32_700 = arith.constant 177 : i32
      %2328 = arith.addi %4, %c177_i32_700 : i32
      %c1_i32_701 = arith.constant 1 : i32
      %2329 = arith.addi %2328, %c1_i32_701 : i32
      %2330 = arith.index_cast %2329 : i32 to index
      %2331 = memref.load %arg2[%2330] : memref<288xf32, #tpu.memory_space<smem>>
      %2332 = vector.broadcast %2331 : f32 to vector<8x16xf32>
      %2333 = arith.mulf %2332, %2299 : vector<8x16xf32>
      %2334 = arith.addf %2274, %2333 : vector<8x16xf32>
      %c213_i32_702 = arith.constant 213 : i32
      %2335 = arith.addi %4, %c213_i32_702 : i32
      %c1_i32_703 = arith.constant 1 : i32
      %2336 = arith.addi %2335, %c1_i32_703 : i32
      %2337 = arith.index_cast %2336 : i32 to index
      %2338 = memref.load %arg2[%2337] : memref<288xf32, #tpu.memory_space<smem>>
      %2339 = vector.broadcast %2338 : f32 to vector<8x16xf32>
      %2340 = arith.mulf %2339, %2299 : vector<8x16xf32>
      %2341 = arith.addf %2281, %2340 : vector<8x16xf32>
      %c249_i32_704 = arith.constant 249 : i32
      %2342 = arith.addi %4, %c249_i32_704 : i32
      %c1_i32_705 = arith.constant 1 : i32
      %2343 = arith.addi %2342, %c1_i32_705 : i32
      %2344 = arith.index_cast %2343 : i32 to index
      %2345 = memref.load %arg2[%2344] : memref<288xf32, #tpu.memory_space<smem>>
      %2346 = vector.broadcast %2345 : f32 to vector<8x16xf32>
      %2347 = arith.mulf %2346, %2299 : vector<8x16xf32>
      %2348 = arith.addf %2288, %2347 : vector<8x16xf32>
      %c285_i32_706 = arith.constant 285 : i32
      %2349 = arith.addi %4, %c285_i32_706 : i32
      %c1_i32_707 = arith.constant 1 : i32
      %2350 = arith.addi %2349, %c1_i32_707 : i32
      %2351 = arith.index_cast %2350 : i32 to index
      %2352 = memref.load %arg2[%2351] : memref<288xf32, #tpu.memory_space<smem>>
      %2353 = vector.broadcast %2352 : f32 to vector<8x16xf32>
      %2354 = arith.mulf %2353, %2299 : vector<8x16xf32>
      %2355 = arith.addf %2295, %2354 : vector<8x16xf32>
      %c2_i32_708 = arith.constant 2 : i32
      %2356 = arith.addi %247, %c2_i32_708 : i32
      %c3_709 = arith.constant 3 : index
      %2357 = arith.index_cast %2356 : i32 to index
      %c2_710 = arith.constant 2 : index
      %2358 = vector.load %arg7[%c3_709, %2357, %c2_710] : memref<4x18x18xf32, #tpu.memory_space<vmem>>, vector<1x8x16xf32>
      %2359 = vector.shape_cast %2358 : vector<1x8x16xf32> to vector<8x16xf32>
      %c33_i32_711 = arith.constant 33 : i32
      %2360 = arith.addi %4, %c33_i32_711 : i32
      %c2_i32_712 = arith.constant 2 : i32
      %2361 = arith.addi %2360, %c2_i32_712 : i32
      %2362 = arith.index_cast %2361 : i32 to index
      %2363 = memref.load %arg2[%2362] : memref<288xf32, #tpu.memory_space<smem>>
      %2364 = vector.broadcast %2363 : f32 to vector<8x16xf32>
      %2365 = arith.mulf %2364, %2359 : vector<8x16xf32>
      %2366 = arith.addf %2306, %2365 : vector<8x16xf32>
      %c69_i32_713 = arith.constant 69 : i32
      %2367 = arith.addi %4, %c69_i32_713 : i32
      %c2_i32_714 = arith.constant 2 : i32
      %2368 = arith.addi %2367, %c2_i32_714 : i32
      %2369 = arith.index_cast %2368 : i32 to index
      %2370 = memref.load %arg2[%2369] : memref<288xf32, #tpu.memory_space<smem>>
      %2371 = vector.broadcast %2370 : f32 to vector<8x16xf32>
      %2372 = arith.mulf %2371, %2359 : vector<8x16xf32>
      %2373 = arith.addf %2313, %2372 : vector<8x16xf32>
      %c105_i32_715 = arith.constant 105 : i32
      %2374 = arith.addi %4, %c105_i32_715 : i32
      %c2_i32_716 = arith.constant 2 : i32
      %2375 = arith.addi %2374, %c2_i32_716 : i32
      %2376 = arith.index_cast %2375 : i32 to index
      %2377 = memref.load %arg2[%2376] : memref<288xf32, #tpu.memory_space<smem>>
      %2378 = vector.broadcast %2377 : f32 to vector<8x16xf32>
      %2379 = arith.mulf %2378, %2359 : vector<8x16xf32>
      %2380 = arith.addf %2320, %2379 : vector<8x16xf32>
      %c141_i32_717 = arith.constant 141 : i32
      %2381 = arith.addi %4, %c141_i32_717 : i32
      %c2_i32_718 = arith.constant 2 : i32
      %2382 = arith.addi %2381, %c2_i32_718 : i32
      %2383 = arith.index_cast %2382 : i32 to index
      %2384 = memref.load %arg2[%2383] : memref<288xf32, #tpu.memory_space<smem>>
      %2385 = vector.broadcast %2384 : f32 to vector<8x16xf32>
      %2386 = arith.mulf %2385, %2359 : vector<8x16xf32>
      %2387 = arith.addf %2327, %2386 : vector<8x16xf32>
      %c177_i32_719 = arith.constant 177 : i32
      %2388 = arith.addi %4, %c177_i32_719 : i32
      %c2_i32_720 = arith.constant 2 : i32
      %2389 = arith.addi %2388, %c2_i32_720 : i32
      %2390 = arith.index_cast %2389 : i32 to index
      %2391 = memref.load %arg2[%2390] : memref<288xf32, #tpu.memory_space<smem>>
      %2392 = vector.broadcast %2391 : f32 to vector<8x16xf32>
      %2393 = arith.mulf %2392, %2359 : vector<8x16xf32>
      %2394 = arith.addf %2334, %2393 : vector<8x16xf32>
      %c213_i32_721 = arith.constant 213 : i32
      %2395 = arith.addi %4, %c213_i32_721 : i32
      %c2_i32_722 = arith.constant 2 : i32
      %2396 = arith.addi %2395, %c2_i32_722 : i32
      %2397 = arith.index_cast %2396 : i32 to index
      %2398 = memref.load %arg2[%2397] : memref<288xf32, #tpu.memory_space<smem>>
      %2399 = vector.broadcast %2398 : f32 to vector<8x16xf32>
      %2400 = arith.mulf %2399, %2359 : vector<8x16xf32>
      %2401 = arith.addf %2341, %2400 : vector<8x16xf32>
      %c249_i32_723 = arith.constant 249 : i32
      %2402 = arith.addi %4, %c249_i32_723 : i32
      %c2_i32_724 = arith.constant 2 : i32
      %2403 = arith.addi %2402, %c2_i32_724 : i32
      %2404 = arith.index_cast %2403 : i32 to index
      %2405 = memref.load %arg2[%2404] : memref<288xf32, #tpu.memory_space<smem>>
      %2406 = vector.broadcast %2405 : f32 to vector<8x16xf32>
      %2407 = arith.mulf %2406, %2359 : vector<8x16xf32>
      %2408 = arith.addf %2348, %2407 : vector<8x16xf32>
      %c285_i32_725 = arith.constant 285 : i32
      %2409 = arith.addi %4, %c285_i32_725 : i32
      %c2_i32_726 = arith.constant 2 : i32
      %2410 = arith.addi %2409, %c2_i32_726 : i32
      %2411 = arith.index_cast %2410 : i32 to index
      %2412 = memref.load %arg2[%2411] : memref<288xf32, #tpu.memory_space<smem>>
      %2413 = vector.broadcast %2412 : f32 to vector<8x16xf32>
      %2414 = arith.mulf %2413, %2359 : vector<8x16xf32>
      %2415 = arith.addf %2355, %2414 : vector<8x16xf32>
      %c0_i32_727 = arith.constant 0 : i32
      %2416 = arith.addi %5, %c0_i32_727 : i32
      %c0_728 = arith.constant 0 : index
      %2417 = arith.index_cast %2416 : i32 to index
      %2418 = memref.load %arg3[%c0_728, %2417] : memref<4x8xf32, #tpu.memory_space<smem>>
      %2419 = vector.broadcast %2418 : f32 to vector<8x16xf32>
      %2420 = arith.addf %2366, %2419 : vector<8x16xf32>
      %cst_729 = arith.constant 0.000000e+00 : f32
      %2421 = vector.broadcast %cst_729 : f32 to vector<8x16xf32>
      %2422 = arith.cmpf ogt, %2420, %2421 : vector<8x16xf32>
      %cst_730 = arith.constant 0.00999999977 : f32
      %2423 = vector.broadcast %cst_730 : f32 to vector<8x16xf32>
      %2424 = arith.mulf %2423, %2420 : vector<8x16xf32>
      %2425 = arith.select %2422, %2420, %2424 : vector<8x16xi1>, vector<8x16xf32>
      %2426 = vector.shape_cast %2425 : vector<8x16xf32> to vector<4x2x16xf32>
      %2427 = vector.extract_strided_slice %2426 {offsets = [0, 0, 0], sizes = [4, 1, 16], strides = [1, 1, 1]} : vector<4x2x16xf32> to vector<4x1x16xf32>
      %2428 = vector.shape_cast %2427 : vector<4x1x16xf32> to vector<4x16xf32>
      %2429 = vector.extract_strided_slice %2426 {offsets = [0, 1, 0], sizes = [4, 1, 16], strides = [1, 1, 1]} : vector<4x2x16xf32> to vector<4x1x16xf32>
      %2430 = vector.shape_cast %2429 : vector<4x1x16xf32> to vector<4x16xf32>
      %2431 = arith.maximumf %2428, %2430 : vector<4x16xf32>
      %c1_i32_731 = arith.constant 1 : i32
      %2432 = arith.addi %5, %c1_i32_731 : i32
      %c0_732 = arith.constant 0 : index
      %2433 = arith.index_cast %2432 : i32 to index
      %2434 = memref.load %arg3[%c0_732, %2433] : memref<4x8xf32, #tpu.memory_space<smem>>
      %2435 = vector.broadcast %2434 : f32 to vector<8x16xf32>
      %2436 = arith.addf %2373, %2435 : vector<8x16xf32>
      %cst_733 = arith.constant 0.000000e+00 : f32
      %2437 = vector.broadcast %cst_733 : f32 to vector<8x16xf32>
      %2438 = arith.cmpf ogt, %2436, %2437 : vector<8x16xf32>
      %cst_734 = arith.constant 0.00999999977 : f32
      %2439 = vector.broadcast %cst_734 : f32 to vector<8x16xf32>
      %2440 = arith.mulf %2439, %2436 : vector<8x16xf32>
      %2441 = arith.select %2438, %2436, %2440 : vector<8x16xi1>, vector<8x16xf32>
      %2442 = vector.shape_cast %2441 : vector<8x16xf32> to vector<4x2x16xf32>
      %2443 = vector.extract_strided_slice %2442 {offsets = [0, 0, 0], sizes = [4, 1, 16], strides = [1, 1, 1]} : vector<4x2x16xf32> to vector<4x1x16xf32>
      %2444 = vector.shape_cast %2443 : vector<4x1x16xf32> to vector<4x16xf32>
      %2445 = vector.extract_strided_slice %2442 {offsets = [0, 1, 0], sizes = [4, 1, 16], strides = [1, 1, 1]} : vector<4x2x16xf32> to vector<4x1x16xf32>
      %2446 = vector.shape_cast %2445 : vector<4x1x16xf32> to vector<4x16xf32>
      %2447 = arith.maximumf %2444, %2446 : vector<4x16xf32>
      %c2_i32_735 = arith.constant 2 : i32
      %2448 = arith.addi %5, %c2_i32_735 : i32
      %c0_736 = arith.constant 0 : index
      %2449 = arith.index_cast %2448 : i32 to index
      %2450 = memref.load %arg3[%c0_736, %2449] : memref<4x8xf32, #tpu.memory_space<smem>>
      %2451 = vector.broadcast %2450 : f32 to vector<8x16xf32>
      %2452 = arith.addf %2380, %2451 : vector<8x16xf32>
      %cst_737 = arith.constant 0.000000e+00 : f32
      %2453 = vector.broadcast %cst_737 : f32 to vector<8x16xf32>
      %2454 = arith.cmpf ogt, %2452, %2453 : vector<8x16xf32>
      %cst_738 = arith.constant 0.00999999977 : f32
      %2455 = vector.broadcast %cst_738 : f32 to vector<8x16xf32>
      %2456 = arith.mulf %2455, %2452 : vector<8x16xf32>
      %2457 = arith.select %2454, %2452, %2456 : vector<8x16xi1>, vector<8x16xf32>
      %2458 = vector.shape_cast %2457 : vector<8x16xf32> to vector<4x2x16xf32>
      %2459 = vector.extract_strided_slice %2458 {offsets = [0, 0, 0], sizes = [4, 1, 16], strides = [1, 1, 1]} : vector<4x2x16xf32> to vector<4x1x16xf32>
      %2460 = vector.shape_cast %2459 : vector<4x1x16xf32> to vector<4x16xf32>
      %2461 = vector.extract_strided_slice %2458 {offsets = [0, 1, 0], sizes = [4, 1, 16], strides = [1, 1, 1]} : vector<4x2x16xf32> to vector<4x1x16xf32>
      %2462 = vector.shape_cast %2461 : vector<4x1x16xf32> to vector<4x16xf32>
      %2463 = arith.maximumf %2460, %2462 : vector<4x16xf32>
      %c3_i32_739 = arith.constant 3 : i32
      %2464 = arith.addi %5, %c3_i32_739 : i32
      %c0_740 = arith.constant 0 : index
      %2465 = arith.index_cast %2464 : i32 to index
      %2466 = memref.load %arg3[%c0_740, %2465] : memref<4x8xf32, #tpu.memory_space<smem>>
      %2467 = vector.broadcast %2466 : f32 to vector<8x16xf32>
      %2468 = arith.addf %2387, %2467 : vector<8x16xf32>
      %cst_741 = arith.constant 0.000000e+00 : f32
      %2469 = vector.broadcast %cst_741 : f32 to vector<8x16xf32>
      %2470 = arith.cmpf ogt, %2468, %2469 : vector<8x16xf32>
      %cst_742 = arith.constant 0.00999999977 : f32
      %2471 = vector.broadcast %cst_742 : f32 to vector<8x16xf32>
      %2472 = arith.mulf %2471, %2468 : vector<8x16xf32>
      %2473 = arith.select %2470, %2468, %2472 : vector<8x16xi1>, vector<8x16xf32>
      %2474 = vector.shape_cast %2473 : vector<8x16xf32> to vector<4x2x16xf32>
      %2475 = vector.extract_strided_slice %2474 {offsets = [0, 0, 0], sizes = [4, 1, 16], strides = [1, 1, 1]} : vector<4x2x16xf32> to vector<4x1x16xf32>
      %2476 = vector.shape_cast %2475 : vector<4x1x16xf32> to vector<4x16xf32>
      %2477 = vector.extract_strided_slice %2474 {offsets = [0, 1, 0], sizes = [4, 1, 16], strides = [1, 1, 1]} : vector<4x2x16xf32> to vector<4x1x16xf32>
      %2478 = vector.shape_cast %2477 : vector<4x1x16xf32> to vector<4x16xf32>
      %2479 = arith.maximumf %2476, %2478 : vector<4x16xf32>
      %c4_i32_743 = arith.constant 4 : i32
      %2480 = arith.addi %5, %c4_i32_743 : i32
      %c0_744 = arith.constant 0 : index
      %2481 = arith.index_cast %2480 : i32 to index
      %2482 = memref.load %arg3[%c0_744, %2481] : memref<4x8xf32, #tpu.memory_space<smem>>
      %2483 = vector.broadcast %2482 : f32 to vector<8x16xf32>
      %2484 = arith.addf %2394, %2483 : vector<8x16xf32>
      %cst_745 = arith.constant 0.000000e+00 : f32
      %2485 = vector.broadcast %cst_745 : f32 to vector<8x16xf32>
      %2486 = arith.cmpf ogt, %2484, %2485 : vector<8x16xf32>
      %cst_746 = arith.constant 0.00999999977 : f32
      %2487 = vector.broadcast %cst_746 : f32 to vector<8x16xf32>
      %2488 = arith.mulf %2487, %2484 : vector<8x16xf32>
      %2489 = arith.select %2486, %2484, %2488 : vector<8x16xi1>, vector<8x16xf32>
      %2490 = vector.shape_cast %2489 : vector<8x16xf32> to vector<4x2x16xf32>
      %2491 = vector.extract_strided_slice %2490 {offsets = [0, 0, 0], sizes = [4, 1, 16], strides = [1, 1, 1]} : vector<4x2x16xf32> to vector<4x1x16xf32>
      %2492 = vector.shape_cast %2491 : vector<4x1x16xf32> to vector<4x16xf32>
      %2493 = vector.extract_strided_slice %2490 {offsets = [0, 1, 0], sizes = [4, 1, 16], strides = [1, 1, 1]} : vector<4x2x16xf32> to vector<4x1x16xf32>
      %2494 = vector.shape_cast %2493 : vector<4x1x16xf32> to vector<4x16xf32>
      %2495 = arith.maximumf %2492, %2494 : vector<4x16xf32>
      %c5_i32_747 = arith.constant 5 : i32
      %2496 = arith.addi %5, %c5_i32_747 : i32
      %c0_748 = arith.constant 0 : index
      %2497 = arith.index_cast %2496 : i32 to index
      %2498 = memref.load %arg3[%c0_748, %2497] : memref<4x8xf32, #tpu.memory_space<smem>>
      %2499 = vector.broadcast %2498 : f32 to vector<8x16xf32>
      %2500 = arith.addf %2401, %2499 : vector<8x16xf32>
      %cst_749 = arith.constant 0.000000e+00 : f32
      %2501 = vector.broadcast %cst_749 : f32 to vector<8x16xf32>
      %2502 = arith.cmpf ogt, %2500, %2501 : vector<8x16xf32>
      %cst_750 = arith.constant 0.00999999977 : f32
      %2503 = vector.broadcast %cst_750 : f32 to vector<8x16xf32>
      %2504 = arith.mulf %2503, %2500 : vector<8x16xf32>
      %2505 = arith.select %2502, %2500, %2504 : vector<8x16xi1>, vector<8x16xf32>
      %2506 = vector.shape_cast %2505 : vector<8x16xf32> to vector<4x2x16xf32>
      %2507 = vector.extract_strided_slice %2506 {offsets = [0, 0, 0], sizes = [4, 1, 16], strides = [1, 1, 1]} : vector<4x2x16xf32> to vector<4x1x16xf32>
      %2508 = vector.shape_cast %2507 : vector<4x1x16xf32> to vector<4x16xf32>
      %2509 = vector.extract_strided_slice %2506 {offsets = [0, 1, 0], sizes = [4, 1, 16], strides = [1, 1, 1]} : vector<4x2x16xf32> to vector<4x1x16xf32>
      %2510 = vector.shape_cast %2509 : vector<4x1x16xf32> to vector<4x16xf32>
      %2511 = arith.maximumf %2508, %2510 : vector<4x16xf32>
      %c6_i32_751 = arith.constant 6 : i32
      %2512 = arith.addi %5, %c6_i32_751 : i32
      %c0_752 = arith.constant 0 : index
      %2513 = arith.index_cast %2512 : i32 to index
      %2514 = memref.load %arg3[%c0_752, %2513] : memref<4x8xf32, #tpu.memory_space<smem>>
      %2515 = vector.broadcast %2514 : f32 to vector<8x16xf32>
      %2516 = arith.addf %2408, %2515 : vector<8x16xf32>
      %cst_753 = arith.constant 0.000000e+00 : f32
      %2517 = vector.broadcast %cst_753 : f32 to vector<8x16xf32>
      %2518 = arith.cmpf ogt, %2516, %2517 : vector<8x16xf32>
      %cst_754 = arith.constant 0.00999999977 : f32
      %2519 = vector.broadcast %cst_754 : f32 to vector<8x16xf32>
      %2520 = arith.mulf %2519, %2516 : vector<8x16xf32>
      %2521 = arith.select %2518, %2516, %2520 : vector<8x16xi1>, vector<8x16xf32>
      %2522 = vector.shape_cast %2521 : vector<8x16xf32> to vector<4x2x16xf32>
      %2523 = vector.extract_strided_slice %2522 {offsets = [0, 0, 0], sizes = [4, 1, 16], strides = [1, 1, 1]} : vector<4x2x16xf32> to vector<4x1x16xf32>
      %2524 = vector.shape_cast %2523 : vector<4x1x16xf32> to vector<4x16xf32>
      %2525 = vector.extract_strided_slice %2522 {offsets = [0, 1, 0], sizes = [4, 1, 16], strides = [1, 1, 1]} : vector<4x2x16xf32> to vector<4x1x16xf32>
      %2526 = vector.shape_cast %2525 : vector<4x1x16xf32> to vector<4x16xf32>
      %2527 = arith.maximumf %2524, %2526 : vector<4x16xf32>
      %c7_i32_755 = arith.constant 7 : i32
      %2528 = arith.addi %5, %c7_i32_755 : i32
      %c0_756 = arith.constant 0 : index
      %2529 = arith.index_cast %2528 : i32 to index
      %2530 = memref.load %arg3[%c0_756, %2529] : memref<4x8xf32, #tpu.memory_space<smem>>
      %2531 = vector.broadcast %2530 : f32 to vector<8x16xf32>
      %2532 = arith.addf %2415, %2531 : vector<8x16xf32>
      %cst_757 = arith.constant 0.000000e+00 : f32
      %2533 = vector.broadcast %cst_757 : f32 to vector<8x16xf32>
      %2534 = arith.cmpf ogt, %2532, %2533 : vector<8x16xf32>
      %cst_758 = arith.constant 0.00999999977 : f32
      %2535 = vector.broadcast %cst_758 : f32 to vector<8x16xf32>
      %2536 = arith.mulf %2535, %2532 : vector<8x16xf32>
      %2537 = arith.select %2534, %2532, %2536 : vector<8x16xi1>, vector<8x16xf32>
      %2538 = vector.shape_cast %2537 : vector<8x16xf32> to vector<4x2x16xf32>
      %2539 = vector.extract_strided_slice %2538 {offsets = [0, 0, 0], sizes = [4, 1, 16], strides = [1, 1, 1]} : vector<4x2x16xf32> to vector<4x1x16xf32>
      %2540 = vector.shape_cast %2539 : vector<4x1x16xf32> to vector<4x16xf32>
      %2541 = vector.extract_strided_slice %2538 {offsets = [0, 1, 0], sizes = [4, 1, 16], strides = [1, 1, 1]} : vector<4x2x16xf32> to vector<4x1x16xf32>
      %2542 = vector.shape_cast %2541 : vector<4x1x16xf32> to vector<4x16xf32>
      %2543 = arith.maximumf %2540, %2542 : vector<4x16xf32>
      %2544 = tpu.concatenate %2431, %2447, %2463, %2479, %2495, %2511, %2527, %2543 in 0 : vector<4x16xf32>, vector<4x16xf32>, vector<4x16xf32>, vector<4x16xf32>, vector<4x16xf32>, vector<4x16xf32>, vector<4x16xf32>, vector<4x16xf32> -> vector<32x16xf32>
      %c15_i32_759 = arith.constant 15 : i32
      %2545 = tpu.dynamic_rotate %2544 by %c15_i32_759 dim 1 : vector<32x16xf32>, i32 -> vector<32x16xf32>
      %2546 = arith.maximumf %2544, %2545 : vector<32x16xf32>
      %cst_760 = arith.constant dense<0.000000e+00> : vector<32x8xf32>
      %2547 = tpu.matmul %2546, %3, %cst_760 {dimension_numbers = #tpu.dot_dimension_numbers<[1], [0], [0], [1], [0, 0, 1, 1], [], []>} : vector<32x16xf32>, vector<16x8xf32>, vector<32x8xf32> -> vector<32x8xf32>
      %c4_i32_761 = arith.constant 4 : i32
      %2548 = arith.muli %arg8, %c4_i32_761 : i32
      %2549 = tpu.assume_multiple %2548, 4 : i32
      %2550 = vector.extract_strided_slice %2547 {offsets = [0, 0], sizes = [4, 8], strides = [1, 1]} : vector<32x8xf32> to vector<4x8xf32>
      %c0_762 = arith.constant 0 : index
      %c0_763 = arith.constant 0 : index
      %2551 = arith.index_cast %2549 : i32 to index
      %c0_764 = arith.constant 0 : index
      %2552 = vector.load %arg6[%c0_762, %c0_763, %2551, %c0_764] : memref<1x8x8x8xf32, #tpu.memory_space<vmem>>, vector<1x1x4x8xf32>
      %2553 = vector.shape_cast %2552 : vector<1x1x4x8xf32> to vector<4x8xf32>
      %2554 = vector.shape_cast %2550 : vector<4x8xf32> to vector<1x1x4x8xf32>
      tpu.vector_store %arg6[%c0_762, %c0_763, %2551, %c0_764], %2554 {strides = array<i32>} : memref<1x8x8x8xf32, #tpu.memory_space<vmem>>, vector<1x1x4x8xf32>,
      %2555 = vector.extract_strided_slice %2547 {offsets = [4, 0], sizes = [4, 8], strides = [1, 1]} : vector<32x8xf32> to vector<4x8xf32>
      %c0_765 = arith.constant 0 : index
      %c1_766 = arith.constant 1 : index
      %2556 = arith.index_cast %2549 : i32 to index
      %c0_767 = arith.constant 0 : index
      %2557 = vector.load %arg6[%c0_765, %c1_766, %2556, %c0_767] : memref<1x8x8x8xf32, #tpu.memory_space<vmem>>, vector<1x1x4x8xf32>
      %2558 = vector.shape_cast %2557 : vector<1x1x4x8xf32> to vector<4x8xf32>
      %2559 = vector.shape_cast %2555 : vector<4x8xf32> to vector<1x1x4x8xf32>
      tpu.vector_store %arg6[%c0_765, %c1_766, %2556, %c0_767], %2559 {strides = array<i32>} : memref<1x8x8x8xf32, #tpu.memory_space<vmem>>, vector<1x1x4x8xf32>,
      %2560 = vector.extract_strided_slice %2547 {offsets = [8, 0], sizes = [4, 8], strides = [1, 1]} : vector<32x8xf32> to vector<4x8xf32>
      %c0_768 = arith.constant 0 : index
      %c2_769 = arith.constant 2 : index
      %2561 = arith.index_cast %2549 : i32 to index
      %c0_770 = arith.constant 0 : index
      %2562 = vector.load %arg6[%c0_768, %c2_769, %2561, %c0_770] : memref<1x8x8x8xf32, #tpu.memory_space<vmem>>, vector<1x1x4x8xf32>
      %2563 = vector.shape_cast %2562 : vector<1x1x4x8xf32> to vector<4x8xf32>
      %2564 = vector.shape_cast %2560 : vector<4x8xf32> to vector<1x1x4x8xf32>
      tpu.vector_store %arg6[%c0_768, %c2_769, %2561, %c0_770], %2564 {strides = array<i32>} : memref<1x8x8x8xf32, #tpu.memory_space<vmem>>, vector<1x1x4x8xf32>,
      %2565 = vector.extract_strided_slice %2547 {offsets = [12, 0], sizes = [4, 8], strides = [1, 1]} : vector<32x8xf32> to vector<4x8xf32>
      %c0_771 = arith.constant 0 : index
      %c3_772 = arith.constant 3 : index
      %2566 = arith.index_cast %2549 : i32 to index
      %c0_773 = arith.constant 0 : index
      %2567 = vector.load %arg6[%c0_771, %c3_772, %2566, %c0_773] : memref<1x8x8x8xf32, #tpu.memory_space<vmem>>, vector<1x1x4x8xf32>
      %2568 = vector.shape_cast %2567 : vector<1x1x4x8xf32> to vector<4x8xf32>
      %2569 = vector.shape_cast %2565 : vector<4x8xf32> to vector<1x1x4x8xf32>
      tpu.vector_store %arg6[%c0_771, %c3_772, %2566, %c0_773], %2569 {strides = array<i32>} : memref<1x8x8x8xf32, #tpu.memory_space<vmem>>, vector<1x1x4x8xf32>,
      %2570 = vector.extract_strided_slice %2547 {offsets = [16, 0], sizes = [4, 8], strides = [1, 1]} : vector<32x8xf32> to vector<4x8xf32>
      %c0_774 = arith.constant 0 : index
      %c4_775 = arith.constant 4 : index
      %2571 = arith.index_cast %2549 : i32 to index
      %c0_776 = arith.constant 0 : index
      %2572 = vector.load %arg6[%c0_774, %c4_775, %2571, %c0_776] : memref<1x8x8x8xf32, #tpu.memory_space<vmem>>, vector<1x1x4x8xf32>
      %2573 = vector.shape_cast %2572 : vector<1x1x4x8xf32> to vector<4x8xf32>
      %2574 = vector.shape_cast %2570 : vector<4x8xf32> to vector<1x1x4x8xf32>
      tpu.vector_store %arg6[%c0_774, %c4_775, %2571, %c0_776], %2574 {strides = array<i32>} : memref<1x8x8x8xf32, #tpu.memory_space<vmem>>, vector<1x1x4x8xf32>,
      %2575 = vector.extract_strided_slice %2547 {offsets = [20, 0], sizes = [4, 8], strides = [1, 1]} : vector<32x8xf32> to vector<4x8xf32>
      %c0_777 = arith.constant 0 : index
      %c5_778 = arith.constant 5 : index
      %2576 = arith.index_cast %2549 : i32 to index
      %c0_779 = arith.constant 0 : index
      %2577 = vector.load %arg6[%c0_777, %c5_778, %2576, %c0_779] : memref<1x8x8x8xf32, #tpu.memory_space<vmem>>, vector<1x1x4x8xf32>
      %2578 = vector.shape_cast %2577 : vector<1x1x4x8xf32> to vector<4x8xf32>
      %2579 = vector.shape_cast %2575 : vector<4x8xf32> to vector<1x1x4x8xf32>
      tpu.vector_store %arg6[%c0_777, %c5_778, %2576, %c0_779], %2579 {strides = array<i32>} : memref<1x8x8x8xf32, #tpu.memory_space<vmem>>, vector<1x1x4x8xf32>,
      %2580 = vector.extract_strided_slice %2547 {offsets = [24, 0], sizes = [4, 8], strides = [1, 1]} : vector<32x8xf32> to vector<4x8xf32>
      %c0_780 = arith.constant 0 : index
      %c6_781 = arith.constant 6 : index
      %2581 = arith.index_cast %2549 : i32 to index
      %c0_782 = arith.constant 0 : index
      %2582 = vector.load %arg6[%c0_780, %c6_781, %2581, %c0_782] : memref<1x8x8x8xf32, #tpu.memory_space<vmem>>, vector<1x1x4x8xf32>
      %2583 = vector.shape_cast %2582 : vector<1x1x4x8xf32> to vector<4x8xf32>
      %2584 = vector.shape_cast %2580 : vector<4x8xf32> to vector<1x1x4x8xf32>
      tpu.vector_store %arg6[%c0_780, %c6_781, %2581, %c0_782], %2584 {strides = array<i32>} : memref<1x8x8x8xf32, #tpu.memory_space<vmem>>, vector<1x1x4x8xf32>,
      %2585 = vector.extract_strided_slice %2547 {offsets = [28, 0], sizes = [4, 8], strides = [1, 1]} : vector<32x8xf32> to vector<4x8xf32>
      %c0_783 = arith.constant 0 : index
      %c7_784 = arith.constant 7 : index
      %2586 = arith.index_cast %2549 : i32 to index
      %c0_785 = arith.constant 0 : index
      %2587 = vector.load %arg6[%c0_783, %c7_784, %2586, %c0_785] : memref<1x8x8x8xf32, #tpu.memory_space<vmem>>, vector<1x1x4x8xf32>
      %2588 = vector.shape_cast %2587 : vector<1x1x4x8xf32> to vector<4x8xf32>
      %2589 = vector.shape_cast %2585 : vector<4x8xf32> to vector<1x1x4x8xf32>
      tpu.vector_store %arg6[%c0_783, %c7_784, %2586, %c0_785], %2589 {strides = array<i32>} : memref<1x8x8x8xf32, #tpu.memory_space<vmem>>, vector<1x1x4x8xf32>,
    }
    %c2_i32_3 = arith.constant 2 : i32
    %c0_4 = arith.constant 0 : index
    %c0_5 = arith.constant 0 : index
    %c0_6 = arith.constant 0 : index
    %c0_7 = arith.constant 0 : index
    %7 = vector.load %arg6[%c0_4, %c0_5, %c0_6, %c0_7] : memref<1x8x8x8xf32, #tpu.memory_space<vmem>>, vector<1x1x8x8xf32>
    %8 = vector.shape_cast %7 : vector<1x1x8x8xf32> to vector<8x8xf32>
    %9 = arith.mulf %8, %8 : vector<8x8xf32>
    %10 = vector.shape_cast %9 : vector<8x8xf32> to vector<1x8x8xf32>
    %cst = arith.constant dense<0.000000e+00> : vector<1xf32>
    %11 = vector.multi_reduction <add>, %10, %cst [1, 2] : vector<1x8x8xf32> to vector<1xf32>
    %12 = vector.shape_cast %11 : vector<1xf32> to vector<1x1x1xf32>
    %13 = vector.extract %12[0, 0, 0] : f32 from vector<1x1x1xf32>
    %cst_8 = arith.constant 1.562500e-02 : f32
    %14 = arith.mulf %13, %cst_8 : f32
    %cst_9 = arith.constant 9.99999974E-6 : f32
    %15 = arith.addf %14, %cst_9 : f32
    %16 = math.rsqrt %15 : f32
    %17 = vector.broadcast %16 : f32 to vector<8x8xf32>
    %18 = arith.mulf %8, %17 : vector<8x8xf32>
    %c0_i32_10 = arith.constant 0 : i32
    %19 = arith.addi %5, %c0_i32_10 : i32
    %c1 = arith.constant 1 : index
    %20 = arith.index_cast %19 : i32 to index
    %21 = memref.load %arg3[%c1, %20] : memref<4x8xf32, #tpu.memory_space<smem>>
    %22 = vector.broadcast %21 : f32 to vector<8x8xf32>
    %23 = arith.mulf %18, %22 : vector<8x8xf32>
    %c0_i32_11 = arith.constant 0 : i32
    %24 = arith.addi %5, %c0_i32_11 : i32
    %c2 = arith.constant 2 : index
    %25 = arith.index_cast %24 : i32 to index
    %26 = memref.load %arg3[%c2, %25] : memref<4x8xf32, #tpu.memory_space<smem>>
    %27 = vector.broadcast %26 : f32 to vector<8x8xf32>
    %28 = arith.addf %23, %27 : vector<8x8xf32>
    %c0_i32_12 = arith.constant 0 : i32
    %29 = arith.addi %5, %c0_i32_12 : i32
    %c3 = arith.constant 3 : index
    %30 = arith.index_cast %29 : i32 to index
    %31 = memref.load %arg3[%c3, %30] : memref<4x8xf32, #tpu.memory_space<smem>>
    %32 = vector.broadcast %31 : f32 to vector<8x8xf32>
    %33 = arith.maximumf %28, %32 : vector<8x8xf32>
    %c0_13 = arith.constant 0 : index
    %c0_14 = arith.constant 0 : index
    %c0_15 = arith.constant 0 : index
    %c0_16 = arith.constant 0 : index
    %34 = vector.load %arg6[%c0_13, %c0_14, %c0_15, %c0_16] : memref<1x8x8x8xf32, #tpu.memory_space<vmem>>, vector<1x1x8x8xf32>
    %35 = vector.shape_cast %34 : vector<1x1x8x8xf32> to vector<8x8xf32>
    %36 = vector.shape_cast %33 : vector<8x8xf32> to vector<1x1x8x8xf32>
    tpu.vector_store %arg6[%c0_13, %c0_14, %c0_15, %c0_16], %36 {strides = array<i32>} : memref<1x8x8x8xf32, #tpu.memory_space<vmem>>, vector<1x1x8x8xf32>,
    %c0_17 = arith.constant 0 : index
    %c1_18 = arith.constant 1 : index
    %c0_19 = arith.constant 0 : index
    %c0_20 = arith.constant 0 : index
    %37 = vector.load %arg6[%c0_17, %c1_18, %c0_19, %c0_20] : memref<1x8x8x8xf32, #tpu.memory_space<vmem>>, vector<1x1x8x8xf32>
    %38 = vector.shape_cast %37 : vector<1x1x8x8xf32> to vector<8x8xf32>
    %39 = arith.mulf %38, %38 : vector<8x8xf32>
    %40 = vector.shape_cast %39 : vector<8x8xf32> to vector<1x8x8xf32>
    %cst_21 = arith.constant dense<0.000000e+00> : vector<1xf32>
    %41 = vector.multi_reduction <add>, %40, %cst_21 [1, 2] : vector<1x8x8xf32> to vector<1xf32>
    %42 = vector.shape_cast %41 : vector<1xf32> to vector<1x1x1xf32>
    %43 = vector.extract %42[0, 0, 0] : f32 from vector<1x1x1xf32>
    %cst_22 = arith.constant 1.562500e-02 : f32
    %44 = arith.mulf %43, %cst_22 : f32
    %cst_23 = arith.constant 9.99999974E-6 : f32
    %45 = arith.addf %44, %cst_23 : f32
    %46 = math.rsqrt %45 : f32
    %47 = vector.broadcast %46 : f32 to vector<8x8xf32>
    %48 = arith.mulf %38, %47 : vector<8x8xf32>
    %c1_i32_24 = arith.constant 1 : i32
    %49 = arith.addi %5, %c1_i32_24 : i32
    %c1_25 = arith.constant 1 : index
    %50 = arith.index_cast %49 : i32 to index
    %51 = memref.load %arg3[%c1_25, %50] : memref<4x8xf32, #tpu.memory_space<smem>>
    %52 = vector.broadcast %51 : f32 to vector<8x8xf32>
    %53 = arith.mulf %48, %52 : vector<8x8xf32>
    %c1_i32_26 = arith.constant 1 : i32
    %54 = arith.addi %5, %c1_i32_26 : i32
    %c2_27 = arith.constant 2 : index
    %55 = arith.index_cast %54 : i32 to index
    %56 = memref.load %arg3[%c2_27, %55] : memref<4x8xf32, #tpu.memory_space<smem>>
    %57 = vector.broadcast %56 : f32 to vector<8x8xf32>
    %58 = arith.addf %53, %57 : vector<8x8xf32>
    %c1_i32_28 = arith.constant 1 : i32
    %59 = arith.addi %5, %c1_i32_28 : i32
    %c3_29 = arith.constant 3 : index
    %60 = arith.index_cast %59 : i32 to index
    %61 = memref.load %arg3[%c3_29, %60] : memref<4x8xf32, #tpu.memory_space<smem>>
    %62 = vector.broadcast %61 : f32 to vector<8x8xf32>
    %63 = arith.maximumf %58, %62 : vector<8x8xf32>
    %c0_30 = arith.constant 0 : index
    %c1_31 = arith.constant 1 : index
    %c0_32 = arith.constant 0 : index
    %c0_33 = arith.constant 0 : index
    %64 = vector.load %arg6[%c0_30, %c1_31, %c0_32, %c0_33] : memref<1x8x8x8xf32, #tpu.memory_space<vmem>>, vector<1x1x8x8xf32>
    %65 = vector.shape_cast %64 : vector<1x1x8x8xf32> to vector<8x8xf32>
    %66 = vector.shape_cast %63 : vector<8x8xf32> to vector<1x1x8x8xf32>
    tpu.vector_store %arg6[%c0_30, %c1_31, %c0_32, %c0_33], %66 {strides = array<i32>} : memref<1x8x8x8xf32, #tpu.memory_space<vmem>>, vector<1x1x8x8xf32>,
    %c0_34 = arith.constant 0 : index
    %c2_35 = arith.constant 2 : index
    %c0_36 = arith.constant 0 : index
    %c0_37 = arith.constant 0 : index
    %67 = vector.load %arg6[%c0_34, %c2_35, %c0_36, %c0_37] : memref<1x8x8x8xf32, #tpu.memory_space<vmem>>, vector<1x1x8x8xf32>
    %68 = vector.shape_cast %67 : vector<1x1x8x8xf32> to vector<8x8xf32>
    %69 = arith.mulf %68, %68 : vector<8x8xf32>
    %70 = vector.shape_cast %69 : vector<8x8xf32> to vector<1x8x8xf32>
    %cst_38 = arith.constant dense<0.000000e+00> : vector<1xf32>
    %71 = vector.multi_reduction <add>, %70, %cst_38 [1, 2] : vector<1x8x8xf32> to vector<1xf32>
    %72 = vector.shape_cast %71 : vector<1xf32> to vector<1x1x1xf32>
    %73 = vector.extract %72[0, 0, 0] : f32 from vector<1x1x1xf32>
    %cst_39 = arith.constant 1.562500e-02 : f32
    %74 = arith.mulf %73, %cst_39 : f32
    %cst_40 = arith.constant 9.99999974E-6 : f32
    %75 = arith.addf %74, %cst_40 : f32
    %76 = math.rsqrt %75 : f32
    %77 = vector.broadcast %76 : f32 to vector<8x8xf32>
    %78 = arith.mulf %68, %77 : vector<8x8xf32>
    %c2_i32_41 = arith.constant 2 : i32
    %79 = arith.addi %5, %c2_i32_41 : i32
    %c1_42 = arith.constant 1 : index
    %80 = arith.index_cast %79 : i32 to index
    %81 = memref.load %arg3[%c1_42, %80] : memref<4x8xf32, #tpu.memory_space<smem>>
    %82 = vector.broadcast %81 : f32 to vector<8x8xf32>
    %83 = arith.mulf %78, %82 : vector<8x8xf32>
    %c2_i32_43 = arith.constant 2 : i32
    %84 = arith.addi %5, %c2_i32_43 : i32
    %c2_44 = arith.constant 2 : index
    %85 = arith.index_cast %84 : i32 to index
    %86 = memref.load %arg3[%c2_44, %85] : memref<4x8xf32, #tpu.memory_space<smem>>
    %87 = vector.broadcast %86 : f32 to vector<8x8xf32>
    %88 = arith.addf %83, %87 : vector<8x8xf32>
    %c2_i32_45 = arith.constant 2 : i32
    %89 = arith.addi %5, %c2_i32_45 : i32
    %c3_46 = arith.constant 3 : index
    %90 = arith.index_cast %89 : i32 to index
    %91 = memref.load %arg3[%c3_46, %90] : memref<4x8xf32, #tpu.memory_space<smem>>
    %92 = vector.broadcast %91 : f32 to vector<8x8xf32>
    %93 = arith.maximumf %88, %92 : vector<8x8xf32>
    %c0_47 = arith.constant 0 : index
    %c2_48 = arith.constant 2 : index
    %c0_49 = arith.constant 0 : index
    %c0_50 = arith.constant 0 : index
    %94 = vector.load %arg6[%c0_47, %c2_48, %c0_49, %c0_50] : memref<1x8x8x8xf32, #tpu.memory_space<vmem>>, vector<1x1x8x8xf32>
    %95 = vector.shape_cast %94 : vector<1x1x8x8xf32> to vector<8x8xf32>
    %96 = vector.shape_cast %93 : vector<8x8xf32> to vector<1x1x8x8xf32>
    tpu.vector_store %arg6[%c0_47, %c2_48, %c0_49, %c0_50], %96 {strides = array<i32>} : memref<1x8x8x8xf32, #tpu.memory_space<vmem>>, vector<1x1x8x8xf32>,
    %c0_51 = arith.constant 0 : index
    %c3_52 = arith.constant 3 : index
    %c0_53 = arith.constant 0 : index
    %c0_54 = arith.constant 0 : index
    %97 = vector.load %arg6[%c0_51, %c3_52, %c0_53, %c0_54] : memref<1x8x8x8xf32, #tpu.memory_space<vmem>>, vector<1x1x8x8xf32>
    %98 = vector.shape_cast %97 : vector<1x1x8x8xf32> to vector<8x8xf32>
    %99 = arith.mulf %98, %98 : vector<8x8xf32>
    %100 = vector.shape_cast %99 : vector<8x8xf32> to vector<1x8x8xf32>
    %cst_55 = arith.constant dense<0.000000e+00> : vector<1xf32>
    %101 = vector.multi_reduction <add>, %100, %cst_55 [1, 2] : vector<1x8x8xf32> to vector<1xf32>
    %102 = vector.shape_cast %101 : vector<1xf32> to vector<1x1x1xf32>
    %103 = vector.extract %102[0, 0, 0] : f32 from vector<1x1x1xf32>
    %cst_56 = arith.constant 1.562500e-02 : f32
    %104 = arith.mulf %103, %cst_56 : f32
    %cst_57 = arith.constant 9.99999974E-6 : f32
    %105 = arith.addf %104, %cst_57 : f32
    %106 = math.rsqrt %105 : f32
    %107 = vector.broadcast %106 : f32 to vector<8x8xf32>
    %108 = arith.mulf %98, %107 : vector<8x8xf32>
    %c3_i32 = arith.constant 3 : i32
    %109 = arith.addi %5, %c3_i32 : i32
    %c1_58 = arith.constant 1 : index
    %110 = arith.index_cast %109 : i32 to index
    %111 = memref.load %arg3[%c1_58, %110] : memref<4x8xf32, #tpu.memory_space<smem>>
    %112 = vector.broadcast %111 : f32 to vector<8x8xf32>
    %113 = arith.mulf %108, %112 : vector<8x8xf32>
    %c3_i32_59 = arith.constant 3 : i32
    %114 = arith.addi %5, %c3_i32_59 : i32
    %c2_60 = arith.constant 2 : index
    %115 = arith.index_cast %114 : i32 to index
    %116 = memref.load %arg3[%c2_60, %115] : memref<4x8xf32, #tpu.memory_space<smem>>
    %117 = vector.broadcast %116 : f32 to vector<8x8xf32>
    %118 = arith.addf %113, %117 : vector<8x8xf32>
    %c3_i32_61 = arith.constant 3 : i32
    %119 = arith.addi %5, %c3_i32_61 : i32
    %c3_62 = arith.constant 3 : index
    %120 = arith.index_cast %119 : i32 to index
    %121 = memref.load %arg3[%c3_62, %120] : memref<4x8xf32, #tpu.memory_space<smem>>
    %122 = vector.broadcast %121 : f32 to vector<8x8xf32>
    %123 = arith.maximumf %118, %122 : vector<8x8xf32>
    %c0_63 = arith.constant 0 : index
    %c3_64 = arith.constant 3 : index
    %c0_65 = arith.constant 0 : index
    %c0_66 = arith.constant 0 : index
    %124 = vector.load %arg6[%c0_63, %c3_64, %c0_65, %c0_66] : memref<1x8x8x8xf32, #tpu.memory_space<vmem>>, vector<1x1x8x8xf32>
    %125 = vector.shape_cast %124 : vector<1x1x8x8xf32> to vector<8x8xf32>
    %126 = vector.shape_cast %123 : vector<8x8xf32> to vector<1x1x8x8xf32>
    tpu.vector_store %arg6[%c0_63, %c3_64, %c0_65, %c0_66], %126 {strides = array<i32>} : memref<1x8x8x8xf32, #tpu.memory_space<vmem>>, vector<1x1x8x8xf32>,
    %c0_67 = arith.constant 0 : index
    %c4 = arith.constant 4 : index
    %c0_68 = arith.constant 0 : index
    %c0_69 = arith.constant 0 : index
    %127 = vector.load %arg6[%c0_67, %c4, %c0_68, %c0_69] : memref<1x8x8x8xf32, #tpu.memory_space<vmem>>, vector<1x1x8x8xf32>
    %128 = vector.shape_cast %127 : vector<1x1x8x8xf32> to vector<8x8xf32>
    %129 = arith.mulf %128, %128 : vector<8x8xf32>
    %130 = vector.shape_cast %129 : vector<8x8xf32> to vector<1x8x8xf32>
    %cst_70 = arith.constant dense<0.000000e+00> : vector<1xf32>
    %131 = vector.multi_reduction <add>, %130, %cst_70 [1, 2] : vector<1x8x8xf32> to vector<1xf32>
    %132 = vector.shape_cast %131 : vector<1xf32> to vector<1x1x1xf32>
    %133 = vector.extract %132[0, 0, 0] : f32 from vector<1x1x1xf32>
    %cst_71 = arith.constant 1.562500e-02 : f32
    %134 = arith.mulf %133, %cst_71 : f32
    %cst_72 = arith.constant 9.99999974E-6 : f32
    %135 = arith.addf %134, %cst_72 : f32
    %136 = math.rsqrt %135 : f32
    %137 = vector.broadcast %136 : f32 to vector<8x8xf32>
    %138 = arith.mulf %128, %137 : vector<8x8xf32>
    %c4_i32 = arith.constant 4 : i32
    %139 = arith.addi %5, %c4_i32 : i32
    %c1_73 = arith.constant 1 : index
    %140 = arith.index_cast %139 : i32 to index
    %141 = memref.load %arg3[%c1_73, %140] : memref<4x8xf32, #tpu.memory_space<smem>>
    %142 = vector.broadcast %141 : f32 to vector<8x8xf32>
    %143 = arith.mulf %138, %142 : vector<8x8xf32>
    %c4_i32_74 = arith.constant 4 : i32
    %144 = arith.addi %5, %c4_i32_74 : i32
    %c2_75 = arith.constant 2 : index
    %145 = arith.index_cast %144 : i32 to index
    %146 = memref.load %arg3[%c2_75, %145] : memref<4x8xf32, #tpu.memory_space<smem>>
    %147 = vector.broadcast %146 : f32 to vector<8x8xf32>
    %148 = arith.addf %143, %147 : vector<8x8xf32>
    %c4_i32_76 = arith.constant 4 : i32
    %149 = arith.addi %5, %c4_i32_76 : i32
    %c3_77 = arith.constant 3 : index
    %150 = arith.index_cast %149 : i32 to index
    %151 = memref.load %arg3[%c3_77, %150] : memref<4x8xf32, #tpu.memory_space<smem>>
    %152 = vector.broadcast %151 : f32 to vector<8x8xf32>
    %153 = arith.maximumf %148, %152 : vector<8x8xf32>
    %c0_78 = arith.constant 0 : index
    %c4_79 = arith.constant 4 : index
    %c0_80 = arith.constant 0 : index
    %c0_81 = arith.constant 0 : index
    %154 = vector.load %arg6[%c0_78, %c4_79, %c0_80, %c0_81] : memref<1x8x8x8xf32, #tpu.memory_space<vmem>>, vector<1x1x8x8xf32>
    %155 = vector.shape_cast %154 : vector<1x1x8x8xf32> to vector<8x8xf32>
    %156 = vector.shape_cast %153 : vector<8x8xf32> to vector<1x1x8x8xf32>
    tpu.vector_store %arg6[%c0_78, %c4_79, %c0_80, %c0_81], %156 {strides = array<i32>} : memref<1x8x8x8xf32, #tpu.memory_space<vmem>>, vector<1x1x8x8xf32>,
    %c0_82 = arith.constant 0 : index
    %c5 = arith.constant 5 : index
    %c0_83 = arith.constant 0 : index
    %c0_84 = arith.constant 0 : index
    %157 = vector.load %arg6[%c0_82, %c5, %c0_83, %c0_84] : memref<1x8x8x8xf32, #tpu.memory_space<vmem>>, vector<1x1x8x8xf32>
    %158 = vector.shape_cast %157 : vector<1x1x8x8xf32> to vector<8x8xf32>
    %159 = arith.mulf %158, %158 : vector<8x8xf32>
    %160 = vector.shape_cast %159 : vector<8x8xf32> to vector<1x8x8xf32>
    %cst_85 = arith.constant dense<0.000000e+00> : vector<1xf32>
    %161 = vector.multi_reduction <add>, %160, %cst_85 [1, 2] : vector<1x8x8xf32> to vector<1xf32>
    %162 = vector.shape_cast %161 : vector<1xf32> to vector<1x1x1xf32>
    %163 = vector.extract %162[0, 0, 0] : f32 from vector<1x1x1xf32>
    %cst_86 = arith.constant 1.562500e-02 : f32
    %164 = arith.mulf %163, %cst_86 : f32
    %cst_87 = arith.constant 9.99999974E-6 : f32
    %165 = arith.addf %164, %cst_87 : f32
    %166 = math.rsqrt %165 : f32
    %167 = vector.broadcast %166 : f32 to vector<8x8xf32>
    %168 = arith.mulf %158, %167 : vector<8x8xf32>
    %c5_i32 = arith.constant 5 : i32
    %169 = arith.addi %5, %c5_i32 : i32
    %c1_88 = arith.constant 1 : index
    %170 = arith.index_cast %169 : i32 to index
    %171 = memref.load %arg3[%c1_88, %170] : memref<4x8xf32, #tpu.memory_space<smem>>
    %172 = vector.broadcast %171 : f32 to vector<8x8xf32>
    %173 = arith.mulf %168, %172 : vector<8x8xf32>
    %c5_i32_89 = arith.constant 5 : i32
    %174 = arith.addi %5, %c5_i32_89 : i32
    %c2_90 = arith.constant 2 : index
    %175 = arith.index_cast %174 : i32 to index
    %176 = memref.load %arg3[%c2_90, %175] : memref<4x8xf32, #tpu.memory_space<smem>>
    %177 = vector.broadcast %176 : f32 to vector<8x8xf32>
    %178 = arith.addf %173, %177 : vector<8x8xf32>
    %c5_i32_91 = arith.constant 5 : i32
    %179 = arith.addi %5, %c5_i32_91 : i32
    %c3_92 = arith.constant 3 : index
    %180 = arith.index_cast %179 : i32 to index
    %181 = memref.load %arg3[%c3_92, %180] : memref<4x8xf32, #tpu.memory_space<smem>>
    %182 = vector.broadcast %181 : f32 to vector<8x8xf32>
    %183 = arith.maximumf %178, %182 : vector<8x8xf32>
    %c0_93 = arith.constant 0 : index
    %c5_94 = arith.constant 5 : index
    %c0_95 = arith.constant 0 : index
    %c0_96 = arith.constant 0 : index
    %184 = vector.load %arg6[%c0_93, %c5_94, %c0_95, %c0_96] : memref<1x8x8x8xf32, #tpu.memory_space<vmem>>, vector<1x1x8x8xf32>
    %185 = vector.shape_cast %184 : vector<1x1x8x8xf32> to vector<8x8xf32>
    %186 = vector.shape_cast %183 : vector<8x8xf32> to vector<1x1x8x8xf32>
    tpu.vector_store %arg6[%c0_93, %c5_94, %c0_95, %c0_96], %186 {strides = array<i32>} : memref<1x8x8x8xf32, #tpu.memory_space<vmem>>, vector<1x1x8x8xf32>,
    %c0_97 = arith.constant 0 : index
    %c6 = arith.constant 6 : index
    %c0_98 = arith.constant 0 : index
    %c0_99 = arith.constant 0 : index
    %187 = vector.load %arg6[%c0_97, %c6, %c0_98, %c0_99] : memref<1x8x8x8xf32, #tpu.memory_space<vmem>>, vector<1x1x8x8xf32>
    %188 = vector.shape_cast %187 : vector<1x1x8x8xf32> to vector<8x8xf32>
    %189 = arith.mulf %188, %188 : vector<8x8xf32>
    %190 = vector.shape_cast %189 : vector<8x8xf32> to vector<1x8x8xf32>
    %cst_100 = arith.constant dense<0.000000e+00> : vector<1xf32>
    %191 = vector.multi_reduction <add>, %190, %cst_100 [1, 2] : vector<1x8x8xf32> to vector<1xf32>
    %192 = vector.shape_cast %191 : vector<1xf32> to vector<1x1x1xf32>
    %193 = vector.extract %192[0, 0, 0] : f32 from vector<1x1x1xf32>
    %cst_101 = arith.constant 1.562500e-02 : f32
    %194 = arith.mulf %193, %cst_101 : f32
    %cst_102 = arith.constant 9.99999974E-6 : f32
    %195 = arith.addf %194, %cst_102 : f32
    %196 = math.rsqrt %195 : f32
    %197 = vector.broadcast %196 : f32 to vector<8x8xf32>
    %198 = arith.mulf %188, %197 : vector<8x8xf32>
    %c6_i32 = arith.constant 6 : i32
    %199 = arith.addi %5, %c6_i32 : i32
    %c1_103 = arith.constant 1 : index
    %200 = arith.index_cast %199 : i32 to index
    %201 = memref.load %arg3[%c1_103, %200] : memref<4x8xf32, #tpu.memory_space<smem>>
    %202 = vector.broadcast %201 : f32 to vector<8x8xf32>
    %203 = arith.mulf %198, %202 : vector<8x8xf32>
    %c6_i32_104 = arith.constant 6 : i32
    %204 = arith.addi %5, %c6_i32_104 : i32
    %c2_105 = arith.constant 2 : index
    %205 = arith.index_cast %204 : i32 to index
    %206 = memref.load %arg3[%c2_105, %205] : memref<4x8xf32, #tpu.memory_space<smem>>
    %207 = vector.broadcast %206 : f32 to vector<8x8xf32>
    %208 = arith.addf %203, %207 : vector<8x8xf32>
    %c6_i32_106 = arith.constant 6 : i32
    %209 = arith.addi %5, %c6_i32_106 : i32
    %c3_107 = arith.constant 3 : index
    %210 = arith.index_cast %209 : i32 to index
    %211 = memref.load %arg3[%c3_107, %210] : memref<4x8xf32, #tpu.memory_space<smem>>
    %212 = vector.broadcast %211 : f32 to vector<8x8xf32>
    %213 = arith.maximumf %208, %212 : vector<8x8xf32>
    %c0_108 = arith.constant 0 : index
    %c6_109 = arith.constant 6 : index
    %c0_110 = arith.constant 0 : index
    %c0_111 = arith.constant 0 : index
    %214 = vector.load %arg6[%c0_108, %c6_109, %c0_110, %c0_111] : memref<1x8x8x8xf32, #tpu.memory_space<vmem>>, vector<1x1x8x8xf32>
    %215 = vector.shape_cast %214 : vector<1x1x8x8xf32> to vector<8x8xf32>
    %216 = vector.shape_cast %213 : vector<8x8xf32> to vector<1x1x8x8xf32>
    tpu.vector_store %arg6[%c0_108, %c6_109, %c0_110, %c0_111], %216 {strides = array<i32>} : memref<1x8x8x8xf32, #tpu.memory_space<vmem>>, vector<1x1x8x8xf32>,
    %c0_112 = arith.constant 0 : index
    %c7 = arith.constant 7 : index
    %c0_113 = arith.constant 0 : index
    %c0_114 = arith.constant 0 : index
    %217 = vector.load %arg6[%c0_112, %c7, %c0_113, %c0_114] : memref<1x8x8x8xf32, #tpu.memory_space<vmem>>, vector<1x1x8x8xf32>
    %218 = vector.shape_cast %217 : vector<1x1x8x8xf32> to vector<8x8xf32>
    %219 = arith.mulf %218, %218 : vector<8x8xf32>
    %220 = vector.shape_cast %219 : vector<8x8xf32> to vector<1x8x8xf32>
    %cst_115 = arith.constant dense<0.000000e+00> : vector<1xf32>
    %221 = vector.multi_reduction <add>, %220, %cst_115 [1, 2] : vector<1x8x8xf32> to vector<1xf32>
    %222 = vector.shape_cast %221 : vector<1xf32> to vector<1x1x1xf32>
    %223 = vector.extract %222[0, 0, 0] : f32 from vector<1x1x1xf32>
    %cst_116 = arith.constant 1.562500e-02 : f32
    %224 = arith.mulf %223, %cst_116 : f32
    %cst_117 = arith.constant 9.99999974E-6 : f32
    %225 = arith.addf %224, %cst_117 : f32
    %226 = math.rsqrt %225 : f32
    %227 = vector.broadcast %226 : f32 to vector<8x8xf32>
    %228 = arith.mulf %218, %227 : vector<8x8xf32>
    %c7_i32 = arith.constant 7 : i32
    %229 = arith.addi %5, %c7_i32 : i32
    %c1_118 = arith.constant 1 : index
    %230 = arith.index_cast %229 : i32 to index
    %231 = memref.load %arg3[%c1_118, %230] : memref<4x8xf32, #tpu.memory_space<smem>>
    %232 = vector.broadcast %231 : f32 to vector<8x8xf32>
    %233 = arith.mulf %228, %232 : vector<8x8xf32>
    %c7_i32_119 = arith.constant 7 : i32
    %234 = arith.addi %5, %c7_i32_119 : i32
    %c2_120 = arith.constant 2 : index
    %235 = arith.index_cast %234 : i32 to index
    %236 = memref.load %arg3[%c2_120, %235] : memref<4x8xf32, #tpu.memory_space<smem>>
    %237 = vector.broadcast %236 : f32 to vector<8x8xf32>
    %238 = arith.addf %233, %237 : vector<8x8xf32>
    %c7_i32_121 = arith.constant 7 : i32
    %239 = arith.addi %5, %c7_i32_121 : i32
    %c3_122 = arith.constant 3 : index
    %240 = arith.index_cast %239 : i32 to index
    %241 = memref.load %arg3[%c3_122, %240] : memref<4x8xf32, #tpu.memory_space<smem>>
    %242 = vector.broadcast %241 : f32 to vector<8x8xf32>
    %243 = arith.maximumf %238, %242 : vector<8x8xf32>
    %c0_123 = arith.constant 0 : index
    %c7_124 = arith.constant 7 : index
    %c0_125 = arith.constant 0 : index
    %c0_126 = arith.constant 0 : index
    %244 = vector.load %arg6[%c0_123, %c7_124, %c0_125, %c0_126] : memref<1x8x8x8xf32, #tpu.memory_space<vmem>>, vector<1x1x8x8xf32>
    %245 = vector.shape_cast %244 : vector<1x1x8x8xf32> to vector<8x8xf32>
    %246 = vector.shape_cast %243 : vector<8x8xf32> to vector<1x1x8x8xf32>
    tpu.vector_store %arg6[%c0_123, %c7_124, %c0_125, %c0_126], %246 {strides = array<i32>} : memref<1x8x8x8xf32, #tpu.memory_space<vmem>>, vector<1x1x8x8xf32>,
    return
  }
  func.func @transform_0(%arg0: i32, %arg1: i32) -> i32 {
    %c0_i32 = arith.constant 0 : i32
    %c0_i32_0 = arith.constant 0 : i32
    return %c0_i32 : i32
  }
  func.func @transform_1(%arg0: i32, %arg1: i32) -> (i32, i32) {
    %c0_i32 = arith.constant 0 : i32
    %c0_i32_0 = arith.constant 0 : i32
    %c0_i32_1 = arith.constant 0 : i32
    return %c0_i32, %c0_i32_0 : i32, i32
  }
  func.func @transform_2(%arg0: i32, %arg1: i32) -> (i32, i32) {
    %c0_i32 = arith.constant 0 : i32
    %c0_i32_0 = arith.constant 0 : i32
    %c0_i32_1 = arith.constant 0 : i32
    return %c0_i32, %c0_i32_0 : i32, i32
  }
  func.func @transform_3(%arg0: i32, %arg1: i32) -> (i32, i32, i32, i32) {
    %c0_i32 = arith.constant 0 : i32
    %c0_i32_0 = arith.constant 0 : i32
    %c0_i32_1 = arith.constant 0 : i32
    %c0_i32_2 = arith.constant 0 : i32
    return %arg0, %c0_i32, %c0_i32_0, %c0_i32_1 : i32, i32, i32, i32
  }
  func.func @transform_4(%arg0: i32, %arg1: i32) -> (i32, i32, i32, i32) {
    %c0_i32 = arith.constant 0 : i32
    %c0_i32_0 = arith.constant 0 : i32
    %c0_i32_1 = arith.constant 0 : i32
    return %arg0, %arg1, %c0_i32, %c0_i32_0 : i32, i32, i32, i32
  }
}

</mosaic_0001>

<bundles_post_ra>
// kernel: tpu_custom_call.1
= control target key start
LH: loop header
LB: loop body
LE: loop exit
PB: predicated region body
PF: predicated region fallthrough
CT: control target
= control target key end

     0   :  { %s6315_s0 = inlined_call_operand.vmem [shape: f32[288], index: 0, kind: input, shape index: {}]   ;;  %s6316_s1 = inlined_call_operand.vmem [shape: f32[4,8], index: 1, kind: input, shape index: {}]   ;;  %s6317_s2 = inlined_call_operand.vmem [shape: f32[16,8], index: 2, kind: input, shape index: {}]   ;;  %s6318_s3 = inlined_call_operand.hbm [shape: f32[2,4,16,16], index: 3, kind: input, shape index: {}]   ;;  %s6319_s4 = inlined_call_operand.hbm [shape: f32[2,8,8,8], index: 4, kind: output, shape index: {}]  }
   0x1   :  { %6330 = sst [smem:[#allocation40_spill]] %s6315_s0 }
   0x2   :  { %6331 = sst [smem:[#allocation41_spill]] %s6316_s1 }
   0x3   :  { %6332 = sst [smem:[#allocation42_spill]] %s6317_s2 }
   0x4   :  { %6333 = sst [smem:[#allocation43_spill]] %s6318_s3 }
   0x5   :  { %9 = vsyncpa [#allocation6], 0 }
   0x6   :  { %10 = vsyncpa [#allocation8], 0 }
   0x7   :  { %11 = vsyncpa [#allocation4], 0 }
   0x8   :  { %13 = vsyncpa [#allocation4 + $0x1], 0 }
   0x9   :  { %14 = vsyncpa [#allocation5], 0 }
   0xa   :  { %16 = vsyncpa [#allocation5 + $0x1], 0  ;;  %s4452_s15 = smov 0   ;;  %s4454_s16 = smov 0  }
   0xb   :  { %s4456_s17 = smov 0   ;;  %s4458_s18 = smov 0  }
   0xc   :  { %s4460_s19 = smov 0   ;;  %s4462_s20 = smov 0  }
   0xd LB: > { %6334 = sst [smem:[#allocation15_spill]] %s4394_s16  ;;  %s3672_s21 = sadd.s32 4294967295, %s4410_s20   ;;  %s4410_s20 = sphi %s4462_s20, %s22_s20   ;;  %s4406_s19 = sphi %s4460_s19, %s6396_s19   ;;  %s4402_s18 = sphi %s4458_s18, %s6395_s18   ;;  %s4398_s17 = sphi %s4456_s17, %s6394_s17   ;;  %s4394_s16 = sphi %s4454_s16, %s6393_s16   ;;  %s4390_s15 = sphi %s4452_s15, %s6392_s15  }
   0xe   : > { %6335 = sst [smem:[#allocation16_spill]] %s4398_s17  ;;  %s3673_s22 = sadd.s32 4294967294, %s4410_s20  }
   0xf   : > { %6336 = sst [smem:[#allocation17_spill]] %s4406_s19  ;;  %s104_s23 = sadd.s32 1, %s4398_s17 }
  0x10   : > { %p111_p0 = scmp.ne.s32.totalorder %s4398_s17, %s4394_s16  ;;  %p112_p1 = scmp.eq.s32.totalorder %s4410_s20, 0 }
  0x11   : > { %p117_p2 = scmp.ne.s32.totalorder %s4394_s16, %s4390_s15  ;;  %p4490_p3 = scmp.eq.s32.totalorder %s3672_s21, 0 }
  0x12   : > { %p143_p4 = scmp.eq.s32.totalorder %s3672_s21, 1  ;;  %p4494_p5 = por %p112_p1, %p111_p0 }
  0x13   : > { %p149_p6 = scmp.eq.s32.totalorder %s3673_s22, 1  ;;  %p4500_p7 = por %p4490_p3, %p117_p2 }
  0x14   : > { %p4504_p8 = por %p143_p4, %p111_p0  ;;  %p3674_p10 = scmp.ge.s32.totalorder %s4410_s20, 1 }
  0x15   : > { %p4508_p9 = por %p149_p6, %p117_p2  ;;  %p156_p11 = scmp.lt.s32.totalorder %s4410_s20, 3 }
  0x16   : > { %s6342_s0 = sld [smem:[#allocation40_spill]]  ;;  %p3677_p13 = scmp.ge.s32.totalorder %s4410_s20, 2 }
  0x17   : > { %p4517_p12 = pnand %p3674_p10, %p156_p11  ;;  %p4166_p0 = scmp.lt.s32.totalorder %s4410_s20, 2 }
  0x18   : > { %s6344_s1 = sld [smem:[#allocation41_spill]]  ;;  %s4416_s11 = smov [#allocation3]  }
  0x19   : > { %p4149_p1 = pneg %p4517_p12  ;;  %p4530_p2 = pnand %p4166_p0, %p4494_p5 }
  0x1a   : > { %s4417_s12 = smov [#allocation7]   ;;  %s34_s13 = sadd.s32 1, %s4406_s19 }
  0x1b   : > { %p4150_p4 = pnand %p4149_p1, %p4490_p3  ;;  %s192_s14 = sand.u32 1, %s4398_s17  }
  0x1c   : > { %s168_s5 = sshll.u32 %s6342_s0, 4  ;;  %p36_p6 = scmp.ge.s32.totalorder %s34_s13, 2  ;;  %s169_s5 = int_to_ptr.vmem [resolvable:$true] %s168_s5 }
  0x1d   : > { %4152 = dma.vmem_to_smem (!%p4150_p4), %s169_s5, 48, %s4416_s11, [#allocation6]  }
  0x1e   : > { %s178_s9 = sshll.u32 %s6344_s1, 4  ;;  %s3678_s21 = sshll.u32 %s192_s14, 6  ;;  %s179_s9 = int_to_ptr.vmem [resolvable:$true] %s178_s9 }
  0x1f   : > { %4155 = dma.vmem_to_smem (!%p4150_p4), %s179_s9, 64, %s4417_s12, [#allocation8]  }
  0x20   : > { %s4097_s22 = sshll.u32 %s4406_s19, 6  ;;  %s6398_s13 = smov (%p36_p6, %s34_s13), 0 }
  0x21   : > { %6346 = sst [smem:[#allocation18_spill]] %s6398_s13  ;;  %s101_s7 = ssub.s32 %s4406_s19, %s6398_s13 }
  0x22   : > { %s6347_s3 = sld [smem:[#allocation43_spill]]  ;;  %p102_p5 = scmp.eq.s32.totalorder %s101_s7, 0 }
  0x23   : > { %s196_s5 = scalar_lea.vmem [#allocation9], %s3678_s21  ;;  %s193_s12 = scalar_lea.sflag [#allocation4], %s192_s14 }
  0x24   : > { %s204_s11 = sshll.u32 %s196_s5, 4  ;;  %s4418_s0 = smov 128   ;;  %s205_s11 = int_to_ptr.vmem [resolvable:$true] %s204_s11 }
  0x25   : > { %s4549_s9 = scalar_select %p102_p5, %s4398_s17, %s104_s23  }
  0x26   : > { %s4419_s1 = smov 8   ;;  %216 = sbr.rel (%p4517_p12) target bundleno = 2086 (0x826), region = 36 }
  0x27   : > { %6348 = sst [smem:[#allocation19_spill]] %s4549_s9 }
  0x28   : > { %s201_s30 = scalar_lea.hbm %s6347_s3, %s4097_s22 }
  0x29   : > { %s202_s8 = sshll.u32 %s201_s30, 4  ;;  %s203_s8 = int_to_ptr.hbm [resolvable:$true] %s202_s8 }
  0x2a   : > { %4159 = dma.hbm_to_vmem [thread:$0]  (!%p4530_p2), %s203_s8, 1024, %s205_s11, %s193_s12, %s4418_s0, %s4418_s0, %s4419_s1  }
  0x2b   : > { %4373 = dma.done.wait (%p4490_p3), [#allocation6], 48  }
  0x2c   : > { %4375 = vsyncadd (%p4490_p3), [#allocation6], 4294967248 }
  0x2d   : > { %4377 = dma.done.wait (%p4490_p3), [#allocation8], 64  }
  0x2e   : > { %4379 = vsyncadd (%p4490_p3), [#allocation8], 4294967232  ;;  %s4564_s23 = sand.u32 1, %s4394_s16  }
  0x2f   : > { %s3684_s0 = sshll.u32 %s4564_s23, 6  ;;  %s229_s1 = scalar_lea.sflag [#allocation4], %s4564_s23 }
  0x30   : > { %s232_s6 = scalar_lea.vmem [#allocation9], %s3684_s0 }
  0x31   : > { %4381 = dma.done.wait (%p4500_p7), %s229_s1, 1024  }
  0x32   : > { %4383 = vsyncadd (%p4500_p7), %s229_s1, 4294966272 }
  0x33   : > { %238 = sfence }
  0x34   : > { %v303_v0 = vld [vmem:[%s232_s6 + $0x10] sm:$0xff]  ;;  %v301_v1 = vld [vmem:[%s232_s6] sm:$0xff]  ;;  %s4420_s24 = smov 1   ;;  %v304_v3 = vld [vmem:[%s232_s6 + $0x18] sm:$0xff]  ;;  %vm264_vm0 = vcmask 139264   ;;  %v4421_v8 = vmov 0.0  }
  0x35   : > { %321 = vrot.lane.b32.xlu1 %v303_v0, %s4420_s24  ;;  %317 = vrot.lane.b32.xlu0 %v301_v1, %s4420_s24  ;;  %v305_v2 = vld [vmem:[%s232_s6 + $0x20] sm:$0xff]  ;;  %v302_v4 = vld [vmem:[%s232_s6 + $0x8] sm:$0xff]  ;;  %266 = vst.msk [vmem:[#allocation2 + $0x18] sm:$0x1] %vm264_vm0, %v4421_v8  ;;  %vm273_vm1 = vcmask 7168   ;;  %vm287_vm2 = vcmask 146568  }
  0x36   : > { %325 = vrot.lane.b32.xlu2 %v305_v2, %s4420_s24  ;;  %v306_v5 = vld [vmem:[%s232_s6 + $0x28] sm:$0xff]  ;;  %v308_v6 = vld [vmem:[%s232_s6 + $0x38] sm:$0xff]  ;;  %v307_v7 = vld [vmem:[%s232_s6 + $0x30] sm:$0xff]  ;;  %278 = vst.msk [vmem:[#allocation2 + $0x18] sm:$0xff] %vm273_vm1, %v4421_v8  ;;  %s6349_s2 = sld [smem:[#allocation42_spill]]  ;;  %vm341_vm3 = vcmask 138248  }
  0x37   : > { %279 = vst.msk [vmem:[#allocation2 + $0x20] sm:$0xff] %vm273_vm1, %v4421_v8  ;;  %vm276_vm4 = vcmask 1024   ;;  %vm290_vm5 = vcmask 140424   ;;  %s4610_s22 = scalar_lea.vmem [#allocation10], %s3684_s0  ;;  %s4612_s25 = smov 0  }
  0x38   : > { %292 = vst.msk [vmem:[#allocation2 + $0x18] sm:$0xff] %vm287_vm2, %v4421_v8 }
  0x39   : > { %293 = vst.msk [vmem:[#allocation2 + $0x20] sm:$0xff] %vm287_vm2, %v4421_v8 }
  0x3a   : > { %265 = vst.msk [vmem:[#allocation2] sm:$0x1] %vm264_vm0, %v4421_v8 }
  0x3b   : > { %267 = vst.msk [vmem:[#allocation2 + $0x30] sm:$0x1] %vm264_vm0, %v4421_v8 }
  0x3c   : > { %268 = vst.msk [vmem:[#allocation2 + $0x48] sm:$0x1] %vm264_vm0, %v4421_v8  ;;  %v4590_v10 = vld [vmem:[%s6349_s2] sm:$0xff]  ;;  %v4595_v11 = vld [vmem:[%s6349_s2 + $0x8] sm:$0xff] }
  0x3d   : > { %323 = vrot.lane.b32.xlu1 %v304_v3, %s4420_s24  ;;  %319 = vrot.lane.b32.xlu0 %v302_v4, %s4420_s24  ;;  %269 = vst.msk [vmem:[#allocation2 + $0x11] sm:$0x1] %vm264_vm0, %v4421_v8 }
  0x3e   : > { %327 = vrot.lane.b32.xlu2 %v306_v5, %s4420_s24  ;;  %270 = vst.msk [vmem:[#allocation2 + $0x29] sm:$0x1] %vm264_vm0, %v4421_v8 }
  0x3f   : > { %271 = vst.msk [vmem:[#allocation2 + $0x41] sm:$0x1] %vm264_vm0, %v4421_v8 }
  0x40   : > { %272 = vst.msk [vmem:[#allocation2 + $0x59] sm:$0x1] %vm264_vm0, %v4421_v8 }
  0x41   : > { %275 = vst.msk [vmem:[#allocation2 + $0x8] sm:$0xff] %vm273_vm1, %v4421_v8 }
  0x42   : > { %282 = vst.msk [vmem:[#allocation2 + $0x38] sm:$0xff] %vm273_vm1, %v4421_v8 }
  0x43   : > { %285 = vst.msk [vmem:[#allocation2 + $0x50] sm:$0xff] %vm273_vm1, %v4421_v8 }
  0x44   : > { %274 = vst.msk [vmem:[#allocation2] sm:$0xff] %vm273_vm1, %v4421_v8 }
  0x45   : > { %331 = vrot.lane.b32.xlu1 %v308_v6, %s4420_s24  ;;  %329 = vrot.lane.b32.xlu0 %v307_v7, %s4420_s24  ;;  %288 = vst.msk [vmem:[#allocation2] sm:$0xff] %vm287_vm2, %v4421_v8 }
  0x46   : > { %289 = vst.msk [vmem:[#allocation2 + $0x8] sm:$0xff] %vm287_vm2, %v4421_v8 }
  0x47   : > { %281 = vst.msk [vmem:[#allocation2 + $0x30] sm:$0xff] %vm273_vm1, %v4421_v8 }
  0x48   : > { %284 = vst.msk [vmem:[#allocation2 + $0x48] sm:$0xff] %vm273_vm1, %v4421_v8 }
  0x49   : > { %296 = vst.msk [vmem:[#allocation2 + $0x38] sm:$0xff] %vm287_vm2, %v4421_v8 }
  0x4a   : > { %6350 = vst [vmem:[#allocation20_spill] sm:$0xff] %v4590_v10 }
  0x4b   : > { %6351 = vst [vmem:[#allocation21_spill] sm:$0xff] %v4595_v11 }
  0x4c   : > { %299 = vst.msk [vmem:[#allocation2 + $0x50] sm:$0xff] %vm287_vm2, %v4421_v8 }
  0x4d   : > { %295 = vst.msk [vmem:[#allocation2 + $0x30] sm:$0xff] %vm287_vm2, %v4421_v8 }
  0x4e   : > { %298 = vst.msk [vmem:[#allocation2 + $0x48] sm:$0xff] %vm287_vm2, %v4421_v8 }
  0x4f   : > { %280 = vst.msk [vmem:[#allocation2 + $0x28] sm:$0x3] %vm276_vm4, %v4421_v8 }
  0x50   : > { %294 = vst.msk [vmem:[#allocation2 + $0x28] sm:$0x3] %vm290_vm5, %v4421_v8 }
  0x51   : > { %277 = vst.msk [vmem:[#allocation2 + $0x10] sm:$0x3] %vm276_vm4, %v4421_v8 }
  0x52   : > { %283 = vst.msk [vmem:[#allocation2 + $0x40] sm:$0x3] %vm276_vm4, %v4421_v8 }
  0x53   : > { %286 = vst.msk [vmem:[#allocation2 + $0x58] sm:$0x3] %vm276_vm4, %v4421_v8 }
  0x54   : > { %291 = vst.msk [vmem:[#allocation2 + $0x10] sm:$0x3] %vm290_vm5, %v4421_v8 }
  0x55   : > { %297 = vst.msk [vmem:[#allocation2 + $0x40] sm:$0x3] %vm290_vm5, %v4421_v8 }
  0x56   : > { %300 = vst.msk [vmem:[#allocation2 + $0x58] sm:$0x3] %vm290_vm5, %v4421_v8 }
  0x90   : > { %v326_v9 = vpop.permute.xlu2 %325 }
  0x91   : > { %346 = vst.msk [vmem:[#allocation2 + $0x31] sm:$0xff] %vm341_vm3, %v326_v9 }
  0x98   : > { %v328_v12 = vpop.permute.xlu2 %327 }
  0x99   : > { %347 = vst.msk [vmem:[#allocation2 + $0x39] sm:$0xff] %vm341_vm3, %v328_v12 }
  0xa7   : > { %v322_v13 = vpop.permute.xlu1 %321  ;;  %v318_v14 = vpop.permute.xlu0 %317 }
  0xa8   : > { %344 = vst.msk [vmem:[#allocation2 + $0x19] sm:$0xff] %vm341_vm3, %v322_v13 }
  0xa9   : > { %342 = vst.msk [vmem:[#allocation2 + $0x1] sm:$0xff] %vm341_vm3, %v318_v14 }
  0xaf   : > { %v324_v15 = vpop.permute.xlu1 %323  ;;  %v320_v16 = vpop.permute.xlu0 %319 }
  0xb0   : > { %345 = vst.msk [vmem:[#allocation2 + $0x21] sm:$0xff] %vm341_vm3, %v324_v15 }
  0xb1   : > { %343 = vst.msk [vmem:[#allocation2 + $0x9] sm:$0xff] %vm341_vm3, %v320_v16 }
  0xb7   : > { %v332_v17 = vpop.permute.xlu1 %331  ;;  %v330_v18 = vpop.permute.xlu0 %329 }
  0xb8   : > { %349 = vst.msk [vmem:[#allocation2 + $0x51] sm:$0xff] %vm341_vm3, %v332_v17 }
  0xb9   : > { %348 = vst.msk [vmem:[#allocation2 + $0x49] sm:$0xff] %vm341_vm3, %v330_v18 }
  0xba LB: >> { %v6352_v11 = vld [vmem:[#allocation21_spill] sm:$0xff]  ;;  %v6353_v10 = vld [vmem:[#allocation20_spill] sm:$0xff]  ;;  %s3698_s29 = sld [smem:[#allocation3 + $0x91]]  ;;  %s3686_s30 = sshll.u32 %s4414_s25, 3  ;;  %vm2850_vm7 = vcmask 1041409   ;;  %vm2852_vm8 = vcmask 1042434   ;;  %s4414_s25 = sphi %s4612_s25, %s359_s25  }
  0xbb   : >> { %4100 = vmatpush.msra.mxu2 %v6352_v11  ;;  %4101 = vmatpush.msra.mxu3 %v6352_v11  ;;  %s3696_s7 = sld [smem:[#allocation3 + $0x49]]  ;;  %s4626_s11 = scalar_lea.vmem [#allocation2], %s3686_s30  ;;  %vm2854_vm9 = vcmask 1043459   ;;  %vm2865_vm12 = vcmask 1045509   ;;  %vm2867_vm13 = vcmask 1046534   ;;  %vm2869_vm15 = vcmask 1047559  }
  0xbc   : >> { %3021 = vmatpush.msra.mxu0 %v6352_v11  ;;  %4099 = vmatpush.msra.mxu1 %v6352_v11  ;;  %s3694_s8 = sld [smem:[#allocation3 + $0x1]]  ;;  %s6322_s1 = smov 127   ;;  %vm2944_vm1 = vcmask 1043456   ;;  %vm2949_vm5 = vcmask 1047680  }
  0xbd   : >> { %4103 = vmatpush.msra.mxu2 %v6353_v10  ;;  %4104 = vmatpush.msra.mxu3 %v6353_v10  ;;  %s3699_s5 = sld [smem:[#allocation3 + $0xb5]]  ;;  %s6368_s19 = smov 127  }
  0xbe   : >> { %3022 = vmatpush.msra.mxu0 %v6353_v10  ;;  %4102 = vmatpush.msra.mxu1 %v6353_v10  ;;  %s3697_s12 = sld [smem:[#allocation3 + $0x6d]] }
  0xbf   : >> { %s3695_s0 = sld [smem:[#allocation3 + $0x25]] }
  0xc0   : >> { %v4629_v19 = vld [vmem:[%s4626_s11] sm:$0xff]  ;;  %v440_v20 = vstv %s3698_s29  ;;  %s3702_s6 = sld [smem:[#allocation3 + $0x2]]  ;;  %s6320_s29 = smov 126  }
  0xc1   : >> { %v441_v21 = vmul.f32 %v440_v20, %v4629_v19  ;;  %v422_v22 = vstv %s3696_s7  ;;  %s3701_s24 = sld [smem:[#allocation3 + $0xfd]]  ;;  %v4661_v50 = vld [vmem:[%s4626_s11 + $0x1] sm:$0xff] }
  0xc2   : >> { %v423_v23 = vmul.f32 %v422_v22, %v4629_v19  ;;  %v404_v24 = vstv %s3694_s8  ;;  %s3700_s26 = sld [smem:[#allocation3 + $0xd9]]  ;;  %v4694_v20 = vld [vmem:[%s4626_s11 + $0x2] sm:$0xff] }
  0xc3   : >> { %443 = vrot.lane.b32.xlu2 %v441_v21, %s6322_s1  ;;  %v405_v25 = vmul.f32 %v404_v24, %v4629_v19  ;;  %v449_v26 = vstv %s3699_s5  ;;  %s3705_s10 = sld [smem:[#allocation3 + $0x6e]] }
  0xc4   : >> { %425 = vrot.lane.b32.xlu1 %v423_v23, %s6322_s1  ;;  %v431_v27 = vstv %s3697_s12  ;;  %v450_v29 = vmul.f32 %v449_v26, %v4629_v19  ;;  %s3704_s14 = sld [smem:[#allocation3 + $0x4a]] }
  0xc5   : >> { %407 = vrot.lane.b32.xlu0 %v405_v25, %s6322_s1  ;;  %v413_v28 = vstv %s3695_s0  ;;  %v432_v30 = vmul.f32 %v431_v27, %v4629_v19  ;;  %s3703_s21 = sld [smem:[#allocation3 + $0x26]] }
  0xc6   : >> { %v414_v31 = vmul.f32 %v413_v28, %v4629_v19  ;;  %v476_v32 = vstv %s3702_s6  ;;  %s3708_s30 = sld [smem:[#allocation3 + $0xda]] }
  0xc7   : >> { %v467_v33 = vstv %s3701_s24  ;;  %v477_v35 = vmul.f32 %v476_v32, %v4629_v19  ;;  %s3707_s7 = sld [smem:[#allocation3 + $0xb6]] }
  0xc8   : >> { %v458_v34 = vstv %s3700_s26  ;;  %v468_v36 = vmul.f32 %v467_v33, %v4629_v19  ;;  %s3706_s8 = sld [smem:[#allocation3 + $0x92]] }
  0xc9   : >> { %v459_v37 = vmul.f32 %v458_v34, %v4629_v19  ;;  %v503_v38 = vstv %s3705_s10  ;;  %s3721_s5 = sld [smem:[#allocation3 + $0x28]] }
  0xca   : >> { %v494_v39 = vstv %s3704_s14  ;;  %v504_v41 = vmul.f32 %v503_v38, %v4629_v19  ;;  %s3720_s12 = sld [smem:[#allocation3 + $0x4]] }
  0xcb   : >> { %452 = vrot.lane.b32.xlu2 %v450_v29, %s6322_s1  ;;  %v485_v40 = vstv %s3703_s21  ;;  %v495_v42 = vmul.f32 %v494_v39, %v4629_v19  ;;  %s3709_s0 = sld [smem:[#allocation3 + $0xfe]] }
  0xcc   : >> { %434 = vrot.lane.b32.xlu1 %v432_v30, %s6322_s1  ;;  %v486_v43 = vmul.f32 %v485_v40, %v4629_v19  ;;  %v530_v44 = vstv %s3708_s30  ;;  %s3724_s6 = sld [smem:[#allocation3 + $0x94]] }
  0xcd   : >> { %416 = vrot.lane.b32.xlu0 %v414_v31, %s6322_s1  ;;  %v521_v45 = vstv %s3707_s7  ;;  %v531_v47 = vmul.f32 %v530_v44, %v4629_v19  ;;  %s3723_s24 = sld [smem:[#allocation3 + $0x70]] }
  0xce   : >> { %v512_v46 = vstv %s3706_s8  ;;  %v522_v48 = vmul.f32 %v521_v45, %v4629_v19  ;;  %s3722_s26 = sld [smem:[#allocation3 + $0x4c]] }
  0xcf   : >> { %v513_v49 = vmul.f32 %v512_v46, %v4629_v19  ;;  %v600_v51 = vstv %s3721_s5  ;;  %s3727_s10 = sld [smem:[#allocation3 + $0x100]] }
  0xd0   : >> { %v591_v52 = vstv %s3720_s12  ;;  %v601_v54 = vmul.f32 %v4661_v50, %v600_v51  ;;  %s3726_s14 = sld [smem:[#allocation3 + $0xdc]] }
  0xd1   : >> { %v539_v53 = vstv %s3709_s0  ;;  %v592_v55 = vmul.f32 %v4661_v50, %v591_v52  ;;  %s3725_s21 = sld [smem:[#allocation3 + $0xb8]] }
  0xd2   : >> { %v540_v56 = vmul.f32 %v539_v53, %v4629_v19  ;;  %v627_v57 = vstv %s3724_s6  ;;  %s3730_s30 = sld [smem:[#allocation3 + $0x4d]] }
  0xd3   : >> { %479 = vrot.lane.b32.xlu2 %v477_v35, %s6320_s29  ;;  %v618_v58 = vstv %s3723_s24  ;;  %v628_v60 = vmul.f32 %v4661_v50, %v627_v57  ;;  %s3729_s7 = sld [smem:[#allocation3 + $0x29]] }
  0xd4   : >> { %470 = vrot.lane.b32.xlu1 %v468_v36, %s6322_s1  ;;  %v609_v59 = vstv %s3722_s26  ;;  %v619_v61 = vmul.f32 %v4661_v50, %v618_v58  ;;  %s3728_s8 = sld [smem:[#allocation3 + $0x5]] }
  0xd5   : >> { %461 = vrot.lane.b32.xlu0 %v459_v37, %s6322_s1  ;;  %v610_v62 = vmul.f32 %v4661_v50, %v609_v59  ;;  %v654_v63 = vstv %s3727_s10  ;;  %s3733_s5 = sld [smem:[#allocation3 + $0xb9]] }
  0xd6   : >> { %v645_v0 = vstv %s3726_s14  ;;  %v655_v2 = vmul.f32 %v4661_v50, %v654_v63  ;;  %s3732_s12 = sld [smem:[#allocation3 + $0x95]] }
  0xd7   : >> { %v636_v1 = vstv %s3725_s21  ;;  %v646_v3 = vmul.f32 %v4661_v50, %v645_v0  ;;  %s3731_s0 = sld [smem:[#allocation3 + $0x71]]  ;;  %v4745_v0 = vld [vmem:[%s4626_s11 + $0x18] sm:$0xff] }
  0xd8   : >> { %v637_v4 = vmul.f32 %v4661_v50, %v636_v1  ;;  %v681_v5 = vstv %s3730_s30  ;;  %s3746_s6 = sld [smem:[#allocation3 + $0x7]] }
  0xd9   : >> { %v672_v6 = vstv %s3729_s7  ;;  %v682_v8 = vmul.f32 %v4661_v50, %v681_v5  ;;  %s3735_s24 = sld [smem:[#allocation3 + $0x101]] }
  0xda   : >> { %v663_v7 = vstv %s3728_s8  ;;  %v673_v9 = vmul.f32 %v4661_v50, %v672_v6  ;;  %s3734_s26 = sld [smem:[#allocation3 + $0xdd]] }
  0xdb   : >> { %506 = vrot.lane.b32.xlu2 %v504_v41, %s6320_s29  ;;  %v664_v12 = vmul.f32 %v4661_v50, %v663_v7  ;;  %v708_v13 = vstv %s3733_s5  ;;  %s3749_s10 = sld [smem:[#allocation3 + $0x73]] }
  0xdc   : >> { %497 = vrot.lane.b32.xlu1 %v495_v42, %s6320_s29  ;;  %v699_v14 = vstv %s3732_s12  ;;  %v709_v16 = vmul.f32 %v4661_v50, %v708_v13  ;;  %s3748_s14 = sld [smem:[#allocation3 + $0x4f]] }
  0xdd   : >> { %488 = vrot.lane.b32.xlu0 %v486_v43, %s6320_s29  ;;  %v690_v15 = vstv %s3731_s0  ;;  %v700_v17 = vmul.f32 %v4661_v50, %v699_v14  ;;  %s3747_s21 = sld [smem:[#allocation3 + $0x2b]] }
  0xde   : >> { %v691_v18 = vmul.f32 %v4661_v50, %v690_v15  ;;  %v778_v21 = vstv %s3746_s6  ;;  %s3752_s30 = sld [smem:[#allocation3 + $0xdf]] }
  0xdf   : >> { %v726_v22 = vstv %s3735_s24  ;;  %v779_v24 = vmul.f32 %v4694_v20, %v778_v21  ;;  %s3751_s7 = sld [smem:[#allocation3 + $0xbb]] }
  0xe0   : >> { %v717_v23 = vstv %s3734_s26  ;;  %v727_v25 = vmul.f32 %v4661_v50, %v726_v22  ;;  %s3750_s8 = sld [smem:[#allocation3 + $0x97]] }
  0xe1   : >> { %v718_v26 = vmul.f32 %v4661_v50, %v717_v23  ;;  %v805_v27 = vstv %s3749_s10  ;;  %s3755_s5 = sld [smem:[#allocation3 + $0x2c]] }
  0xe2   : >> { %v796_v28 = vstv %s3748_s14  ;;  %v806_v30 = vmul.f32 %v4694_v20, %v805_v27  ;;  %s3754_s12 = sld [smem:[#allocation3 + $0x8]] }
  0xe3   : >> { %533 = vrot.lane.b32.xlu2 %v531_v47, %s6320_s29  ;;  %v787_v29 = vstv %s3747_s21  ;;  %v797_v31 = vmul.f32 %v4694_v20, %v796_v28  ;;  %s3753_s0 = sld [smem:[#allocation3 + $0x103]] }
  0xe4   : >> { %524 = vrot.lane.b32.xlu1 %v522_v48, %s6320_s29  ;;  %v788_v32 = vmul.f32 %v4694_v20, %v787_v29  ;;  %v832_v33 = vstv %s3752_s30  ;;  %s3758_s6 = sld [smem:[#allocation3 + $0x98]] }
  0xe5   : >> { %515 = vrot.lane.b32.xlu0 %v513_v49, %s6320_s29  ;;  %v823_v35 = vstv %s3751_s7  ;;  %v833_v37 = vmul.f32 %v4694_v20, %v832_v33  ;;  %s3757_s24 = sld [smem:[#allocation3 + $0x74]] }
  0xe6   : >> { %v814_v36 = vstv %s3750_s8  ;;  %v824_v38 = vmul.f32 %v4694_v20, %v823_v35  ;;  %s3756_s26 = sld [smem:[#allocation3 + $0x50]] }
  0xe7   : >> { %v815_v39 = vmul.f32 %v4694_v20, %v814_v36  ;;  %v859_v40 = vstv %s3755_s5  ;;  %s3761_s10 = sld [smem:[#allocation3 + $0x104]] }
  0xe8   : >> { %v850_v42 = vstv %s3754_s12  ;;  %v860_v44 = vmul.f32 %v4694_v20, %v859_v40  ;;  %s3760_s14 = sld [smem:[#allocation3 + $0xe0]] }
  0xe9   : >> { %v841_v43 = vstv %s3753_s0  ;;  %v851_v45 = vmul.f32 %v4694_v20, %v850_v42  ;;  %s3759_s21 = sld [smem:[#allocation3 + $0xbc]] }
  0xea   : >> { %v842_v46 = vmul.f32 %v4694_v20, %v841_v43  ;;  %v886_v47 = vstv %s3758_s6  ;;  %s3774_s30 = sld [smem:[#allocation3 + $0x52]] }
  0xeb   : >> { %603 = vrot.lane.b32.xlu2 %v601_v54, %s6322_s1  ;;  %v877_v49 = vstv %s3757_s24  ;;  %v887_v52 = vmul.f32 %v4694_v20, %v886_v47  ;;  %s3773_s7 = sld [smem:[#allocation3 + $0x2e]] }
  0xec   : >> { %594 = vrot.lane.b32.xlu1 %v592_v55, %s6322_s1  ;;  %v868_v51 = vstv %s3756_s26  ;;  %v878_v53 = vmul.f32 %v4694_v20, %v877_v49  ;;  %s3772_s8 = sld [smem:[#allocation3 + $0xa]] }
  0xed   : >> { %542 = vrot.lane.b32.xlu0 %v540_v56, %s6320_s29  ;;  %v869_v54 = vmul.f32 %v4694_v20, %v868_v51  ;;  %v913_v55 = vstv %s3761_s10  ;;  %s3777_s5 = sld [smem:[#allocation3 + $0xbe]] }
  0xee   : >> { %v904_v57 = vstv %s3760_s14  ;;  %s3776_s12 = sld [smem:[#allocation3 + $0x9a]] }
  0xef   : >> { %v895_v59 = vstv %s3759_s21  ;;  %s3775_s0 = sld [smem:[#allocation3 + $0x76]] }
  0xf0   : >> { %v896_v63 = vmul.f32 %v4694_v20, %v895_v59  ;;  %v983_v1 = vstv %s3774_s30  ;;  %s3780_s6 = sld [smem:[#allocation3 + $0xb]] }
  0xf1   : >> { %v984_v7 = vmul.f32 %v4745_v0, %v983_v1  ;;  %s3779_s24 = sld [smem:[#allocation3 + $0x106]] }
  0xf2   : >> { %v965_v5 = vstv %s3772_s8  ;;  %s3778_s26 = sld [smem:[#allocation3 + $0xe2]] }
  0xf3   : >> { %630 = vrot.lane.b32.xlu2 %v628_v60, %s6322_s1  ;;  %s3783_s10 = sld [smem:[#allocation3 + $0x77]] }
  0xf4   : >> { %621 = vrot.lane.b32.xlu1 %v619_v61, %s6322_s1  ;;  %v914_v61 = vmul.f32 %v4694_v20, %v913_v55  ;;  %v1001_v14 = vstv %s3776_s12  ;;  %s3782_s14 = sld [smem:[#allocation3 + $0x53]] }
  0xf5   : >> { %612 = vrot.lane.b32.xlu0 %v610_v62, %s6322_s1  ;;  %v905_v62 = vmul.f32 %v4694_v20, %v904_v57  ;;  %v1002_v21 = vmul.f32 %v4745_v0, %v1001_v14  ;;  %s3781_s21 = sld [smem:[#allocation3 + $0x2f]] }
  0xf6   : >> { %v1037_v23 = vstv %s3780_s6  ;;  %s3786_s30 = sld [smem:[#allocation3 + $0xe3]] }
  0xf7   : >> { %v1038_v29 = vmul.f32 %v4745_v0, %v1037_v23  ;;  %s3784_s8 = sld [smem:[#allocation3 + $0x9b]] }
  0xf8   : >> { %v1019_v27 = vstv %s3778_s26  ;;  %s3798_s12 = sld [smem:[#allocation3 + $0xd]] }
  0xf9   : >> { %s3802_s6 = sld [smem:[#allocation3 + $0x9d]] }
  0xfa   : >> { %v1055_v35 = vstv %s3782_s14  ;;  %s3800_s26 = sld [smem:[#allocation3 + $0x55]] }
  0xfb   : >> { %657 = vrot.lane.b32.xlu2 %v655_v2, %s6322_s1  ;;  %v1056_v40 = vmul.f32 %v4745_v0, %v1055_v35  ;;  %s3804_s14 = sld [smem:[#allocation3 + $0xe5]] }
  0xfc   : >> { %648 = vrot.lane.b32.xlu1 %v646_v3, %s6322_s1  ;;  %v974_v3 = vstv %s3773_s7  ;;  %s3785_s7 = sld [smem:[#allocation3 + $0xbf]]  ;;  %v1091_v43 = vstv %s3786_s30 }
  0xfd   : >> { %639 = vrot.lane.b32.xlu0 %v637_v4, %s6322_s1  ;;  %v1073_v47 = vstv %s3784_s8  ;;  %v1092_v51 = vmul.f32 %v4745_v0, %v1091_v43  ;;  %s3808_s30 = sld [smem:[#allocation3 + $0x56]] }
  0xfe   : >> { %v1152_v59 = vstv %s3798_s12  ;;  %s3806_s8 = sld [smem:[#allocation3 + $0xe]] }
  0xff   : >> { %s3810_s12 = sld [smem:[#allocation3 + $0x9e]] }
 0x100   : >> { %v1170_v14 = vstv %s3800_s26  ;;  %s3812_s26 = sld [smem:[#allocation3 + $0xe6]] }
 0x101   : >> { %s4930_s2 = sld [smem:[#allocation3 + $0xd8]] }
 0x102   : >> { %s4944_s3 = sld [smem:[#allocation3 + $0xff]] }
 0x103   : >> { %684 = vrot.lane.b32.xlu2 %v682_v8, %s6320_s29  ;;  %v975_v8 = vmul.f32 %v4745_v0, %v974_v3  ;;  %s4949_s13 = sld [smem:[#allocation3 + $0xeb]] }
 0x104   : >> { %675 = vrot.lane.b32.xlu1 %v673_v9, %s6320_s29  ;;  %v966_v9 = vmul.f32 %v4745_v0, %v965_v5  ;;  %s4954_s9 = sld [smem:[#allocation3 + $0xc7]] }
 0x105   : >> { %666 = vrot.lane.b32.xlu0 %v664_v12, %s6320_s29  ;;  %v1010_v12 = vstv %s3777_s5  ;;  %s3799_s5 = sld [smem:[#allocation3 + $0x31]] }
 0x106   : >> { %s4966_s17 = sld [smem:[#allocation3 + $0x4b]] }
 0x107   : >> { %s4980_s16 = sld [smem:[#allocation3 + $0x2a]] }
 0x10b   : >> { %711 = vrot.lane.b32.xlu2 %v709_v16, %s6320_s29  ;;  %v992_v16 = vstv %s3775_s0  ;;  %s3787_s0 = sld [smem:[#allocation3 + $0x107]]  ;;  %v1161_v55 = vstv %s3799_s5 }
 0x10c   : >> { %702 = vrot.lane.b32.xlu1 %v700_v17, %s6320_s29  ;;  %v993_v22 = vmul.f32 %v4745_v0, %v992_v16  ;;  %s3811_s5 = sld [smem:[#allocation3 + $0xc2]] }
 0x10d   : >> { %693 = vrot.lane.b32.xlu0 %v691_v18, %s6320_s29  ;;  %v1011_v18 = vmul.f32 %v4745_v0, %v1010_v12 }
 0x113   : >> { %781 = vrot.lane.b32.xlu2 %v779_v24, %s6322_s1 }
 0x114   : >> { %729 = vrot.lane.b32.xlu1 %v727_v25, %s6320_s29  ;;  %v1028_v25 = vstv %s3779_s24  ;;  %s3801_s24 = sld [smem:[#allocation3 + $0x79]] }
 0x115   : >> { %720 = vrot.lane.b32.xlu0 %v718_v26, %s6320_s29 }
 0x11b   : >> { %808 = vrot.lane.b32.xlu2 %v806_v30, %s6322_s1  ;;  %v1029_v30 = vmul.f32 %v4745_v0, %v1028_v25 }
 0x11c   : >> { %799 = vrot.lane.b32.xlu1 %v797_v31, %s6322_s1  ;;  %v1020_v31 = vmul.f32 %v4745_v0, %v1019_v27  ;;  %v1206_v27 = vstv %s3804_s14  ;;  %s3826_s14 = sld [smem:[#allocation3 + $0x58]] }
 0x11d   : >> { %790 = vrot.lane.b32.xlu0 %v788_v32, %s6322_s1  ;;  %v4709_v34 = vpop.permute.xlu2 %443  ;;  %v1064_v32 = vstv %s3783_s10  ;;  %s3805_s10 = sld [smem:[#allocation3 + $0x109]] }
 0x123   : >> { %835 = vrot.lane.b32.xlu2 %v833_v37, %s6322_s1  ;;  %v1046_v37 = vstv %s3781_s21  ;;  %s3803_s21 = sld [smem:[#allocation3 + $0xc1]]  ;;  %v1215_v23 = vstv %s3805_s10 }
 0x124   : >> { %826 = vrot.lane.b32.xlu1 %v824_v38, %s6322_s1  ;;  %v1047_v42 = vmul.f32 %v4745_v0, %v1046_v37  ;;  %s3827_s10 = sld [smem:[#allocation3 + $0x7c]] }
 0x125   : >> { %817 = vrot.lane.b32.xlu0 %v815_v39, %s6322_s1  ;;  %v4717_v41 = vpop.permute.xlu2 %452  ;;  %v1065_v39 = vmul.f32 %v4745_v0, %v1064_v32 }
 0x12b   : >> { %862 = vrot.lane.b32.xlu2 %v860_v44, %s6320_s29 }
 0x12c   : >> { %853 = vrot.lane.b32.xlu1 %v851_v45, %s6320_s29  ;;  %v1082_v45 = vstv %s3785_s7  ;;  %s3807_s7 = sld [smem:[#allocation3 + $0x32]] }
 0x12d   : >> { %844 = vrot.lane.b32.xlu0 %v842_v46, %s6322_s1  ;;  %v4725_v48 = vpop.permute.xlu2 %479 }
 0x133   : >> { %889 = vrot.lane.b32.xlu2 %v887_v52, %s6320_s29  ;;  %v1083_v52 = vmul.f32 %v4745_v0, %v1082_v45  ;;  %v1224_v45 = vstv %s3806_s8  ;;  %s3828_s8 = sld [smem:[#allocation3 + $0xa0]] }
 0x134   : >> { %880 = vrot.lane.b32.xlu1 %v878_v53, %s6320_s29  ;;  %v1074_v53 = vmul.f32 %v4745_v0, %v1073_v47 }
 0x135   : >> { %871 = vrot.lane.b32.xlu0 %v869_v54, %s6320_s29  ;;  %v4733_v56 = vpop.permute.xlu2 %506  ;;  %v4808_v54 = vld [vmem:[%s4626_s11 + $0x19] sm:$0xff] }
 0x136   : >> { %v4735_v58 = vpop.permute.xlu1 %425  ;;  %v1162_v1 = vmul.f32 %v4808_v54, %v1161_v55  ;;  %v1153_v3 = vmul.f32 %v4808_v54, %v1152_v59  ;;  %v1216_v32 = vmul.f32 %v4808_v54, %v1215_v23  ;;  %v1207_v35 = vmul.f32 %v4808_v54, %v1206_v27 }
 0x137   : >> { %v4737_v60 = vpop.permute.xlu0 %407  ;;  %v1269_v55 = vstv %s3811_s5  ;;  %s4895_s5 = sld [smem:[#allocation3 + $0x90]] }
 0x13b   : >> { %916 = vrot.lane.b32.xlu2 %v914_v61, %s6320_s29 }
 0x13c   : >> { %907 = vrot.lane.b32.xlu1 %v905_v62, %s6320_s29  ;;  %v1100_v62 = vstv %s3787_s0  ;;  %s3809_s0 = sld [smem:[#allocation3 + $0x7a]] }
 0x13d   : >> { %898 = vrot.lane.b32.xlu0 %v896_v63, %s6320_s29  ;;  %v4748_v2 = vpop.permute.xlu2 %533  ;;  %v1101_v5 = vmul.f32 %v4745_v0, %v1100_v62  ;;  %v1260_v62 = vstv %s3810_s12  ;;  %s4897_s12 = sld [smem:[#allocation3 + $0xb4]] }
 0x13e   : >> { %v4750_v4 = vpop.permute.xlu1 %434 }
 0x13f   : >> { %v4752_v6 = vpop.permute.xlu0 %416 }
 0x143   : >> { %986 = vrot.lane.b32.xlu2 %v984_v7, %s6322_s1  ;;  %v1188_v7 = vstv %s3802_s6  ;;  %s3824_s6 = sld [smem:[#allocation3 + $0x10]] }
 0x144   : >> { %977 = vrot.lane.b32.xlu1 %v975_v8, %s6322_s1 }
 0x145   : >> { %968 = vrot.lane.b32.xlu0 %v966_v9, %s6322_s1  ;;  %v4760_v13 = vpop.permute.xlu2 %603  ;;  %v1179_v9 = vstv %s3801_s24  ;;  %s3813_s24 = sld [smem:[#allocation3 + $0x10a]] }
 0x146   : >> { %v4762_v15 = vpop.permute.xlu1 %470 }
 0x147   : >> { %v4764_v17 = vpop.permute.xlu0 %461 }
 0x14b   : >> { %1013 = vrot.lane.b32.xlu2 %v1011_v18, %s6322_s1  ;;  %v1189_v18 = vmul.f32 %v4808_v54, %v1188_v7  ;;  %v1270_v7 = vmul.f32 %v4808_v54, %v1269_v55  ;;  %v1287_v23 = vstv %s3813_s24  ;;  %s3831_s24 = sld [smem:[#allocation3 + $0x10c]] }
 0x14c   : >> { %1004 = vrot.lane.b32.xlu1 %v1002_v21, %s6322_s1  ;;  %v1180_v21 = vmul.f32 %v4808_v54, %v1179_v9  ;;  %v1261_v9 = vmul.f32 %v4808_v54, %v1260_v62 }
 0x14d   : >> { %995 = vrot.lane.b32.xlu0 %v993_v22, %s6322_s1  ;;  %v4772_v24 = vpop.permute.xlu2 %630  ;;  %v1171_v22 = vmul.f32 %v4808_v54, %v1170_v14 }
 0x14e   : >> { %v4774_v26 = vpop.permute.xlu1 %497 }
 0x14f   : >> { %v4776_v28 = vpop.permute.xlu0 %488 }
 0x153   : >> { %1040 = vrot.lane.b32.xlu2 %v1038_v29, %s6320_s29 }
 0x154   : >> { %1031 = vrot.lane.b32.xlu1 %v1029_v30, %s6322_s1  ;;  %v1197_v30 = vstv %s3803_s21  ;;  %s3825_s21 = sld [smem:[#allocation3 + $0x34]] }
 0x155   : >> { %1022 = vrot.lane.b32.xlu0 %v1020_v31, %s6322_s1  ;;  %v4784_v33 = vpop.permute.xlu2 %657  ;;  %v1198_v37 = vmul.f32 %v4808_v54, %v1197_v30  ;;  %v1278_v30 = vstv %s3812_s26  ;;  %s4906_s26 = sld [smem:[#allocation3 + $0x48]] }
 0x156   : >> { %v4786_v36 = vpop.permute.xlu1 %524 }
 0x157   : >> { %v4788_v38 = vpop.permute.xlu0 %515 }
 0x15b   : >> { %1067 = vrot.lane.b32.xlu2 %v1065_v39, %s6320_s29  ;;  %v1242_v39 = vstv %s3808_s30  ;;  %s3830_s30 = sld [smem:[#allocation3 + $0xe8]] }
 0x15c   : >> { %1058 = vrot.lane.b32.xlu1 %v1056_v40, %s6320_s29 }
 0x15d   : >> { %1049 = vrot.lane.b32.xlu0 %v1047_v42, %s6320_s29  ;;  %v4796_v44 = vpop.permute.xlu2 %684  ;;  %v1233_v42 = vstv %s3807_s7  ;;  %s3829_s7 = sld [smem:[#allocation3 + $0xc4]] }
 0x15e   : >> { %v4798_v46 = vpop.permute.xlu1 %594 }
 0x15f   : >> { %v4800_v49 = vpop.permute.xlu0 %542 }
 0x163   : >> { %1094 = vrot.lane.b32.xlu2 %v1092_v51, %s6320_s29  ;;  %v1243_v51 = vmul.f32 %v4808_v54, %v1242_v39  ;;  %v1279_v39 = vmul.f32 %v4808_v54, %v1278_v30  ;;  %v1375_v30 = vstv %s3828_s8  ;;  %s3838_s8 = sld [smem:[#allocation3 + $0xe9]] }
 0x164   : >> { %1085 = vrot.lane.b32.xlu1 %v1083_v52, %s6320_s29  ;;  %v1234_v52 = vmul.f32 %v4808_v54, %v1233_v42  ;;  %v1366_v42 = vstv %s3827_s10  ;;  %s4911_s10 = sld [smem:[#allocation3]] }
 0x165   : >> { %1076 = vrot.lane.b32.xlu0 %v1074_v53, %s6320_s29  ;;  %v4811_v57 = vpop.permute.xlu2 %711  ;;  %v1225_v53 = vmul.f32 %v4808_v54, %v1224_v45 }
 0x166   : >> { %v4813_v61 = vpop.permute.xlu1 %621 }
 0x167   : >> { %v4815_v63 = vpop.permute.xlu0 %612 }
 0x16b   : >> { %1164 = vrot.lane.b32.xlu2 %v1162_v1, %s6322_s1 }
 0x16c   : >> { %1155 = vrot.lane.b32.xlu1 %v1153_v3, %s6322_s1  ;;  %v1251_v3 = vstv %s3809_s0  ;;  %s3836_s0 = sld [smem:[#allocation3 + $0xa1]] }
 0x16d   : >> { %1103 = vrot.lane.b32.xlu0 %v1101_v5, %s6320_s29  ;;  %v4823_v8 = vpop.permute.xlu2 %781  ;;  %v1252_v14 = vmul.f32 %v4808_v54, %v1251_v3 }
 0x16e   : >> { %6354 = vst [vmem:[#allocation22_spill] sm:$0xff] %v4823_v8  ;;  %v4825_v12 = vpop.permute.xlu1 %648 }
 0x16f   : >> { %v4827_v16 = vpop.permute.xlu0 %639 }
 0x173   : >> { %1191 = vrot.lane.b32.xlu2 %v1189_v18, %s6322_s1  ;;  %v4871_v18 = vld [vmem:[%s4626_s11 + $0x1a] sm:$0xff] }
 0x174   : >> { %1182 = vrot.lane.b32.xlu1 %v1180_v21, %s6322_s1  ;;  %v1339_v21 = vstv %s3824_s6  ;;  %v1367_v62 = vmul.f32 %v4871_v18, %v1366_v42  ;;  %s3832_s6 = sld [smem:[#allocation3 + $0x11]]  ;;  %v1376_v42 = vmul.f32 %v4871_v18, %v1375_v30 }
 0x175   : >> { %1173 = vrot.lane.b32.xlu0 %v1171_v22, %s6322_s1  ;;  %v4835_v25 = vpop.permute.xlu2 %808 }
 0x176   : >> { %6355 = vst [vmem:[#allocation23_spill] sm:$0xff] %v4835_v25  ;;  %v4837_v29 = vpop.permute.xlu1 %675 }
 0x177   : >> { %v4839_v31 = vpop.permute.xlu0 %666 }
 0x17b   : >> { %1218 = vrot.lane.b32.xlu2 %v1216_v32, %s6322_s1 }
 0x17c   : >> { %1209 = vrot.lane.b32.xlu1 %v1207_v35, %s6322_s1  ;;  %v1340_v35 = vmul.f32 %v4871_v18, %v1339_v21  ;;  %v1384_v21 = vstv %s3829_s7  ;;  %s4923_s7 = sld [smem:[#allocation3 + $0x10d]] }
 0x17d   : >> { %1200 = vrot.lane.b32.xlu0 %v1198_v37, %s6322_s1  ;;  %v4847_v40 = vpop.permute.xlu2 %835  ;;  %v1288_v37 = vmul.f32 %v4808_v54, %v1287_v23 }
 0x17e   : >> { %6356 = vst [vmem:[#allocation24_spill] sm:$0xff] %v4847_v40  ;;  %v4849_v43 = vpop.permute.xlu1 %702 }
 0x17f   : >> { %v4851_v47 = vpop.permute.xlu0 %693 }
 0x183   : >> { %1245 = vrot.lane.b32.xlu2 %v1243_v51, %s6320_s29  ;;  %v1357_v51 = vstv %s3826_s14  ;;  %s4914_s14 = sld [smem:[#allocation3 + $0x6c]] }
 0x184   : >> { %1236 = vrot.lane.b32.xlu1 %v1234_v52, %s6320_s29  ;;  %v1358_v3 = vmul.f32 %v4871_v18, %v1357_v51  ;;  %v1447_v51 = vstv %s3836_s0  ;;  %s4935_s0 = sld [smem:[#allocation3 + $0x27]] }
 0x185   : >> { %1227 = vrot.lane.b32.xlu0 %v1225_v53, %s6320_s29  ;;  %v4859_v59 = vpop.permute.xlu2 %862  ;;  %v1348_v53 = vstv %s3825_s21  ;;  %s4917_s21 = sld [smem:[#allocation3 + $0x24]] }
 0x186   : >> { %v4861_v1 = vpop.permute.xlu1 %729 }
 0x187   : >> { %v4863_v5 = vpop.permute.xlu0 %720 }
 0x188   : >> { %6357 = vst [vmem:[#allocation25_spill] sm:$0xff] %v4863_v5 }
 0x18b   : >> { %1272 = vrot.lane.b32.xlu2 %v1270_v7, %s6320_s29  ;;  %v1349_v7 = vmul.f32 %v4871_v18, %v1348_v53 }
 0x18c   : >> { %1263 = vrot.lane.b32.xlu1 %v1261_v9, %s6320_s29  ;;  %v1393_v9 = vstv %s3830_s30  ;;  %s4919_s30 = sld [smem:[#allocation3 + $0xfc]] }
 0x18d   : >> { %1254 = vrot.lane.b32.xlu0 %v1252_v14, %s6320_s29  ;;  %v4874_v22 = vpop.permute.xlu2 %889 }
 0x18e   : >> { %v4876_v27 = vpop.permute.xlu1 %799 }
 0x18f   : >> { %6358 = vst [vmem:[#allocation26_spill] sm:$0xff] %v4876_v27  ;;  %v4878_v32 = vpop.permute.xlu0 %790 }
 0x193   : >> { %1342 = vrot.lane.b32.xlu2 %v1340_v35, %s6322_s1 }
 0x194   : >> { %1290 = vrot.lane.b32.xlu1 %v1288_v37, %s6320_s29  ;;  %v1394_v37 = vmul.f32 %v4871_v18, %v1393_v9 }
 0x195   : >> { %1281 = vrot.lane.b32.xlu0 %v1279_v39, %s6320_s29  ;;  %v4886_v45 = vpop.permute.xlu2 %916  ;;  %v1385_v39 = vmul.f32 %v4871_v18, %v1384_v21  ;;  %s3837_s29 = sld [smem:[#allocation3 + $0xc5]]  ;;  %v1448_v21 = vmul.f32 %v4871_v18, %v1447_v51 }
 0x196   : >> { %6359 = vst [vmem:[#allocation27_spill] sm:$0xff] %v4886_v45  ;;  %v4888_v52 = vpop.permute.xlu1 %826 }
 0x197   : >> { %6360 = vst [vmem:[#allocation28_spill] sm:$0xff] %v4888_v52  ;;  %v4890_v55 = vpop.permute.xlu0 %817  ;;  %v1571_v52 = vstv %s4954_s9  ;;  %s5019_s9 = sld [smem:[#allocation3 + $0x4e]] }
 0x19b   : >> { %1369 = vrot.lane.b32.xlu2 %v1367_v62, %s6322_s1  ;;  %v1411_v62 = vstv %s3832_s6  ;;  %s4941_s6 = sld [smem:[#allocation3 + $0x3]] }
 0x19c   : >> { %1360 = vrot.lane.b32.xlu1 %v1358_v3, %s6322_s1  ;;  %v1412_v30 = vmul.f32 %v4871_v18, %v1411_v62  ;;  %v1465_v62 = vstv %s3838_s8  ;;  %s4970_s8 = sld [smem:[#allocation3 + $0xdb]] }
 0x19d   : >> { %1351 = vrot.lane.b32.xlu0 %v1349_v7, %s6322_s1  ;;  %v4902_v14 = vpop.permute.xlu2 %986  ;;  %v1402_v7 = vstv %s3831_s24  ;;  %s6367_s24 = smov 126   ;;  %v1466_v11 = vmul.f32 %v4871_v18, %v1465_v62  ;;  %v374_v62 = vstv %s4906_s26  ;;  %s5012_s26 = sld [smem:[#allocation3 + $0x6]] }
 0x19e   : >> { %6361 = vst [vmem:[#allocation29_spill] sm:$0xff] %v4902_v14  ;;  %v4904_v23 = vpop.permute.xlu1 %853  ;;  %v389_v14 = vstv %s4897_s12  ;;  %s4999_s12 = sld [smem:[#allocation3 + $0x35]] }
 0x19f   : >> { %6362 = vst [vmem:[#allocation30_spill] sm:$0xff] %v4904_v23  ;;  %v4908_v35 = vpop.permute.xlu0 %844  ;;  %v364_v23 = vstv %s4911_s10  ;;  %s5025_s10 = sld [smem:[#allocation3 + $0xba]] }
 0x1a0   : >> { %6363 = vst [vmem:[#allocation31_spill] sm:$0xff] %v4908_v35 }
 0x1a3   : >> { %1396 = vrot.lane.b32.xlu2 %v1394_v37, %s6322_s1  ;;  %v1403_v37 = vmul.f32 %v4871_v18, %v1402_v7 }
 0x1a4   : >> { %1387 = vrot.lane.b32.xlu1 %v1385_v39, %s6322_s1  ;;  %v369_v39 = vstv %s4917_s21  ;;  %s4959_s21 = sld [smem:[#allocation3 + $0xa3]] }
 0x1a5   : >> { %1378 = vrot.lane.b32.xlu0 %v1376_v42, %s6322_s1  ;;  %v4926_v53 = vpop.permute.xlu2 %1013  ;;  %s4938_s1 = sld [smem:[#allocation3 + $0x93]]  ;;  %v1474_v42 = vstv %s4923_s7  ;;  %v370_v7 = vmul.f32 %v369_v39, %v4629_v19  ;;  %v556_v39 = vstv %s4935_s0 }
 0x1a6   : >> { %6364 = vst [vmem:[#allocation32_spill] sm:$0xff] %v4926_v53  ;;  %v4928_v3 = vpop.permute.xlu1 %880  ;;  %s4961_s7 = sld [smem:[#allocation3 + $0x6f]]  ;;  %v384_v53 = vstv %s4895_s5 }
 0x1a7   : >> { %6365 = vst [vmem:[#allocation33_spill] sm:$0xff] %v4928_v3  ;;  %v4932_v9 = vpop.permute.xlu0 %871  ;;  %v419_v8 = vadd.f32 %v4752_v6, %v370_v7  ;;  %v1580_v6 = vstv %s4949_s13  ;;  %s4991_s5 = sld [smem:[#allocation3 + $0x59]]  ;;  %v385_v7 = vmul.f32 %v384_v53, %v4629_v19 }
 0x1a8   : >> { %6366 = vst [vmem:[#allocation34_spill] sm:$0xff] %v4932_v9  ;;  %s5007_s13 = sld [smem:[#allocation3 + $0x10f]] }
 0x1a9   : >> { %s5075_s0 = sld [smem:[#allocation3 + $0xde]] }
 0x1aa   : >> { %v1562_v53 = vstv %s4959_s21  ;;  %s5093_s21 = sld [smem:[#allocation3 + $0x30]] }
 0x1ab   : >> { %1450 = vrot.lane.b32.xlu2 %v1448_v21, %s6367_s24  ;;  %v1456_v21 = vstv %s3837_s29  ;;  %s4976_s29 = sld [smem:[#allocation3 + $0xb7]] }
 0x1ac   : >> { %1414 = vrot.lane.b32.xlu1 %v1412_v30, %s6367_s24  ;;  %v566_v9 = vstv %s4961_s7  ;;  %s5100_s7 = sld [smem:[#allocation3 + $0x13]] }
 0x1ad   : >> { %1405 = vrot.lane.b32.xlu0 %v1403_v37, %s6368_s19  ;;  %v4952_v51 = vpop.permute.xlu2 %1040  ;;  %v1475_v37 = vmul.f32 %v4871_v18, %v1474_v42  ;;  %v379_v42 = vstv %s4914_s14  ;;  %v567_v5 = vmul.f32 %v4661_v50, %v566_v9  ;;  %s5063_s14 = sld [smem:[#allocation3 + $0x7d]] }
 0x1ae   : >> { %6369 = vst [vmem:[#allocation35_spill] sm:$0xff] %v4952_v51  ;;  %v4957_v10 = vpop.permute.xlu1 %907  ;;  %v1457_v51 = vmul.f32 %v4871_v18, %v1456_v21  ;;  %v491_v21 = vadd.f32 %v4776_v28, %v419_v8  ;;  %v380_v28 = vmul.f32 %v379_v42, %v4629_v19  ;;  %v551_v8 = vstv %s4941_s6  ;;  %s5087_s6 = sld [smem:[#allocation3 + $0x99]] }
 0x1af   : >> { %6370 = vst [vmem:[#allocation36_spill] sm:$0xff] %v4957_v10  ;;  %v4963_v30 = vpop.permute.xlu0 %898  ;;  %v4988_v10 = vld [vmem:[%s4626_s11 + $0x30] sm:$0xff]  ;;  %v561_v42 = vstv %s4966_s17  ;;  %v552_v35 = vmul.f32 %v4661_v50, %v551_v8  ;;  %v743_v8 = vstv %s4980_s16  ;;  %s5038_s17 = sld [smem:[#allocation3 + $0x2d]] }
 0x1b0   : >> { %6371 = vst [vmem:[#allocation37_spill] sm:$0xff] %v4963_v30  ;;  %v557_v30 = vmul.f32 %v4661_v50, %v556_v39  ;;  %v1581_v45 = vmul.f32 %v4988_v10, %v1580_v6  ;;  %v1572_v27 = vmul.f32 %v4988_v10, %v1571_v52  ;;  %v446_v6 = vadd.f32 %v4709_v34, %v385_v7  ;;  %s5055_s16 = sld [smem:[#allocation3 + $0xa4]] }
 0x1b1   : >> { %v562_v52 = vmul.f32 %v4661_v50, %v561_v42  ;;  %v1429_v7 = vstv %s4991_s5  ;;  %s5125_s5 = sld [smem:[#allocation3 + $0x51]] }
 0x1b2   : >> { %v558_v3 = vadd.f32 %v557_v30, %v491_v21  ;;  %v437_v30 = vadd.f32 %v4750_v4, %v380_v28  ;;  %v518_v4 = vadd.f32 %v4788_v38, %v446_v6 }
 0x1b3   : >> { %1477 = vrot.lane.b32.xlu2 %v1475_v37, %s6367_s24  ;;  %v365_v37 = vmul.f32 %v364_v23, %v4629_v19  ;;  %v375_v23 = vmul.f32 %v374_v62, %v4629_v19  ;;  %v571_v62 = vstv %s4938_s1  ;;  %s5046_s1 = sld [smem:[#allocation3 + $0xc8]] }
 0x1b4   : >> { %1468 = vrot.lane.b32.xlu1 %v1466_v11, %s6367_s24  ;;  %v390_v11 = vmul.f32 %v389_v14, %v4629_v19  ;;  %v394_v14 = vstv %s4930_s2  ;;  %s5032_s2 = sld [smem:[#allocation3 + $0x96]]  ;;  %v572_v34 = vmul.f32 %v4661_v50, %v571_v62  ;;  %v606_v9 = vadd.f32 %v4760_v13, %v558_v3 }
 0x1b5   : >> { %1459 = vrot.lane.b32.xlu0 %v1457_v51, %s6367_s24  ;;  %v4996_v39 = vpop.permute.xlu2 %1067  ;;  %v399_v51 = vstv %s4919_s30  ;;  %v410_v25 = vadd.f32 %v4737_v60, %v365_v37  ;;  %v395_v60 = vmul.f32 %v394_v14, %v4629_v19  ;;  %v581_v37 = vstv %s4970_s8  ;;  %s5068_s30 = sld [smem:[#allocation3 + $0x72]] }
 0x1b6   : >> { %6372 = vst [vmem:[#allocation38_spill] sm:$0xff] %v4996_v39  ;;  %v5004_v40 = vpop.permute.xlu1 %977  ;;  %v400_v21 = vmul.f32 %v399_v51, %v4629_v19  ;;  %v428_v19 = vadd.f32 %v4735_v58, %v375_v23  ;;  %v1420_v51 = vstv %s4999_s12  ;;  %v509_v13 = vadd.f32 %v4733_v56, %v437_v30  ;;  %s5109_s8 = sld [smem:[#allocation3 + $0x110]] }
 0x1b7   : >> { %v5014_v39 = vpop.permute.xlu0 %968  ;;  %v482_v28 = vadd.f32 %v4725_v48, %v410_v25  ;;  %v678_v38 = vadd.f32 %v4837_v29, %v606_v9  ;;  %v1589_v14 = vstv %s5007_s13  ;;  %v464_v48 = vadd.f32 %v4764_v17, %v395_v60  ;;  %s5136_s12 = sld [smem:[#allocation3 + $0x75]] }
 0x1b8   : >> { %6373 = vst [vmem:[#allocation39_spill] sm:$0xff] %v5014_v39  ;;  %v1563_v39 = vmul.f32 %v4988_v10, %v1562_v53  ;;  %v576_v53 = vstv %s4976_s29  ;;  %v500_v58 = vadd.f32 %v4774_v26, %v428_v19  ;;  %v586_v25 = vstv %s4944_s3  ;;  %s5082_s3 = sld [smem:[#allocation3 + $0x102]] }
 0x1b9   : >> { %v1430_v56 = vmul.f32 %v4871_v18, %v1429_v7  ;;  %v455_v29 = vadd.f32 %v4717_v41, %v390_v11  ;;  %v473_v23 = vadd.f32 %v4762_v15, %v400_v21  ;;  %v573_v42 = vadd.f32 %v572_v34, %v518_v4  ;;  %s5116_s29 = sld [smem:[#allocation3 + $0xec]] }
 0x1ba   : >> { %v1421_v17 = vmul.f32 %v4871_v18, %v1420_v51  ;;  %v5078_v62 = vadd.f32 %v552_v35, %v482_v28  ;;  %v582_v26 = vmul.f32 %v4661_v50, %v581_v37  ;;  %v577_v6 = vmul.f32 %v4661_v50, %v576_v53  ;;  %s5141_s13 = sld [smem:[#allocation3 + $0x105]] }
 0x1bb   : >> { %1583 = vrot.lane.b32.xlu2 %v1581_v45, %s6368_s19  ;;  %v1590_v41 = vmul.f32 %v4988_v10, %v1589_v14  ;;  %v587_v15 = vmul.f32 %v4661_v50, %v586_v25  ;;  %v545_v11 = vadd.f32 %v4800_v49, %v473_v23  ;;  %v568_v30 = vadd.f32 %v567_v5, %v509_v13 }
 0x1bc   : >> { %1574 = vrot.lane.b32.xlu1 %v1572_v27, %s6368_s19  ;;  %v744_v27 = vmul.f32 %v4694_v20, %v743_v8  ;;  %v536_v35 = vadd.f32 %v4748_v2, %v464_v48  ;;  %v563_v60 = vadd.f32 %v562_v52, %v500_v58  ;;  %v748_v37 = vstv %s5019_s9  ;;  %s5154_s9 = sld [smem:[#allocation3 + $0x7f]] }
 0x1bd   : >> { %1565 = vrot.lane.b32.xlu0 %v1563_v39, %s6368_s19  ;;  %v5052_v45 = vpop.permute.xlu2 %1094  ;;  %v758_v8 = vstv %s5032_s2  ;;  %v633_v50 = vadd.f32 %v4772_v24, %v573_v42  ;;  %v763_v5 = vstv %s5025_s10  ;;  %v1643_v34 = vstv %s5046_s1  ;;  %s5163_s10 = sld [smem:[#allocation3 + $0x5b]] }
 0x1be   : >> { %v5060_v3 = vpop.permute.xlu1 %1004  ;;  %v745_v21 = vadd.f32 %v744_v27, %v678_v38  ;;  %v527_v2 = vadd.f32 %v4786_v36, %v455_v29  ;;  %v738_v52 = vstv %s5012_s26  ;;  %v930_v4 = vstv %s5038_s17  ;;  %s5148_s26 = sld [smem:[#allocation3 + $0x9c]] }
 0x1bf   : >> { %v5070_v39 = vpop.permute.xlu0 %995  ;;  %v1634_v7 = vstv %s5055_s16  ;;  %v588_v24 = vadd.f32 %v587_v15, %v545_v11  ;;  %v759_v19 = vmul.f32 %v4694_v20, %v758_v8  ;;  %v1438_v53 = vstv %s5063_s14  ;;  %s5171_s2 = sld [smem:[#allocation3 + $0x37]] }
 0x1c0   : >> { %v793_v49 = vadd.f32 %v4878_v32, %v745_v21  ;;  %v705_v32 = vadd.f32 %v4849_v43, %v633_v50  ;;  %v615_v36 = vadd.f32 %v4815_v63, %v563_v60  ;;  %v753_v51 = vstv %s5068_s30  ;;  %s5178_s17 = sld [smem:[#allocation3 + $0xbd]] }
 0x1c1   : >> { %v749_v13 = vmul.f32 %v4694_v20, %v748_v37  ;;  %v1644_v27 = vmul.f32 %v4988_v10, %v1643_v34  ;;  %v583_v14 = vadd.f32 %v582_v26, %v536_v35  ;;  %v931_v48 = vmul.f32 %v4745_v0, %v930_v4  ;;  %s5184_s1 = sld [smem:[#allocation3 + $0xe1]] }
 0x1c2   : >> { %v865_v43 = vadd.f32 %v4859_v59, %v793_v49  ;;  %v1635_v58 = vmul.f32 %v4988_v10, %v1634_v7  ;;  %v5130_v63 = vmul.f32 %v4694_v20, %v738_v52  ;;  %v5133_v25 = vmul.f32 %v4694_v20, %v763_v5  ;;  %s5189_s16 = sld [smem:[#allocation3 + $0x78]] }
 0x1c3   : >> { %1432 = vrot.lane.b32.xlu2 %v1430_v56, %s6367_s24  ;;  %v773_v56 = vstv %s5082_s3  ;;  %v1439_v29 = vmul.f32 %v4871_v18, %v1438_v53  ;;  %v578_v59 = vadd.f32 %v577_v6, %v527_v2  ;;  %v754_v23 = vmul.f32 %v4694_v20, %v753_v51  ;;  %v6374_v51 = vld [vmem:[#allocation25_spill] sm:$0xff]  ;;  %s5196_s14 = sld [smem:[#allocation3 + $0x108]] }
 0x1c4   : >> { %1423 = vrot.lane.b32.xlu1 %v1421_v17, %s6367_s24  ;;  %v660_v42 = vadd.f32 %v4784_v33, %v588_v24  ;;  %v760_v17 = vadd.f32 %v759_v19, %v705_v32  ;;  %v624_v26 = vadd.f32 %v4813_v61, %v568_v30  ;;  %v768_v15 = vstv %s5075_s0  ;;  %s5201_s30 = sld [smem:[#allocation3 + $0xee]] }
 0x1c5   : >> { %1592 = vrot.lane.b32.xlu0 %v1590_v41, %s6368_s19  ;;  %v5106_v9 = vpop.permute.xlu2 %1164  ;;  %v687_v41 = vadd.f32 %v4796_v44, %v615_v36  ;;  %v1117_v11 = vstv %s5093_s21  ;;  %v774_v21 = vmul.f32 %v4694_v20, %v773_v56  ;;  %v932_v33 = vadd.f32 %v931_v48, %v865_v43  ;;  %s5213_s0 = sld [smem:[#allocation3 + $0xca]] }
 0x1c6   : >> { %v5113_v28 = vpop.permute.xlu1 %1031  ;;  %v820_v6 = vadd.f32 %v4890_v55, %v760_v17  ;;  %v1526_v35 = vstv %s5100_s7  ;;  %v642_v44 = vadd.f32 %v4827_v16, %v578_v59  ;;  %v696_v61 = vadd.f32 %v4851_v47, %v624_v26  ;;  %v6377_v17 = vld [vmem:[#allocation26_spill] sm:$0xff]  ;;  %s5221_s3 = sld [smem:[#allocation3 + $0xa6]] }
 0x1c7   : >> { %v5121_v38 = vpop.permute.xlu0 %1022  ;;  %v945_v30 = vstv %s5087_s6  ;;  %v1661_v37 = vstv %s5109_s8  ;;  %v732_v55 = vadd.f32 %v4861_v1, %v660_v42  ;;  %v980_v8 = vadd.f32 %v5004_v40, %v932_v33  ;;  %s5226_s6 = sld [smem:[#allocation3 + $0x54]] }
 0x1c8   : >> { %v1118_v49 = vmul.f32 %v4808_v54, %v1117_v11  ;;  %v1652_v5 = vstv %s5116_s29  ;;  %v597_v16 = vadd.f32 %v4798_v46, %v5078_v62  ;;  %v769_v47 = vmul.f32 %v4694_v20, %v768_v15  ;;  %s5235_s21 = sld [smem:[#allocation3 + $0x9]] }
 0x1c9   : >> { %v750_v34 = vadd.f32 %v749_v13, %v687_v41  ;;  %v1527_v1 = vmul.f32 %v4988_v10, %v1526_v35  ;;  %v892_v40 = vadd.f32 %v4874_v22, %v820_v6  ;;  %v946_v52 = vmul.f32 %v4745_v0, %v945_v30  ;;  %s5241_s7 = sld [smem:[#allocation3 + $0xe4]] }
 0x1ca   : >> { %v1662_v7 = vmul.f32 %v4988_v10, %v1661_v37  ;;  %v651_v46 = vadd.f32 %v4825_v12, %v583_v14  ;;  %v714_v20 = vadd.f32 %v4811_v57, %v642_v44  ;;  %v755_v62 = vadd.f32 %v754_v23, %v696_v61  ;;  %v6380_v37 = vld [vmem:[#allocation34_spill] sm:$0xff]  ;;  %s5245_s8 = sld [smem:[#allocation3 + $0x38]] }
 0x1cb   : >> { %1646 = vrot.lane.b32.xlu2 %v1644_v27, %s6367_s24  ;;  %v1653_v24 = vmul.f32 %v4988_v10, %v1652_v5  ;;  %v775_v22 = vadd.f32 %v774_v21, %v732_v55  ;;  %v935_v32 = vstv %s5125_s5  ;;  %v960_v19 = vstv %s5141_s13  ;;  %v6375_v27 = vld [vmem:[#allocation31_spill] sm:$0xff]  ;;  %v6378_v21 = vld [vmem:[#allocation33_spill] sm:$0xff]  ;;  %s5258_s29 = sld [smem:[#allocation3 + $0x14]] }
 0x1cc   : >> { %1637 = vrot.lane.b32.xlu1 %v1635_v58, %s6367_s24  ;;  %v669_v36 = vadd.f32 %v4839_v31, %v597_v16  ;;  %v723_v13 = vadd.f32 %v6374_v51, %v651_v46  ;;  %v940_v12 = vstv %s5136_s12  ;;  %v1132_v57 = vstv %s5148_s26  ;;  %v6376_v58 = vld [vmem:[#allocation23_spill] sm:$0xff]  ;;  %s5266_s5 = sld [smem:[#allocation3 + $0x112]] }
 0x1cd   : >> { %1441 = vrot.lane.b32.xlu0 %v1439_v29, %s6367_s24  ;;  %v5160_v60 = vpop.permute.xlu2 %1191  ;;  %v847_v14 = vadd.f32 %v6375_v27, %v775_v22  ;;  %v947_v43 = vadd.f32 %v946_v52, %v892_v40  ;;  %v1553_v48 = vstv %s5154_s9  ;;  %v811_v56 = vadd.f32 %v6376_v58, %v755_v62  ;;  %s5272_s12 = sld [smem:[#allocation3 + $0xc0]] }
 0x1ce   : >> { %v5167_v50 = vpop.permute.xlu1 %1058  ;;  %v936_v29 = vmul.f32 %v4745_v0, %v935_v32  ;;  %v961_v59 = vmul.f32 %v4745_v0, %v960_v19  ;;  %v1544_v42 = vstv %s5163_s10  ;;  %v802_v26 = vadd.f32 %v6377_v17, %v750_v34  ;;  %s5283_s13 = sld [smem:[#allocation3 + $0xc]] }
 0x1cf   : >> { %v1050_v2 = vpop.permute.xlu0 %1049  ;;  %v1007_v41 = vadd.f32 %v5060_v3, %v947_v43  ;;  %v1535_v11 = vstv %s5171_s2  ;;  %v770_v6 = vadd.f32 %v769_v47, %v723_v13  ;;  %v883_v33 = vadd.f32 %v6378_v21, %v811_v56  ;;  %v6379_v3 = vld [vmem:[#allocation27_spill] sm:$0xff]  ;;  %s5289_s26 = sld [smem:[#allocation3 + $0xa7]] }
 0x1d0   : >> { %v1052_v4 = vadd.f32 %v1050_v2, %v980_v8  ;;  %v941_v35 = vmul.f32 %v4745_v0, %v940_v12  ;;  %v1554_v61 = vmul.f32 %v4988_v10, %v1553_v48  ;;  %v919_v30 = vadd.f32 %v6379_v3, %v847_v14  ;;  %s5298_s9 = sld [smem:[#allocation3 + $0x80]] }
 0x1d1   : >> { %v874_v55 = vadd.f32 %v6380_v37, %v802_v26  ;;  %v1536_v5 = vmul.f32 %v4988_v10, %v1535_v11  ;;  %v740_v16 = vadd.f32 %v5130_v63, %v669_v36  ;;  %v765_v47 = vadd.f32 %v5133_v25, %v714_v20  ;;  %v6382_v20 = vld [vmem:[#allocation28_spill] sm:$0xff]  ;;  %v6386_v26 = vld [vmem:[#allocation38_spill] sm:$0xff]  ;;  %v4237_v37 = vld [vmem:[%s4626_s11 + $0x18] sm:$0xff]  ;;  %s5303_s10 = sld [smem:[#allocation3 + $0x5c]] }
 0x1d2   : >> { %v1119_v53 = vadd.f32 %v1118_v49, %v1052_v4  ;;  %v1545_v49 = vmul.f32 %v4988_v10, %v1544_v42  ;;  %v950_v34 = vstv %s5178_s17  ;;  %v942_v52 = vadd.f32 %v941_v35, %v883_v33  ;;  %s5319_s2 = sld [smem:[#allocation3 + $0xf]] }
 0x1d3   : >> { %1529 = vrot.lane.b32.xlu2 %v1527_v1, %s6368_s19  ;;  %v6381_v1 = vld [vmem:[#allocation24_spill] sm:$0xff]  ;;  %v955_v4 = vstv %s5184_s1  ;;  %v937_v46 = vadd.f32 %v936_v29, %v874_v55  ;;  %v962_v62 = vadd.f32 %v961_v59, %v919_v30  ;;  %v1767_v63 = vstv %s5201_s30  ;;  %v6385_v29 = vld [vmem:[#allocation29_spill] sm:$0xff]  ;;  %s5324_s17 = sld [smem:[#allocation3 + $0x113]] }
 0x1d4   : >> { %1664 = vrot.lane.b32.xlu1 %v1662_v7, %s6367_s24  ;;  %v5204_v31 = vadd.f32 %v5106_v9, %v1119_v53  ;;  %v1133_v9 = vmul.f32 %v4808_v54, %v1132_v57  ;;  %v838_v40 = vadd.f32 %v6381_v1, %v770_v6  ;;  %v1147_v7 = vstv %s5196_s14  ;;  %v5255_v53 = vld [vmem:[%s4626_s11 + $0x31] sm:$0xff]  ;;  %s5329_s1 = sld [smem:[#allocation3 + $0xef]] }
 0x1d5   : >> { %1655 = vrot.lane.b32.xlu0 %v1653_v24, %s6367_s24  ;;  %v5210_v23 = vpop.permute.xlu2 %1218  ;;  %v829_v24 = vadd.f32 %v6382_v20, %v765_v47  ;;  %v951_v22 = vmul.f32 %v4745_v0, %v950_v34  ;;  %v998_v32 = vadd.f32 %v5070_v39, %v942_v52  ;;  %v1758_v36 = vstv %s5213_s0  ;;  %v6383_v39 = vld [vmem:[#allocation36_spill] sm:$0xff]  ;;  %v6388_v47 = vld [vmem:[#allocation30_spill] sm:$0xff]  ;;  %s5345_s14 = sld [smem:[#allocation3 + $0x7b]] }
 0x1d6   : >> { %v5217_v15 = vpop.permute.xlu1 %1085  ;;  %v1034_v51 = vadd.f32 %v5113_v28, %v962_v62  ;;  %v1749_v12 = vstv %s5221_s3  ;;  %v1127_v57 = vstv %s5189_s16  ;;  %v910_v27 = vadd.f32 %v6383_v39, %v838_v40  ;;  %v6384_v28 = vld [vmem:[#allocation37_spill] sm:$0xff]  ;;  %s5332_s16 = sld [smem:[#allocation3 + $0xcb]] }
 0x1d7   : >> { %v1077_v44 = vpop.permute.xlu0 %1076  ;;  %v956_v14 = vmul.f32 %v4745_v0, %v955_v4  ;;  %v1122_v48 = vstv %s5226_s6  ;;  %v1768_v58 = vmul.f32 %v5255_v53, %v1767_v63  ;;  %v901_v56 = vadd.f32 %v6384_v28, %v829_v24  ;;  %s5349_s30 = sld [smem:[#allocation3 + $0x5e]] }
 0x1d8   : >> { %v1079_v8 = vadd.f32 %v1077_v44, %v1007_v41  ;;  %v989_v59 = vadd.f32 %v6385_v29, %v937_v46  ;;  %v1759_v17 = vmul.f32 %v5255_v53, %v1758_v36  ;;  %v1070_v41 = vadd.f32 %v6386_v26, %v998_v32  ;;  %v6387_v44 = vld [vmem:[#allocation22_spill] sm:$0xff]  ;;  %v6389_v46 = vld [vmem:[#allocation32_spill] sm:$0xff]  ;;  %s5353_s0 = sld [smem:[#allocation3 + $0x3a]] }
 0x1d9   : >> { %v1128_v0 = vmul.f32 %v4808_v54, %v1127_v57  ;;  %v925_v11 = vstv %s5235_s21  ;;  %v1123_v33 = vmul.f32 %v4808_v54, %v1122_v48  ;;  %v957_v35 = vadd.f32 %v956_v14, %v910_v27  ;;  %v6390_v57 = vld [vmem:[#allocation39_spill] sm:$0xff]  ;;  %s3876_s3 = sld [smem:[#allocation3 + $0x16]] }
 0x1da   : >> { %v1134_v2 = vadd.f32 %v1133_v9, %v1079_v8  ;;  %v1750_v9 = vmul.f32 %v5255_v53, %v1749_v12  ;;  %v1061_v6 = vadd.f32 %v5167_v50, %v989_v59  ;;  %v952_v3 = vadd.f32 %v951_v22, %v901_v56  ;;  %v6391_v59 = vld [vmem:[#allocation35_spill] sm:$0xff]  ;;  %s5364_s6 = sld [smem:[#allocation3 + $0x57]] }
 0x1db   : >> { %1556 = vrot.lane.b32.xlu2 %v1554_v61, %s6368_s19  ;;  %v784_v61 = vadd.f32 %v6387_v44, %v740_v16  ;;  %v1607_v30 = vstv %s5245_s8  ;;  %v926_v55 = vmul.f32 %v4237_v37, %v925_v11  ;;  %v1025_v8 = vadd.f32 %v5121_v38, %v957_v35  ;;  %s5368_s21 = sld [smem:[#allocation3 + $0xe7]] }
 0x1dc   : >> { %1547 = vrot.lane.b32.xlu1 %v1545_v49, %s6368_s19  ;;  %v5248_v25 = vadd.f32 %v5160_v60, %v1134_v2  ;;  %v1148_v60 = vmul.f32 %v4808_v54, %v1147_v7  ;;  %v1598_v16 = vstv %s5258_s29  ;;  %v1124_v1 = vadd.f32 %v1123_v33, %v1061_v6  ;;  %s5378_s8 = sld [smem:[#allocation3 + $0xa9]] }
 0x1dd   : >> { %1538 = vrot.lane.b32.xlu0 %v1536_v5, %s6368_s19  ;;  %v1246_v19 = vpop.permute.xlu2 %1245  ;;  %v1129_v5 = vadd.f32 %v1128_v0, %v1070_v41  ;;  %v856_v34 = vadd.f32 %v6388_v47, %v784_v61  ;;  %v1776_v40 = vstv %s5266_s5  ;;  %v1142_v52 = vstv %s5241_s7  ;;  %s5372_s7 = sld [smem:[#allocation3 + $0xcd]] }
 0x1de   : >> { %v5261_v13 = vpop.permute.xlu1 %1155  ;;  %v1137_v7 = vstv %s5272_s12  ;;  %v1608_v38 = vmul.f32 %v4988_v10, %v1607_v30  ;;  %v1016_v62 = vadd.f32 %v6389_v46, %v952_v3  ;;  %v1599_v20 = vmul.f32 %v4988_v10, %v1598_v16  ;;  %s5381_s29 = sld [smem:[#allocation3 + $0x82]] }
 0x1df   : >> { %v1104_v43 = vpop.permute.xlu0 %1103  ;;  %v1097_v24 = vadd.f32 %v5052_v45, %v1025_v8  ;;  %v1777_v22 = vmul.f32 %v5255_v53, %v1776_v40  ;;  %v1143_v32 = vmul.f32 %v4808_v54, %v1142_v52  ;;  %v927_v36 = vadd.f32 %v926_v55, %v856_v34  ;;  %s5387_s5 = sld [smem:[#allocation3 + $0x33]] }
 0x1e0   : >> { %v1106_v42 = vadd.f32 %v1104_v43, %v1034_v51  ;;  %v1088_v51 = vadd.f32 %v5217_v15, %v1016_v62  ;;  %v1138_v12 = vmul.f32 %v4808_v54, %v1137_v7  ;;  %v1821_v45 = vstv %s5289_s26  ;;  %s5394_s12 = sld [smem:[#allocation3 + $0xc3]] }
 0x1e1   : >> { %v971_v39 = vadd.f32 %v6390_v57, %v927_v36  ;;  %v1112_v27 = vstv %s5283_s13  ;;  %v1625_v14 = vstv %s5298_s9  ;;  %v1822_v29 = vmul.f32 %v5255_v53, %v1821_v45  ;;  %s5398_s13 = sld [smem:[#allocation3 + $0x17]] }
 0x1e2   : >> { %v1149_v21 = vadd.f32 %v1148_v60, %v1106_v42  ;;  %v1139_v48 = vadd.f32 %v1138_v12, %v1088_v51  ;;  %v1626_v41 = vmul.f32 %v4988_v10, %v1625_v14  ;;  %v1299_v11 = vstv %s5319_s2  ;;  %s5409_s26 = sld [smem:[#allocation3 + $0x115]] }
 0x1e3   : >> { %1770 = vrot.lane.b32.xlu2 %v1768_v58, %s6368_s19  ;;  %v1616_v58 = vstv %s5303_s10  ;;  %v1043_v42 = vadd.f32 %v6391_v59, %v971_v39  ;;  %v1839_v33 = vstv %s5329_s1  ;;  %v1300_v61 = vmul.f32 %v4871_v18, %v1299_v11  ;;  %s5414_s9 = sld [smem:[#allocation3 + $0xf1]] }
 0x1e4   : >> { %1761 = vrot.lane.b32.xlu1 %v1759_v17, %s6368_s19  ;;  %v5292_v50 = vadd.f32 %v5210_v23, %v1149_v21  ;;  %v1113_v17 = vmul.f32 %v4808_v54, %v1112_v27  ;;  %v1848_v21 = vstv %s5324_s17  ;;  %v1830_v3 = vstv %s5332_s16  ;;  %s5421_s10 = sld [smem:[#allocation3 + $0x9f]] }
 0x1e5   : >> { %1752 = vrot.lane.b32.xlu0 %v1750_v9, %s6368_s19  ;;  %v1273_v49 = vpop.permute.xlu2 %1272  ;;  %v1617_v9 = vmul.f32 %v4988_v10, %v1616_v58  ;;  %v1849_v55 = vmul.f32 %v5255_v53, %v1848_v21  ;;  %v1713_v52 = vstv %s3876_s3  ;;  %v1936_v36 = vstv %s5378_s8  ;;  %s5431_s2 = sld [smem:[#allocation3 + $0x83]] }
 0x1e6   : >> { %v1183_v2 = vpop.permute.xlu1 %1182  ;;  %v1114_v6 = vadd.f32 %v1113_v17, %v1043_v42  ;;  %v1740_v57 = vstv %s5381_s29  ;;  %v1309_v39 = vstv %s5364_s6  ;;  %s5440_s17 = sld [smem:[#allocation3 + $0x5f]] }
 0x1e7   : >> { %v5305_v23 = vadd.f32 %v1183_v2, %v1129_v5  ;;  %v1174_v4 = vpop.permute.xlu0 %1173  ;;  %v1831_v5 = vmul.f32 %v5255_v53, %v1830_v3  ;;  %v1722_v2 = vstv %s5353_s0  ;;  %v1310_v58 = vmul.f32 %v4871_v18, %v1309_v39  ;;  %s5445_s1 = sld [smem:[#allocation3 + $0x3b]] }
 0x1e8   : >> { %v1176_v63 = vadd.f32 %v1174_v4, %v1124_v1  ;;  %v1158_v35 = vadd.f32 %v5261_v13, %v1114_v6  ;;  %v1314_v13 = vstv %s5345_s14  ;;  %v1723_v62 = vmul.f32 %v5255_v53, %v1722_v2  ;;  %s3823_s16 = sld [smem:[#allocation3 + $0x10b]] }
 0x1e9   : >> { %v1315_v40 = vmul.f32 %v4871_v18, %v1314_v13  ;;  %v1963_v17 = vstv %s5409_s26  ;;  %s5457_s14 = sld [smem:[#allocation3 + $0xf2]] }
 0x1ea   : >> { %v5315_v60 = vadd.f32 %v1246_v19, %v1176_v63  ;;  %v1144_v19 = vadd.f32 %v1143_v32, %v1097_v24  ;;  %v1714_v63 = vmul.f32 %v5255_v53, %v1713_v52  ;;  %v1329_v24 = vstv %s5368_s21  ;;  %v5406_v32 = vld [vmem:[%s4626_s11 + $0x32] sm:$0xff]  ;;  %s5468_s0 = sld [smem:[#allocation3 + $0xaa]] }
 0x1eb   : >> { %1610 = vrot.lane.b32.xlu2 %v1608_v38, %s6367_s24  ;;  %v1330_v12 = vmul.f32 %v4871_v18, %v1329_v24  ;;  %v1319_v21 = vstv %s5421_s10  ;;  %s5473_s3 = sld [smem:[#allocation3 + $0x12]] }
 0x1ec   : >> { %1601 = vrot.lane.b32.xlu1 %v1599_v20, %s6367_s24  ;;  %v1311_v42 = vadd.f32 %v1310_v58, %v5315_v60  ;;  %s3848_s6 = sld [smem:[#allocation3 + $0xea]] }
 0x1ed   : >> { %1779 = vrot.lane.b32.xlu0 %v1777_v22, %s6368_s19  ;;  %v1343_v15 = vpop.permute.xlu2 %1342  ;;  %s5479_s21 = sld [smem:[#allocation3 + $0xc6]] }
 0x1ee   : >> { %v1210_v43 = vpop.permute.xlu1 %1209  ;;  %s5487_s8 = sld [smem:[#allocation3 + $0x19]] }
 0x1ef   : >> { %v5334_v28 = vadd.f32 %v1210_v43, %v1144_v19  ;;  %v1201_v56 = vpop.permute.xlu0 %1200  ;;  %v1937_v43 = vmul.f32 %v5406_v32, %v1936_v36  ;;  %s5493_s29 = sld [smem:[#allocation3 + $0x116]] }
 0x1f0   : >> { %v1203_v26 = vadd.f32 %v1201_v56, %v1139_v48  ;;  %v1741_v48 = vmul.f32 %v5255_v53, %v1740_v57  ;;  %v2008_v24 = vstv %s5468_s0  ;;  %s5517_s26 = sld [smem:[#allocation3 + $0x61]] }
 0x1f1   : >> { %v2009_v57 = vmul.f32 %v5406_v32, %v2008_v24  ;;  %s5535_s10 = sld [smem:[#allocation3 + $0x118]] }
 0x1f2   : >> { %v5341_v0 = vadd.f32 %v1273_v49, %v1203_v26  ;;  %v1840_v49 = vmul.f32 %v5255_v53, %v1839_v33  ;;  %v1964_v33 = vmul.f32 %v5406_v32, %v1963_v17  ;;  %s5574_s0 = sld [smem:[#allocation3 + $0x5a]] }
 0x1f3   : >> { %1824 = vrot.lane.b32.xlu2 %v1822_v29, %s6367_s24  ;;  %v1785_v29 = vstv %s5398_s13  ;;  %s5513_s13 = sld [smem:[#allocation3 + $0x85]]  ;;  %v1511_v58 = vstv %s5479_s21 }
 0x1f4   : >> { %1628 = vrot.lane.b32.xlu1 %v1626_v41, %s6367_s24  ;;  %v1954_v41 = vstv %s5414_s9  ;;  %s5522_s9 = sld [smem:[#allocation3 + $0x10e]] }
 0x1f5   : >> { %1619 = vrot.lane.b32.xlu0 %v1617_v9, %s6367_s24  ;;  %v1370_v54 = vpop.permute.xlu2 %1369  ;;  %v1324_v9 = vstv %s5394_s12  ;;  %s5507_s12 = sld [smem:[#allocation3 + $0xac]] }
 0x1f6   : >> { %v1237_v44 = vpop.permute.xlu1 %1236  ;;  %s5585_s21 = sld [smem:[#allocation3 + $0xad]] }
 0x1f7   : >> { %v5359_v30 = vadd.f32 %v1237_v44, %v5204_v31  ;;  %v1228_v37 = vpop.permute.xlu0 %1227  ;;  %v1731_v31 = vstv %s5349_s30  ;;  %v4238_v44 = vld [vmem:[%s4626_s11 + $0x1a] sm:$0xff]  ;;  %s5464_s30 = sld [smem:[#allocation3 + $0xce]] }
 0x1f8   : >> { %v1230_v8 = vadd.f32 %v1228_v37, %v1158_v35  ;;  %v1732_v38 = vmul.f32 %v5255_v53, %v1731_v31  ;;  %v1955_v35 = vmul.f32 %v5406_v32, %v1954_v41  ;;  %v1320_v3 = vmul.f32 %v4238_v44, %v1319_v21 }
 0x1fa   : >> { %v1301_v16 = vadd.f32 %v1300_v61, %v1230_v8  ;;  %v1325_v61 = vmul.f32 %v4238_v44, %v1324_v9  ;;  %v1803_v8 = vstv %s5440_s17  ;;  %v1512_v9 = vmul.f32 %v4988_v10, %v1511_v58  ;;  %s3933_s17 = sld [smem:[#allocation3 + $0xd0]] }
 0x1fb   : >> { %1851 = vrot.lane.b32.xlu2 %v1849_v55, %s6367_s24  ;;  %v2123_v21 = vstv %s5507_s12  ;;  %s5610_s12 = sld [smem:[#allocation3 + $0x119]] }
 0x1fc   : >> { %1842 = vrot.lane.b32.xlu1 %v1840_v49, %s6367_s24  ;;  %v5374_v47 = vadd.f32 %v1343_v15, %v1301_v16  ;;  %v1304_v15 = vstv %s5387_s5  ;;  %v1326_v55 = vadd.f32 %v1325_v61, %v5341_v0  ;;  %v1794_v16 = vstv %s5445_s1  ;;  %s5497_s5 = sld [smem:[#allocation3 + $0xa2]] }
 0x1fd   : >> { %1833 = vrot.lane.b32.xlu0 %v1831_v5, %s6367_s24  ;;  %v1397_v34 = vpop.permute.xlu2 %1396  ;;  %v1795_v0 = vmul.f32 %v5255_v53, %v1794_v16  ;;  %s3845_s1 = sld [smem:[#allocation3 + $0x7e]] }
 0x1fe   : >> { %v1264_v1 = vpop.permute.xlu1 %1263 }
 0x1ff   : >> { %v5384_v4 = vadd.f32 %v1264_v1, %v5248_v25  ;;  %v1255_v7 = vpop.permute.xlu0 %1254  ;;  %v1945_v25 = vstv %s5372_s7  ;;  %s5483_s7 = sld [smem:[#allocation3 + $0x3d]] }
 0x200   : >> { %v1257_v46 = vadd.f32 %v1255_v7, %v5305_v23  ;;  %v1946_v19 = vmul.f32 %v5406_v32, %v1945_v25  ;;  %v2026_v7 = vstv %s5457_s14  ;;  %s5565_s14 = sld [smem:[#allocation3 + $0x3e]] }
 0x201   : >> { %v1321_v5 = vadd.f32 %v1320_v3, %v5384_v4  ;;  %v2027_v36 = vmul.f32 %v5406_v32, %v2026_v7  ;;  %v1918_v3 = vstv %s5517_s26  ;;  %v2132_v7 = vstv %s3933_s17  ;;  %s5621_s26 = sld [smem:[#allocation3 + $0xa5]] }
 0x202   : >> { %v1316_v20 = vadd.f32 %v1315_v40, %v1257_v46  ;;  %v1804_v40 = vmul.f32 %v5255_v53, %v1803_v8  ;;  %v2017_v46 = vstv %s5464_s30  ;;  %v1521_v8 = vstv %s5522_s9  ;;  %s3910_s30 = sld [smem:[#allocation3 + $0x1a]] }
 0x203   : >> { %1734 = vrot.lane.b32.xlu2 %v1732_v38, %s6368_s19  ;;  %s5633_s9 = sld [smem:[#allocation3 + $0x88]] }
 0x204   : >> { %1725 = vrot.lane.b32.xlu1 %v1723_v62, %s6368_s19  ;;  %v5400_v22 = vadd.f32 %v1370_v54, %v1316_v20  ;;  %v1786_v54 = vmul.f32 %v5255_v53, %v1785_v29  ;;  %v1506_v29 = vstv %s5497_s5  ;;  %s5606_s5 = sld [smem:[#allocation3 + $0x1c]] }
 0x205   : >> { %1716 = vrot.lane.b32.xlu0 %v1714_v63, %s6368_s19  ;;  %v5403_v23 = vpop.permute.xlu2 %1450  ;;  %s3875_s17 = sld [smem:[#allocation3 + $0x111]] }
 0x206   : >> { %v1291_v51 = vpop.permute.xlu1 %1290 }
 0x207   : >> { %v5417_v45 = vadd.f32 %v1291_v51, %v5292_v50  ;;  %v1282_v27 = vpop.permute.xlu0 %1281  ;;  %v1305_v50 = vmul.f32 %v4871_v18, %v1304_v15 }
 0x208   : >> { %v1284_v14 = vadd.f32 %v1282_v27, %v5334_v28 }
 0x209   : >> { %v1306_v26 = vadd.f32 %v1305_v50, %v5359_v30  ;;  %v1812_v30 = vstv %s5431_s2  ;;  %s5539_s2 = sld [smem:[#allocation3 + $0xf4]] }
 0x20a   : >> { %v1331_v56 = vadd.f32 %v1330_v12, %v1284_v14  ;;  %v1813_v2 = vmul.f32 %v5255_v53, %v1812_v30  ;;  %v2018_v12 = vmul.f32 %v5406_v32, %v2017_v46  ;;  %v1486_v14 = vstv %s5473_s3  ;;  %v5546_v30 = vld [vmem:[%s4626_s11 + $0x48] sm:$0xff]  ;;  %s5577_s3 = sld [smem:[#allocation3 + $0xed]] }
 0x20b   : >> { %1948 = vrot.lane.b32.xlu2 %v1946_v19, %s6368_s19  ;;  %v1900_v19 = vstv %s5487_s8  ;;  %s5593_s8 = sld [smem:[#allocation3 + $0x36]] }
 0x20c   : >> { %1939 = vrot.lane.b32.xlu1 %v1937_v43, %s6368_s19  ;;  %v5433_v28 = vadd.f32 %v1397_v34, %v1331_v56  ;;  %v1334_v34 = vstv %s3823_s16  ;;  %v1901_v17 = vmul.f32 %v5406_v32, %v1900_v19  ;;  %s5561_s16 = sld [smem:[#allocation3 + $0x62]] }
 0x20d   : >> { %1743 = vrot.lane.b32.xlu0 %v1741_v48, %s6368_s19  ;;  %v5436_v59 = vpop.permute.xlu2 %1477  ;;  %v1335_v4 = vmul.f32 %v4238_v44, %v1334_v34  ;;  %v2035_v48 = vstv %s5493_s29  ;;  %v5555_v34 = vld [vmem:[%s4626_s11 + $0x30] sm:$0xff]  ;;  %s5600_s29 = sld [smem:[#allocation3 + $0xc9]] }
 0x20e   : >> { %v1361_v18 = vpop.permute.xlu1 %1360  ;;  %v2036_v41 = vmul.f32 %v5406_v32, %v2035_v48 }
 0x20f   : >> { %v1363_v11 = vadd.f32 %v1361_v18, %v1311_v42  ;;  %v1352_v6 = vpop.permute.xlu0 %1351  ;;  %v1336_v20 = vadd.f32 %v1335_v4, %v5417_v45  ;;  %v1516_v45 = vstv %s3848_s6  ;;  %v1487_v18 = vmul.f32 %v4988_v10, %v1486_v14  ;;  %s5581_s6 = sld [smem:[#allocation3 + $0xd1]] }
 0x210   : >> { %v5449_v60 = vadd.f32 %v1352_v6, %v1306_v26  ;;  %v1517_v15 = vmul.f32 %v4988_v10, %v1516_v45  ;;  %v1703_v48 = vstv %s5577_s3  ;;  %s5687_s3 = sld [smem:[#allocation3 + $0x1d]] }
 0x213   : >> { %1788 = vrot.lane.b32.xlu2 %v1786_v54, %s6367_s24 }
 0x214   : >> { %1966 = vrot.lane.b32.xlu1 %v1964_v33, %s6368_s19 }
 0x215   : >> { %1957 = vrot.lane.b32.xlu0 %v1955_v35, %s6368_s19  ;;  %v5460_v37 = vpop.permute.xlu2 %1583  ;;  %v1927_v35 = vstv %s5513_s13  ;;  %s5615_s13 = sld [smem:[#allocation3 + $0xf5]] }
 0x216   : >> { %v1388_v49 = vpop.permute.xlu1 %1387  ;;  %v1928_v16 = vmul.f32 %v5406_v32, %v1927_v35 }
 0x217   : >> { %v1390_v13 = vadd.f32 %v1388_v49, %v1326_v55  ;;  %v1379_v31 = vpop.permute.xlu0 %1378  ;;  %v2124_v49 = vmul.f32 %v5546_v30, %v2123_v21 }
 0x218   : >> { %v1381_v1 = vadd.f32 %v1379_v31, %v1321_v5  ;;  %v1919_v31 = vmul.f32 %v5406_v32, %v1918_v3  ;;  %v2222_v3 = vstv %s5610_s12  ;;  %s5719_s12 = sld [smem:[#allocation3 + $0x15]] }
 0x21a   : >> { %v5476_v52 = vadd.f32 %v5403_v23, %v1381_v1  ;;  %v2150_v1 = vstv %s5535_s10  ;;  %s5638_s10 = sld [smem:[#allocation3 + $0x64]] }
 0x21b   : >> { %1815 = vrot.lane.b32.xlu2 %v1813_v2, %s6367_s24  ;;  %v1522_v2 = vmul.f32 %v5555_v34, %v1521_v8 }
 0x21c   : >> { %1806 = vrot.lane.b32.xlu1 %v1804_v40, %s6367_s24  ;;  %v2141_v40 = vstv %s5539_s2  ;;  %s5643_s2 = sld [smem:[#allocation3 + $0x40]] }
 0x21d   : >> { %1797 = vrot.lane.b32.xlu0 %v1795_v0, %s6367_s24  ;;  %v1433_v38 = vpop.permute.xlu2 %1432  ;;  %v2142_v24 = vmul.f32 %v5546_v30, %v2141_v40 }
 0x21e   : >> { %v5489_v62 = vadd.f32 %v1433_v38, %v1363_v11  ;;  %v1415_v63 = vpop.permute.xlu1 %1414 }
 0x21f   : >> { %v1417_v25 = vadd.f32 %v1415_v63, %v5374_v47  ;;  %v1406_v23 = vpop.permute.xlu0 %1405  ;;  %v1909_v47 = vstv %s5483_s7  ;;  %v2151_v63 = vmul.f32 %v5546_v30, %v2150_v1  ;;  %s5588_s7 = sld [smem:[#allocation3 + $0x86]]  ;;  %v2223_v1 = vmul.f32 %v5546_v30, %v2222_v3 }
 0x220   : >> { %v1408_v51 = vadd.f32 %v1406_v23, %v1336_v20  ;;  %v1501_v23 = vstv %s3845_s1  ;;  %s5658_s1 = sld [smem:[#allocation3 + $0xf7]] }
 0x221   : >> { %v1488_v6 = vadd.f32 %v1487_v18, %v1417_v25  ;;  %v2133_v25 = vmul.f32 %v5546_v30, %v2132_v7  ;;  %v2114_v7 = vstv %s5633_s9  ;;  %s5736_s9 = sld [smem:[#allocation3 + $0xf8]] }
 0x222   : >> { %v5502_v39 = vadd.f32 %v5436_v59, %v1408_v51  ;;  %v1910_v59 = vmul.f32 %v5406_v32, %v1909_v47 }
 0x223   : >> { %2029 = vrot.lane.b32.xlu2 %v2027_v36, %s6367_s24  ;;  %v1990_v36 = vstv %s5561_s16  ;;  %s5663_s16 = sld [smem:[#allocation3 + $0xd3]] }
 0x224   : >> { %2020 = vrot.lane.b32.xlu1 %v2018_v12, %s6367_s24  ;;  %v1523_v4 = vadd.f32 %v1522_v2, %v5502_v39  ;;  %v1972_v39 = vstv %s3910_s30  ;;  %s5676_s30 = sld [smem:[#allocation3 + $0x5d]] }
 0x225   : >> { %2011 = vrot.lane.b32.xlu0 %v2009_v57, %s6367_s24  ;;  %v1647_v27 = vpop.permute.xlu2 %1646  ;;  %v1502_v57 = vmul.f32 %v5555_v34, %v1501_v23  ;;  %v1973_v14 = vmul.f32 %v5406_v32, %v1972_v39 }
 0x226   : >> { %v1469_v43 = vpop.permute.xlu1 %1468 }
 0x227   : >> { %v1471_v56 = vadd.f32 %v1469_v43, %v5433_v28  ;;  %v1460_v50 = vpop.permute.xlu0 %1459  ;;  %v1507_v28 = vmul.f32 %v4988_v10, %v1506_v29 }
 0x228   : >> { %v1462_v42 = vadd.f32 %v1460_v50, %v1390_v13 }
 0x229   : >> { %v1518_v26 = vadd.f32 %v1517_v15, %v1471_v56  ;;  %v1508_v61 = vadd.f32 %v1507_v28, %v5476_v52  ;;  %v2204_v56 = vstv %s5581_s6  ;;  %s3961_s6 = sld [smem:[#allocation3 + $0x11b]] }
 0x22a   : >> { %v1513_v33 = vadd.f32 %v1512_v9, %v1462_v42  ;;  %v1999_v42 = vstv %s5588_s7  ;;  %v2205_v9 = vmul.f32 %v5546_v30, %v2204_v56  ;;  %s5702_s7 = sld [smem:[#allocation3 + $0xcc]] }
 0x22b   : >> { %1912 = vrot.lane.b32.xlu2 %v1910_v59, %s6368_s19  ;;  %v5531_v11 = vadd.f32 %v5460_v37, %v1518_v26  ;;  %v1704_v59 = vmul.f32 %v5255_v53, %v1703_v48  ;;  %v2000_v21 = vmul.f32 %v5406_v32, %v1999_v42 }
 0x22c   : >> { %1903 = vrot.lane.b32.xlu1 %v1901_v17, %s6368_s19  ;;  %v1496_v17 = vstv %s5574_s0  ;;  %s5680_s0 = sld [smem:[#allocation3 + $0x41]] }
 0x22d   : >> { %2038 = vrot.lane.b32.xlu0 %v2036_v41, %s6367_s24  ;;  %v1530_v54 = vpop.permute.xlu2 %1529  ;;  %v1491_v41 = vstv %s5593_s8  ;;  %s5706_s8 = sld [smem:[#allocation3 + $0xb0]] }
 0x22e   : >> { %v5541_v10 = vadd.f32 %v1530_v54, %v1488_v6  ;;  %v1575_v44 = vpop.permute.xlu1 %1574  ;;  %v1497_v54 = vmul.f32 %v5555_v34, %v1496_v17  ;;  %v1492_v35 = vmul.f32 %v5555_v34, %v1491_v41  ;;  %v1693_v34 = vstv %s5621_s26  ;;  %s5732_s26 = sld [smem:[#allocation3 + $0x11c]] }
 0x22f   : >> { %v1577_v37 = vadd.f32 %v1575_v44, %v1513_v33  ;;  %v1566_v55 = vpop.permute.xlu0 %1565 }
 0x230   : >> { %v1568_v5 = vadd.f32 %v1566_v55, %v1508_v61  ;;  %v2087_v61 = vstv %s5606_s5  ;;  %s5713_s5 = sld [smem:[#allocation3 + $0x65]] }
 0x231   : >> { %v5551_v13 = vadd.f32 %v1647_v27, %v1577_v37  ;;  %v1991_v27 = vmul.f32 %v5406_v32, %v1990_v36  ;;  %v2088_v2 = vmul.f32 %v5546_v30, %v2087_v61 }
 0x233   : >> { %2126 = vrot.lane.b32.xlu2 %v2124_v49, %s6368_s19  ;;  %v2213_v49 = vstv %s5615_s13  ;;  %s5726_s13 = sld [smem:[#allocation3 + $0xa8]] }
 0x234   : >> { %1930 = vrot.lane.b32.xlu1 %v1928_v16, %s6368_s19  ;;  %v2214_v40 = vmul.f32 %v5546_v30, %v2213_v49 }
 0x235   : >> { %1921 = vrot.lane.b32.xlu0 %v1919_v31, %s6368_s19  ;;  %v1557_v0 = vpop.permute.xlu2 %1556 }
 0x236   : >> { %v1424_v52 = vpop.permute.xlu1 %1423 }
 0x237   : >> { %v5569_v38 = vadd.f32 %v1424_v52, %v5449_v60  ;;  %v1593_v46 = vpop.permute.xlu0 %1592  ;;  %v1981_v60 = vstv %s5565_s14  ;;  %s3958_s14 = sld [smem:[#allocation3 + $0xaf]] }
 0x238   : >> { %v1595_v20 = vadd.f32 %v1593_v46, %v1523_v4  ;;  %v1982_v19 = vmul.f32 %v5406_v32, %v1981_v60  ;;  %v1694_v4 = vmul.f32 %v5255_v53, %v1693_v34  ;;  %v2105_v46 = vstv %s5638_s10  ;;  %s5741_s10 = sld [smem:[#allocation3 + $0xd4]] }
 0x239   : >> { %v1493_v8 = vadd.f32 %v1492_v35, %v5569_v38  ;;  %v1708_v60 = vstv %s3875_s17  ;;  %s5756_s17 = sld [smem:[#allocation3 + $0x114]] }
 0x23b   : >> { %2153 = vrot.lane.b32.xlu2 %v2151_v63, %s6368_s19 }
 0x23c   : >> { %2144 = vrot.lane.b32.xlu1 %v2142_v24, %s6368_s19 }
 0x23d   : >> { %2135 = vrot.lane.b32.xlu0 %v2133_v25, %s6368_s19  ;;  %v1771_v51 = vpop.permute.xlu2 %1770  ;;  %v2096_v25 = vstv %s5643_s2  ;;  %v2310_v48 = vstv %s3958_s14  ;;  %s5748_s2 = sld [smem:[#allocation3 + $0x81]] }
 0x23e   : >> { %v1638_v12 = vpop.permute.xlu1 %1637  ;;  %s5772_s14 = sld [smem:[#allocation3 + $0x1f]] }
 0x23f   : >> { %v5590_v45 = vadd.f32 %v1638_v12, %v1568_v5  ;;  %v1442_v47 = vpop.permute.xlu0 %1441  ;;  %v1698_v5 = vstv %s5600_s29  ;;  %s5710_s29 = sld [smem:[#allocation3 + $0x89]] }
 0x240   : >> { %v1444_v15 = vadd.f32 %v1442_v47, %v5400_v22  ;;  %v2195_v22 = vstv %s5585_s21  ;;  %v1709_v47 = vmul.f32 %v5255_v53, %v1708_v60  ;;  %s5698_s21 = sld [smem:[#allocation3 + $0x39]] }
 0x241   : >> { %v2196_v6 = vmul.f32 %v5546_v30, %v2195_v22  ;;  %v1695_v24 = vadd.f32 %v1694_v4, %v5590_v45  ;;  %v2328_v45 = vstv %s5658_s1  ;;  %s5762_s1 = sld [smem:[#allocation3 + $0x67]] }
 0x242   : >> { %v1503_v43 = vadd.f32 %v1502_v57, %v1444_v15  ;;  %v2097_v57 = vmul.f32 %v5546_v30, %v2096_v25  ;;  %v2319_v15 = vstv %s5663_s16  ;;  %v2400_v25 = vstv %s5736_s9  ;;  %s5767_s16 = sld [smem:[#allocation3 + $0x43]] }
 0x243   : >> { %1993 = vrot.lane.b32.xlu2 %v1991_v27, %s6367_s24  ;;  %v5684_v27 = vld [vmem:[%s4626_s11 + $0x49] sm:$0xff]  ;;  %s5856_s9 = sld [smem:[#allocation3 + $0x84]] }
 0x244   : >> { %v5602_v58 = vadd.f32 %v1557_v0, %v1503_v43  ;;  %1984 = vrot.lane.b32.xlu1 %v1982_v19, %s6367_s24  ;;  %v1699_v0 = vmul.f32 %v5255_v53, %v1698_v5  ;;  %v2311_v42 = vmul.f32 %v5684_v27, %v2310_v48 }
 0x245   : >> { %1975 = vrot.lane.b32.xlu0 %v1973_v14, %s6367_s24  ;;  %v1611_v50 = vpop.permute.xlu2 %1610 }
 0x246   : >> { %v1665_v29 = vpop.permute.xlu1 %1664  ;;  %v1700_v38 = vadd.f32 %v1699_v0, %v5551_v13  ;;  %v2106_v13 = vmul.f32 %v5546_v30, %v2105_v46  ;;  %v1678_v34 = vstv %s5698_s21  ;;  %s5809_s21 = sld [smem:[#allocation3 + $0x3c]] }
 0x247   : >> { %v5617_v18 = vadd.f32 %v1665_v29, %v1595_v20  ;;  %v1656_v26 = vpop.permute.xlu0 %1655 }
 0x248   : >> { %v1658_v28 = vadd.f32 %v1656_v26, %v5531_v11  ;;  %v1498_v11 = vadd.f32 %v1497_v54, %v5489_v62  ;;  %v1683_v26 = vstv %s5676_s30  ;;  %s3900_s30 = sld [smem:[#allocation3 + $0xf0]] }
 0x249   : >> { %v1710_v43 = vadd.f32 %v1709_v47, %v5617_v18  ;;  %v2159_v18 = vstv %s5687_s3  ;;  %v1688_v47 = vstv %s5748_s2  ;;  %s5792_s3 = sld [smem:[#allocation3 + $0xb2]] }
 0x24a   : >> { %v1705_v33 = vadd.f32 %v1704_v59, %v1658_v28  ;;  %v2320_v59 = vmul.f32 %v5684_v27, %v2319_v15  ;;  %v1684_v28 = vmul.f32 %v5255_v53, %v1683_v26  ;;  %v2160_v61 = vmul.f32 %v5546_v30, %v2159_v18  ;;  %s5866_s2 = sld [smem:[#allocation3 + $0xfb]] }
 0x24b   : >> { %2207 = vrot.lane.b32.xlu2 %v2205_v9, %s6367_s24  ;;  %v2401_v15 = vmul.f32 %v5684_v27, %v2400_v25  ;;  %v1689_v48 = vmul.f32 %v5255_v53, %v1688_v47  ;;  %v2274_v26 = vstv %s5772_s14  ;;  %s5889_s14 = sld [smem:[#allocation3 + $0xf3]] }
 0x24c   : >> { %v5629_v44 = vadd.f32 %v1771_v51, %v1705_v33  ;;  %2198 = vrot.lane.b32.xlu1 %v2196_v6, %s6367_s24  ;;  %v2115_v51 = vmul.f32 %v5546_v30, %v2114_v7  ;;  %v2337_v6 = vstv %s3961_s6  ;;  %s5797_s6 = sld [smem:[#allocation3 + $0x8b]] }
 0x24d   : >> { %2002 = vrot.lane.b32.xlu0 %v2000_v21, %s6367_s24  ;;  %v1825_v37 = vpop.permute.xlu2 %1824 }
 0x24e   : >> { %v1548_v55 = vpop.permute.xlu1 %1547 }
 0x24f   : >> { %v5645_v16 = vadd.f32 %v1548_v55, %v1498_v11  ;;  %v1539_v31 = vpop.permute.xlu0 %1538  ;;  %v2338_v11 = vmul.f32 %v5684_v27, %v2337_v6  ;;  %v2382_v55 = vstv %s5706_s8  ;;  %v2275_v6 = vmul.f32 %v5684_v27, %v2274_v26  ;;  %s5821_s8 = sld [smem:[#allocation3 + $0x11e]] }
 0x250   : >> { %v1541_v62 = vadd.f32 %v1539_v31, %v1493_v8  ;;  %v2186_v8 = vstv %s5710_s29  ;;  %v2177_v31 = vstv %s5713_s5  ;;  %s3986_s29 = sld [smem:[#allocation3 + $0xfa]]  ;;  %v2587_v26 = vstv %s5866_s2 }
 0x251   : >> { %v2187_v4 = vmul.f32 %v5546_v30, %v2186_v8  ;;  %v2178_v7 = vmul.f32 %v5546_v30, %v2177_v31  ;;  %s5836_s5 = sld [smem:[#allocation3 + $0xab]] }
 0x252   : >> { %v5652_v52 = vadd.f32 %v1611_v50, %v1541_v62  ;;  %v2329_v50 = vmul.f32 %v5684_v27, %v2328_v45  ;;  %s3953_s2 = sld [smem:[#allocation3 + $0x11a]] }
 0x253   : >> { %2090 = vrot.lane.b32.xlu2 %v2088_v2, %s6368_s19 }
 0x254   : >> { %2225 = vrot.lane.b32.xlu1 %v2223_v1, %s6367_s24  ;;  %v1673_v1 = vstv %s5719_s12  ;;  %s5840_s12 = sld [smem:[#allocation3 + $0x8c]] }
 0x255   : >> { %2216 = vrot.lane.b32.xlu0 %v2214_v40, %s6367_s24  ;;  %v1852_v63 = vpop.permute.xlu2 %1851  ;;  %v2383_v40 = vmul.f32 %v5684_v27, %v2382_v55 }
 0x256   : >> { %v1762_v20 = vpop.permute.xlu1 %1761 }
 0x257   : >> { %v5667_v23 = vadd.f32 %v1762_v20, %v1700_v38  ;;  %v1753_v36 = vpop.permute.xlu0 %1752  ;;  %v1679_v38 = vmul.f32 %v5255_v53, %v1678_v34  ;;  %v2409_v20 = vstv %s5732_s26  ;;  %s5847_s26 = sld [smem:[#allocation3 + $0x44]] }
 0x258   : >> { %v1755_v12 = vadd.f32 %v1753_v36, %v1695_v24  ;;  %v2410_v45 = vmul.f32 %v5684_v27, %v2409_v20 }
 0x259   : >> { %v1680_v24 = vadd.f32 %v1679_v38, %v5652_v52 }
 0x25a   : >> { %v5672_v39 = vadd.f32 %v1825_v37, %v1755_v12  ;;  %v1885_v37 = vstv %s5702_s7  ;;  %v1880_v12 = vstv %s5726_s13  ;;  %s5813_s7 = sld [smem:[#allocation3 + $0x20]] }
 0x25b   : >> { %2117 = vrot.lane.b32.xlu2 %v2115_v51, %s6368_s19  ;;  %v2391_v51 = vstv %s5741_s10  ;;  %s5844_s13 = sld [smem:[#allocation3 + $0x68]] }
 0x25c   : >> { %2108 = vrot.lane.b32.xlu1 %v2106_v13, %s6368_s19  ;;  %s5860_s10 = sld [smem:[#allocation3 + $0x117]] }
 0x25d   : >> { %2099 = vrot.lane.b32.xlu0 %v2097_v57, %s6368_s19  ;;  %v1735_v19 = vpop.permute.xlu2 %1734 }
 0x25e   : >> { %v1602_v14 = vpop.permute.xlu1 %1601 }
 0x25f   : >> { %v5691_v56 = vadd.f32 %v1602_v14, %v5541_v10  ;;  %v1780_v22 = vpop.permute.xlu0 %1779  ;;  %v2168_v10 = vstv %s5680_s0  ;;  %v1881_v14 = vmul.f32 %v5406_v32, %v1880_v12  ;;  %s5787_s0 = sld [smem:[#allocation3 + $0xd6]]  ;;  %v2373_v12 = vstv %s5840_s12 }
 0x260   : >> { %v1782_v29 = vadd.f32 %v1780_v22, %v1710_v43  ;;  %v2169_v33 = vmul.f32 %v5546_v30, %v2168_v10  ;;  %s3989_s12 = sld [smem:[#allocation3 + $0x47]] }
 0x261   : >> { %v1882_v22 = vadd.f32 %v1881_v14, %v5672_v39 }
 0x262   : >> { %v5696_v17 = vadd.f32 %v1852_v63, %v1782_v29 }
 0x263   : >> { %2331 = vrot.lane.b32.xlu2 %v2329_v50, %s6368_s19  ;;  %v2283_v50 = vstv %s5767_s16  ;;  %s5881_s16 = sld [smem:[#allocation3 + $0x60]] }
 0x264   : >> { %2322 = vrot.lane.b32.xlu1 %v2320_v59, %s6368_s19 }
 0x265   : >> { %2313 = vrot.lane.b32.xlu0 %v2311_v42, %s6368_s19  ;;  %v1949_v41 = vpop.permute.xlu2 %1948 }
 0x266   : >> { %v1629_v9 = vpop.permute.xlu1 %1628 }
 0x267   : >> { %v5716_v21 = vadd.f32 %v1629_v9, %v5602_v58  ;;  %v1620_v54 = vpop.permute.xlu0 %1619 }
 0x268   : >> { %v1622_v35 = vadd.f32 %v1620_v54, %v5645_v16  ;;  %v1886_v16 = vmul.f32 %v5406_v32, %v1885_v37 }
 0x269   : >> { %v1690_v42 = vadd.f32 %v1689_v48, %v5716_v21  ;;  %v2374_v48 = vmul.f32 %v5684_v27, %v2373_v12 }
 0x26a   : >> { %v1685_v3 = vadd.f32 %v1684_v28, %v1622_v35  ;;  %v2284_v28 = vmul.f32 %v5684_v27, %v2283_v50  ;;  %v2506_v35 = vstv %s5787_s0  ;;  %s5900_s0 = sld [smem:[#allocation3 + $0x22]] }
 0x26b   : >> { %2171 = vrot.lane.b32.xlu2 %v2169_v33, %s6367_s24 }
 0x26c   : >> { %v5728_v58 = vadd.f32 %v1735_v19, %v1685_v3  ;;  %2162 = vrot.lane.b32.xlu1 %v2160_v61, %s6367_s24  ;;  %v2392_v19 = vmul.f32 %v5684_v27, %v2391_v51  ;;  %v2497_v3 = vstv %s5792_s3  ;;  %v2067_v51 = vstv %s5836_s5  ;;  %s5905_s3 = sld [smem:[#allocation3 + $0x11f]] }
 0x26d   : >> { %2340 = vrot.lane.b32.xlu0 %v2338_v11, %s6368_s19  ;;  %v1789_v49 = vpop.permute.xlu2 %1788  ;;  %v5818_v11 = vld [vmem:[%s4626_s11 + $0x4a] sm:$0xff]  ;;  %s5832_s11 = sld [smem:[#allocation3 + $0x18]] }
 0x26e   : >> { %v1843_v5 = vpop.permute.xlu1 %1842  ;;  %v2507_v31 = vmul.f32 %v5818_v11, %v2506_v35  ;;  %v2498_v34 = vmul.f32 %v5818_v11, %v2497_v3  ;;  %v2588_v35 = vmul.f32 %v5818_v11, %v2587_v26  ;;  %s3990_s5 = sld [smem:[#allocation3 + $0x6b]] }
 0x26f   : >> { %v5744_v2 = vadd.f32 %v1843_v5, %v5629_v44  ;;  %v1834_v62 = vpop.permute.xlu0 %1833  ;;  %v1674_v44 = vmul.f32 %v5255_v53, %v1673_v1  ;;  %v1895_v53 = vstv %s5756_s17  ;;  %s5870_s17 = sld [smem:[#allocation3 + $0xd7]] }
 0x270   : >> { %v1836_v0 = vadd.f32 %v1834_v62, %v5667_v23  ;;  %v1896_v21 = vmul.f32 %v5406_v32, %v1895_v53 }
 0x271   : >> { %v1675_v60 = vadd.f32 %v1674_v44, %v5691_v56  ;;  %v2292_v56 = vstv %s5762_s1  ;;  %s5875_s1 = sld [smem:[#allocation3 + $0xb3]] }
 0x272   : >> { %v1887_v46 = vadd.f32 %v1886_v16, %v1836_v0  ;;  %v2293_v39 = vmul.f32 %v5684_v27, %v2292_v56  ;;  %v1897_v61 = vadd.f32 %v1896_v21, %v5696_v17  ;;  %v2524_v0 = vstv %s5821_s8  ;;  %s3982_s8 = sld [smem:[#allocation3 + $0x6a]] }
 0x273   : >> { %2385 = vrot.lane.b32.xlu2 %v2383_v40, %s6367_s24  ;;  %v1865_v40 = vstv %s5809_s21  ;;  %s5923_s21 = sld [smem:[#allocation3 + $0x23]] }
 0x274   : >> { %v5758_v63 = vadd.f32 %v1949_v41, %v1887_v46  ;;  %2189 = vrot.lane.b32.xlu1 %v2187_v4, %s6367_s24  ;;  %v1890_v41 = vstv %s3900_s30  ;;  %v1866_v38 = vmul.f32 %v5406_v32, %v1865_v40  ;;  %v2515_v46 = vstv %s3986_s29  ;;  %s5895_s30 = sld [smem:[#allocation3 + $0x46]] }
 0x275   : >> { %2180 = vrot.lane.b32.xlu0 %v2178_v7, %s6367_s24  ;;  %v1816_v23 = vpop.permute.xlu2 %1815  ;;  %v1891_v33 = vmul.f32 %v5406_v32, %v1890_v41  ;;  %v2077_v40 = vstv %s5889_s14  ;;  %s3920_s29 = sld [smem:[#allocation3 + $0x1b]] }
 0x276   : >> { %v1726_v36 = vpop.permute.xlu1 %1725  ;;  %s6006_s14 = sld [smem:[#allocation3 + $0xb1]] }
 0x277   : >> { %v5774_v13 = vadd.f32 %v1726_v36, %v1680_v24  ;;  %v1717_v57 = vpop.permute.xlu0 %1716  ;;  %v1892_v8 = vadd.f32 %v1891_v33, %v5744_v2  ;;  %v2346_v2 = vstv %s5813_s7  ;;  %v2516_v36 = vmul.f32 %v5818_v11, %v2515_v46  ;;  %s5928_s7 = sld [smem:[#allocation3 + $0x8e]] }
 0x278   : >> { %v1719_v52 = vadd.f32 %v1717_v57, %v1675_v60  ;;  %v2347_v24 = vmul.f32 %v5684_v27, %v2346_v2  ;;  %v1870_v33 = vstv %s5881_s16  ;;  %s6004_s16 = sld [smem:[#allocation3 + $0x42]] }
 0x27a   : >> { %v5781_v43 = vadd.f32 %v1789_v49, %v1719_v52  ;;  %v2301_v49 = vstv %s5797_s6  ;;  %v2355_v52 = vstv %s5847_s26  ;;  %s5911_s6 = sld [smem:[#allocation3 + $0xcf]] }
 0x27b   : >> { %2412 = vrot.lane.b32.xlu2 %v2410_v45, %s6367_s24  ;;  %v2302_v62 = vmul.f32 %v5684_v27, %v2301_v49  ;;  %v2068_v45 = vmul.f32 %v5546_v30, %v2067_v51  ;;  %v2356_v50 = vmul.f32 %v5684_v27, %v2355_v52  ;;  %s3952_s26 = sld [smem:[#allocation3 + $0xf6]] }
 0x27c   : >> { %2403 = vrot.lane.b32.xlu1 %v2401_v15, %s6367_s24  ;;  %v1860_v15 = vstv %s5832_s11  ;;  %s3991_s11 = sld [smem:[#allocation3 + $0x8f]] }
 0x27d   : >> { %2394 = vrot.lane.b32.xlu0 %v2392_v19, %s6367_s24  ;;  %v2030_v29 = vpop.permute.xlu2 %2029 }
 0x27e   : >> { %v1940_v59 = vpop.permute.xlu1 %1939 }
 0x27f   : >> { %v5799_v10 = vadd.f32 %v1940_v59, %v1882_v22  ;;  %v1744_v18 = vpop.permute.xlu0 %1743 }
 0x280   : >> { %v1746_v9 = vadd.f32 %v1744_v18, %v1690_v42  ;;  %v2082_v42 = vstv %s5860_s10  ;;  %s3921_s10 = sld [smem:[#allocation3 + $0x3f]] }
 0x282   : >> { %v5805_v54 = vadd.f32 %v1816_v23, %v1746_v9  ;;  %v2525_v23 = vmul.f32 %v5818_v11, %v2524_v0  ;;  %v2569_v9 = vstv %s5875_s1  ;;  %s3951_s1 = sld [smem:[#allocation3 + $0xd2]] }
 0x283   : >> { %2295 = vrot.lane.b32.xlu2 %v2293_v39, %s6368_s19  ;;  %v2083_v39 = vmul.f32 %v5546_v30, %v2082_v42  ;;  %v2570_v3 = vmul.f32 %v5818_v11, %v2569_v9 }
 0x284   : >> { %2286 = vrot.lane.b32.xlu1 %v2284_v28, %s6368_s19  ;;  %v1875_v28 = vstv %s5856_s9  ;;  %s3922_s9 = sld [smem:[#allocation3 + $0x63]] }
 0x285   : >> { %2277 = vrot.lane.b32.xlu0 %v2275_v6, %s6368_s19  ;;  %v1913_v37 = vpop.permute.xlu2 %1912 }
 0x286   : >> { %v1967_v55 = vpop.permute.xlu1 %1966 }
 0x287   : >> { %v5825_v5 = vadd.f32 %v1967_v55, %v1897_v61  ;;  %v1958_v16 = vpop.permute.xlu0 %1957 }
 0x288   : >> { %v1960_v17 = vadd.f32 %v1958_v16, %v1892_v8  ;;  %v1871_v8 = vmul.f32 %v5406_v32, %v1870_v33  ;;  %v2470_v16 = vstv %s5895_s30  ;;  %s6008_s30 = sld [smem:[#allocation3 + $0x1e]] }
 0x28a   : >> { %v5830_v1 = vadd.f32 %v2030_v29, %v1960_v17  ;;  %v1861_v29 = vmul.f32 %v5406_v32, %v1860_v15 }
 0x28b   : >> { %2509 = vrot.lane.b32.xlu2 %v2507_v31, %s6368_s19  ;;  %v2461_v31 = vstv %s5900_s0  ;;  %s6010_s0 = sld [smem:[#allocation3 + $0x11d]] }
 0x28c   : >> { %2500 = vrot.lane.b32.xlu1 %v2498_v34, %s6368_s19  ;;  %v1862_v53 = vadd.f32 %v1861_v29, %v5781_v43 }
 0x28d   : >> { %2304 = vrot.lane.b32.xlu0 %v2302_v62, %s6368_s19  ;;  %v2127_v4 = vpop.permute.xlu2 %2126  ;;  %v2596_v62 = vstv %s5905_s3  ;;  %s6012_s3 = sld [smem:[#allocation3 + $0x66]] }
 0x28e   : >> { %v1807_v7 = vpop.permute.xlu1 %1806  ;;  %v2597_v46 = vmul.f32 %v5818_v11, %v2596_v62 }
 0x28f   : >> { %v5850_v44 = vadd.f32 %v1807_v7, %v5728_v58  ;;  %v1798_v20 = vpop.permute.xlu0 %1797  ;;  %v2471_v7 = vmul.f32 %v5818_v11, %v2470_v16 }
 0x290   : >> { %v1800_v25 = vadd.f32 %v1798_v20, %v5774_v13  ;;  %v2364_v13 = vstv %s5844_s13  ;;  %v2078_v20 = vmul.f32 %v5546_v30, %v2077_v40  ;;  %s3923_s13 = sld [smem:[#allocation3 + $0x87]] }
 0x291   : >> { %v2365_v22 = vmul.f32 %v5684_v27, %v2364_v13  ;;  %v2479_v13 = vstv %s3982_s8  ;;  %s6029_s8 = sld [smem:[#allocation3 + $0x21]] }
 0x292   : >> { %v1867_v60 = vadd.f32 %v1866_v38, %v1800_v25  ;;  %v2533_v25 = vstv %s5923_s21  ;;  %s6020_s21 = sld [smem:[#allocation3 + $0xd5]] }
 0x293   : >> { %2349 = vrot.lane.b32.xlu2 %v2347_v24, %s6367_s24 }
 0x294   : >> { %v5862_v58 = vadd.f32 %v1913_v37, %v1867_v60  ;;  %2527 = vrot.lane.b32.xlu1 %v2525_v23, %s6368_s19  ;;  %v1876_v37 = vmul.f32 %v5406_v32, %v1875_v28  ;;  %v1872_v32 = vadd.f32 %v1871_v8, %v5850_v44  ;;  %v2079_v23 = vadd.f32 %v2078_v20, %v5830_v1 }
 0x295   : >> { %2518 = vrot.lane.b32.xlu0 %v2516_v36, %s6368_s19  ;;  %v2154_v57 = vpop.permute.xlu2 %2153  ;;  %v2488_v36 = vstv %s5928_s7  ;;  %v2047_v1 = vstv %s3920_s29  ;;  %s6026_s7 = sld [smem:[#allocation7 + $0x6]] }
 0x296   : >> { %v2021_v47 = vpop.permute.xlu1 %2020  ;;  %v2489_v15 = vmul.f32 %v5818_v11, %v2488_v36  ;;  %v2048_v29 = vmul.f32 %v5546_v30, %v2047_v1  ;;  %v2062_v9 = vstv %s3923_s13  ;;  %s6033_s29 = sld [smem:[#allocation3 + $0x8d]] }
 0x297   : >> { %v5878_v19 = vadd.f32 %v2021_v47, %v5758_v63  ;;  %v2012_v14 = vpop.permute.xlu0 %2011  ;;  %v2063_v33 = vmul.f32 %v5546_v30, %v2062_v9  ;;  %v2239_v9 = vstv %s6004_s16  ;;  %s6071_s13 = sld [smem:[#allocation7 + $0x4]] }
 0x298   : >> { %v2014_v56 = vadd.f32 %v2012_v14, %v5799_v10  ;;  %v2578_v10 = vstv %s5870_s17  ;;  %v2480_v14 = vmul.f32 %v5818_v11, %v2479_v13  ;;  %s3978_s17 = sld [smem:[#allocation3 + $0xf9]] }
 0x299   : >> { %v2579_v61 = vmul.f32 %v5818_v11, %v2578_v10 }
 0x29a   : >> { %v2069_v59 = vadd.f32 %v2068_v45, %v2014_v56  ;;  %v2534_v45 = vmul.f32 %v5818_v11, %v2533_v25  ;;  %v2551_v56 = vstv %s3990_s5  ;;  %s6054_s5 = sld [smem:[#allocation3 + $0x69]] }
 0x29b   : >> { %2376 = vrot.lane.b32.xlu2 %v2374_v48, %s6367_s24 }
 0x29c   : >> { %v5891_v63 = vadd.f32 %v2127_v4, %v2069_v59  ;;  %2367 = vrot.lane.b32.xlu1 %v2365_v22, %s6367_s24  ;;  %v2072_v4 = vstv %s5911_s6  ;;  %v2542_v59 = vstv %s3989_s12  ;;  %s6018_s6 = sld [smem:[#allocation3 + $0x8a]] }
 0x29d   : >> { %2358 = vrot.lane.b32.xlu0 %v2356_v50, %s6367_s24  ;;  %v1994_v18 = vpop.permute.xlu2 %1993  ;;  %v2073_v44 = vmul.f32 %v5546_v30, %v2072_v4  ;;  %s6067_s12 = sld [smem:[#allocation7 + $0x5]] }
 0x29e   : >> { %v1904_v41 = vpop.permute.xlu1 %1903 }
 0x29f   : >> { %v5907_v6 = vadd.f32 %v1904_v41, %v1862_v53  ;;  %v2039_v21 = vpop.permute.xlu0 %2038  ;;  %v2074_v12 = vadd.f32 %v2073_v44, %v5878_v19  ;;  %v2560_v19 = vstv %s3991_s11  ;;  %v2543_v41 = vmul.f32 %v5818_v11, %v2542_v59  ;;  %s6048_s11 = sld [smem:[#allocation3 + $0x45]] }
 0x2a0   : >> { %v2041_v43 = vadd.f32 %v2039_v21, %v5825_v5  ;;  %v1877_v5 = vadd.f32 %v1876_v37, %v5805_v54  ;;  %v2462_v54 = vmul.f32 %v5818_v11, %v2461_v31  ;;  %v2561_v53 = vmul.f32 %v5818_v11, %v2560_v19 }
 0x2a1   : >> { %v2269_v19 = vstv %s3953_s2  ;;  %s6095_s2 = sld [smem:[#allocation7 + $0x1]] }
 0x2a2   : >> { %v2084_v55 = vadd.f32 %v2083_v39, %v2041_v43 }
 0x2a3   : >> { %2590 = vrot.lane.b32.xlu2 %v2588_v35, %s6367_s24 }
 0x2a4   : >> { %v5919_v49 = vadd.f32 %v2154_v57, %v2084_v55  ;;  %2581 = vrot.lane.b32.xlu1 %v2579_v61, %s6367_s24 }
 0x2a5   : >> { %2572 = vrot.lane.b32.xlu0 %v2570_v3, %s6367_s24  ;;  %v2208_v17 = vpop.permute.xlu2 %2207  ;;  %v2264_v3 = vstv %s3952_s26  ;;  %s6077_s26 = sld [smem:[#allocation7 + $0x7]] }
 0x2a6   : >> { %v1931_v34 = vpop.permute.xlu1 %1930  ;;  %v2265_v16 = vmul.f32 %v5684_v27, %v2264_v3 }
 0x2a7   : >> { %v1933_v2 = vadd.f32 %v1931_v34, %v1877_v5  ;;  %v1922_v0 = vpop.permute.xlu0 %1921  ;;  %v2057_v5 = vstv %s3922_s9  ;;  %v2052_v34 = vstv %s3921_s10  ;;  %s6079_s9 = sld [smem:[#allocation7]] }
 0x2a8   : >> { %v1924_v38 = vadd.f32 %v1922_v0, %v1872_v32  ;;  %v2053_v40 = vmul.f32 %v5546_v30, %v2052_v34  ;;  %s6087_s10 = sld [smem:[#allocation7 + $0x3]] }
 0x2aa   : >> { %v5938_v24 = vadd.f32 %v1994_v18, %v1924_v38  ;;  %v2552_v18 = vmul.f32 %v5818_v11, %v2551_v56 }
 0x2ab   : >> { %2473 = vrot.lane.b32.xlu2 %v2471_v7, %s6368_s19 }
 0x2ac   : >> { %2464 = vrot.lane.b32.xlu1 %v2462_v54, %s6368_s19 }
 0x2ad   : >> { %2599 = vrot.lane.b32.xlu0 %v2597_v46, %s6367_s24  ;;  %v2091_v60 = vpop.permute.xlu2 %2090 }
 0x2ae   : >> { %v2145_v51 = vpop.permute.xlu1 %2144 }
 0x2af   : >> { %v2147_v57 = vadd.f32 %v2145_v51, %v2079_v23  ;;  %v2136_v47 = vpop.permute.xlu0 %2135 }
 0x2b0   : >> { %v2138_v52 = vadd.f32 %v2136_v47, %v2074_v12 }
 0x2b2   : >> { %v5951_v48 = vadd.f32 %v2208_v17, %v2138_v52 }
 0x2b3   : >> { %2536 = vrot.lane.b32.xlu2 %v2534_v45, %s6367_s24 }
 0x2b4   : >> { %2491 = vrot.lane.b32.xlu1 %v2489_v15, %s6368_s19 }
 0x2b5   : >> { %2482 = vrot.lane.b32.xlu0 %v2480_v14, %s6368_s19  ;;  %v2118_v22 = vpop.permute.xlu2 %2117 }
 0x2b6   : >> { %v1985_v50 = vpop.permute.xlu1 %1984 }
 0x2b7   : >> { %v1987_v42 = vadd.f32 %v1985_v50, %v5862_v58  ;;  %v1976_v26 = vpop.permute.xlu0 %1975  ;;  %v2451_v50 = vstv %s3978_s17  ;;  %s4424_s17 = smov 16  }
 0x2b8   : >> { %v1978_v10 = vadd.f32 %v1976_v26, %v5907_v6 }
 0x2b9   : >> { %v2054_v38 = vadd.f32 %v2053_v40, %v1987_v42  ;;  %v2270_v42 = vmul.f32 %v5684_v27, %v2269_v19  ;;  %v2784_v40 = vstv %s6026_s7 }
 0x2ba   : >> { %v2049_v39 = vadd.f32 %v2048_v29, %v1978_v10  ;;  %v2259_v29 = vstv %s3951_s1  ;;  %s4039_s1 = sshll.u32 %s4414_s25, 2  ;;  %s359_s25 = sadd.s32 1, %s4414_s25  }
 0x2bb   : >> { %2563 = vrot.lane.b32.xlu2 %v2561_v53, %s6367_s24  ;;  %v2452_v53 = vmul.f32 %v5818_v11, %v2451_v50  ;;  %v2260_v10 = vmul.f32 %v5684_v27, %v2259_v29  ;;  %s3037_s16 = scalar_lea.vmem %s4610_s22, %s4039_s1 [#allocation10]  ;;  %p356_p3 = scmp.ge.s32.totalorder %s359_s25, 2  }
 0x2bc   : >> { %v2093_v28 = vadd.f32 %v2091_v60, %v2049_v39  ;;  %2554 = vrot.lane.b32.xlu1 %v2552_v18, %s6367_s24  ;;  %v2234_v18 = vstv %s6008_s30  ;;  %s4054_s30 = sld [smem:[#allocation7 + $0x80]] (%p356_p3) }
 0x2bd   : >> { %2545 = vrot.lane.b32.xlu0 %v2543_v41, %s6367_s24  ;;  %v2332_v58 = vpop.permute.xlu2 %2331  ;;  %s3950_s24 = sld [smem:[#allocation3 + $0xae]] }
 0x2be   : >> { %v2199_v21 = vpop.permute.xlu1 %2198 }
 0x2bf   : >> { %v5967_v6 = vadd.f32 %v2199_v21, %v5891_v63  ;;  %v2003_v35 = vpop.permute.xlu0 %2002  ;;  %v2058_v63 = vmul.f32 %v5546_v30, %v2057_v5  ;;  %v2249_v21 = vstv %s6018_s6 }
 0x2c0   : >> { %v2005_v43 = vadd.f32 %v2003_v35, %v1933_v2 }
 0x2c1   : >> { %v2059_v0 = vadd.f32 %v2058_v63, %v5938_v24  ;;  %v2250_v63 = vmul.f32 %v5684_v27, %v2249_v21 }
 0x2c2   : >> { %v2064_v61 = vadd.f32 %v2063_v33, %v2005_v43  ;;  %v2456_v33 = vstv %s6010_s0  ;;  %s4055_s0 = sld [smem:[#allocation7 + $0x100]] (%p356_p3) }
 0x2c3   : >> { %v2254_v1 = vstv %s3950_s24  ;;  %s6092_s24 = sld [smem:[#allocation7 + $0x2]] }
 0x2c4   : >> { %v5969_v37 = vadd.f32 %v2118_v22, %v2064_v61  ;;  %v2255_v59 = vmul.f32 %v5684_v27, %v2254_v1 }
 0x2c5   : >> { %v2172_v55 = vpop.permute.xlu2 %2171 }
 0x2c6   : >> { %v2226_v8 = vpop.permute.xlu1 %2225  ;;  %v2256_v41 = vadd.f32 %v2255_v59, %v5967_v6  ;;  %v2261_v6 = vadd.f32 %v2260_v10, %v5951_v48 }
 0x2c7   : >> { %v2228_v31 = vadd.f32 %v2226_v8, %v5919_v49  ;;  %v2217_v17 = vpop.permute.xlu0 %2216  ;;  %v2235_v8 = vmul.f32 %v5684_v27, %v2234_v18 }
 0x2c8   : >> { %v2219_v32 = vadd.f32 %v2217_v17, %v2147_v57 }
 0x2c9   : >> { %v2271_v39 = vadd.f32 %v2270_v42, %v2228_v31  ;;  %v2240_v31 = vmul.f32 %v5684_v27, %v2239_v9 }
 0x2ca   : >> { %v2266_v62 = vadd.f32 %v2265_v16, %v2219_v32 }
 0x2cc   : >> { %v2334_v2 = vadd.f32 %v2332_v58, %v2266_v62  ;;  %v2244_v58 = vstv %s6012_s3  ;;  %v2457_v62 = vmul.f32 %v5818_v11, %v2456_v33  ;;  %s4056_s3 = sld [smem:[#allocation7 + $0x180]] (%p356_p3) }
 0x2cd   : >> { %v5976_v4 = vpop.permute.xlu2 %2385  ;;  %v2245_v32 = vmul.f32 %v5684_v27, %v2244_v58 }
 0x2ce   : >> { %v2109_v7 = vpop.permute.xlu1 %2108 }
 0x2cf   : >> { %v5978_v54 = vadd.f32 %v2109_v7, %v2059_v0  ;;  %v2100_v46 = vpop.permute.xlu0 %2099  ;;  %v2421_v7 = vstv %s6029_s8 }
 0x2d0   : >> { %v2102_v20 = vadd.f32 %v2100_v46, %v2054_v38 }
 0x2d2   : >> { %v5980_v49 = vadd.f32 %v2172_v55, %v2102_v20  ;;  %v2446_v55 = vstv %s6020_s21 }
 0x2d3   : >> { %v2447_v48 = vmul.f32 %v5818_v11, %v2446_v55 }
 0x2d5   : >> { %v5982_v44 = vpop.permute.xlu2 %2412 }
 0x2d6   : >> { %v5984_v25 = vpop.permute.xlu1 %2322 }
 0x2d7   : >> { %v2314_v23 = vpop.permute.xlu0 %2313 }
 0x2d8   : >> { %v2316_v61 = vadd.f32 %v2314_v23, %v2256_v41 }
 0x2da   : >> { %v2388_v38 = vadd.f32 %v5976_v4, %v2316_v61 }
 0x2dd   : >> { %v5988_v24 = vpop.permute.xlu2 %2295 }
 0x2de   : >> { %v2163_v36 = vpop.permute.xlu1 %2162 }
 0x2df   : >> { %v5986_v30 = vadd.f32 %v2163_v36, %v2093_v28  ;;  %v2341_v60 = vpop.permute.xlu0 %2340  ;;  %v2441_v28 = vstv %s6006_s14 }
 0x2e0   : >> { %v2343_v3 = vadd.f32 %v2341_v60, %v2271_v39  ;;  %v2442_v17 = vmul.f32 %v5818_v11, %v2441_v28 }
 0x2e1   : >> { %v2236_v27 = vadd.f32 %v2235_v8, %v5986_v30  ;;  %v2422_v30 = vmul.f32 %v5818_v11, %v2421_v7 }
 0x2e2   : >> { %v2415_v46 = vadd.f32 %v5982_v44, %v2343_v3 }
 0x2e5   : >> { %v5994_v13 = vpop.permute.xlu2 %2509 }
 0x2e6   : >> { %v5990_v51 = vpop.permute.xlu1 %2189 }
 0x2e7   : >> { %v5992_v12 = vpop.permute.xlu0 %2180  ;;  %v2192_v23 = vadd.f32 %v5990_v51, %v5969_v37  ;;  %v2443_v51 = vadd.f32 %v2442_v17, %v2388_v38 }
 0x2e8   : >> { %v2183_v20 = vadd.f32 %v5992_v12, %v5978_v54  ;;  %v2458_v12 = vadd.f32 %v2457_v62, %v2415_v46  ;;  %v2694_v46 = vstv %s6087_s10  ;;  %s4063_s10 = sld [smem:[#allocation7 + $0x82]] (%p356_p3) }
 0x2e9   : >> { %v2251_v50 = vadd.f32 %v2250_v63, %v2192_v23  ;;  %v2814_v63 = vstv %s6077_s26 }
 0x2ea   : >> { %v2246_v37 = vadd.f32 %v2245_v32, %v2183_v20 }
 0x2ec   : >> { %v2298_v39 = vadd.f32 %v5988_v24, %v2246_v37 }
 0x2ed   : >> { %v5998_v45 = vpop.permute.xlu2 %2349 }
 0x2ee   : >> { %v2404_v57 = vpop.permute.xlu1 %2403 }
 0x2ef   : >> { %v5996_v47 = vpop.permute.xlu0 %2394  ;;  %v2406_v26 = vadd.f32 %v2404_v57, %v2334_v2  ;;  %v2325_v2 = vadd.f32 %v5984_v25, %v2261_v6  ;;  %v2436_v25 = vstv %s6033_s29  ;;  %v2241_v57 = vadd.f32 %v2240_v31, %v5980_v49  ;;  %s4058_s29 = sld [smem:[#allocation7 + $0x81]] (%p356_p3) }
 0x2f0   : >> { %v2437_v1 = vmul.f32 %v5818_v11, %v2436_v25  ;;  %v2426_v49 = vstv %s6048_s11  ;;  %s4059_s11 = sld [smem:[#allocation7 + $0x101]] (%p356_p3) }
 0x2f1   : >> { %v2453_v43 = vadd.f32 %v2452_v53, %v2406_v26  ;;  %v2397_v36 = vadd.f32 %v5996_v47, %v2325_v2  ;;  %v2431_v26 = vstv %s6054_s5  ;;  %v2427_v28 = vmul.f32 %v5818_v11, %v2426_v49  ;;  %s4060_s5 = sld [smem:[#allocation7 + $0x181]] (%p356_p3) }
 0x2f3   : >> { %v2448_v19 = vadd.f32 %v2447_v48, %v2397_v36 }
 0x2f5   : >> { %v6014_v14 = vpop.permute.xlu2 %2376  ;;  %v2512_v21 = vadd.f32 %v5994_v13, %v2448_v19 }
 0x2f6   : >> { %v6000_v52 = vpop.permute.xlu1 %2286 }
 0x2f7   : >> { %v6002_v15 = vpop.permute.xlu0 %2277  ;;  %v2289_v53 = vadd.f32 %v6000_v52, %v2241_v57  ;;  %v2432_v52 = vmul.f32 %v5818_v11, %v2431_v26  ;;  %v2664_v57 = vstv %s6092_s24  ;;  %s4064_s24 = sld [smem:[#allocation7 + $0x102]] (%p356_p3) }
 0x2f8   : >> { %v2280_v4 = vadd.f32 %v6002_v15, %v2236_v27 }
 0x2fa   : >> { %v2352_v10 = vadd.f32 %v5998_v45, %v2280_v4  ;;  %v2634_v4 = vstv %s6095_s2  ;;  %s4065_s2 = sld [smem:[#allocation7 + $0x182]] (%p356_p3) }
 0x2fd   : >> { %v2591_v5 = vpop.permute.xlu2 %2590 }
 0x2fe   : >> { %v6016_v56 = vpop.permute.xlu1 %2500 }
 0x2ff   : >> { %v6022_v22 = vpop.permute.xlu0 %2304  ;;  %v2503_v55 = vadd.f32 %v6016_v56, %v2443_v51  ;;  %v2604_v56 = vstv %s6079_s9 }
 0x300   : >> { %v2307_v18 = vadd.f32 %v6022_v22, %v2251_v50  ;;  %v2724_v22 = vstv %s6071_s13 }
 0x302   : >> { %v2379_v8 = vadd.f32 %v6014_v14, %v2307_v18 }
 0x305   : >> { %v2474_v61 = vpop.permute.xlu2 %2473 }
 0x306   : >> { %v6041_v35 = vpop.permute.xlu1 %2527 }
 0x307   : >> { %v2519_v16 = vpop.permute.xlu0 %2518  ;;  %v2530_v2 = vadd.f32 %v6041_v35, %v2458_v12 }
 0x308   : >> { %v2521_v34 = vadd.f32 %v2519_v16, %v2453_v43  ;;  %v2754_v43 = vstv %s6067_s12  ;;  %v2423_v16 = vadd.f32 %v2422_v30, %v2352_v10 }
 0x30a   : >> { %v2593_v0 = vadd.f32 %v2591_v5, %v2521_v34 }
 0x30c   : >> { %v2785_v60 = vadd.f32 %v2784_v40, %v2593_v0  ;;  %v6102_v0 = vadd.f32 %v2437_v1, %v2379_v8 }
 0x30d   : >> { %v2537_v25 = vpop.permute.xlu2 %2536 }
 0x30e   : >> { %vm2786_vm6 = vcmp.gt.f32.partialorder %v2785_v60, 0.0  ;;  %v2787_v54 = vmul.f32 0.01, %v2785_v60  ;;  %v2368_v44 = vpop.permute.xlu1 %2367 }
 0x30f   : >> { %v2359_v47 = vpop.permute.xlu0 %2358  ;;  %v2370_v17 = vadd.f32 %v2368_v44, %v2298_v39 }
 0x310   : >> { %v2788_v29 = vsel %vm2786_vm6, %v2785_v60, %v2787_v54  ;;  %v2361_v33 = vadd.f32 %v2359_v47, %v2289_v53  ;;  %vm2994_vm6 = vcmask 130048  }
 0x311   : >> { %v2790_v59 = vrot.slane %v2788_v29, 2  ;;  %v2791_v15 = vrot.slane %v2788_v29, 4  ;;  %v4026_v42 = vrot.slane %v2788_v29, 9  ;;  %v2792_v41 = vrot.slane %v2788_v29, 6 }
 0x312   : >> { %v2428_v34 = vadd.f32 %v2427_v28, %v2361_v33  ;;  %v6108_v36 = vadd.f32 %v2432_v52, %v2370_v17 }
 0x313   : >> { %v4027_v9 = vrot.slane %v2790_v59, 9  ;;  %v4028_v58 = vrot.slane %v2791_v15, 9  ;;  %v2808_v45 = vmax.f32 %v2788_v29, %v4026_v42  ;;  %v4029_v24 = vrot.slane %v2792_v41, 9 }
 0x314   : >> { %v6106_v27 = vadd.f32 %v2474_v61, %v2428_v34 }
 0x315   : >> { %v2809_v3 = vmax.f32 %v2790_v59, %v4027_v9  ;;  %v2810_v5 = vmax.f32 %v2791_v15, %v4028_v58  ;;  %v2924_v62 = vperm.slane %v2808_v45, 0  ;;  %v2811_v14 = vmax.f32 %v2792_v41, %v4029_v24  ;;  %v2564_v17 = vpop.permute.xlu2 %2563 }
 0x316   : >> { %v2582_v13 = vpop.permute.xlu1 %2581 }
 0x317   : >> { %v2584_v6 = vadd.f32 %v2582_v13, %v2512_v21  ;;  %v2573_v11 = vpop.permute.xlu0 %2572  ;;  %v2925_v31 = vperm.slane %v2809_v3, 0  ;;  %v2926_v7 = vperm.slane %v2810_v5, 0  ;;  %v2927_v35 = vperm.slane %v2811_v14, 0 }
 0x318   : >> { %v2575_v32 = vadd.f32 %v2573_v11, %v2503_v55 }
 0x319   : >> { %v2755_v40 = vadd.f32 %v2754_v43, %v2584_v6  ;;  %v2928_v20 = vsel %vm2850_vm7, %v2925_v31, %v2924_v62 }
 0x31a   : >> { %v2725_v48 = vadd.f32 %v2724_v22, %v2575_v32  ;;  %v2929_v51 = vsel %vm2852_vm8, %v2926_v7, %v2928_v20 }
 0x31b   : >> { %vm2756_vm10 = vcmp.gt.f32.partialorder %v2755_v40, 0.0  ;;  %v2757_v38 = vmul.f32 0.01, %v2755_v40  ;;  %v6114_v33 = vsel %vm2854_vm9, %v2927_v35, %v2929_v51 }
 0x31c   : >> { %vm2726_vm11 = vcmp.gt.f32.partialorder %v2725_v48, 0.0  ;;  %v2727_v23 = vmul.f32 0.01, %v2725_v48 }
 0x31d   : >> { %v2758_v60 = vsel %vm2756_vm10, %v2755_v40, %v2757_v38 }
 0x31e   : >> { %v2760_v54 = vrot.slane %v2758_v60, 2  ;;  %v4021_v44 = vrot.slane %v2758_v60, 9  ;;  %v2728_v30 = vsel %vm2726_vm11, %v2725_v48, %v2727_v23  ;;  %v2465_v37 = vpop.permute.xlu1 %2464  ;;  %v2761_v29 = vrot.slane %v2758_v60, 4 }
 0x31f   : >> { %v2730_v12 = vrot.slane %v2728_v30, 2  ;;  %v2731_v47 = vrot.slane %v2728_v30, 4  ;;  %v4016_v1 = vrot.slane %v2728_v30, 9  ;;  %v2467_v19 = vadd.f32 %v2465_v37, %v2423_v16  ;;  %v2600_v50 = vpop.permute.xlu0 %2599 }
 0x320   : >> { %v2778_v49 = vmax.f32 %v2758_v60, %v4021_v44  ;;  %v2602_v59 = vadd.f32 %v2600_v50, %v2530_v2  ;;  %v2732_v15 = vrot.slane %v2728_v30, 6  ;;  %v4022_v18 = vrot.slane %v2760_v54, 9 }
 0x321   : >> { %v4017_v42 = vrot.slane %v2730_v12, 9  ;;  %v2748_v26 = vmax.f32 %v2728_v30, %v4016_v1  ;;  %v2539_v53 = vadd.f32 %v2537_v25, %v2467_v19  ;;  %v4018_v10 = vrot.slane %v2731_v47, 9 }
 0x322   : >> { %v2815_v41 = vadd.f32 %v2814_v63, %v2602_v59  ;;  %v4019_v39 = vrot.slane %v2732_v15, 9  ;;  %v2762_v9 = vrot.slane %v2758_v60, 6  ;;  %v2912_v28 = vperm.slane %v2778_v49, 0 }
 0x323   : >> { %v2605_v58 = vadd.f32 %v2604_v56, %v2539_v53  ;;  %v2749_v21 = vmax.f32 %v2730_v12, %v4017_v42  ;;  %v2750_v52 = vmax.f32 %v2731_v47, %v4018_v10  ;;  %v4023_v45 = vrot.slane %v2761_v29, 9 }
 0x324   : >> { %vm2816_vm14 = vcmp.gt.f32.partialorder %v2815_v41, 0.0  ;;  %v2817_v43 = vmul.f32 0.01, %v2815_v41  ;;  %v2900_v61 = vperm.slane %v2748_v26, 0  ;;  %v4024_v24 = vrot.slane %v2762_v9, 9 }
 0x325   : >> { %vm2606_vm0 = vcmp.gt.f32.partialorder %v2605_v58, 0.0  ;;  %v2607_v22 = vmul.f32 0.01, %v2605_v58  ;;  %v2751_v8 = vmax.f32 %v2732_v15, %v4019_v39  ;;  %v2779_v13 = vmax.f32 %v2760_v54, %v4022_v18 }
 0x326   : >> { %v2818_v3 = vsel %vm2816_vm14, %v2815_v41, %v2817_v43  ;;  %v2492_v55 = vpop.permute.xlu1 %2491  ;;  %v2780_v16 = vmax.f32 %v2761_v29, %v4023_v45  ;;  %v2901_v34 = vperm.slane %v2749_v21, 0  ;;  %v2902_v40 = vperm.slane %v2750_v52, 0 }
 0x327   : >> { %v2820_v5 = vrot.slane %v2818_v3, 2  ;;  %v4031_v6 = vrot.slane %v2818_v3, 9  ;;  %v6116_v11 = vsel %vm2606_vm0, %v2605_v58, %v2607_v22  ;;  %v2483_v31 = vpop.permute.xlu0 %2482  ;;  %v2821_v32 = vrot.slane %v2818_v3, 4 }
 0x328   : >> { %v2610_v63 = vrot.slane %v6116_v11, 2  ;;  %v2494_v62 = vadd.f32 %v2492_v55, %v6102_v0  ;;  %v2611_v14 = vrot.slane %v6116_v11, 4  ;;  %v3996_v2 = vrot.slane %v6116_v11, 9 }
 0x329   : >> { %v2838_v56 = vmax.f32 %v2818_v3, %v4031_v6  ;;  %v2781_v48 = vmax.f32 %v2762_v9, %v4024_v24  ;;  %v4032_v7 = vrot.slane %v2820_v5, 9  ;;  %v2485_v20 = vadd.f32 %v2483_v31, %v6108_v36 }
 0x32a   : >> { %v6124_v38 = vrot.slane %v2610_v63, 9  ;;  %v2566_v23 = vadd.f32 %v2564_v17, %v2494_v62  ;;  %v2903_v60 = vperm.slane %v2751_v8, 0  ;;  %v2904_v25 = vsel %vm2850_vm7, %v2901_v34, %v2900_v61 }
 0x32b   : >> { %v2913_v35 = vperm.slane %v2779_v13, 0  ;;  %v2914_v0 = vperm.slane %v2780_v16, 0  ;;  %v2936_v54 = vperm.slane %v2838_v56, 0  ;;  %v2905_v30 = vsel %vm2852_vm8, %v2902_v40, %v2904_v25 }
 0x32c   : >> { %v2695_v44 = vadd.f32 %v2694_v46, %v2566_v23  ;;  %v2915_v37 = vperm.slane %v2781_v48, 0  ;;  %v2906_v51 = vsel %vm2854_vm9, %v2903_v60, %v2905_v30  ;;  %v2822_v47 = vrot.slane %v2818_v3, 6 }
 0x32d   : >> { %v2916_v12 = vsel %vm2865_vm12, %v2913_v35, %v2912_v28  ;;  %v4033_v1 = vrot.slane %v2821_v32, 9  ;;  %v2839_v29 = vmax.f32 %v2820_v5, %v4032_v7  ;;  %v6140_v41 = vmax.f32 %v6116_v11, %v3996_v2 }
 0x32e   : >> { %vm2696_vm2 = vcmp.gt.f32.partialorder %v2695_v44, 0.0  ;;  %v2697_v36 = vmul.f32 0.01, %v2695_v44  ;;  %v2917_v19 = vsel %vm2867_vm13, %v2914_v0, %v2916_v12  ;;  %v2555_v50 = vpop.permute.xlu1 %2554  ;;  %v4034_v15 = vrot.slane %v2822_v47, 9 }
 0x32f   : >> { %v2918_v49 = vsel %vm2869_vm15, %v2915_v37, %v2917_v19  ;;  %v2557_v46 = vadd.f32 %v2555_v50, %v2485_v20  ;;  %v2546_v59 = vpop.permute.xlu0 %2545  ;;  %v2840_v42 = vmax.f32 %v2821_v32, %v4033_v1  ;;  %v2937_v18 = vperm.slane %v2839_v29, 0 }
 0x330   : >> { %v2698_v26 = vsel %vm2696_vm2, %v2695_v44, %v2697_v36  ;;  %v6136_v53 = vsel %vm2944_vm1, %v2906_v51, %v2918_v49  ;;  %v2548_v10 = vadd.f32 %v2546_v59, %v6106_v27  ;;  %v2841_v21 = vmax.f32 %v2822_v47, %v4034_v15 }
 0x331   : >> { %v2700_v39 = vrot.slane %v2698_v26, 2  ;;  %v4011_v9 = vrot.slane %v2698_v26, 9  ;;  %2956 = vrot.lane.b32.xlu0 %v6136_v53, %s4424_s17  ;;  %v2665_v28 = vadd.f32 %v2664_v57, %v2557_v46  ;;  %v2938_v43 = vperm.slane %v2840_v42, 0 }
 0x332   : >> { %v2635_v58 = vadd.f32 %v2634_v4, %v2548_v10  ;;  %v2940_v52 = vsel %vm2865_vm12, %v2937_v18, %v2936_v54  ;;  %v2701_v45 = vrot.slane %v2698_v26, 4  ;;  %v2939_v13 = vperm.slane %v2841_v21, 0 }
 0x333   : >> { %v2718_v27 = vmax.f32 %v2698_v26, %v4011_v9  ;;  %vm2666_vm3 = vcmp.gt.f32.partialorder %v2665_v28, 0.0  ;;  %v2667_v61 = vmul.f32 0.01, %v2665_v28  ;;  %v4012_v22 = vrot.slane %v2700_v39, 9 }
 0x334   : >> { %vm2636_vm4 = vcmp.gt.f32.partialorder %v2635_v58, 0.0  ;;  %v2637_v24 = vmul.f32 0.01, %v2635_v58  ;;  %v2941_v3 = vsel %vm2867_vm13, %v2938_v43, %v2940_v52  ;;  %v2702_v16 = vrot.slane %v2698_v26, 6 }
 0x335   : >> { %v2888_v55 = vperm.slane %v2718_v27, 0  ;;  %v2668_v8 = vsel %vm2666_vm3, %v2665_v28, %v2667_v61  ;;  %v2942_v34 = vsel %vm2869_vm15, %v2939_v13, %v2941_v3  ;;  %v4013_v32 = vrot.slane %v2701_v45, 9 }
 0x336   : >> { %v2670_v57 = vrot.slane %v2668_v8, 2  ;;  %v2671_v5 = vrot.slane %v2668_v8, 4  ;;  %v4006_v4 = vrot.slane %v2668_v8, 9  ;;  %v2638_v6 = vsel %vm2636_vm4, %v2635_v58, %v2637_v24 }
 0x337   : >> { %v2640_v31 = vrot.slane %v2638_v6, 2  ;;  %v4001_v17 = vrot.slane %v2638_v6, 9  ;;  %v6153_v56 = vsel %vm2944_vm1, %v6114_v33, %v2942_v34  ;;  %v2672_v2 = vrot.slane %v2668_v8, 6 }
 0x338   : >> { %v4007_v62 = vrot.slane %v2670_v57, 9  ;;  %v2688_v40 = vmax.f32 %v2668_v8, %v4006_v4  ;;  %v2641_v48 = vrot.slane %v2638_v6, 4  ;;  %2959 = vrot.lane.b32.xlu1 %v6153_v56, %s4424_s17  ;;  %v4008_v20 = vrot.slane %v2671_v5, 9 }
 0x339   : >> { %v4002_v7 = vrot.slane %v2640_v31, 9  ;;  %v4014_v23 = vrot.slane %v2702_v16, 9  ;;  %v2658_v60 = vmax.f32 %v2638_v6, %v4001_v17  ;;  %v4009_v25 = vrot.slane %v2672_v2, 9 }
 0x33a   : >> { %v2689_v35 = vmax.f32 %v2670_v57, %v4007_v62  ;;  %v2719_v0 = vmax.f32 %v2700_v39, %v4012_v22  ;;  %v2876_v54 = vperm.slane %v2688_v40, 0  ;;  %v2690_v44 = vmax.f32 %v2671_v5, %v4008_v20 }
 0x33b   : >> { %v2720_v30 = vmax.f32 %v2701_v45, %v4013_v32  ;;  %v2721_v37 = vmax.f32 %v2702_v16, %v4014_v23  ;;  %v2691_v51 = vmax.f32 %v2672_v2, %v4009_v25  ;;  %v2612_v47 = vrot.slane %v6116_v11, 6 }
 0x33c   : >> { %v2877_v12 = vperm.slane %v2689_v35, 0  ;;  %v2889_v33 = vperm.slane %v2719_v0, 0  ;;  %v2878_v1 = vperm.slane %v2690_v44, 0  ;;  %v3998_v50 = vrot.slane %v2611_v14, 9 }
 0x33d   : >> { %v2890_v36 = vperm.slane %v2720_v30, 0  ;;  %v2891_v19 = vperm.slane %v2721_v37, 0  ;;  %v2879_v29 = vperm.slane %v2691_v51, 0  ;;  %v3999_v59 = vrot.slane %v2612_v47, 9 }
 0x33e   : >> { %v2880_v49 = vsel %vm2850_vm7, %v2877_v12, %v2876_v54  ;;  %v2892_v46 = vsel %vm2865_vm12, %v2889_v33, %v2888_v55  ;;  %v2629_v26 = vmax.f32 %v2610_v63, %v6124_v38  ;;  %v2630_v10 = vmax.f32 %v2611_v14, %v3998_v50 }
 0x33f   : >> { %v2881_v15 = vsel %vm2852_vm8, %v2878_v1, %v2880_v49  ;;  %v2893_v42 = vsel %vm2867_vm13, %v2890_v36, %v2892_v46  ;;  %v2846_v18 = vperm.slane %v6140_v41, 0  ;;  %v2642_v28 = vrot.slane %v2638_v6, 6 }
 0x340   : >> { %v2882_v39 = vsel %vm2854_vm9, %v2879_v29, %v2881_v15  ;;  %v2894_v9 = vsel %vm2869_vm15, %v2891_v19, %v2893_v42  ;;  %v4003_v21 = vrot.slane %v2641_v48, 9  ;;  %v2659_v43 = vmax.f32 %v2640_v31, %v4002_v7 }
 0x341   : >> { %v2946_v58 = vsel %vm2944_vm1, %v2882_v39, %v2894_v9  ;;  %v2847_v52 = vperm.slane %v2629_v26, 0  ;;  %v2631_v45 = vmax.f32 %v2612_v47, %v3999_v59  ;;  %v4004_v27 = vrot.slane %v2642_v28, 9 }
 0x342   : >> { %2953 = vrot.lane.b32.xlu0 %v2946_v58, %s4424_s17  ;;  %v2848_v63 = vperm.slane %v2630_v10, 0  ;;  %v2861_v38 = vperm.slane %v2658_v60, 0  ;;  %v2660_v11 = vmax.f32 %v2641_v48, %v4003_v21  ;;  %v2862_v41 = vperm.slane %v2659_v43, 0 }
 0x343   : >> { %v2851_v14 = vsel %vm2850_vm7, %v2847_v52, %v2846_v18  ;;  %v2661_v61 = vmax.f32 %v2642_v28, %v4004_v27  ;;  %v2849_v55 = vperm.slane %v2631_v45, 0  ;;  %vm3038_vm7 = vcmask 60416  }
 0x344   : >> { %v2853_v22 = vsel %vm2852_vm8, %v2848_v63, %v2851_v14  ;;  %v2863_v24 = vperm.slane %v2660_v11, 0  ;;  %v2866_v3 = vsel %vm2865_vm12, %v2862_v41, %v2861_v38  ;;  %vm3042_vm8 = vcmask 64516  }
 0x345   : >> { %v2864_v8 = vperm.slane %v2661_v61, 0  ;;  %v2855_v16 = vsel %vm2854_vm9, %v2849_v55, %v2853_v22  ;;  %vm3064_vm9 = vcmask (%p356_p3), 64512  }
 0x346   : >> { %v2868_v13 = vsel %vm2867_vm13, %v2863_v24, %v2866_v3 }
 0x347   : >> { %v2870_v57 = vsel %vm2869_vm15, %v2864_v8, %v2868_v13 }
 0x348   : >> { %v2945_v5 = vsel %vm2944_vm1, %v2855_v16, %v2870_v57 }
 0x349   : >> { %2950 = vrot.lane.b32.xlu2 %v2945_v5, %s4424_s17 }
 0x3a3   : >> { %v2957_v4 = vpop.permute.xlu0 %2956  ;;  %v2951_v31 = vpop.permute.xlu2 %2950 }
 0x3a4   : >> { %v2958_v6 = vsel %vm2949_vm5, %v2957_v4, %v6136_v53  ;;  %v2952_v17 = vsel %vm2949_vm5, %v2951_v31, %v2945_v5  ;;  %v3099_v31 = vstv (%p356_p3), %s4054_s30  ;;  %s4070_s30 = sld [smem:[#allocation7 + $0x183]] (%p356_p3) }
 0x3a5   : >> { %2966 = vrot.lane.b32.xlu1 %v2958_v6, %s4424_s17  ;;  %2962 = vrot.lane.b32.xlu0 %v2952_v17, %s4424_s17 }
 0x3aa   : >> { %v2960_v34 = vpop.permute.xlu1 %2959 }
 0x3ab   : >> { %v2961_v32 = vsel %vm2949_vm5, %v2960_v34, %v6153_v56 }
 0x3ac   : >> { %2968 = vrot.lane.b32.xlu2 %v2961_v32, %s4424_s17  ;;  %v3105_v32 = vstv (%p356_p3), %s4055_s0 }
 0x3b4   : >> { %v2954_v62 = vpop.permute.xlu0 %2953 }
 0x3b5   : >> { %v2955_v40 = vsel %vm2949_vm5, %v2954_v62, %v2946_v58 }
 0x3b6   : >> { %2964 = vrot.lane.b32.xlu1 %v2955_v40, %s4424_s17 }
 0x406   : >> { %v2969_v2 = vpop.permute.xlu2 %2968 }
 0x407   : >> { %v2973_v48 = vsel %vm2949_vm5, %v2969_v2, %v6153_v56  ;;  %v3111_v2 = vstv (%p356_p3), %s4056_s3 }
 0x408   : >> { %2984 = vrot.lane.b32.xlu0 %v2973_v48, %s6368_s19 }
 0x417   : >> { %v2967_v7 = vpop.permute.xlu1 %2966  ;;  %v2963_v23 = vpop.permute.xlu0 %2962 }
 0x418   : >> { %v2972_v20 = vsel %vm2949_vm5, %v2967_v7, %v6136_v53  ;;  %v2970_v60 = vsel %vm2949_vm5, %v2963_v23, %v2945_v5 }
 0x419   : >> { %2982 = vrot.lane.b32.xlu2 %v2972_v20, %s6368_s19  ;;  %2978 = vrot.lane.b32.xlu1 %v2970_v60, %s6368_s19 }
 0x428   : >> { %v2965_v25 = vpop.permute.xlu1 %2964 }
 0x429   : >> { %v2971_v35 = vsel %vm2949_vm5, %v2965_v25, %v2946_v58 }
 0x42a   : >> { %2980 = vrot.lane.b32.xlu2 %v2971_v35, %s6368_s19 }
 0x473   : >> { %v2983_v0 = vpop.permute.xlu2 %2982 }
 0x474   : >> { %v2992_v54 = vmax.f32 %v6136_v53, %v2983_v0 }
 0x476   : >> { %4037 = vmatmul.msk.f32.vlgmr.msra.gmra.mxu2 %vm2994_vm6, %v2992_v54 }
 0x47a   : >> { %v2985_v44 = vpop.permute.xlu0 %2984 }
 0x47b   : >> { %v2993_v30 = vmax.f32 %v6153_v56, %v2985_v44 }
 0x47d   : >> { %4038 = vmatmul.msk.f32.vlgmr.msra.gmra.mxu3 %vm2994_vm6, %v2993_v30 }
 0x484   : >> { %v2981_v37 = vpop.permute.xlu2 %2980 }
 0x485   : >> { %v2991_v51 = vmax.f32 %v2946_v58, %v2981_v37 }
 0x487   : >> { %4036 = vmatmul.msk.f32.vlgmr.msra.gmra.mxu1 %vm2994_vm6, %v2991_v51 }
 0x48b   : >> { %v2979_v12 = vpop.permute.xlu1 %2978 }
 0x48c   : >> { %v2990_v33 = vmax.f32 %v2945_v5, %v2979_v12 }
 0x48e   : >> { %4035 = vmatmul.msk.f32.vlgmr.msra.gmra.mxu0 %vm2994_vm6, %v2990_v33 }
 0x4f9   : >> { %v3030_v47 = vpop.f32.mrf.mxu2 }
 0x4fa   : >> { %4047 = vst.msk [vmem:[%s3037_s16 + $0x20] sm:$0xf] %vm3038_vm7, %v3030_v47 }
 0x4fb   : >> { %4049 = vst.msk [vmem:[%s3037_s16 + $0x24] sm:$0xf0] %vm3042_vm8, %v3030_v47 }
 0x500   : >> { %v3033_v1 = vpop.f32.mrf.mxu3 }
 0x501   : >> { %4051 = vst.msk [vmem:[%s3037_s16 + $0x30] sm:$0xf] %vm3038_vm7, %v3033_v1 }
 0x502   : >> { %4053 = vst.msk [vmem:[%s3037_s16 + $0x34] sm:$0xf0] %vm3042_vm8, %v3033_v1 }
 0x504   : >> { %v3027_v53 = vpop.f32.mrf.mxu1 }
 0x505   : >> { %4043 = vst.msk [vmem:[%s3037_s16 + $0x10] sm:$0xf] %vm3038_vm7, %v3027_v53 }
 0x506   : >> { %4045 = vst.msk [vmem:[%s3037_s16 + $0x14] sm:$0xf0] %vm3042_vm8, %v3027_v53 }
 0x509   : > { %358 = sbr.rel (!%p356_p3) target bundleno = 186 (0xba), region = 128 }
 0x50b   : >> { %v3024_v56 = vpop.f32.mrf.mxu0 }
 0x50c   : >> { %3039 = vst.msk [vmem:[%s3037_s16] sm:$0xf] %vm3038_vm7, %v3024_v56 }
 0x50d   : >> { %4041 = vst.msk [vmem:[%s3037_s16 + $0x4] sm:$0xf0] %vm3042_vm8, %v3024_v56 }
 0x514   : > { %v3062_v36 = vld [vmem:[%s4610_s22] sm:$0xff]  ;;  %v6211_v50 = vld [vmem:[%s4610_s22 + $0x8] sm:$0xff]  ;;  %v6218_v59 = vld [vmem:[%s4610_s22 + $0x10] sm:$0xff] }
 0x515   : > { %v3063_v19 = vmul.f32 %v3062_v36, %v3062_v36  ;;  %v3116_v49 = vmul.f32 %v6211_v50, %v6211_v50  ;;  %v3169_v15 = vmul.f32 %v6218_v59, %v6218_v59  ;;  %v6224_v21 = vld [vmem:[%s4610_s22 + $0x18] sm:$0xff]  ;;  %v6230_v57 = vld [vmem:[%s4610_s22 + $0x20] sm:$0xff]  ;;  %v6238_v47 = vld [vmem:[%s4610_s22 + $0x28] sm:$0xff] }
 0x516   : > { %v3222_v43 = vmul.f32 %v6224_v21, %v6224_v21  ;;  %v3275_v5 = vmul.f32 %v6230_v57, %v6230_v57  ;;  %v3328_v1 = vmul.f32 %v6238_v47, %v6238_v47 }
 0x517   : > { %v3065_v29 = vsel %vm3064_vm9, %v3063_v19, 0.0  ;;  %v3117_v46 = vsel %vm3064_vm9, %v3116_v49, 0.0  ;;  %v3170_v42 = vsel %vm3064_vm9, %v3169_v15, 0.0  ;;  %v3158_v49 = vstv %s4059_s11 }
 0x518   : > { %3066 = vadd.xlane.f32.xlu0 %v3065_v29  ;;  %3171 = vadd.xlane.f32.xlu1 %v3170_v42  ;;  %v3223_v52 = vsel %vm3064_vm9, %v3222_v43, 0.0  ;;  %v3276_v4 = vsel %vm3064_vm9, %v3275_v5, 0.0  ;;  %v3329_v53 = vsel %vm3064_vm9, %v3328_v1, 0.0  ;;  %v3164_v42 = vstv %s4060_s5 }
 0x519   : > { %3277 = vadd.xlane.f32.xlu2 %v3276_v4  ;;  %v3217_v5 = vstv %s4065_s2  ;;  %v3270_v1 = vstv %s4070_s30 }
 0x520   : > { %3118 = vadd.xlane.f32.xlu0 %v3117_v46  ;;  %3224 = vadd.xlane.f32.xlu1 %v3223_v52 }
 0x521   : > { %3330 = vadd.xlane.f32.xlu2 %v3329_v53 }
 0x58b   : > { %v3067_v26 = vpop.xlane.xlu0 %3066  ;;  %v3172_v17 = vpop.xlane.xlu1 %3171 }
 0x58c   : > { %v3068_v10 = vrot.slane %v3067_v26, 4  ;;  %v3173_v40 = vrot.slane %v3172_v17, 4 }
 0x58e   : > { %v3069_v18 = vadd.f32 %v3068_v10, %v3067_v26  ;;  %v3174_v23 = vadd.f32 %v3173_v40, %v3172_v17 }
 0x590   : > { %v3070_v39 = vrot.slane %v3069_v18, 2  ;;  %v3175_v60 = vrot.slane %v3174_v23, 2 }
 0x592   : > { %v3071_v9 = vadd.f32 %v3070_v39, %v3069_v18  ;;  %v3176_v54 = vadd.f32 %v3175_v60, %v3174_v23 }
 0x593   : > { %v3119_v45 = vpop.xlane.xlu0 %3118  ;;  %v3225_v19 = vpop.xlane.xlu1 %3224 }
 0x594   : > { %v3072_v28 = vrot.slane %v3071_v9, 1  ;;  %v3120_v27 = vrot.slane %v3119_v45, 4  ;;  %v3177_v37 = vrot.slane %v3176_v54, 1  ;;  %v3226_v15 = vrot.slane %v3225_v19, 4 }
 0x596   : > { %v3073_v58 = vadd.f32 %v3072_v28, %v3071_v9  ;;  %v3121_v38 = vadd.f32 %v3120_v27, %v3119_v45  ;;  %v3178_v33 = vadd.f32 %v3177_v37, %v3176_v54  ;;  %v3227_v39 = vadd.f32 %v3226_v15, %v3225_v19 }
 0x598   : > { %4105 = vpush %v3073_v58  ;;  %v3122_v11 = vrot.slane %v3121_v38, 2  ;;  %v3228_v9 = vrot.slane %v3227_v39, 2 }
 0x59a   : > { %v3123_v22 = vadd.f32 %v3122_v11, %v3121_v38  ;;  %v3229_v52 = vadd.f32 %v3228_v9, %v3227_v39 }
 0x59c   : > { %v3124_v55 = vrot.slane %v3123_v22, 1  ;;  %v3230_v27 = vrot.slane %v3229_v52, 1 }
 0x59e   : > { %v3125_v16 = vadd.f32 %v3124_v55, %v3123_v22  ;;  %v3231_v11 = vadd.f32 %v3230_v27, %v3229_v52 }
 0x5c9   : > { %s4106_s19 = spop %4105 }
 0x5ca   : > { %s3075_s25 = smul.f32 0.015625, %s4106_s19 }
 0x5cc   : > { %s3076_s14 = sadd.f32 1e-05, %s3075_s25 }
 0x5cd   : > { %s4068_s25 = sld [smem:[#allocation7 + $0x83]] }
 0x5ce   : > { %v3077_v63 = vstv %s3076_s14  ;;  %s4069_s14 = sld [smem:[#allocation7 + $0x103]] }
 0x5cf   : > { %4240 = vrsqrt.f32 %v3077_v63  ;;  %vm3084_vm11 = vweird.f32 %v3077_v63 }
 0x5d5   : > { %v4241_v14 = vpop.eup %4240 }
 0x5d6   : > { %v3079_v41 = vmul.f32 %v4241_v14, %v3077_v63  ;;  %vm3085_vm10 = vweird.f32 %v4241_v14 }
 0x5d7   : > { %vm3086_vm12 = vmor %vm3084_vm11, %vm3085_vm10 }
 0x5d8   : > { %v3080_v61 = vmul.f32 %v4241_v14, %v3079_v41 }
 0x5da   : > { %v3081_v24 = vmul.f32 0.5, %v3080_v61 }
 0x5dc   : > { %v3082_v3 = vsub.f32 1.5, %v3081_v24  ;;  %v3205_v24 = vstv %s4063_s10  ;;  %s4080_s10 = sld [smem:[#allocation7 + $0x185]] }
 0x5de   : > { %v3083_v8 = vmul.f32 %v4241_v14, %v3082_v3  ;;  %v3278_v3 = vpop.xlane.xlu2 %3277 }
 0x5e0   : > { %v3087_v13 = vsel %vm3086_vm12, %v4241_v14, %v3083_v8  ;;  %v6247_v14 = vld [vmem:[%s4610_s22 + $0x30] sm:$0xff]  ;;  %v3211_v8 = vstv %s4064_s24 }
 0x5e1   : > { %4107 = vpush %v3087_v13  ;;  %v3381_v41 = vmul.f32 %v6247_v14, %v6247_v14 }
 0x5e2   : > { %4109 = vpush %v3125_v16  ;;  %v3279_v16 = vrot.slane %v3278_v3, 4 }
 0x5e3   : > { %v3382_v61 = vsel %vm3064_vm9, %v3381_v41, 0.0 }
 0x5e4   : > { %3383 = vadd.xlane.f32.xlu0 %v3382_v61  ;;  %v3280_v17 = vadd.f32 %v3279_v16, %v3278_v3 }
 0x612   : > { %s4108_s6 = spop %4107 }
 0x613   : > { %v3089_v6 = vstv %s4108_s6  ;;  %s4110_s21 = spop %4109 }
 0x614   : > { %v3090_v34 = vmul.f32 %v3089_v6, %v3062_v36  ;;  %s3127_s7 = smul.f32 0.015625, %s4110_s21  ;;  %v3152_v36 = vstv %s4058_s29  ;;  %s4075_s29 = sld [smem:[#allocation7 + $0x184]] }
 0x616   : > { %v3100_v62 = vmul.f32 %v3099_v31, %v3090_v34  ;;  %s3128_s8 = sadd.f32 1e-05, %s3127_s7  ;;  %v3281_v34 = vrot.slane %v3280_v17, 2 }
 0x617   : > { %s4073_s7 = sld [smem:[#allocation7 + $0x84]] }
 0x618   : > { %v3106_v48 = vadd.f32 %v3105_v32, %v3100_v62  ;;  %v3129_v7 = vstv %s3128_s8  ;;  %s4074_s8 = sld [smem:[#allocation7 + $0x104]] }
 0x619   : > { %4242 = vrsqrt.f32 %v3129_v7  ;;  %vm3136_vm14 = vweird.f32 %v3129_v7 }
 0x61a   : > { %v3112_v20 = vmax.f32 %v3106_v48, %v3111_v2  ;;  %v3282_v2 = vadd.f32 %v3281_v34, %v3280_v17 }
 0x61c   : > { %3113 = vst.msk [vmem:[%s4610_s22] sm:$0xff] %vm3064_vm9, %v3112_v20 }
 0x61f   : > { %v4243_v25 = vpop.eup %4242 }
 0x620   : > { %v3131_v35 = vmul.f32 %v4243_v25, %v3129_v7  ;;  %vm3137_vm13 = vweird.f32 %v4243_v25  ;;  %v3283_v7 = vrot.slane %v3282_v2, 1 }
 0x621   : > { %vm3138_vm15 = vmor %vm3136_vm14, %vm3137_vm13 }
 0x622   : > { %v3132_v0 = vmul.f32 %v4243_v25, %v3131_v35  ;;  %v3284_v60 = vadd.f32 %v3283_v7, %v3282_v2 }
 0x624   : > { %v3133_v44 = vmul.f32 0.5, %v3132_v0 }
 0x626   : > { %v3134_v30 = vsub.f32 1.5, %v3133_v44  ;;  %v3258_v44 = vstv %s4068_s25  ;;  %s4085_s25 = sld [smem:[#allocation7 + $0x186]] }
 0x628   : > { %v3135_v51 = vmul.f32 %v4243_v25, %v3134_v30  ;;  %v3331_v30 = vpop.xlane.xlu2 %3330 }
 0x62a   : > { %v3139_v12 = vsel %vm3138_vm15, %v4243_v25, %v3135_v51  ;;  %v6256_v25 = vld [vmem:[%s4610_s22 + $0x38] sm:$0xff]  ;;  %v3264_v51 = vstv %s4069_s14 }
 0x62b   : > { %4111 = vpush %v3139_v12  ;;  %v3434_v35 = vmul.f32 %v6256_v25, %v6256_v25 }
 0x62c   : > { %4113 = vpush %v3178_v33  ;;  %v3332_v33 = vrot.slane %v3331_v30, 4 }
 0x62d   : > { %v3435_v0 = vsel %vm3064_vm9, %v3434_v35, 0.0 }
 0x62e   : > { %3436 = vadd.xlane.f32.xlu1 %v3435_v0  ;;  %v3333_v19 = vadd.f32 %v3332_v33, %v3331_v30 }
 0x65c   : > { %s4112_s12 = spop %4111 }
 0x65d   : > { %v3141_v56 = vstv %s4112_s12  ;;  %s4114_s13 = spop %4113 }
 0x65e   : > { %v3142_v29 = vmul.f32 %v6211_v50, %v3141_v56  ;;  %s3180_s26 = smul.f32 0.015625, %s4114_s13 }
 0x660   : > { %v3153_v46 = vmul.f32 %v3152_v36, %v3142_v29  ;;  %s3181_s9 = sadd.f32 1e-05, %s3180_s26  ;;  %v3334_v29 = vrot.slane %v3333_v19, 2 }
 0x661   : > { %s4078_s26 = sld [smem:[#allocation7 + $0x85]] }
 0x662   : > { %v3159_v26 = vadd.f32 %v3158_v49, %v3153_v46  ;;  %v3182_v10 = vstv %s3181_s9  ;;  %s4079_s9 = sld [smem:[#allocation7 + $0x105]] }
 0x663   : > { %4244 = vrsqrt.f32 %v3182_v10  ;;  %vm3189_vm1 = vweird.f32 %v3182_v10 }
 0x664   : > { %v3165_v18 = vmax.f32 %v3159_v26, %v3164_v42  ;;  %v3335_v42 = vadd.f32 %v3334_v29, %v3333_v19  ;;  %v3429_v29 = vstv %s4085_s25 }
 0x666   : > { %4061 = vst.msk [vmem:[%s4610_s22 + $0x8] sm:$0xff] %vm3064_vm9, %v3165_v18 }
 0x667   : > { %v3364_v17 = vstv %s4078_s26 }
 0x669   : > { %v4245_v28 = vpop.eup %4244 }
 0x66a   : > { %v3184_v58 = vmul.f32 %v4245_v28, %v3182_v10  ;;  %vm3190_vm0 = vweird.f32 %v4245_v28  ;;  %v3336_v10 = vrot.slane %v3335_v42, 1 }
 0x66b   : > { %vm3191_vm2 = vmor %vm3189_vm1, %vm3190_vm0 }
 0x66c   : > { %v3185_v43 = vmul.f32 %v4245_v28, %v3184_v58  ;;  %v3337_v9 = vadd.f32 %v3336_v10, %v3335_v42  ;;  %v3311_v58 = vstv %s4073_s7  ;;  %s4090_s7 = sld [smem:[#allocation7 + $0x187]] }
 0x66e   : > { %v3186_v50 = vmul.f32 0.5, %v3185_v43  ;;  %v3384_v43 = vpop.xlane.xlu0 %3383 }
 0x66f   : > { %v3385_v27 = vrot.slane %v3384_v43, 4 }
 0x670   : > { %v3187_v45 = vsub.f32 1.5, %v3186_v50  ;;  %v3317_v50 = vstv %s4074_s8  ;;  %s4098_s8 = sshll.u32 %s4402_s18, 6  ;;  %s3486_s18 = scalar_lea.sflag [#allocation5], %s4564_s23 }
 0x671   : > { %v3386_v61 = vadd.f32 %v3385_v27, %v3384_v43 }
 0x672   : > { %v3188_v63 = vmul.f32 %v4245_v28, %v3187_v45 }
 0x674   : > { %v3192_v38 = vsel %vm3191_vm2, %v4245_v28, %v3188_v63  ;;  %v3323_v63 = vstv %s4075_s29 }
 0x675   : > { %4115 = vpush %v3192_v38 }
 0x676   : > { %4117 = vpush %v3231_v11 }
 0x6a1   : > { %v3437_v34 = vpop.xlane.xlu1 %3436 }
 0x6a2   : > { %v3438_v2 = vrot.slane %v3437_v34, 4 }
 0x6a6   : > { %s4116_s17 = spop %4115 }
 0x6a7   : > { %v3194_v22 = vstv %s4116_s17  ;;  %s4118_s1 = spop %4117 }
 0x6a8   : > { %v3195_v55 = vmul.f32 %v6218_v59, %v3194_v22  ;;  %s3233_s16 = smul.f32 0.015625, %s4118_s1  ;;  %v3387_v22 = vrot.slane %v3386_v61, 2 }
 0x6aa   : > { %v3206_v13 = vmul.f32 %v3205_v24, %v3195_v55  ;;  %s3234_s19 = sadd.f32 1e-05, %s3233_s16 }
 0x6ab   : > { %s4083_s16 = sld [smem:[#allocation7 + $0x86]] }
 0x6ac   : > { %v3212_v4 = vadd.f32 %v3211_v8, %v3206_v13  ;;  %v3235_v6 = vstv %s3234_s19  ;;  %v3388_v8 = vadd.f32 %v3387_v22, %v3386_v61  ;;  %s4084_s19 = sld [smem:[#allocation7 + $0x106]] }
 0x6ad   : > { %4246 = vrsqrt.f32 %v3235_v6  ;;  %vm3242_vm4 = vweird.f32 %v3235_v6 }
 0x6ae   : > { %v3218_v31 = vmax.f32 %v3212_v4, %v3217_v5  ;;  %v3389_v16 = vrot.slane %v3388_v8, 1 }
 0x6b0   : > { %4066 = vst.msk [vmem:[%s4610_s22 + $0x10] sm:$0xff] %vm3064_vm9, %v3218_v31 }
 0x6b3   : > { %v4247_v32 = vpop.eup %4246 }
 0x6b4   : > { %v3237_v62 = vmul.f32 %v4247_v32, %v3235_v6  ;;  %vm3243_vm3 = vweird.f32 %v4247_v32  ;;  %v3390_v6 = vadd.f32 %v3389_v16, %v3388_v8 }
 0x6b5   : > { %vm3244_vm5 = vmor %vm3242_vm4, %vm3243_vm3 }
 0x6b6   : > { %v3238_v40 = vmul.f32 %v4247_v32, %v3237_v62  ;;  %v3370_v62 = vstv %s4079_s9 }
 0x6b8   : > { %v3239_v59 = vmul.f32 0.5, %v3238_v40 }
 0x6ba   : > { %v3240_v48 = vsub.f32 1.5, %v3239_v59  ;;  %v3376_v59 = vstv %s4080_s10 }
 0x6bc   : > { %v3241_v20 = vmul.f32 %v4247_v32, %v3240_v48 }
 0x6be   : > { %v3245_v23 = vsel %vm3244_vm5, %v4247_v32, %v3241_v20 }
 0x6bf   : > { %4119 = vpush %v3245_v23  ;;  %v3439_v23 = vadd.f32 %v3438_v2, %v3437_v34 }
 0x6c0   : > { %4121 = vpush %v3284_v60 }
 0x6c1   : > { %v3440_v60 = vrot.slane %v3439_v23, 2 }
 0x6f0   : > { %s4120_s0 = spop %4119 }
 0x6f1   : > { %v3247_v54 = vstv %s4120_s0  ;;  %s4122_s3 = spop %4121 }
 0x6f2   : > { %v3248_v37 = vmul.f32 %v6224_v21, %v3247_v54  ;;  %s3286_s6 = smul.f32 0.015625, %s4122_s3 }
 0x6f4   : > { %v3259_v12 = vmul.f32 %v3258_v44, %v3248_v37  ;;  %s3287_s21 = sadd.f32 1e-05, %s3286_s6  ;;  %v3441_v44 = vadd.f32 %v3440_v60, %v3439_v23 }
 0x6f5   : > { %s4088_s6 = sld [smem:[#allocation7 + $0x87]] }
 0x6f6   : > { %v3265_v53 = vadd.f32 %v3264_v51, %v3259_v12  ;;  %v3288_v56 = vstv %s3287_s21  ;;  %v3442_v37 = vrot.slane %v3441_v44, 1  ;;  %s4089_s21 = sld [smem:[#allocation7 + $0x107]] }
 0x6f7   : > { %4248 = vrsqrt.f32 %v3288_v56  ;;  %vm3295_vm7 = vweird.f32 %v3288_v56 }
 0x6f8   : > { %v3271_v36 = vmax.f32 %v3265_v53, %v3270_v1  ;;  %v3443_v33 = vadd.f32 %v3442_v37, %v3441_v44  ;;  %v3417_v53 = vstv %s4083_s16 }
 0x6fa   : > { %4071 = vst.msk [vmem:[%s4610_s22 + $0x18] sm:$0xff] %vm3064_vm9, %v3271_v36  ;;  %v3423_v36 = vstv %s4084_s19 }
 0x6fc   : > { %v3476_v43 = vstv %s4089_s21 }
 0x6fd   : > { %v4249_v49 = vpop.eup %4248 }
 0x6fe   : > { %v3290_v46 = vmul.f32 %v4249_v49, %v3288_v56  ;;  %vm3296_vm6 = vweird.f32 %v4249_v49 }
 0x6ff   : > { %vm3297_vm8 = vmor %vm3295_vm7, %vm3296_vm6 }
 0x700   : > { %v3291_v15 = vmul.f32 %v4249_v49, %v3290_v46 }
 0x702   : > { %v3292_v26 = vmul.f32 0.5, %v3291_v15 }
 0x704   : > { %v3293_v21 = vsub.f32 1.5, %v3292_v26 }
 0x706   : > { %v3294_v18 = vmul.f32 %v4249_v49, %v3293_v21 }
 0x708   : > { %v3298_v39 = vsel %vm3297_vm8, %v4249_v49, %v3294_v18 }
 0x709   : > { %4123 = vpush %v3298_v39 }
 0x70a   : > { %4125 = vpush %v3337_v9 }
 0x73a   : > { %s4124_s11 = spop %4123 }
 0x73b   : > { %v3300_v28 = vstv %s4124_s11  ;;  %s4126_s5 = spop %4125 }
 0x73c   : > { %v3301_v52 = vmul.f32 %v6230_v57, %v3300_v28  ;;  %s3339_s12 = smul.f32 0.015625, %s4126_s5  ;;  %v3470_v28 = vstv %s4088_s6 }
 0x73e   : > { %v3312_v45 = vmul.f32 %v3311_v58, %v3301_v52  ;;  %s3340_s13 = sadd.f32 1e-05, %s3339_s12  ;;  %s3499_s12 = scalar_lea.hbm %s6319_s4, %s4098_s8 }
 0x73f   : > { %s3502_s26 = sshll.u32 %s3499_s12, 4  ;;  %s3503_s26 = int_to_ptr.hbm [resolvable:$true] %s3502_s26 }
 0x740   : > { %v3318_v38 = vadd.f32 %v3317_v50, %v3312_v45  ;;  %v3341_v11 = vstv %s3340_s13  ;;  %s3500_s13 = sshll.u32 %s4610_s22, 4  ;;  %v3482_v50 = vstv %s4090_s7  ;;  %s4330_s9 = sshra.s32 %s3503_s26, 4  ;;  %s3501_s13 = int_to_ptr.vmem [resolvable:$true] %s3500_s13  ;;  %s4331_s9 = int_to_ptr.hbm [resolvable:$true] %s4330_s9 }
 0x741   : > { %4250 = vrsqrt.f32 %v3341_v11  ;;  %vm3348_vm11 = vweird.f32 %v3341_v11  ;;  %s4332_s10 = scalar_lea.hbm %s4331_s9, 64  ;;  %p4337_p12 = scmp.lt.s32.totalorder %s4331_s9, %s6319_s4 }
 0x742   : > { %v3324_v41 = vmax.f32 %v3318_v38, %v3323_v63  ;;  %p4333_p7 = scmp.ne.s32.totalorder %s4331_s9, %s4332_s10 }
 0x744   : > { %4076 = vst.msk [vmem:[%s4610_s22 + $0x20] sm:$0xff] %vm3064_vm9, %v3324_v41  ;;  %p4334_p10 = pnand %p4333_p7, %p4504_p8 }
 0x746   : > { %p4335_p11 = pneg %p4334_p10 }
 0x747   : > { %v4251_v24 = vpop.eup %4250 }
 0x748   : > { %v3343_v3 = vmul.f32 %v4251_v24, %v3341_v11  ;;  %vm3349_vm10 = vweird.f32 %v4251_v24 }
 0x749   : > { %vm3350_vm12 = vmor %vm3348_vm11, %vm3349_vm10 }
 0x74a   : > { %v3344_v55 = vmul.f32 %v4251_v24, %v3343_v3 }
 0x74c   : > { %v3345_v13 = vmul.f32 0.5, %v3344_v55 }
 0x74e   : > { %v3346_v57 = vsub.f32 1.5, %v3345_v13 }
 0x750   : > { %v3347_v5 = vmul.f32 %v4251_v24, %v3346_v57 }
 0x752   : > { %v3351_v4 = vsel %vm3350_vm12, %v4251_v24, %v3347_v5 }
 0x753   : > { %4127 = vpush %v3351_v4 }
 0x754   : > { %4129 = vpush %v3390_v6 }
 0x784   : > { %s4128_s24 = spop %4127 }
 0x785   : > { %v3353_v31 = vstv %s4128_s24  ;;  %s4130_s2 = spop %4129 }
 0x786   : > { %v3354_v32 = vmul.f32 %v6238_v47, %v3353_v31  ;;  %s3392_s17 = smul.f32 0.015625, %s4130_s2 }
 0x788   : > { %v3365_v40 = vmul.f32 %v3364_v17, %v3354_v32  ;;  %s3393_s1 = sadd.f32 1e-05, %s3392_s17  ;;  %s4336_s17 = scalar_lea.hbm %s6319_s4, 128 }
 0x789   : > { %p4338_p0 = scmp.lt.s32.totalorder %s4336_s17, %s4332_s10 }
 0x78a   : > { %v3371_v48 = vadd.f32 %v3370_v62, %v3365_v40  ;;  %v3394_v7 = vstv %s3393_s1 }
 0x78b   : > { %4252 = vrsqrt.f32 %v3394_v7  ;;  %vm3401_vm14 = vweird.f32 %v3394_v7  ;;  %p4339_p1 = por %p4338_p0, %p4337_p12 }
 0x78c   : > { %v3377_v20 = vmax.f32 %v3371_v48, %v3376_v59 }
 0x78d   : > { %p4340_p2 = pnand %p4339_p1, %p4335_p11 }
 0x78e   : > { %4081 = vst.msk [vmem:[%s4610_s22 + $0x28] sm:$0xff] %vm3064_vm9, %v3377_v20 }
 0x791   : > { %v4253_v35 = vpop.eup %4252 }
 0x792   : > { %v3396_v0 = vmul.f32 %v4253_v35, %v3394_v7  ;;  %vm3402_vm13 = vweird.f32 %v4253_v35 }
 0x793   : > { %vm3403_vm15 = vmor %vm3401_vm14, %vm3402_vm13 }
 0x794   : > { %v3397_v54 = vmul.f32 %v4253_v35, %v3396_v0 }
 0x796   : > { %v3398_v30 = vmul.f32 0.5, %v3397_v54 }
 0x798   : > { %v3399_v47 = vsub.f32 1.5, %v3398_v30 }
 0x79a   : > { %v3400_v51 = vmul.f32 %v4253_v35, %v3399_v47 }
 0x79c   : > { %v3404_v12 = vsel %vm3403_vm15, %v4253_v35, %v3400_v51 }
 0x79d   : > { %4131 = vpush %v3404_v12 }
 0x79e   : > { %4133 = vpush %v3443_v33 }
 0x7ce   : > { %s4132_s14 = spop %4131 }
 0x7cf   : > { %v3406_v1 = vstv %s4132_s14  ;;  %s4134_s30 = spop %4133 }
 0x7d0   : > { %v3407_v56 = vmul.f32 %v6247_v14, %v3406_v1  ;;  %s3445_s0 = smul.f32 0.015625, %s4134_s30 }
 0x7d2   : > { %v3418_v19 = vmul.f32 %v3417_v53, %v3407_v56  ;;  %s3446_s3 = sadd.f32 1e-05, %s3445_s0 }
 0x7d4   : > { %v3424_v49 = vadd.f32 %v3423_v36, %v3418_v19  ;;  %v3447_v46 = vstv %s3446_s3 }
 0x7d5   : > { %4254 = vrsqrt.f32 %v3447_v46  ;;  %vm3454_vm1 = vweird.f32 %v3447_v46 }
 0x7d6   : > { %v3430_v15 = vmax.f32 %v3424_v49, %v3429_v29 }
 0x7d8   : > { %4086 = vst.msk [vmem:[%s4610_s22 + $0x30] sm:$0xff] %vm3064_vm9, %v3430_v15 }
 0x7db   : > { %v4255_v42 = vpop.eup %4254 }
 0x7dc   : > { %v3449_v26 = vmul.f32 %v4255_v42, %v3447_v46  ;;  %vm3455_vm0 = vweird.f32 %v4255_v42 }
 0x7dd   : > { %vm3456_vm2 = vmor %vm3454_vm1, %vm3455_vm0 }
 0x7de   : > { %v3450_v21 = vmul.f32 %v4255_v42, %v3449_v26 }
 0x7e0   : > { %v3451_v10 = vmul.f32 0.5, %v3450_v21 }
 0x7e2   : > { %v3452_v18 = vsub.f32 1.5, %v3451_v10 }
 0x7e4   : > { %v3453_v39 = vmul.f32 %v4255_v42, %v3452_v18 }
 0x7e6   : > { %v3457_v14 = vsel %vm3456_vm2, %v4255_v42, %v3453_v39 }
 0x7e7   : > { %4135 = vpush %v3457_v14 }
 0x818   : > { %s4136_s29 = spop %4135 }
 0x819   : > { %v3459_v9 = vstv %s4136_s29 }
 0x81a   : > { %v3460_v58 = vmul.f32 %v6256_v25, %v3459_v9 }
 0x81c   : > { %v3471_v52 = vmul.f32 %v3470_v28, %v3460_v58 }
 0x81e   : > { %v3477_v45 = vadd.f32 %v3476_v43, %v3471_v52 }
 0x820   : > { %v3483_v27 = vmax.f32 %v3477_v45, %v3482_v50 }
 0x822   : > { %4091 = vst.msk [vmem:[%s4610_s22 + $0x38] sm:$0xff] %vm3064_vm9, %v3483_v27 }
 0x823   : > { %4343 = shalt.err (!%p4340_p2)
}
 0x824   : > { %s4425_s23 = smov 128   ;;  %s4426_s22 = smov 8  }
 0x825   : > { %4147 = dma.vmem_to_hbm [thread:$0]  (%p4504_p8), %s3501_s13, 1024, %s3503_s26, %s3486_s18, %s4425_s23, %s4425_s23, %s4426_s22  }
 0x826 PF: > { %s3517_s19 = sand.u32 1, %s4390_s15   ;;  %p4161_p4 = pnand %p3677_p13, %p4508_p9 }
 0x827   : > { %s3518_s25 = scalar_lea.sflag [#allocation5], %s3517_s19 }
 0x828   : > { %p4162_p6 = pneg %p4161_p4 }
 0x82a   : > { %4385 = dma.done.wait (%p4162_p6), %s3518_s25, 1024  }
 0x82b   : > { %4387 = vsyncadd (%p4162_p6), %s3518_s25, 4294966272  ;;  %s22_s20 = sadd.s32 1, %s4410_s20   ;;  %s6392_s15 = sld [smem:[#allocation15_spill]] }
 0x82c   : > { %p19_p5 = scmp.ge.s32.totalorder %s22_s20, 4   ;;  %s6393_s16 = sld [smem:[#allocation16_spill]] }
 0x82d   : > { %s6394_s17 = sld [smem:[#allocation19_spill]] }
 0x82e   : > { %s6395_s18 = sld [smem:[#allocation17_spill]]  ;;  %21 = sbr.rel (!%p19_p5) target bundleno = 13 (0xd), region = 139 }
 0x82f   : > { %s6396_s19 = sld [smem:[#allocation18_spill]] }
 0x833   :  { %3524 = vsyncpa [#allocation4], 1 }
 0x834   :  { %3526 = vsyncpa [#allocation4 + $0x1], 1 }
 0x835   :  { %3527 = vsyncpa [#allocation5], 1 }
 0x836   :  { %3529 = vsyncpa [#allocation5 + $0x1], 1 }
 0x837   :  { %3530 = vsyncpa [#allocation6], 1 }
 0x838   :  { %3532 = vsyncpa [#allocation6 + $0x1], 1 }
 0x839   :  { %3533 = vsyncpa [#allocation8], 1 }

</bundles_post_ra>
